<compile_context>
chip_gen: v6e
topology: v6e:2x2x1
jax: 0.10.0
libtpu: 0.0.40
codegen_flags: <defaults>
</compile_context>

<pallas_src>
import functools

import jax
import jax.numpy as jnp
from jax import lax
from jax.experimental import pallas as pl
from jax.experimental.pallas import tpu as pltpu

BN_EPS = 1e-5
LANE = 128


def _round_up(v, m):
    return ((v + m - 1) // m) * m


def _pad_to(a, axis, target):
    amt = target - a.shape[axis]
    if amt == 0:
        return a
    widths = [(0, 0)] * a.ndim
    widths[axis] = (0, amt)
    return jnp.pad(a, widths)


def bottleneck_kernel(
    x_ref,       # (N, H, W, Cp)    bf16  channel-padded NHWC input
    w1_ref,      # (Cp, Pp)         bf16
    w2_ref,      # (9*Pp, Pp)       bf16  im2col-reshaped HWIO 3x3 weights
    w3_ref,      # (Pp, Ep)         bf16
    wsc_ref,     # (Cp, Ep)         bf16  projection-shortcut weights
    bn12_ref,    # (4, Pp)          f32   rows: g1, b1, g2, b2
    bn3sc_ref,   # (4, Ep)          f32   rows: g3, b3, g_sc, b_sc
    out_ref,     # (N*H*W, Ep)      f32   lane-dense output slab
):
    N, H, W, Cp = x_ref.shape
    Pp = w1_ref.shape[1]
    NHW = N * H * W

    def bn(h, g, b, relu):
        # Training-mode batchnorm over the row axis, folded to one FMA apply.
        mean = jnp.mean(h, axis=0, keepdims=True)
        var = jnp.mean((h - mean) ** 2, axis=0, keepdims=True)   # biased var
        a = g * lax.rsqrt(var + BN_EPS)                          # (1, C)  EUP
        c = b - mean * a                                         # (1, C)
        y = h * a + c                                            # single FMA pass
        return jnp.maximum(y, 0.0) if relu else y

    x2d = x_ref[...].reshape(NHW, Cp)                            # bf16

    # ---- conv1 (1x1) + bn1 + relu ---------------------------------------- MXU
    h1 = jnp.dot(x2d, w1_ref[...], preferred_element_type=jnp.float32)
    h1 = bn(h1, bn12_ref[0:1, :], bn12_ref[1:2, :], relu=True)   # (NHW, Pp) f32

    # ---- conv2 (3x3, stride 1, pad 1) + bn2 + relu ------------------------ MXU
    # im2col: spatial zero-pad as a value (concat with zero slabs), take the
    # nine shifted taps, concat along channels -> a single K = 9*Pp matmul.
    h1b = h1.astype(jnp.bfloat16).reshape(N, H, W, Pp)
    zrow = jnp.zeros((N, 1, W, Pp), jnp.bfloat16)
    zcol = jnp.zeros((N, H + 2, 1, Pp), jnp.bfloat16)
    padded = jnp.concatenate([zrow, h1b, zrow], axis=1)          # (N, H+2, W,   Pp)
    padded = jnp.concatenate([zcol, padded, zcol], axis=2)       # (N, H+2, W+2, Pp)
    taps = [padded[:, di:di + H, dj:dj + W, :]
            for di in range(3) for dj in range(3)]
    col = jnp.concatenate(taps, axis=-1).reshape(NHW, 9 * Pp)    # (NHW, 9*Pp) bf16
    h2 = jnp.dot(col, w2_ref[...], preferred_element_type=jnp.float32)
    h2 = bn(h2, bn12_ref[2:3, :], bn12_ref[3:4, :], relu=True)   # (NHW, Pp) f32

    # ---- conv3 (1x1) + bn3 ------------------------------------------------ MXU
    h3 = jnp.dot(h2.astype(jnp.bfloat16), w3_ref[...],
                 preferred_element_type=jnp.float32)
    h3 = bn(h3, bn3sc_ref[0:1, :], bn3sc_ref[1:2, :], relu=False)  # (NHW, Ep)

    # ---- projection shortcut: 1x1 conv + bn ------------------------------- MXU
    sc = jnp.dot(x2d, wsc_ref[...], preferred_element_type=jnp.float32)
    sc = bn(sc, bn3sc_ref[2:3, :], bn3sc_ref[3:4, :], relu=False)  # (NHW, Ep)

    # ---- residual add + relu, full-lane unmasked stores -------------------
    out_ref[...] = jnp.maximum(h3 + sc, 0.0)


def _prepare_inputs(x_nhwc, params):
    """Pad channel dims up to the lane width and pre-reshape the 3x3 weights."""
    (w1, g1, b1, w2, g2, b2, w3, g3, b3, wsc, gsc, bsc) = params
    cin, p = w1.shape
    pe = w3.shape[1]
    cp = _round_up(cin, LANE)
    pp = _round_up(p, LANE)
    ep = _round_up(pe, LANE)

    xp = _pad_to(x_nhwc, 3, cp).astype(jnp.bfloat16)

    w1p = _pad_to(_pad_to(w1, 0, cp), 1, pp).astype(jnp.bfloat16)
    w2p = _pad_to(_pad_to(w2, 2, pp), 3, pp)                     # (3,3,Pp,Pp)
    w2p = w2p.reshape(9 * pp, pp).astype(jnp.bfloat16)           # im2col layout
    w3p = _pad_to(_pad_to(w3, 0, pp), 1, ep).astype(jnp.bfloat16)
    wscp = _pad_to(_pad_to(wsc, 0, cp), 1, ep).astype(jnp.bfloat16)

    # Padded gammas/betas are zero => padded channels stay exactly zero.
    bn12 = _pad_to(jnp.concatenate([g1, b1, g2, b2], axis=0), 1, pp)
    bn3sc = _pad_to(jnp.concatenate([g3, b3, gsc, bsc], axis=0), 1, ep)
    return (xp, w1p, w2p, w3p, wscp,
            bn12.astype(jnp.float32), bn3sc.astype(jnp.float32), pe, ep)


@jax.jit
def bottleneck_forward_nhwc(x_nhwc, params):
    """NHWC fast path: no layout transposes around the kernel."""
    N, H, W, _ = x_nhwc.shape
    xp, w1p, w2p, w3p, wscp, bn12, bn3sc, pe, ep = _prepare_inputs(x_nhwc, params)

    out2d = pl.pallas_call(
        bottleneck_kernel,
        out_shape=jax.ShapeDtypeStruct((N * H * W, ep), jnp.float32),
        in_specs=[pl.BlockSpec(memory_space=pltpu.MemorySpace.VMEM)] * 7,
        out_specs=pl.BlockSpec(memory_space=pltpu.MemorySpace.VMEM),
    )(xp, w1p, w2p, w3p, wscp, bn12, bn3sc)

    return out2d[:, :pe].reshape(N, H, W, pe)


@functools.partial(jax.jit, static_argnames=("stride",))
def bottleneck_forward(x_nchw, params, stride=1):
    """PyTorch-layout wrapper (NCHW in / NCHW out) for parity with the module."""
    assert stride == 1, "only stride=1 implemented"  # TODO(synk): stride > 1
    x = jnp.transpose(x_nchw, (0, 2, 3, 1))
    out = bottleneck_forward_nhwc(x, params)
    return jnp.transpose(out, (0, 3, 1, 2))


def make_params(key, in_planes, planes, expansion=4):
    """Deterministic synthetic parameters (conv weights + BN gamma/beta)."""
    ks = jax.random.split(key, 8)
    pe = expansion * planes
    w1 = 0.1 * jax.random.normal(ks[0], (in_planes, planes), jnp.float32)
    w2 = 0.1 * jax.random.normal(ks[1], (3, 3, planes, planes), jnp.float32)  # HWIO
    w3 = 0.1 * jax.random.normal(ks[2], (planes, pe), jnp.float32)
    wsc = 0.1 * jax.random.normal(ks[3], (in_planes, pe), jnp.float32)
    g1 = 1.0 + 0.1 * jax.random.normal(ks[4], (1, planes), jnp.float32)
    b1 = 0.1 * jax.random.normal(ks[5], (1, planes), jnp.float32)
    g2 = 1.0 + 0.1 * jax.random.normal(ks[6], (1, planes), jnp.float32)
    b2 = 0.1 * jax.random.normal(ks[7], (1, planes), jnp.float32)
    ks2 = jax.random.split(jax.random.fold_in(key, 1), 4)
    g3 = 1.0 + 0.1 * jax.random.normal(ks2[0], (1, pe), jnp.float32)
    b3 = 0.1 * jax.random.normal(ks2[1], (1, pe), jnp.float32)
    gsc = 1.0 + 0.1 * jax.random.normal(ks2[2], (1, pe), jnp.float32)
    bsc = 0.1 * jax.random.normal(ks2[3], (1, pe), jnp.float32)
    return (w1, g1, b1, w2, g2, b2, w3, g3, b3, wsc, gsc, bsc)


def bottleneck_reference(x_nchw, params, matmul_dtype=jnp.bfloat16):
    """Pure-JAX reference with the kernel's mixed-precision policy:
    bf16 conv/matmul inputs, f32 accumulation and f32 BatchNorm math
    (the standard TPU execution of the PyTorch training-mode forward)."""
    (w1, g1, b1, w2, g2, b2, w3, g3, b3, wsc, gsc, bsc) = params
    x = jnp.transpose(x_nchw, (0, 2, 3, 1)).astype(jnp.float32)

    def conv1x1(h, w):
        return jnp.einsum("nhwc,cd->nhwd", h.astype(matmul_dtype),
                          w.astype(matmul_dtype),
                          preferred_element_type=jnp.float32)

    def bn(h, g, b):
        mean = jnp.mean(h, axis=(0, 1, 2), keepdims=True)
        var = jnp.mean((h - mean) ** 2, axis=(0, 1, 2), keepdims=True)
        return (h - mean) * lax.rsqrt(var + BN_EPS) * g.reshape(1, 1, 1, -1) \
            + b.reshape(1, 1, 1, -1)

    h1 = jax.nn.relu(bn(conv1x1(x, w1), g1, b1))
    h2 = lax.conv_general_dilated(
        h1.astype(matmul_dtype), w2.astype(matmul_dtype),
        window_strides=(1, 1), padding=((1, 1), (1, 1)),
        dimension_numbers=("NHWC", "HWIO", "NHWC"),
        preferred_element_type=jnp.float32)
    h2 = jax.nn.relu(bn(h2, g2, b2))
    h3 = bn(conv1x1(h2, w3), g3, b3)
    sc = bn(conv1x1(x, wsc), gsc, bsc)
    out = jax.nn.relu(h3 + sc)
    return jnp.transpose(out, (0, 3, 1, 2))


if __name__ == "__main__":
    # Bottleneck(in_planes=8, planes=4, stride=1): projection shortcut active
    # because in_planes != expansion * planes.
    N, Cin, H, W = 2, 8, 16, 16
    planes = 4

    key = jax.random.PRNGKey(0)
    kx, kp = jax.random.split(key)
    x = jax.random.normal(kx, (N, Cin, H, W), jnp.float32)   # NCHW like torch
    params = make_params(kp, Cin, planes)

    out = bottleneck_forward(x, params, stride=1)
    out = jax.block_until_ready(out)

    ref = bottleneck_reference(x, params)
    assert out.shape == (N, 4 * planes, H, W), out.shape
    assert jnp.allclose(out, ref, atol=2e-2, rtol=2e-2), (
        float(jnp.max(jnp.abs(out - ref))))

    print("KERNEL_OK")
</pallas_src>

<mosaic_0001>
module attributes {stable_mosaic.version = 11 : i64} {
  func.func @bottleneck_kernel(%arg0: memref<2x16x16x128xbf16, #tpu.memory_space<vmem>>, %arg1: memref<128x128xbf16, #tpu.memory_space<vmem>>, %arg2: memref<1152x128xbf16, #tpu.memory_space<vmem>>, %arg3: memref<128x128xbf16, #tpu.memory_space<vmem>>, %arg4: memref<128x128xbf16, #tpu.memory_space<vmem>>, %arg5: memref<4x128xf32, #tpu.memory_space<vmem>>, %arg6: memref<4x128xf32, #tpu.memory_space<vmem>>, %arg7: memref<512x128xf32, #tpu.memory_space<vmem>>) attributes {dimension_semantics = [], scalar_prefetch = 0 : i64, scratch_operands = 0 : i64, tpu.core_type = #tpu.core_type<tc>} {
    %c0 = arith.constant 0 : index
    %c0_0 = arith.constant 0 : index
    %c0_1 = arith.constant 0 : index
    %c0_2 = arith.constant 0 : index
    %0 = vector.load %arg0[%c0, %c0_0, %c0_1, %c0_2] : memref<2x16x16x128xbf16, #tpu.memory_space<vmem>>, vector<2x16x16x128xbf16>
    %1 = vector.shape_cast %0 : vector<2x16x16x128xbf16> to vector<512x128xbf16>
    %c0_3 = arith.constant 0 : index
    %c0_4 = arith.constant 0 : index
    %2 = vector.load %arg1[%c0_3, %c0_4] : memref<128x128xbf16, #tpu.memory_space<vmem>>, vector<128x128xbf16>
    %cst = arith.constant dense<0.000000e+00> : vector<512x128xf32>
    %3 = tpu.matmul %1, %2, %cst {dimension_numbers = #tpu.dot_dimension_numbers<[1], [0], [0], [1], [0, 0, 1, 1], [], []>} : vector<512x128xbf16>, vector<128x128xbf16>, vector<512x128xf32> -> vector<512x128xf32>
    %c0_5 = arith.constant 0 : index
    %c0_6 = arith.constant 0 : index
    %4 = vector.load %arg5[%c0_5, %c0_6] : memref<4x128xf32, #tpu.memory_space<vmem>>, vector<1x128xf32>
    %c1 = arith.constant 1 : index
    %c0_7 = arith.constant 0 : index
    %5 = vector.load %arg5[%c1, %c0_7] : memref<4x128xf32, #tpu.memory_space<vmem>>, vector<1x128xf32>
    %cst_8 = arith.constant dense<0.000000e+00> : vector<128xf32>
    %6 = vector.multi_reduction <add>, %3, %cst_8 [0] : vector<512x128xf32> to vector<128xf32>
    %7 = vector.shape_cast %6 : vector<128xf32> to vector<1x128xf32>
    %cst_9 = arith.constant 5.120000e+02 : f32
    %8 = vector.broadcast %cst_9 : f32 to vector<1x128xf32>
    %9 = arith.divf %7, %8 : vector<1x128xf32>
    %10 = vector.broadcast %9 : vector<1x128xf32> to vector<512x128xf32>
    %11 = arith.subf %3, %10 : vector<512x128xf32>
    %12 = arith.mulf %11, %11 : vector<512x128xf32>
    %cst_10 = arith.constant dense<0.000000e+00> : vector<128xf32>
    %13 = vector.multi_reduction <add>, %12, %cst_10 [0] : vector<512x128xf32> to vector<128xf32>
    %14 = vector.shape_cast %13 : vector<128xf32> to vector<1x128xf32>
    %cst_11 = arith.constant 5.120000e+02 : f32
    %15 = vector.broadcast %cst_11 : f32 to vector<1x128xf32>
    %16 = arith.divf %14, %15 : vector<1x128xf32>
    %cst_12 = arith.constant 9.99999974E-6 : f32
    %17 = vector.broadcast %cst_12 : f32 to vector<1x128xf32>
    %18 = arith.addf %16, %17 : vector<1x128xf32>
    %19 = math.rsqrt %18 : vector<1x128xf32>
    %20 = arith.mulf %4, %19 : vector<1x128xf32>
    %21 = arith.mulf %9, %20 : vector<1x128xf32>
    %22 = arith.subf %5, %21 : vector<1x128xf32>
    %23 = vector.broadcast %20 : vector<1x128xf32> to vector<512x128xf32>
    %24 = arith.mulf %3, %23 : vector<512x128xf32>
    %25 = vector.broadcast %22 : vector<1x128xf32> to vector<512x128xf32>
    %26 = arith.addf %24, %25 : vector<512x128xf32>
    %cst_13 = arith.constant 0.000000e+00 : f32
    %27 = vector.broadcast %cst_13 : f32 to vector<512x128xf32>
    %28 = arith.maximumf %26, %27 : vector<512x128xf32>
    %29 = arith.truncf %28 : vector<512x128xf32> to vector<512x128xbf16>
    %30 = vector.shape_cast %29 : vector<512x128xbf16> to vector<2x16x16x128xbf16>
    %cst_14 = arith.constant 0.000000e+00 : bf16
    %31 = vector.broadcast %cst_14 : bf16 to vector<2x1x16x128xbf16>
    %cst_15 = arith.constant 0.000000e+00 : bf16
    %32 = vector.broadcast %cst_15 : bf16 to vector<2x18x1x128xbf16>
    %33 = tpu.concatenate %31, %30, %31 in 1 : vector<2x1x16x128xbf16>, vector<2x16x16x128xbf16>, vector<2x1x16x128xbf16> -> vector<2x18x16x128xbf16>
    %34 = tpu.concatenate %32, %33, %32 in 2 : vector<2x18x1x128xbf16>, vector<2x18x16x128xbf16>, vector<2x18x1x128xbf16> -> vector<2x18x18x128xbf16>
    %35 = vector.extract_strided_slice %34 {offsets = [0, 0, 0, 0], sizes = [2, 16, 16, 128], strides = [1, 1, 1, 1]} : vector<2x18x18x128xbf16> to vector<2x16x16x128xbf16>
    %36 = vector.extract_strided_slice %34 {offsets = [0, 0, 1, 0], sizes = [2, 16, 16, 128], strides = [1, 1, 1, 1]} : vector<2x18x18x128xbf16> to vector<2x16x16x128xbf16>
    %37 = vector.extract_strided_slice %34 {offsets = [0, 0, 2, 0], sizes = [2, 16, 16, 128], strides = [1, 1, 1, 1]} : vector<2x18x18x128xbf16> to vector<2x16x16x128xbf16>
    %38 = vector.extract_strided_slice %34 {offsets = [0, 1, 0, 0], sizes = [2, 16, 16, 128], strides = [1, 1, 1, 1]} : vector<2x18x18x128xbf16> to vector<2x16x16x128xbf16>
    %39 = vector.extract_strided_slice %34 {offsets = [0, 1, 1, 0], sizes = [2, 16, 16, 128], strides = [1, 1, 1, 1]} : vector<2x18x18x128xbf16> to vector<2x16x16x128xbf16>
    %40 = vector.extract_strided_slice %34 {offsets = [0, 1, 2, 0], sizes = [2, 16, 16, 128], strides = [1, 1, 1, 1]} : vector<2x18x18x128xbf16> to vector<2x16x16x128xbf16>
    %41 = vector.extract_strided_slice %34 {offsets = [0, 2, 0, 0], sizes = [2, 16, 16, 128], strides = [1, 1, 1, 1]} : vector<2x18x18x128xbf16> to vector<2x16x16x128xbf16>
    %42 = vector.extract_strided_slice %34 {offsets = [0, 2, 1, 0], sizes = [2, 16, 16, 128], strides = [1, 1, 1, 1]} : vector<2x18x18x128xbf16> to vector<2x16x16x128xbf16>
    %43 = vector.extract_strided_slice %34 {offsets = [0, 2, 2, 0], sizes = [2, 16, 16, 128], strides = [1, 1, 1, 1]} : vector<2x18x18x128xbf16> to vector<2x16x16x128xbf16>
    %44 = tpu.concatenate %35, %36, %37, %38, %39, %40, %41, %42, %43 in 3 : vector<2x16x16x128xbf16>, vector<2x16x16x128xbf16>, vector<2x16x16x128xbf16>, vector<2x16x16x128xbf16>, vector<2x16x16x128xbf16>, vector<2x16x16x128xbf16>, vector<2x16x16x128xbf16>, vector<2x16x16x128xbf16>, vector<2x16x16x128xbf16> -> vector<2x16x16x1152xbf16>
    %45 = vector.shape_cast %44 : vector<2x16x16x1152xbf16> to vector<512x1152xbf16>
    %c0_16 = arith.constant 0 : index
    %c0_17 = arith.constant 0 : index
    %46 = vector.load %arg2[%c0_16, %c0_17] : memref<1152x128xbf16, #tpu.memory_space<vmem>>, vector<1152x128xbf16>
    %cst_18 = arith.constant dense<0.000000e+00> : vector<512x128xf32>
    %47 = tpu.matmul %45, %46, %cst_18 {dimension_numbers = #tpu.dot_dimension_numbers<[1], [0], [0], [1], [0, 0, 1, 1], [], []>} : vector<512x1152xbf16>, vector<1152x128xbf16>, vector<512x128xf32> -> vector<512x128xf32>
    %c2 = arith.constant 2 : index
    %c0_19 = arith.constant 0 : index
    %48 = vector.load %arg5[%c2, %c0_19] : memref<4x128xf32, #tpu.memory_space<vmem>>, vector<1x128xf32>
    %c3 = arith.constant 3 : index
    %c0_20 = arith.constant 0 : index
    %49 = vector.load %arg5[%c3, %c0_20] : memref<4x128xf32, #tpu.memory_space<vmem>>, vector<1x128xf32>
    %cst_21 = arith.constant dense<0.000000e+00> : vector<128xf32>
    %50 = vector.multi_reduction <add>, %47, %cst_21 [0] : vector<512x128xf32> to vector<128xf32>
    %51 = vector.shape_cast %50 : vector<128xf32> to vector<1x128xf32>
    %cst_22 = arith.constant 5.120000e+02 : f32
    %52 = vector.broadcast %cst_22 : f32 to vector<1x128xf32>
    %53 = arith.divf %51, %52 : vector<1x128xf32>
    %54 = vector.broadcast %53 : vector<1x128xf32> to vector<512x128xf32>
    %55 = arith.subf %47, %54 : vector<512x128xf32>
    %56 = arith.mulf %55, %55 : vector<512x128xf32>
    %cst_23 = arith.constant dense<0.000000e+00> : vector<128xf32>
    %57 = vector.multi_reduction <add>, %56, %cst_23 [0] : vector<512x128xf32> to vector<128xf32>
    %58 = vector.shape_cast %57 : vector<128xf32> to vector<1x128xf32>
    %cst_24 = arith.constant 5.120000e+02 : f32
    %59 = vector.broadcast %cst_24 : f32 to vector<1x128xf32>
    %60 = arith.divf %58, %59 : vector<1x128xf32>
    %cst_25 = arith.constant 9.99999974E-6 : f32
    %61 = vector.broadcast %cst_25 : f32 to vector<1x128xf32>
    %62 = arith.addf %60, %61 : vector<1x128xf32>
    %63 = math.rsqrt %62 : vector<1x128xf32>
    %64 = arith.mulf %48, %63 : vector<1x128xf32>
    %65 = arith.mulf %53, %64 : vector<1x128xf32>
    %66 = arith.subf %49, %65 : vector<1x128xf32>
    %67 = vector.broadcast %64 : vector<1x128xf32> to vector<512x128xf32>
    %68 = arith.mulf %47, %67 : vector<512x128xf32>
    %69 = vector.broadcast %66 : vector<1x128xf32> to vector<512x128xf32>
    %70 = arith.addf %68, %69 : vector<512x128xf32>
    %cst_26 = arith.constant 0.000000e+00 : f32
    %71 = vector.broadcast %cst_26 : f32 to vector<512x128xf32>
    %72 = arith.maximumf %70, %71 : vector<512x128xf32>
    %73 = arith.truncf %72 : vector<512x128xf32> to vector<512x128xbf16>
    %c0_27 = arith.constant 0 : index
    %c0_28 = arith.constant 0 : index
    %74 = vector.load %arg3[%c0_27, %c0_28] : memref<128x128xbf16, #tpu.memory_space<vmem>>, vector<128x128xbf16>
    %cst_29 = arith.constant dense<0.000000e+00> : vector<512x128xf32>
    %75 = tpu.matmul %73, %74, %cst_29 {dimension_numbers = #tpu.dot_dimension_numbers<[1], [0], [0], [1], [0, 0, 1, 1], [], []>} : vector<512x128xbf16>, vector<128x128xbf16>, vector<512x128xf32> -> vector<512x128xf32>
    %c0_30 = arith.constant 0 : index
    %c0_31 = arith.constant 0 : index
    %76 = vector.load %arg6[%c0_30, %c0_31] : memref<4x128xf32, #tpu.memory_space<vmem>>, vector<1x128xf32>
    %c1_32 = arith.constant 1 : index
    %c0_33 = arith.constant 0 : index
    %77 = vector.load %arg6[%c1_32, %c0_33] : memref<4x128xf32, #tpu.memory_space<vmem>>, vector<1x128xf32>
    %cst_34 = arith.constant dense<0.000000e+00> : vector<128xf32>
    %78 = vector.multi_reduction <add>, %75, %cst_34 [0] : vector<512x128xf32> to vector<128xf32>
    %79 = vector.shape_cast %78 : vector<128xf32> to vector<1x128xf32>
    %cst_35 = arith.constant 5.120000e+02 : f32
    %80 = vector.broadcast %cst_35 : f32 to vector<1x128xf32>
    %81 = arith.divf %79, %80 : vector<1x128xf32>
    %82 = vector.broadcast %81 : vector<1x128xf32> to vector<512x128xf32>
    %83 = arith.subf %75, %82 : vector<512x128xf32>
    %84 = arith.mulf %83, %83 : vector<512x128xf32>
    %cst_36 = arith.constant dense<0.000000e+00> : vector<128xf32>
    %85 = vector.multi_reduction <add>, %84, %cst_36 [0] : vector<512x128xf32> to vector<128xf32>
    %86 = vector.shape_cast %85 : vector<128xf32> to vector<1x128xf32>
    %cst_37 = arith.constant 5.120000e+02 : f32
    %87 = vector.broadcast %cst_37 : f32 to vector<1x128xf32>
    %88 = arith.divf %86, %87 : vector<1x128xf32>
    %cst_38 = arith.constant 9.99999974E-6 : f32
    %89 = vector.broadcast %cst_38 : f32 to vector<1x128xf32>
    %90 = arith.addf %88, %89 : vector<1x128xf32>
    %91 = math.rsqrt %90 : vector<1x128xf32>
    %92 = arith.mulf %76, %91 : vector<1x128xf32>
    %93 = arith.mulf %81, %92 : vector<1x128xf32>
    %94 = arith.subf %77, %93 : vector<1x128xf32>
    %95 = vector.broadcast %92 : vector<1x128xf32> to vector<512x128xf32>
    %96 = arith.mulf %75, %95 : vector<512x128xf32>
    %97 = vector.broadcast %94 : vector<1x128xf32> to vector<512x128xf32>
    %98 = arith.addf %96, %97 : vector<512x128xf32>
    %c0_39 = arith.constant 0 : index
    %c0_40 = arith.constant 0 : index
    %99 = vector.load %arg4[%c0_39, %c0_40] : memref<128x128xbf16, #tpu.memory_space<vmem>>, vector<128x128xbf16>
    %cst_41 = arith.constant dense<0.000000e+00> : vector<512x128xf32>
    %100 = tpu.matmul %1, %99, %cst_41 {dimension_numbers = #tpu.dot_dimension_numbers<[1], [0], [0], [1], [0, 0, 1, 1], [], []>} : vector<512x128xbf16>, vector<128x128xbf16>, vector<512x128xf32> -> vector<512x128xf32>
    %c2_42 = arith.constant 2 : index
    %c0_43 = arith.constant 0 : index
    %101 = vector.load %arg6[%c2_42, %c0_43] : memref<4x128xf32, #tpu.memory_space<vmem>>, vector<1x128xf32>
    %c3_44 = arith.constant 3 : index
    %c0_45 = arith.constant 0 : index
    %102 = vector.load %arg6[%c3_44, %c0_45] : memref<4x128xf32, #tpu.memory_space<vmem>>, vector<1x128xf32>
    %cst_46 = arith.constant dense<0.000000e+00> : vector<128xf32>
    %103 = vector.multi_reduction <add>, %100, %cst_46 [0] : vector<512x128xf32> to vector<128xf32>
    %104 = vector.shape_cast %103 : vector<128xf32> to vector<1x128xf32>
    %cst_47 = arith.constant 5.120000e+02 : f32
    %105 = vector.broadcast %cst_47 : f32 to vector<1x128xf32>
    %106 = arith.divf %104, %105 : vector<1x128xf32>
    %107 = vector.broadcast %106 : vector<1x128xf32> to vector<512x128xf32>
    %108 = arith.subf %100, %107 : vector<512x128xf32>
    %109 = arith.mulf %108, %108 : vector<512x128xf32>
    %cst_48 = arith.constant dense<0.000000e+00> : vector<128xf32>
    %110 = vector.multi_reduction <add>, %109, %cst_48 [0] : vector<512x128xf32> to vector<128xf32>
    %111 = vector.shape_cast %110 : vector<128xf32> to vector<1x128xf32>
    %cst_49 = arith.constant 5.120000e+02 : f32
    %112 = vector.broadcast %cst_49 : f32 to vector<1x128xf32>
    %113 = arith.divf %111, %112 : vector<1x128xf32>
    %cst_50 = arith.constant 9.99999974E-6 : f32
    %114 = vector.broadcast %cst_50 : f32 to vector<1x128xf32>
    %115 = arith.addf %113, %114 : vector<1x128xf32>
    %116 = math.rsqrt %115 : vector<1x128xf32>
    %117 = arith.mulf %101, %116 : vector<1x128xf32>
    %118 = arith.mulf %106, %117 : vector<1x128xf32>
    %119 = arith.subf %102, %118 : vector<1x128xf32>
    %120 = vector.broadcast %117 : vector<1x128xf32> to vector<512x128xf32>
    %121 = arith.mulf %100, %120 : vector<512x128xf32>
    %122 = vector.broadcast %119 : vector<1x128xf32> to vector<512x128xf32>
    %123 = arith.addf %121, %122 : vector<512x128xf32>
    %124 = arith.addf %98, %123 : vector<512x128xf32>
    %cst_51 = arith.constant 0.000000e+00 : f32
    %125 = vector.broadcast %cst_51 : f32 to vector<512x128xf32>
    %126 = arith.maximumf %124, %125 : vector<512x128xf32>
    %c0_52 = arith.constant 0 : index
    %c0_53 = arith.constant 0 : index
    %127 = vector.load %arg7[%c0_52, %c0_53] : memref<512x128xf32, #tpu.memory_space<vmem>>, vector<512x128xf32>
    tpu.vector_store %arg7[%c0_52, %c0_53], %126 {strides = array<i32>} : memref<512x128xf32, #tpu.memory_space<vmem>>, vector<512x128xf32>,
    return
  }
}

</mosaic_0001>

<bundles_post_ra>
// kernel: bottleneck_forward_nhwc.1
= control target key start
LH: loop header
LB: loop body
LE: loop exit
PB: predicated region body
PF: predicated region fallthrough
CT: control target
= control target key end

     0   :  { %s12510_s0 = inlined_call_operand.vmem [shape: bf16[2,16,16,128], index: 0, kind: input, shape index: {}]   ;;  %s12511_s1 = inlined_call_operand.vmem [shape: bf16[128,128], index: 1, kind: input, shape index: {}]   ;;  %s12512_s2 = inlined_call_operand.vmem [shape: bf16[1152,128], index: 2, kind: input, shape index: {}]   ;;  %s12513_s3 = inlined_call_operand.vmem [shape: bf16[128,128], index: 3, kind: input, shape index: {}]   ;;  %s12514_s4 = inlined_call_operand.vmem [shape: bf16[128,128], index: 4, kind: input, shape index: {}]   ;;  %s12515_s5 = inlined_call_operand.vmem [shape: f32[4,128], index: 5, kind: input, shape index: {}]   ;;  %s12516_s6 = inlined_call_operand.vmem [shape: f32[4,128], index: 6, kind: input, shape index: {}]   ;;  %s12517_s7 = inlined_call_operand.hbm [shape: f32[512,128], index: 7, kind: output, shape index: {}]  }
   0x1   :  { %v7032_v0 = vld [vmem:[%s12511_s1 + $0x38] sm:$0xff]   ;;  %v7033_v1 = vld [vmem:[%s12511_s1 + $0x30] sm:$0xff]   ;;  %v7034_v2 = vld [vmem:[%s12511_s1 + $0x28] sm:$0xff]  }
   0x2   :  { %6692 = vmatprep.subr.bf16.mxu0 %v7032_v0  ;;  %v7035_v3 = vld [vmem:[%s12511_s1 + $0x20] sm:$0xff]   ;;  %v7036_v5 = vld [vmem:[%s12511_s1 + $0x18] sm:$0xff]   ;;  %v7037_v6 = vld [vmem:[%s12511_s1 + $0x10] sm:$0xff]  }
   0x3   :  { %6693 = vmatpush3.bf16.msra.mxu0 %v7032_v0  ;;  %v7040_v4 = vld [vmem:[%s12510_s0] sm:$0xff]   ;;  %v7038_v7 = vld [vmem:[%s12511_s1 + $0x8] sm:$0xff]   ;;  %v7042_v10 = vld [vmem:[%s12510_s0 + $0x10] sm:$0xff]  }
   0x4   :  { %6694 = vmatprep.subr.bf16.mxu0 %v7033_v1  ;;  %6708 = vmatprep.mubr.bf16.mxu0 %v7040_v4  ;;  %v7039_v8 = vld [vmem:[%s12511_s1] sm:$0xff]   ;;  %v7041_v9 = vld [vmem:[%s12510_s0 + $0x8] sm:$0xff]   ;;  %v7043_v11 = vld [vmem:[%s12510_s0 + $0x18] sm:$0xff]  }
   0x5   :  { %v7044_v12 = vld [vmem:[%s12510_s0 + $0x20] sm:$0xff]   ;;  %v7045_v13 = vld [vmem:[%s12510_s0 + $0x28] sm:$0xff]   ;;  %v7046_v14 = vld [vmem:[%s12510_s0 + $0x30] sm:$0xff]  }
   0x6   :  { %v7047_v15 = vld [vmem:[%s12510_s0 + $0x38] sm:$0xff]   ;;  %v7048_v16 = vld [vmem:[%s12510_s0 + $0x40] sm:$0xff]   ;;  %v7049_v17 = vld [vmem:[%s12510_s0 + $0x48] sm:$0xff]  }
   0x7   :  { %6695 = vmatpush3.bf16.msra.mxu0 %v7033_v1  ;;  %v7050_v18 = vld [vmem:[%s12510_s0 + $0x50] sm:$0xff]   ;;  %v7051_v19 = vld [vmem:[%s12510_s0 + $0x58] sm:$0xff]   ;;  %v7052_v20 = vld [vmem:[%s12510_s0 + $0x60] sm:$0xff]  }
   0x8   :  { %6696 = vmatprep.subr.bf16.mxu0 %v7034_v2  ;;  %v7053_v21 = vld [vmem:[%s12510_s0 + $0x68] sm:$0xff]   ;;  %v7054_v22 = vld [vmem:[%s12510_s0 + $0x70] sm:$0xff]   ;;  %v7055_v23 = vld [vmem:[%s12510_s0 + $0x78] sm:$0xff]  }
   0x9   :  { %v7056_v24 = vld [vmem:[%s12510_s0 + $0x80] sm:$0xff]   ;;  %v7057_v25 = vld [vmem:[%s12510_s0 + $0x88] sm:$0xff]   ;;  %v7058_v26 = vld [vmem:[%s12510_s0 + $0x90] sm:$0xff]  }
   0xb   :  { %6697 = vmatpush3.bf16.msra.mxu0 %v7034_v2 }
   0xc   :  { %6698 = vmatprep.subr.bf16.mxu0 %v7035_v3 }
   0xf   :  { %6699 = vmatpush3.bf16.msra.mxu0 %v7035_v3 }
  0x10   :  { %6700 = vmatprep.subr.bf16.mxu0 %v7036_v5 }
  0x13   :  { %6701 = vmatpush3.bf16.msra.mxu0 %v7036_v5 }
  0x14   :  { %6702 = vmatprep.subr.bf16.mxu0 %v7037_v6 }
  0x17   :  { %6703 = vmatpush3.bf16.msra.mxu0 %v7037_v6 }
  0x18   :  { %6704 = vmatprep.subr.bf16.mxu0 %v7038_v7 }
  0x1b   :  { %6705 = vmatpush3.bf16.msra.mxu0 %v7038_v7 }
  0x1c   :  { %6706 = vmatprep.subr.bf16.mxu0 %v7039_v8 }
  0x1f   :  { %6707 = vmatpush3.bf16.msra.mxu0 %v7039_v8 }
  0x22   :  { %6709 = vmatmul.mubr.bf16.vlgmr.msra.gmra.mxu0 %v7041_v9 }
  0x23   :  { %6712 = vmatprep.mubr.bf16.mxu0 %v7042_v10 }
  0x2a   :  { %6713 = vmatmul.mubr.bf16.gmra.mxu0 %v7043_v11 }
  0x2b   :  { %6716 = vmatprep.mubr.bf16.mxu0 %v7044_v12 }
  0x32   :  { %6717 = vmatmul.mubr.bf16.gmra.mxu0 %v7045_v13 }
  0x33   :  { %6720 = vmatprep.mubr.bf16.mxu0 %v7046_v14 }
  0x3a   :  { %6721 = vmatmul.mubr.bf16.gmra.mxu0 %v7047_v15 }
  0x3b   :  { %6724 = vmatprep.mubr.bf16.mxu0 %v7048_v16 }
  0x42   :  { %6725 = vmatmul.mubr.bf16.gmra.mxu0 %v7049_v17 }
  0x43   :  { %6728 = vmatprep.mubr.bf16.mxu0 %v7050_v18 }
  0x4a   :  { %6729 = vmatmul.mubr.bf16.gmra.mxu0 %v7051_v19 }
  0x4b   :  { %6732 = vmatprep.mubr.bf16.mxu0 %v7052_v20 }
  0x52   :  { %6733 = vmatmul.mubr.bf16.gmra.mxu0 %v7053_v21 }
  0x53   :  { %6736 = vmatprep.mubr.bf16.mxu0 %v7054_v22 }
  0x5a   :  { %6737 = vmatmul.mubr.bf16.gmra.mxu0 %v7055_v23 }
  0x5b   :  { %6740 = vmatprep.mubr.bf16.mxu0 %v7056_v24 }
  0x62   :  { %6741 = vmatmul.mubr.bf16.gmra.mxu0 %v7057_v25 }
  0x63   :  { %12 = vsyncpa [#allocation3], 0  ;;  %6744 = vmatprep.mubr.bf16.mxu0 %v7058_v26  ;;  %v7059_v27 = vld [vmem:[%s12510_s0 + $0x98] sm:$0xff]   ;;  %v7060_v28 = vld [vmem:[%s12510_s0 + $0xa0] sm:$0xff]   ;;  %vm1442_vm0 = vcmask 1040384   ;;  %vm1977_vm4 = vcmask 1046528  }
  0x64   :  { %v7061_v29 = vld [vmem:[%s12510_s0 + $0xa8] sm:$0xff]   ;;  %v7062_v30 = vld [vmem:[%s12510_s0 + $0xb0] sm:$0xff]   ;;  %v7063_v31 = vld [vmem:[%s12510_s0 + $0xb8] sm:$0xff]   ;;  %vm1443_vm1 = vsmask.f32 256 }
  0x65   :  { %v7064_v32 = vld [vmem:[%s12510_s0 + $0xc0] sm:$0xff]   ;;  %v7065_v33 = vld [vmem:[%s12510_s0 + $0xc8] sm:$0xff]   ;;  %v7066_v34 = vld [vmem:[%s12510_s0 + $0xd0] sm:$0xff]   ;;  %vm1511_vm3 = vsmask.f32 7424 }
  0x66   :  { %v7067_v35 = vld [vmem:[%s12510_s0 + $0xd8] sm:$0xff]   ;;  %v7068_v36 = vld [vmem:[%s12510_s0 + $0xe0] sm:$0xff]   ;;  %v7069_v37 = vld [vmem:[%s12510_s0 + $0xe8] sm:$0xff]  }
  0x67   :  { %v7070_v38 = vld [vmem:[%s12510_s0 + $0xf0] sm:$0xff]   ;;  %v7071_v39 = vld [vmem:[%s12510_s0 + $0xf8] sm:$0xff]   ;;  %vm7796_vm2 = vmand %vm1442_vm0, %vm1443_vm1 }
  0x6a   :  { %6745 = vmatmul.mubr.bf16.gmra.mxu0 %v7059_v27 }
  0x6b   :  { %6748 = vmatprep.mubr.bf16.mxu0 %v7060_v28 }
  0x72   :  { %6749 = vmatmul.mubr.bf16.gmra.mxu0 %v7061_v29 }
  0x73   :  { %6752 = vmatprep.mubr.bf16.mxu0 %v7062_v30 }
  0x7a   :  { %6753 = vmatmul.mubr.bf16.gmra.mxu0 %v7063_v31 }
  0x7b   :  { %6756 = vmatprep.mubr.bf16.mxu0 %v7064_v32 }
  0x82   :  { %6757 = vmatmul.mubr.bf16.gmra.mxu0 %v7065_v33 }
  0x83   :  { %6760 = vmatprep.mubr.bf16.mxu0 %v7066_v34 }
  0x8a   :  { %6761 = vmatmul.mubr.bf16.gmra.mxu0 %v7067_v35 }
  0x8b   :  { %6764 = vmatprep.mubr.bf16.mxu0 %v7068_v36 }
  0x92   :  { %6765 = vmatmul.mubr.bf16.gmra.mxu0 %v7069_v37 }
  0x93   :  { %6768 = vmatprep.mubr.bf16.mxu0 %v7070_v38 }
  0x9a   :  { %6769 = vmatmul.mubr.bf16.gmra.mxu0 %v7071_v39 }
  0xe2   :  { %v7386_v40 = vpop.f32.mrf.mxu0 }
  0xe3   :  { %12902 = vst [vmem:[#allocation5_spill] sm:$0xff] %v7386_v40 }
  0xe4   :  { %v7388_v41 = vpop.f32.mrf.mxu0 }
  0xe5   :  { %12903 = vst [vmem:[#allocation6_spill] sm:$0xff] %v7388_v41 }
  0xe6   :  { %v7390_v42 = vpop.f32.mrf.mxu0 }
  0xe7   :  { %12904 = vst [vmem:[#allocation7_spill] sm:$0xff] %v7390_v42 }
  0xe8   :  { %v7392_v43 = vpop.f32.mrf.mxu0 }
  0xe9   :  { %12905 = vst [vmem:[#allocation8_spill] sm:$0xff] %v7392_v43  ;;  %v639_v44 = vadd.f32 %v7392_v43, %v7388_v41 }
  0xea   :  { %v7396_v45 = vpop.f32.mrf.mxu0 }
  0xeb   :  { %12906 = vst [vmem:[#allocation9_spill] sm:$0xff] %v7396_v45  ;;  %v640_v46 = vadd.f32 %v7386_v40, %v639_v44 }
  0xec   :  { %v7399_v47 = vpop.f32.mrf.mxu0 }
  0xed   :  { %12907 = vst [vmem:[#allocation10_spill] sm:$0xff] %v7399_v47  ;;  %v641_v48 = vadd.f32 %v7390_v42, %v640_v46 }
  0xee   :  { %v7402_v49 = vpop.f32.mrf.mxu0 }
  0xef   :  { %12908 = vst [vmem:[#allocation11_spill] sm:$0xff] %v7402_v49  ;;  %v642_v50 = vadd.f32 %v641_v48, %v7399_v47 }
  0xf0   :  { %v7405_v51 = vpop.f32.mrf.mxu0 }
  0xf1   :  { %12909 = vst [vmem:[#allocation12_spill] sm:$0xff] %v7405_v51  ;;  %v643_v52 = vadd.f32 %v642_v50, %v7405_v51 }
  0xf2   :  { %v7408_v53 = vpop.f32.mrf.mxu0 }
  0xf3   :  { %12910 = vst [vmem:[#allocation13_spill] sm:$0xff] %v7408_v53  ;;  %v644_v54 = vadd.f32 %v7396_v45, %v643_v52 }
  0xf4   :  { %v7411_v55 = vpop.f32.mrf.mxu0 }
  0xf5   :  { %12911 = vst [vmem:[#allocation14_spill] sm:$0xff] %v7411_v55  ;;  %v645_v56 = vadd.f32 %v7402_v49, %v644_v54 }
  0xf6   :  { %v7414_v57 = vpop.f32.mrf.mxu0 }
  0xf7   :  { %12912 = vst [vmem:[#allocation15_spill] sm:$0xff] %v7414_v57  ;;  %v646_v58 = vadd.f32 %v645_v56, %v7411_v55 }
  0xf8   :  { %v7417_v59 = vpop.f32.mrf.mxu0 }
  0xf9   :  { %12913 = vst [vmem:[#allocation16_spill] sm:$0xff] %v7417_v59  ;;  %v647_v60 = vadd.f32 %v646_v58, %v7417_v59 }
  0xfa   :  { %v7420_v61 = vpop.f32.mrf.mxu0 }
  0xfb   :  { %12914 = vst [vmem:[#allocation17_spill] sm:$0xff] %v7420_v61  ;;  %v648_v62 = vadd.f32 %v7408_v53, %v647_v60 }
  0xfc   :  { %v7423_v63 = vpop.f32.mrf.mxu0 }
  0xfd   :  { %12915 = vst [vmem:[#allocation18_spill] sm:$0xff] %v7423_v63  ;;  %v649_v0 = vadd.f32 %v7414_v57, %v648_v62 }
  0xfe   :  { %v7426_v1 = vpop.f32.mrf.mxu0 }
  0xff   :  { %12916 = vst [vmem:[#allocation19_spill] sm:$0xff] %v7426_v1  ;;  %v650_v2 = vadd.f32 %v649_v0, %v7423_v63 }
 0x100   :  { %v7429_v3 = vpop.f32.mrf.mxu0 }
 0x101   :  { %12917 = vst [vmem:[#allocation20_spill] sm:$0xff] %v7429_v3  ;;  %v651_v4 = vadd.f32 %v650_v2, %v7429_v3 }
 0x102   :  { %v7432_v5 = vpop.f32.mrf.mxu0 }
 0x103   :  { %v652_v6 = vadd.f32 %v7420_v61, %v651_v4 }
 0x104   :  { %v7435_v7 = vpop.f32.mrf.mxu0 }
 0x105   :  { %12918 = vst [vmem:[#allocation21_spill] sm:$0xff] %v7435_v7  ;;  %v653_v8 = vadd.f32 %v7426_v1, %v652_v6 }
 0x106   :  { %v7438_v9 = vpop.f32.mrf.mxu0 }
 0x107   :  { %v654_v10 = vadd.f32 %v653_v8, %v7435_v7 }
 0x108   :  { %v7441_v11 = vpop.f32.mrf.mxu0 }
 0x109   :  { %12919 = vst [vmem:[#allocation22_spill] sm:$0xff] %v7441_v11  ;;  %v655_v12 = vadd.f32 %v654_v10, %v7441_v11 }
 0x10a   :  { %v7444_v13 = vpop.f32.mrf.mxu0 }
 0x10b   :  { %v656_v14 = vadd.f32 %v7432_v5, %v655_v12 }
 0x10c   :  { %v7447_v15 = vpop.f32.mrf.mxu0 }
 0x10d   :  { %v657_v16 = vadd.f32 %v7438_v9, %v656_v14 }
 0x10e   :  { %v7450_v17 = vpop.f32.mrf.mxu0 }
 0x10f   :  { %v658_v18 = vadd.f32 %v657_v16, %v7447_v15 }
 0x110   :  { %v7453_v19 = vpop.f32.mrf.mxu0 }
 0x111   :  { %v659_v20 = vadd.f32 %v658_v18, %v7453_v19 }
 0x112   :  { %v7456_v21 = vpop.f32.mrf.mxu0 }
 0x113   :  { %v660_v22 = vadd.f32 %v7444_v13, %v659_v20 }
 0x114   :  { %v7459_v23 = vpop.f32.mrf.mxu0 }
 0x115   :  { %v661_v24 = vadd.f32 %v7450_v17, %v660_v22 }
 0x116   :  { %v7462_v25 = vpop.f32.mrf.mxu0 }
 0x117   :  { %v662_v26 = vadd.f32 %v661_v24, %v7459_v23 }
 0x118   :  { %v7465_v27 = vpop.f32.mrf.mxu0 }
 0x119   :  { %v663_v28 = vadd.f32 %v662_v26, %v7465_v27 }
 0x11a   :  { %v7468_v29 = vpop.f32.mrf.mxu0 }
 0x11b   :  { %v664_v30 = vadd.f32 %v7456_v21, %v663_v28 }
 0x11c   :  { %v7471_v31 = vpop.f32.mrf.mxu0 }
 0x11d   :  { %v665_v32 = vadd.f32 %v7462_v25, %v664_v30 }
 0x11e   :  { %v7474_v33 = vpop.f32.mrf.mxu0 }
 0x11f   :  { %v666_v34 = vadd.f32 %v665_v32, %v7471_v31 }
 0x120   :  { %v7477_v35 = vpop.f32.mrf.mxu0 }
 0x121   :  { %v667_v36 = vadd.f32 %v666_v34, %v7477_v35 }
 0x122   :  { %v7480_v37 = vpop.f32.mrf.mxu0 }
 0x123   :  { %v668_v38 = vadd.f32 %v7468_v29, %v667_v36 }
 0x124   :  { %v7483_v39 = vpop.f32.mrf.mxu0 }
 0x125   :  { %v669_v44 = vadd.f32 %v7474_v33, %v668_v38 }
 0x126   :  { %v7486_v46 = vpop.f32.mrf.mxu0 }
 0x127   :  { %v670_v48 = vadd.f32 %v669_v44, %v7483_v39 }
 0x128   :  { %v7489_v50 = vpop.f32.mrf.mxu0 }
 0x129   :  { %v671_v52 = vadd.f32 %v670_v48, %v7489_v50 }
 0x12a   :  { %v7492_v54 = vpop.f32.mrf.mxu0 }
 0x12b   :  { %v672_v56 = vadd.f32 %v7480_v37, %v671_v52 }
 0x12c   :  { %v7495_v58 = vpop.f32.mrf.mxu0 }
 0x12d   :  { %v673_v60 = vadd.f32 %v7486_v46, %v672_v56 }
 0x12e   :  { %v7498_v62 = vpop.f32.mrf.mxu0 }
 0x12f   :  { %v674_v0 = vadd.f32 %v673_v60, %v7495_v58 }
 0x130   :  { %v7501_v2 = vpop.f32.mrf.mxu0 }
 0x131   :  { %v675_v4 = vadd.f32 %v674_v0, %v7501_v2 }
 0x132   :  { %v7504_v6 = vpop.f32.mrf.mxu0 }
 0x133   :  { %v676_v8 = vadd.f32 %v7492_v54, %v675_v4 }
 0x134   :  { %v7507_v10 = vpop.f32.mrf.mxu0 }
 0x135   :  { %v677_v12 = vadd.f32 %v7498_v62, %v676_v8 }
 0x136   :  { %v7510_v14 = vpop.f32.mrf.mxu0 }
 0x137   :  { %v678_v16 = vadd.f32 %v677_v12, %v7507_v10 }
 0x138   :  { %v7513_v18 = vpop.f32.mrf.mxu0 }
 0x139   :  { %v679_v20 = vadd.f32 %v678_v16, %v7513_v18 }
 0x13a   :  { %v7516_v22 = vpop.f32.mrf.mxu0 }
 0x13b   :  { %12920 = vst [vmem:[#allocation23_spill] sm:$0xff] %v7516_v22  ;;  %v680_v24 = vadd.f32 %v7504_v6, %v679_v20 }
 0x13c   :  { %v7519_v26 = vpop.f32.mrf.mxu0 }
 0x13d   :  { %v681_v28 = vadd.f32 %v7510_v14, %v680_v24 }
 0x13e   :  { %v7522_v30 = vpop.f32.mrf.mxu0 }
 0x13f   :  { %12921 = vst [vmem:[#allocation24_spill] sm:$0xff] %v7522_v30  ;;  %v682_v32 = vadd.f32 %v681_v28, %v7519_v26 }
 0x140   :  { %v7525_v34 = vpop.f32.mrf.mxu0 }
 0x141   :  { %v683_v36 = vadd.f32 %v682_v32, %v7525_v34 }
 0x142   :  { %v7528_v38 = vpop.f32.mrf.mxu0 }
 0x143   :  { %12922 = vst [vmem:[#allocation25_spill] sm:$0xff] %v7528_v38  ;;  %v684_v44 = vadd.f32 %v7516_v22, %v683_v36 }
 0x144   :  { %v7531_v48 = vpop.f32.mrf.mxu0 }
 0x145   :  { %12923 = vst [vmem:[#allocation26_spill] sm:$0xff] %v7531_v48  ;;  %v685_v52 = vadd.f32 %v7522_v30, %v684_v44 }
 0x146   :  { %v7534_v56 = vpop.f32.mrf.mxu0 }
 0x147   :  { %12924 = vst [vmem:[#allocation27_spill] sm:$0xff] %v7534_v56  ;;  %v686_v60 = vadd.f32 %v685_v52, %v7531_v48 }
 0x148   :  { %v7537_v0 = vpop.f32.mrf.mxu0 }
 0x149   :  { %12925 = vst [vmem:[#allocation28_spill] sm:$0xff] %v7537_v0  ;;  %v687_v4 = vadd.f32 %v686_v60, %v7537_v0 }
 0x14a   :  { %v7540_v8 = vpop.f32.mrf.mxu0 }
 0x14b   :  { %12926 = vst [vmem:[#allocation29_spill] sm:$0xff] %v7540_v8  ;;  %v688_v12 = vadd.f32 %v7528_v38, %v687_v4 }
 0x14c   :  { %v7543_v16 = vpop.f32.mrf.mxu0 }
 0x14d   :  { %12927 = vst [vmem:[#allocation30_spill] sm:$0xff] %v7543_v16  ;;  %v689_v20 = vadd.f32 %v7534_v56, %v688_v12 }
 0x14e   :  { %v7546_v24 = vpop.f32.mrf.mxu0 }
 0x14f   :  { %12928 = vst [vmem:[#allocation31_spill] sm:$0xff] %v7546_v24  ;;  %v690_v28 = vadd.f32 %v689_v20, %v7543_v16 }
 0x150   :  { %v7549_v32 = vpop.f32.mrf.mxu0 }
 0x151   :  { %12929 = vst [vmem:[#allocation32_spill] sm:$0xff] %v7549_v32  ;;  %v691_v36 = vadd.f32 %v690_v28, %v7549_v32 }
 0x152   :  { %v7552_v44 = vpop.f32.mrf.mxu0 }
 0x153   :  { %12930 = vst [vmem:[#allocation33_spill] sm:$0xff] %v7552_v44  ;;  %v692_v52 = vadd.f32 %v7540_v8, %v691_v36 }
 0x154   :  { %v7555_v60 = vpop.f32.mrf.mxu0 }
 0x155   :  { %12931 = vst [vmem:[#allocation34_spill] sm:$0xff] %v7555_v60  ;;  %v693_v4 = vadd.f32 %v7546_v24, %v692_v52 }
 0x156   :  { %v7558_v38 = vpop.f32.mrf.mxu0 }
 0x157   :  { %12932 = vst [vmem:[#allocation35_spill] sm:$0xff] %v7558_v38  ;;  %v694_v12 = vadd.f32 %v693_v4, %v7555_v60 }
 0x158   :  { %v7561_v56 = vpop.f32.mrf.mxu0 }
 0x159   :  { %12933 = vst [vmem:[#allocation36_spill] sm:$0xff] %v7561_v56  ;;  %v695_v20 = vadd.f32 %v694_v12, %v7561_v56 }
 0x15a   :  { %v7564_v16 = vpop.f32.mrf.mxu0 }
 0x15b   :  { %12934 = vst [vmem:[#allocation37_spill] sm:$0xff] %v7564_v16  ;;  %v696_v28 = vadd.f32 %v7552_v44, %v695_v20 }
 0x15c   :  { %v7567_v32 = vpop.f32.mrf.mxu0 }
 0x15d   :  { %v697_v36 = vadd.f32 %v7558_v38, %v696_v28 }
 0x15e   :  { %v7570_v8 = vpop.f32.mrf.mxu0 }
 0x15f   :  { %v698_v52 = vadd.f32 %v697_v36, %v7567_v32 }
 0x160   :  { %v7573_v24 = vpop.f32.mrf.mxu0 }
 0x161   :  { %v699_v4 = vadd.f32 %v698_v52, %v7573_v24 }
 0x163   :  { %v700_v60 = vadd.f32 %v7564_v16, %v699_v4 }
 0x165   :  { %v701_v12 = vadd.f32 %v7570_v8, %v700_v60 }
 0x167   :  { %v702_v56 = vrot.slane %v701_v12, 4 }
 0x169   :  { %v703_v0 = vadd.f32 %v702_v56, %v701_v12 }
 0x16b   :  { %v704_v48 = vrot.slane %v703_v0, 2 }
 0x16d   :  { %v705_v20 = vadd.f32 %v704_v48, %v703_v0 }
 0x16f   :  { %v706_v44 = vrot.slane %v705_v20, 1 }
 0x171   :  { %v707_v30 = vadd.f32 %v706_v44, %v705_v20 }
 0x173   :  { %v7578_v22 = vmul.f32 0.001953125, %v707_v30 }
 0x175   :  { %v710_v28 = vsub.f32 %v7388_v41, %v7578_v22  ;;  %v711_v36 = vsub.f32 %v7392_v43, %v7578_v22  ;;  %v712_v52 = vsub.f32 %v7386_v40, %v7578_v22  ;;  %v713_v56 = vsub.f32 %v7390_v42, %v7578_v22 }
 0x176   :  { %v714_v48 = vsub.f32 %v7399_v47, %v7578_v22  ;;  %v715_v44 = vsub.f32 %v7405_v51, %v7578_v22  ;;  %v716_v20 = vsub.f32 %v7396_v45, %v7578_v22  ;;  %v718_v47 = vsub.f32 %v7411_v55, %v7578_v22 }
 0x177   :  { %v774_v4 = vmul.f32 %v710_v28, %v710_v28  ;;  %v775_v16 = vmul.f32 %v711_v36, %v711_v36  ;;  %v776_v0 = vmul.f32 %v712_v52, %v712_v52  ;;  %v777_v60 = vmul.f32 %v713_v56, %v713_v56 }
 0x178   :  { %v778_v43 = vmul.f32 %v714_v48, %v714_v48  ;;  %v717_v28 = vsub.f32 %v7402_v49, %v7578_v22  ;;  %v779_v36 = vmul.f32 %v715_v44, %v715_v44  ;;  %v780_v52 = vmul.f32 %v716_v20, %v716_v20 }
 0x179   :  { %v838_v30 = vadd.f32 %v775_v16, %v774_v4  ;;  %v719_v4 = vsub.f32 %v7417_v59, %v7578_v22  ;;  %v782_v48 = vmul.f32 %v718_v47, %v718_v47 }
 0x17a   :  { %v781_v56 = vmul.f32 %v717_v28, %v717_v28 }
 0x17b   :  { %v839_v12 = vadd.f32 %v838_v30, %v776_v0  ;;  %v720_v30 = vsub.f32 %v7408_v53, %v7578_v22  ;;  %v783_v44 = vmul.f32 %v719_v4, %v719_v4 }
 0x17d   :  { %v840_v41 = vadd.f32 %v839_v12, %v777_v60  ;;  %v721_v12 = vsub.f32 %v7414_v57, %v7578_v22  ;;  %v784_v20 = vmul.f32 %v720_v30, %v720_v30 }
 0x17f   :  { %v841_v42 = vadd.f32 %v840_v41, %v778_v43  ;;  %v722_v43 = vsub.f32 %v7423_v63, %v7578_v22  ;;  %v785_v28 = vmul.f32 %v721_v12, %v721_v12  ;;  %v12948_v63 = vld [vmem:[#allocation29_spill] sm:$0xff] }
 0x180   :  { %v764_v57 = vsub.f32 %v12948_v63, %v7578_v22 }
 0x181   :  { %v842_v16 = vadd.f32 %v841_v42, %v779_v36  ;;  %v723_v36 = vsub.f32 %v7429_v3, %v7578_v22  ;;  %v786_v47 = vmul.f32 %v722_v43, %v722_v43  ;;  %v728_v43 = vsub.f32 %v7432_v5, %v7578_v22 }
 0x183   :  { %v843_v0 = vadd.f32 %v842_v16, %v780_v52  ;;  %v724_v16 = vsub.f32 %v7420_v61, %v7578_v22  ;;  %v787_v4 = vmul.f32 %v723_v36, %v723_v36 }
 0x185   :  { %v844_v60 = vadd.f32 %v843_v0, %v781_v56  ;;  %v725_v0 = vsub.f32 %v7426_v1, %v7578_v22  ;;  %v788_v30 = vmul.f32 %v724_v16, %v724_v16  ;;  %v12942_v1 = vld [vmem:[#allocation30_spill] sm:$0xff] }
 0x187   :  { %v845_v41 = vadd.f32 %v844_v60, %v782_v48  ;;  %v726_v60 = vsub.f32 %v7435_v7, %v7578_v22  ;;  %v789_v12 = vmul.f32 %v725_v0, %v725_v0  ;;  %v792_v0 = vmul.f32 %v728_v43, %v728_v43  ;;  %v7096_v7 = vld [vmem:[%s12512_s2 + $0xe0] sm:$0xff]  }
 0x189   :  { %v846_v42 = vadd.f32 %v845_v41, %v783_v44  ;;  %v727_v41 = vsub.f32 %v7441_v11, %v7578_v22  ;;  %v790_v36 = vmul.f32 %v726_v60, %v726_v60 }
 0x18b   :  { %v847_v52 = vadd.f32 %v846_v42, %v784_v20  ;;  %v12550_v42 = vmov 0   ;;  %v791_v16 = vmul.f32 %v727_v41, %v727_v41 }
 0x18c   :  { %2716 = vmatprep.subr.bf16.mxu1 %v12550_v42  ;;  %3005 = vmatprep.subr.bf16.mxu0 %v12550_v42  ;;  %v732_v42 = vsub.f32 %v7444_v13, %v7578_v22 }
 0x18d   :  { %v848_v56 = vadd.f32 %v847_v52, %v785_v28  ;;  %v729_v52 = vsub.f32 %v7438_v9, %v7578_v22 }
 0x18e   :  { %v796_v43 = vmul.f32 %v732_v42, %v732_v42  ;;  %v7073_v42 = vld [vmem:[%s12512_s2 + $0x30] sm:$0xff]  }
 0x18f   :  { %v849_v48 = vadd.f32 %v848_v56, %v786_v47  ;;  %v730_v56 = vsub.f32 %v7447_v15, %v7578_v22 }
 0x191   :  { %v850_v44 = vadd.f32 %v849_v48, %v787_v4  ;;  %v731_v48 = vsub.f32 %v7453_v19, %v7578_v22  ;;  %v794_v60 = vmul.f32 %v730_v56, %v730_v56 }
 0x193   :  { %v851_v20 = vadd.f32 %v850_v44, %v788_v30  ;;  %v793_v30 = vmul.f32 %v729_v52, %v729_v52  ;;  %v795_v41 = vmul.f32 %v731_v48, %v731_v48  ;;  %v7072_v52 = vld [vmem:[%s12512_s2 + $0x38] sm:$0xff]  }
 0x194   :  { %2717 = vmatpush1.bf16.msra.mxu1 %v7072_v52  ;;  %v739_v52 = vsub.f32 %v7477_v35, %v7578_v22 }
 0x195   :  { %v852_v28 = vadd.f32 %v851_v20, %v789_v12  ;;  %v733_v20 = vsub.f32 %v7450_v17, %v7578_v22 }
 0x197   :  { %v853_v47 = vadd.f32 %v852_v28, %v790_v36  ;;  %v734_v28 = vsub.f32 %v7459_v23, %v7578_v22 }
 0x199   :  { %v854_v4 = vadd.f32 %v853_v47, %v791_v16  ;;  %v735_v47 = vsub.f32 %v7465_v27, %v7578_v22  ;;  %v798_v48 = vmul.f32 %v734_v28, %v734_v28  ;;  %v7074_v28 = vld [vmem:[%s12512_s2 + $0xb8] sm:$0xff]  }
 0x19a   :  { %3006 = vmatpush1.bf16.msra.mxu0 %v7074_v28  ;;  %v7078_v28 = vld [vmem:[%s12512_s2 + $0xa8] sm:$0xff]  }
 0x19b   :  { %v855_v44 = vadd.f32 %v854_v4, %v792_v0  ;;  %v797_v0 = vmul.f32 %v733_v20, %v733_v20  ;;  %v736_v4 = vsub.f32 %v7456_v21, %v7578_v22  ;;  %v738_v20 = vsub.f32 %v7471_v31, %v7578_v22 }
 0x19d   :  { %v856_v12 = vadd.f32 %v855_v44, %v793_v30  ;;  %v12935_v44 = vmov 0  }
 0x19e   :  { %2718 = vmatprep.subr.bf16.mxu1 %v12935_v44  ;;  %3007 = vmatprep.subr.bf16.mxu0 %v12935_v44 }
 0x19f   :  { %v857_v36 = vadd.f32 %v856_v12, %v794_v60  ;;  %v737_v60 = vsub.f32 %v7462_v25, %v7578_v22  ;;  %v799_v12 = vmul.f32 %v735_v47, %v735_v47  ;;  %2719 = vmatpush1.bf16.msra.mxu1 %v7073_v42  ;;  %v7077_v42 = vld [vmem:[%s12512_s2 + $0x20] sm:$0xff]  }
 0x1a0   :  { %2720 = vmatprep.subr.bf16.mxu1 %v12935_v44 }
 0x1a1   :  { %v858_v16 = vadd.f32 %v857_v36, %v795_v41  ;;  %v800_v36 = vmul.f32 %v736_v4, %v736_v4  ;;  %v801_v47 = vmul.f32 %v737_v60, %v737_v60  ;;  %v802_v4 = vmul.f32 %v738_v20, %v738_v20 }
 0x1a2   :  { %v741_v60 = vsub.f32 %v7474_v33, %v7578_v22  ;;  %v742_v20 = vsub.f32 %v7483_v39, %v7578_v22 }
 0x1a3   :  { %v859_v56 = vadd.f32 %v858_v16, %v796_v43  ;;  %v7075_v16 = vld [vmem:[%s12512_s2 + $0x28] sm:$0xff]  }
 0x1a4   :  { %2721 = vmatpush1.bf16.msra.mxu1 %v7075_v16  ;;  %v7079_v16 = vld [vmem:[%s12512_s2 + $0x18] sm:$0xff]  }
 0x1a5   :  { %v860_v30 = vadd.f32 %v859_v56, %v797_v0  ;;  %v740_v56 = vsub.f32 %v7468_v29, %v7578_v22  ;;  %2722 = vmatprep.subr.bf16.mxu1 %v12935_v44 }
 0x1a7   :  { %v861_v41 = vadd.f32 %v860_v30, %v798_v48  ;;  %v7076_v30 = vld [vmem:[%s12512_s2 + $0xb0] sm:$0xff]  }
 0x1a8   :  { %3008 = vmatpush1.bf16.msra.mxu0 %v7076_v30  ;;  %2723 = vmatpush1.bf16.msra.mxu1 %v7077_v42  ;;  %v7080_v30 = vld [vmem:[%s12512_s2 + $0xa0] sm:$0xff]   ;;  %v7081_v42 = vld [vmem:[%s12512_s2 + $0x10] sm:$0xff]  }
 0x1a9   :  { %v862_v43 = vadd.f32 %v861_v41, %v799_v12  ;;  %v803_v12 = vmul.f32 %v739_v52, %v739_v52  ;;  %3009 = vmatprep.subr.bf16.mxu0 %v12935_v44  ;;  %2724 = vmatprep.subr.bf16.mxu1 %v12935_v44  ;;  %v743_v52 = vsub.f32 %v7489_v50, %v7578_v22 }
 0x1ab   :  { %v863_v0 = vadd.f32 %v862_v43, %v800_v36  ;;  %v804_v36 = vmul.f32 %v740_v56, %v740_v56  ;;  %v744_v56 = vsub.f32 %v7480_v37, %v7578_v22 }
 0x1ac   :  { %3010 = vmatpush1.bf16.msra.mxu0 %v7078_v28  ;;  %2725 = vmatpush1.bf16.msra.mxu1 %v7079_v16  ;;  %v7082_v28 = vld [vmem:[%s12512_s2 + $0x98] sm:$0xff]   ;;  %v7083_v16 = vld [vmem:[%s12512_s2 + $0x8] sm:$0xff]  }
 0x1ad   :  { %v864_v48 = vadd.f32 %v863_v0, %v801_v47  ;;  %v805_v47 = vmul.f32 %v741_v60, %v741_v60  ;;  %3011 = vmatprep.subr.bf16.mxu0 %v12935_v44  ;;  %2726 = vmatprep.subr.bf16.mxu1 %v12935_v44  ;;  %v745_v60 = vsub.f32 %v7486_v46, %v7578_v22 }
 0x1af   :  { %v865_v41 = vadd.f32 %v864_v48, %v802_v4  ;;  %v806_v4 = vmul.f32 %v742_v20, %v742_v20  ;;  %v746_v20 = vsub.f32 %v7495_v58, %v7578_v22 }
 0x1b0   :  { %3012 = vmatpush1.bf16.msra.mxu0 %v7080_v30  ;;  %2727 = vmatpush1.bf16.msra.mxu1 %v7081_v42  ;;  %v7084_v30 = vld [vmem:[%s12512_s2 + $0x90] sm:$0xff]   ;;  %v7085_v42 = vld [vmem:[%s12512_s2] sm:$0xff]  }
 0x1b1   :  { %v866_v43 = vadd.f32 %v865_v41, %v803_v12  ;;  %v807_v12 = vmul.f32 %v743_v52, %v743_v52  ;;  %3013 = vmatprep.subr.bf16.mxu0 %v12935_v44  ;;  %2728 = vmatprep.subr.bf16.mxu1 %v12935_v44  ;;  %v747_v52 = vsub.f32 %v7501_v2, %v7578_v22 }
 0x1b3   :  { %v867_v0 = vadd.f32 %v866_v43, %v804_v36  ;;  %v808_v36 = vmul.f32 %v744_v56, %v744_v56  ;;  %v748_v56 = vsub.f32 %v7492_v54, %v7578_v22 }
 0x1b4   :  { %3014 = vmatpush1.bf16.msra.mxu0 %v7082_v28  ;;  %2729 = vmatpush1.bf16.msra.mxu1 %v7083_v16  ;;  %v7086_v28 = vld [vmem:[%s12512_s2 + $0x88] sm:$0xff]   ;;  %v7087_v16 = vld [vmem:[%s12512_s2 + $0x78] sm:$0xff]  }
 0x1b5   :  { %v868_v48 = vadd.f32 %v867_v0, %v805_v47  ;;  %v809_v47 = vmul.f32 %v745_v60, %v745_v60  ;;  %3015 = vmatprep.subr.bf16.mxu0 %v12935_v44  ;;  %2730 = vmatprep.subr.bf16.mxu1 %v12935_v44  ;;  %v749_v60 = vsub.f32 %v7498_v62, %v7578_v22 }
 0x1b7   :  { %v869_v41 = vadd.f32 %v868_v48, %v806_v4  ;;  %v810_v4 = vmul.f32 %v746_v20, %v746_v20  ;;  %v750_v20 = vsub.f32 %v7507_v10, %v7578_v22 }
 0x1b8   :  { %3016 = vmatpush1.bf16.msra.mxu0 %v7084_v30  ;;  %2731 = vmatpush1.bf16.msra.mxu1 %v7085_v42  ;;  %v7088_v30 = vld [vmem:[%s12512_s2 + $0x80] sm:$0xff]   ;;  %v7089_v42 = vld [vmem:[%s12512_s2 + $0x70] sm:$0xff]  }
 0x1b9   :  { %v870_v43 = vadd.f32 %v869_v41, %v807_v12  ;;  %v811_v12 = vmul.f32 %v747_v52, %v747_v52  ;;  %3017 = vmatprep.subr.bf16.mxu0 %v12935_v44  ;;  %2732 = vmatprep.subr.bf16.mxu1 %v12935_v44  ;;  %v751_v52 = vsub.f32 %v7513_v18, %v7578_v22 }
 0x1bb   :  { %v871_v0 = vadd.f32 %v870_v43, %v808_v36  ;;  %v812_v36 = vmul.f32 %v748_v56, %v748_v56  ;;  %v752_v56 = vsub.f32 %v7504_v6, %v7578_v22 }
 0x1bc   :  { %3018 = vmatpush1.bf16.msra.mxu0 %v7086_v28  ;;  %2733 = vmatpush2.bf16.msra.mxu1 %v7087_v16  ;;  %v7090_v28 = vld [vmem:[%s12512_s2 + $0xf8] sm:$0xff]   ;;  %v7091_v16 = vld [vmem:[%s12512_s2 + $0x68] sm:$0xff]  }
 0x1bd   :  { %v872_v48 = vadd.f32 %v871_v0, %v809_v47  ;;  %v813_v47 = vmul.f32 %v749_v60, %v749_v60  ;;  %3019 = vmatprep.subr.bf16.mxu0 %v12935_v44  ;;  %2734 = vmatprep.subr.bf16.mxu1 %v12935_v44  ;;  %v753_v60 = vsub.f32 %v7510_v14, %v7578_v22 }
 0x1bf   :  { %v873_v41 = vadd.f32 %v872_v48, %v810_v4  ;;  %v814_v4 = vmul.f32 %v750_v20, %v750_v20  ;;  %v754_v20 = vsub.f32 %v7519_v26, %v7578_v22 }
 0x1c0   :  { %3020 = vmatpush1.bf16.msra.mxu0 %v7088_v30  ;;  %2735 = vmatpush2.bf16.msra.mxu1 %v7089_v42  ;;  %v7092_v42 = vld [vmem:[%s12512_s2 + $0xf0] sm:$0xff]  }
 0x1c1   :  { %v874_v43 = vadd.f32 %v873_v41, %v811_v12  ;;  %v815_v12 = vmul.f32 %v751_v52, %v751_v52  ;;  %3021 = vmatprep.subr.bf16.mxu0 %v12935_v44  ;;  %2736 = vmatprep.subr.bf16.mxu1 %v12935_v44  ;;  %v755_v52 = vsub.f32 %v7525_v34, %v7578_v22 }
 0x1c3   :  { %v875_v0 = vadd.f32 %v874_v43, %v812_v36  ;;  %v816_v36 = vmul.f32 %v752_v56, %v752_v56  ;;  %v12936_v56 = vld [vmem:[#allocation23_spill] sm:$0xff] }
 0x1c4   :  { %3022 = vmatpush2.bf16.msra.mxu0 %v7090_v28  ;;  %2737 = vmatpush2.bf16.msra.mxu1 %v7091_v16 }
 0x1c5   :  { %v876_v48 = vadd.f32 %v875_v0, %v813_v47  ;;  %v817_v47 = vmul.f32 %v753_v60, %v753_v60  ;;  %3023 = vmatprep.subr.bf16.mxu0 %v12935_v44  ;;  %2738 = vmatprep.subr.bf16.mxu1 %v12935_v44  ;;  %v7093_v60 = vld [vmem:[%s12512_s2 + $0x60] sm:$0xff]  }
 0x1c7   :  { %v877_v41 = vadd.f32 %v876_v48, %v814_v4  ;;  %v756_v4 = vsub.f32 %v12936_v56, %v7578_v22  ;;  %v818_v48 = vmul.f32 %v754_v20, %v754_v20  ;;  %v12938_v20 = vld [vmem:[#allocation26_spill] sm:$0xff] }
 0x1c8   :  { %3024 = vmatpush2.bf16.msra.mxu0 %v7092_v42  ;;  %2739 = vmatpush2.bf16.msra.mxu1 %v7093_v60  ;;  %v758_v28 = vsub.f32 %v12938_v20, %v7578_v22 }
 0x1c9   :  { %v878_v43 = vadd.f32 %v877_v41, %v815_v12  ;;  %v12937_v12 = vld [vmem:[#allocation24_spill] sm:$0xff]  ;;  %3025 = vmatprep.subr.bf16.mxu0 %v12935_v44  ;;  %v820_v16 = vmul.f32 %v756_v4, %v756_v4  ;;  %2740 = vmatprep.subr.bf16.mxu1 %v12935_v44  ;;  %v12940_v4 = vld [vmem:[#allocation25_spill] sm:$0xff] }
 0x1ca   :  { %v757_v41 = vsub.f32 %v12937_v12, %v7578_v22 }
 0x1cb   :  { %v879_v0 = vadd.f32 %v878_v43, %v816_v36  ;;  %v819_v36 = vmul.f32 %v755_v52, %v755_v52  ;;  %v7095_v52 = vld [vmem:[%s12512_s2 + $0x58] sm:$0xff]  }
 0x1cc   :  { %v821_v42 = vmul.f32 %v757_v41, %v757_v41  ;;  %2741 = vmatpush2.bf16.msra.mxu1 %v7095_v52  ;;  %v7097_v41 = vld [vmem:[%s12512_s2 + $0x50] sm:$0xff]  }
 0x1cd   :  { %v880_v30 = vadd.f32 %v879_v0, %v817_v47  ;;  %v7094_v0 = vld [vmem:[%s12512_s2 + $0xe8] sm:$0xff]   ;;  %2742 = vmatprep.subr.bf16.mxu1 %v12935_v44 }
 0x1ce   :  { %3026 = vmatpush2.bf16.msra.mxu0 %v7094_v0 }
 0x1cf   :  { %v881_v43 = vadd.f32 %v880_v30, %v818_v48  ;;  %v12939_v48 = vld [vmem:[#allocation28_spill] sm:$0xff]  ;;  %3027 = vmatprep.subr.bf16.mxu0 %v12935_v44 }
 0x1d0   :  { %v759_v30 = vsub.f32 %v12939_v48, %v7578_v22  ;;  %2743 = vmatpush2.bf16.msra.mxu1 %v7097_v41 }
 0x1d1   :  { %v882_v47 = vadd.f32 %v881_v43, %v819_v36  ;;  %v760_v36 = vsub.f32 %v12940_v4, %v7578_v22  ;;  %v822_v43 = vmul.f32 %v758_v28, %v758_v28  ;;  %v762_v28 = vsub.f32 %v12942_v1, %v7578_v22  ;;  %2744 = vmatprep.subr.bf16.mxu1 %v12935_v44 }
 0x1d2   :  { %v823_v0 = vmul.f32 %v759_v30, %v759_v30  ;;  %3028 = vmatpush2.bf16.msra.mxu0 %v7096_v7  ;;  %v7098_v30 = vld [vmem:[%s12512_s2 + $0xd8] sm:$0xff]   ;;  %v12943_v7 = vmov 0 }
 0x1d3   :  { %v883_v60 = vadd.f32 %v882_v47, %v820_v16  ;;  %v12941_v16 = vld [vmem:[#allocation27_spill] sm:$0xff]  ;;  %3029 = vmatprep.subr.bf16.mxu0 %v12935_v44  ;;  %v12944_v7 = vsel %vm7796_vm2, 4294967295, %v12943_v7  ;;  %v826_v53 = vmul.f32 %v762_v28, %v762_v28 }
 0x1d4   :  { %v761_v47 = vsub.f32 %v12941_v16, %v7578_v22  ;;  %12945 = vst [vmem:[#allocation23_spill] sm:$0xff] %v12944_v7  ;;  %v12950_v28 = vld [vmem:[#allocation31_spill] sm:$0xff] }
 0x1d5   :  { %v884_v11 = vadd.f32 %v883_v60, %v821_v42  ;;  %v1148_v42 = vrot.slane %v12935_v44, 7  ;;  %v824_v60 = vmul.f32 %v760_v36, %v760_v36  ;;  %v12947_v36 = vld [vmem:[#allocation32_spill] sm:$0xff] }
 0x1d6   :  { %v763_v41 = vsub.f32 %v12947_v36, %v7578_v22  ;;  %3030 = vmatpush2.bf16.msra.mxu0 %v7098_v30 }
 0x1d7   :  { %v885_v52 = vadd.f32 %v884_v11, %v822_v43  ;;  %v7099_v11 = vld [vmem:[%s12512_s2 + $0x48] sm:$0xff]   ;;  %v7805_v43 = vsel %vm7796_vm2, 0, %v1148_v42  ;;  %3031 = vmatprep.subr.bf16.mxu0 %v12935_v44  ;;  %v7815_v59 = vsel %vm7796_vm2, %v1148_v42, 0  ;;  %v7101_v42 = vld [vmem:[%s12512_s2 + $0x40] sm:$0xff]  }
 0x1d8   :  { %12946 = vst [vmem:[#allocation24_spill] sm:$0xff] %v7805_v43  ;;  %v1515_v3 = vshll.u32 %v7805_v43, 16  ;;  %2745 = vmatpush2.bf16.msra.mxu1 %v7099_v11  ;;  %12949 = vst [vmem:[#allocation26_spill] sm:$0xff] %v7815_v59  ;;  %v1520_v30 = vshll.u32 %v7815_v59, 16  ;;  %v765_v11 = vsub.f32 %v12950_v28, %v7578_v22  ;;  %v827_v7 = vmul.f32 %v763_v41, %v763_v41  ;;  %v7102_v41 = vld [vmem:[%s12512_s2 + $0xc8] sm:$0xff]  }
 0x1d9   :  { %v886_v61 = vadd.f32 %v885_v52, %v823_v0  ;;  %v825_v0 = vmul.f32 %v761_v47, %v761_v47  ;;  %2746 = vmatprep.subr.bf16.mxu1 %v12935_v44  ;;  %v1513_v47 = vshrl.u32 %v7805_v43, 16  ;;  %v828_v59 = vmul.f32 %v764_v57, %v764_v57  ;;  %v12954_v57 = vld [vmem:[#allocation33_spill] sm:$0xff] }
 0x1da   :  { %v1522_v49 = vrot.slane %v1520_v30, 1 }
 0x1db   :  { %v887_v52 = vadd.f32 %v886_v61, %v824_v60  ;;  %v7100_v61 = vld [vmem:[%s12512_s2 + $0xd0] sm:$0xff]   ;;  %v1517_v60 = vrot.slane %v1515_v3, 1  ;;  %v12951_v3 = vld [vmem:[#allocation34_spill] sm:$0xff] }
 0x1dc   :  { %3032 = vmatpush2.bf16.msra.mxu0 %v7100_v61  ;;  %2747 = vmatpush2.bf16.msra.mxu1 %v7101_v42  ;;  %v766_v45 = vsub.f32 %v12951_v3, %v7578_v22  ;;  %v829_v61 = vmul.f32 %v765_v11, %v765_v11  ;;  %v769_v42 = vsub.f32 %v7558_v38, %v7578_v22 }
 0x1dd   :  { %v888_v55 = vadd.f32 %v887_v52, %v825_v0  ;;  %v1518_v52 = vor.u32 %v1517_v60, %v1513_v47  ;;  %3033 = vmatprep.subr.bf16.mxu0 %v12935_v44  ;;  %3294 = vmatprep.subr.bf16.mxu1 %v12935_v44 }
 0x1de   :  { %v830_v60 = vmul.f32 %v766_v45, %v766_v45  ;;  %v771_v45 = vsub.f32 %v7573_v24, %v7578_v22 }
 0x1df   :  { %v889_v0 = vadd.f32 %v888_v55, %v826_v53  ;;  %v7832_v40 = vsel %vm1511_vm3, %v1518_v52, %v1522_v49  ;;  %v12953_v53 = vld [vmem:[#allocation36_spill] sm:$0xff]  ;;  %v7103_v49 = vld [vmem:[%s12512_s2 + $0xc0] sm:$0xff]  }
 0x1e0   :  { %12952 = vst [vmem:[#allocation28_spill] sm:$0xff] %v7832_v40  ;;  %2748 = vmatprep.mubr.bf16.mxu1 %v7832_v40  ;;  %v767_v55 = vsub.f32 %v12953_v53, %v7578_v22  ;;  %3034 = vmatpush2.bf16.msra.mxu0 %v7102_v41  ;;  %v7104_v41 = vld [vmem:[%s12512_s2 + $0x138] sm:$0xff]  }
 0x1e1   :  { %v890_v51 = vadd.f32 %v889_v0, %v827_v7  ;;  %2749 = vmatmul.mubr.bf16.vlgmr.msra.gmra.mxu1 %v7805_v43  ;;  %3035 = vmatprep.subr.bf16.mxu0 %v12935_v44  ;;  %v768_v7 = vsub.f32 %v12954_v57, %v7578_v22 }
 0x1e2   :  { %v831_v0 = vmul.f32 %v767_v55, %v767_v55  ;;  %3295 = vmatpush1.bf16.msra.mxu1 %v7104_v41  ;;  %v12955_v55 = vld [vmem:[#allocation37_spill] sm:$0xff] }
 0x1e3   :  { %v891_v47 = vadd.f32 %v890_v51, %v828_v59  ;;  %v770_v51 = vsub.f32 %v7567_v32, %v7578_v22  ;;  %v832_v59 = vmul.f32 %v768_v7, %v768_v7  ;;  %3296 = vmatprep.subr.bf16.mxu1 %v12935_v44  ;;  %v773_v7 = vsub.f32 %v7570_v8, %v7578_v22 }
 0x1e4   :  { %3036 = vmatpush2.bf16.msra.mxu0 %v7103_v49  ;;  %v772_v49 = vsub.f32 %v12955_v55, %v7578_v22 }
 0x1e5   :  { %v892_v30 = vadd.f32 %v891_v47, %v829_v61  ;;  %3583 = vmatprep.subr.bf16.mxu0 %v12935_v44  ;;  %v833_v61 = vmul.f32 %v769_v42, %v769_v42  ;;  %v837_v38 = vmul.f32 %v773_v7, %v773_v7  ;;  %v638_v7 = vld [vmem:[%s12515_s5 + $0x1] sm:$0x1] }
 0x1e6   :  { %v836_v40 = vmul.f32 %v772_v49, %v772_v49 }
 0x1e7   :  { %v893_v11 = vadd.f32 %v892_v30, %v830_v60  ;;  %v834_v60 = vmul.f32 %v770_v51, %v770_v51 }
 0x1e9   :  { %v894_v52 = vadd.f32 %v893_v11, %v831_v0  ;;  %v835_v0 = vmul.f32 %v771_v45, %v771_v45 }
 0x1eb   :  { %v895_v47 = vadd.f32 %v894_v52, %v832_v59  ;;  %v7105_v52 = vld [vmem:[%s12512_s2 + $0x130] sm:$0xff]  }
 0x1ec   :  { %3297 = vmatpush1.bf16.msra.mxu1 %v7105_v52 }
 0x1ed   :  { %v896_v30 = vadd.f32 %v895_v47, %v833_v61  ;;  %3298 = vmatprep.subr.bf16.mxu1 %v12935_v44 }
 0x1ef   :  { %v897_v11 = vadd.f32 %v896_v30, %v834_v60 }
 0x1f1   :  { %v898_v43 = vadd.f32 %v897_v11, %v835_v0 }
 0x1f3   :  { %v899_v57 = vadd.f32 %v898_v43, %v836_v40  ;;  %v7106_v40 = vld [vmem:[%s12512_s2 + $0x128] sm:$0xff]  }
 0x1f4   :  { %3299 = vmatpush1.bf16.msra.mxu1 %v7106_v40 }
 0x1f5   :  { %v900_v53 = vadd.f32 %v899_v57, %v837_v38  ;;  %v913_v38 = vlaneseq  ;;  %3300 = vmatprep.subr.bf16.mxu1 %v12935_v44 }
 0x1f7   :  { %v901_v42 = vrot.slane %v900_v53, 4  ;;  %v914_v43 = vshrl.u32 %v913_v38, 7 }
 0x1f9   :  { %v902_v59 = vadd.f32 %v901_v42, %v900_v53  ;;  %v637_v53 = vld [vmem:[%s12515_s5] sm:$0x1]  ;;  %v7874_v57 = vsub.s32 0, %v914_v43 }
 0x1fb   :  { %v903_v51 = vrot.slane %v902_v59, 2  ;;  %12956 = vst [vmem:[#allocation25_spill] sm:$0xff] %v7874_v57 }
 0x1fd   :  { %v904_v41 = vadd.f32 %v903_v51, %v902_v59  ;;  %v7107_v59 = vld [vmem:[%s12512_s2 + $0x120] sm:$0xff]  }
 0x1fe   :  { %3301 = vmatpush1.bf16.msra.mxu1 %v7107_v59 }
 0x1ff   :  { %v905_v61 = vrot.slane %v904_v41, 1  ;;  %3302 = vmatprep.subr.bf16.mxu1 %v12935_v44 }
 0x201   :  { %v906_v47 = vadd.f32 %v905_v61, %v904_v41 }
 0x203   :  { %v907_v45 = vmul.f32 0.001953125, %v906_v47 }
 0x205   :  { %v908_v60 = vadd.f32 1e-05, %v907_v45 }
 0x207   :  { %7160 = vrsqrt.f32 %v908_v60 }
 0x214   :  { %v7161_v49 = vpop.eup %7160 }
 0x215   :  { %v910_v30 = vmul.f32 %v7161_v49, %v637_v53 }
 0x217   :  { %v911_v0 = vmul.f32 %v910_v30, %v7578_v22  ;;  %v7881_v11 = vrot.slane %v910_v30, %v7874_v57 }
 0x219   :  { %v912_v42 = vsub.f32 %v638_v7, %v911_v0  ;;  %v977_v52 = vmul.f32 %v7881_v11, %v7567_v32  ;;  %v978_v51 = vmul.f32 %v7881_v11, %v7573_v24  ;;  %v935_v32 = vmul.f32 %v7432_v5, %v7881_v11  ;;  %v12958_v7 = vld [vmem:[#allocation33_spill] sm:$0xff]  ;;  %v12959_v0 = vld [vmem:[#allocation35_spill] sm:$0xff] }
 0x21a   :  { %v936_v24 = vmul.f32 %v7438_v9, %v7881_v11  ;;  %v937_v40 = vmul.f32 %v7881_v11, %v7447_v15  ;;  %v938_v38 = vmul.f32 %v7881_v11, %v7453_v19  ;;  %v939_v43 = vmul.f32 %v7444_v13, %v7881_v11 }
 0x21b   :  { %v7891_v41 = vrot.slane %v912_v42, %v7874_v57  ;;  %v940_v53 = vmul.f32 %v7450_v17, %v7881_v11  ;;  %v941_v49 = vmul.f32 %v7881_v11, %v7459_v23  ;;  %v942_v5 = vmul.f32 %v7881_v11, %v7465_v27 }
 0x21c   :  { %v943_v9 = vmul.f32 %v7456_v21, %v7881_v11  ;;  %v944_v15 = vmul.f32 %v7462_v25, %v7881_v11  ;;  %v945_v19 = vmul.f32 %v7881_v11, %v7471_v31  ;;  %v946_v13 = vmul.f32 %v7881_v11, %v7477_v35 }
 0x21d   :  { %v1045_v22 = vadd.f32 %v7891_v41, %v977_v52  ;;  %v1046_v61 = vadd.f32 %v7891_v41, %v978_v51  ;;  %v947_v17 = vmul.f32 %v7468_v29, %v7881_v11  ;;  %v948_v23 = vmul.f32 %v7474_v33, %v7881_v11 }
 0x21e   :  { %v949_v27 = vmul.f32 %v7881_v11, %v7483_v39  ;;  %v950_v21 = vmul.f32 %v7881_v11, %v7489_v50  ;;  %v951_v25 = vmul.f32 %v7480_v37, %v7881_v11  ;;  %v952_v31 = vmul.f32 %v7486_v46, %v7881_v11 }
 0x21f   :  { %v1109_v47 = vmax.f32 %v1045_v22, 0.0  ;;  %v1110_v45 = vmax.f32 %v1046_v61, 0.0  ;;  %v953_v35 = vmul.f32 %v7881_v11, %v7495_v58  ;;  %v954_v29 = vmul.f32 %v7881_v11, %v7501_v2  ;;  %v7108_v58 = vld [vmem:[%s12512_s2 + $0x118] sm:$0xff]  }
 0x220   :  { %v955_v33 = vmul.f32 %v7492_v54, %v7881_v11  ;;  %v956_v39 = vmul.f32 %v7498_v62, %v7881_v11  ;;  %v957_v50 = vmul.f32 %v7881_v11, %v7507_v10  ;;  %v958_v37 = vmul.f32 %v7881_v11, %v7513_v18  ;;  %3303 = vmatpush1.bf16.msra.mxu1 %v7108_v58 }
 0x221   :  { %v7896_v60 = vpack.c.bf16 %v1110_v45, %v1109_v47  ;;  %v959_v46 = vmul.f32 %v7504_v6, %v7881_v11  ;;  %v960_v2 = vmul.f32 %v7510_v14, %v7881_v11  ;;  %v961_v54 = vmul.f32 %v7881_v11, %v7519_v26  ;;  %3304 = vmatprep.subr.bf16.mxu1 %v12935_v44 }
 0x222   :  { %v962_v62 = vmul.f32 %v7881_v11, %v7525_v34  ;;  %v963_v10 = vmul.f32 %v12936_v56, %v7881_v11  ;;  %v964_v18 = vmul.f32 %v12937_v12, %v7881_v11  ;;  %v965_v6 = vmul.f32 %v7881_v11, %v12938_v20 }
 0x223   :  { %v966_v30 = vmul.f32 %v7881_v11, %v12939_v48  ;;  %v967_v14 = vmul.f32 %v12940_v4, %v7881_v11  ;;  %v968_v26 = vmul.f32 %v12941_v16, %v7881_v11  ;;  %v969_v34 = vmul.f32 %v7881_v11, %v12942_v1  ;;  %v12957_v4 = vld [vmem:[#allocation36_spill] sm:$0xff] }
 0x224   :  { %v970_v56 = vmul.f32 %v7881_v11, %v12947_v36  ;;  %v971_v12 = vmul.f32 %v12948_v63, %v7881_v11  ;;  %v972_v20 = vmul.f32 %v12950_v28, %v7881_v11  ;;  %v973_v48 = vmul.f32 %v7881_v11, %v12951_v3 }
 0x225   :  { %v974_v16 = vmul.f32 %v7881_v11, %v12957_v4  ;;  %v975_v1 = vmul.f32 %v12958_v7, %v7881_v11  ;;  %v976_v36 = vmul.f32 %v12959_v0, %v7881_v11  ;;  %v979_v63 = vmul.f32 %v12955_v55, %v7881_v11 }
 0x226   :  { %v980_v42 = vmul.f32 %v7570_v8, %v7881_v11  ;;  %v7991_v28 = vadd.f32 %v7891_v41, %v935_v32  ;;  %v7994_v3 = vadd.f32 %v7891_v41, %v936_v24  ;;  %v7997_v59 = vadd.f32 %v7891_v41, %v937_v40 }
 0x227   :  { %v8000_v52 = vadd.f32 %v7891_v41, %v938_v38  ;;  %v8003_v51 = vadd.f32 %v7891_v41, %v939_v43  ;;  %v8006_v55 = vadd.f32 %v7891_v41, %v940_v53  ;;  %v8009_v8 = vadd.f32 %v7891_v41, %v941_v49 }
 0x228   :  { %v8012_v22 = vadd.f32 %v7891_v41, %v942_v5  ;;  %v8015_v61 = vadd.f32 %v7891_v41, %v943_v9  ;;  %v8018_v47 = vadd.f32 %v7891_v41, %v944_v15  ;;  %v8021_v45 = vadd.f32 %v7891_v41, %v945_v19 }
 0x229   :  { %v8024_v32 = vadd.f32 %v7891_v41, %v946_v13  ;;  %v8027_v24 = vadd.f32 %v7891_v41, %v947_v17  ;;  %v8030_v40 = vadd.f32 %v7891_v41, %v948_v23  ;;  %v8033_v38 = vadd.f32 %v7891_v41, %v949_v27 }
 0x22a   :  { %v8036_v43 = vadd.f32 %v7891_v41, %v950_v21  ;;  %v8039_v53 = vadd.f32 %v7891_v41, %v951_v25  ;;  %v8042_v49 = vadd.f32 %v7891_v41, %v952_v31  ;;  %v8045_v5 = vadd.f32 %v7891_v41, %v953_v35 }
 0x22b   :  { %v8048_v9 = vadd.f32 %v7891_v41, %v954_v29  ;;  %v8051_v15 = vadd.f32 %v7891_v41, %v955_v33  ;;  %v8054_v19 = vadd.f32 %v7891_v41, %v956_v39  ;;  %v8057_v13 = vadd.f32 %v7891_v41, %v957_v50 }
 0x22c   :  { %v8060_v17 = vadd.f32 %v7891_v41, %v958_v37  ;;  %v8063_v23 = vadd.f32 %v7891_v41, %v959_v46  ;;  %v8066_v27 = vadd.f32 %v7891_v41, %v960_v2  ;;  %v8069_v21 = vadd.f32 %v7891_v41, %v961_v54 }
 0x22d   :  { %v8072_v25 = vadd.f32 %v7891_v41, %v962_v62  ;;  %v8075_v31 = vadd.f32 %v7891_v41, %v963_v10  ;;  %v8078_v35 = vadd.f32 %v7891_v41, %v964_v18  ;;  %v8081_v29 = vadd.f32 %v7891_v41, %v965_v6 }
 0x22e   :  { %v8084_v33 = vadd.f32 %v7891_v41, %v966_v30  ;;  %v8087_v39 = vadd.f32 %v7891_v41, %v967_v14  ;;  %v8090_v50 = vadd.f32 %v7891_v41, %v968_v26  ;;  %v8093_v37 = vadd.f32 %v7891_v41, %v969_v34  ;;  %v7109_v14 = vld [vmem:[%s12512_s2 + $0x110] sm:$0xff]   ;;  %v12960_v26 = vld [vmem:[#allocation5_spill] sm:$0xff] }
 0x22f   :  { %v8096_v46 = vadd.f32 %v7891_v41, %v970_v56  ;;  %v8099_v58 = vadd.f32 %v7891_v41, %v971_v12  ;;  %v8102_v2 = vadd.f32 %v7891_v41, %v972_v20  ;;  %v8105_v54 = vadd.f32 %v7891_v41, %v973_v48  ;;  %3305 = vmatpush1.bf16.msra.mxu1 %v7109_v14  ;;  %v12961_v56 = vld [vmem:[#allocation7_spill] sm:$0xff] }
 0x230   :  { %v8108_v62 = vadd.f32 %v7891_v41, %v974_v16  ;;  %v8111_v10 = vadd.f32 %v7891_v41, %v975_v1  ;;  %v8114_v18 = vadd.f32 %v7891_v41, %v976_v36  ;;  %v8117_v6 = vadd.f32 %v7891_v41, %v979_v63  ;;  %3306 = vmatprep.subr.bf16.mxu1 %v12935_v44 }
 0x231   :  { %v8120_v30 = vadd.f32 %v7891_v41, %v980_v42  ;;  %v919_v34 = vmul.f32 %v12960_v26, %v7881_v11  ;;  %v920_v12 = vmul.f32 %v12961_v56, %v7881_v11  ;;  %v1067_v4 = vmax.f32 %v7991_v28, 0.0 }
 0x232   :  { %v1068_v16 = vmax.f32 %v7994_v3, 0.0  ;;  %v1069_v7 = vmax.f32 %v7997_v59, 0.0  ;;  %v1070_v1 = vmax.f32 %v8000_v52, 0.0  ;;  %v1071_v0 = vmax.f32 %v8003_v51, 0.0 }
 0x233   :  { %v8131_v20 = vadd.f32 %v7891_v41, %v919_v34  ;;  %v8134_v48 = vadd.f32 %v7891_v41, %v920_v12  ;;  %v1072_v36 = vmax.f32 %v8006_v55, 0.0  ;;  %v1073_v63 = vmax.f32 %v8009_v8, 0.0 }
 0x234   :  { %v1074_v42 = vmax.f32 %v8012_v22, 0.0  ;;  %v1075_v14 = vmax.f32 %v8015_v61, 0.0  ;;  %v1076_v26 = vmax.f32 %v8018_v47, 0.0  ;;  %v1077_v28 = vmax.f32 %v8021_v45, 0.0 }
 0x235   :  { %v1078_v3 = vmax.f32 %v8024_v32, 0.0  ;;  %v1079_v59 = vmax.f32 %v8027_v24, 0.0  ;;  %v1080_v52 = vmax.f32 %v8030_v40, 0.0  ;;  %v1081_v51 = vmax.f32 %v8033_v38, 0.0 }
 0x236   :  { %v1082_v55 = vmax.f32 %v8036_v43, 0.0  ;;  %v1083_v8 = vmax.f32 %v8039_v53, 0.0  ;;  %v1084_v22 = vmax.f32 %v8042_v49, 0.0  ;;  %v1085_v61 = vmax.f32 %v8045_v5, 0.0 }
 0x237   :  { %v1086_v47 = vmax.f32 %v8048_v9, 0.0  ;;  %v1087_v45 = vmax.f32 %v8051_v15, 0.0  ;;  %v1088_v32 = vmax.f32 %v8054_v19, 0.0  ;;  %v1089_v24 = vmax.f32 %v8057_v13, 0.0 }
 0x238   :  { %v1090_v40 = vmax.f32 %v8060_v17, 0.0  ;;  %v1091_v38 = vmax.f32 %v8063_v23, 0.0  ;;  %v1092_v43 = vmax.f32 %v8066_v27, 0.0  ;;  %v1093_v53 = vmax.f32 %v8069_v21, 0.0 }
 0x239   :  { %v1094_v49 = vmax.f32 %v8072_v25, 0.0  ;;  %v1095_v5 = vmax.f32 %v8075_v31, 0.0  ;;  %v1096_v9 = vmax.f32 %v8078_v35, 0.0  ;;  %v1097_v15 = vmax.f32 %v8081_v29, 0.0  ;;  %v7110_v31 = vld [vmem:[%s12512_s2 + $0x108] sm:$0xff]  }
 0x23a   :  { %v1098_v19 = vmax.f32 %v8084_v33, 0.0  ;;  %v1099_v13 = vmax.f32 %v8087_v39, 0.0  ;;  %v1100_v17 = vmax.f32 %v8090_v50, 0.0  ;;  %v1101_v23 = vmax.f32 %v8093_v37, 0.0  ;;  %3307 = vmatpush1.bf16.msra.mxu1 %v7110_v31 }
 0x23b   :  { %v1102_v27 = vmax.f32 %v8096_v46, 0.0  ;;  %v1103_v21 = vmax.f32 %v8099_v58, 0.0  ;;  %v1104_v25 = vmax.f32 %v8102_v2, 0.0  ;;  %v1105_v35 = vmax.f32 %v8105_v54, 0.0  ;;  %3308 = vmatprep.subr.bf16.mxu1 %v12935_v44 }
 0x23c   :  { %v1106_v29 = vmax.f32 %v8108_v62, 0.0  ;;  %v1107_v33 = vmax.f32 %v8111_v10, 0.0  ;;  %v1108_v39 = vmax.f32 %v8114_v18, 0.0  ;;  %v1111_v50 = vmax.f32 %v8117_v6, 0.0 }
 0x23d   :  { %v1112_v37 = vmax.f32 %v8120_v30, 0.0  ;;  %v8183_v46 = vpack.c.bf16 %v1068_v16, %v1067_v4  ;;  %v8185_v58 = vpack.c.bf16 %v1070_v1, %v1069_v7  ;;  %v8187_v2 = vpack.c.bf16 %v1072_v36, %v1071_v0 }
 0x23e   :  { %v8189_v34 = vpack.c.bf16 %v1074_v42, %v1073_v63  ;;  %v8191_v54 = vpack.c.bf16 %v1076_v26, %v1075_v14  ;;  %v8193_v62 = vpack.c.bf16 %v1078_v3, %v1077_v28  ;;  %v8196_v10 = vpack.c.bf16 %v1080_v52, %v1079_v59  ;;  %v12962_v28 = vld [vmem:[#allocation10_spill] sm:$0xff]  ;;  %v12963_v59 = vld [vmem:[#allocation12_spill] sm:$0xff] }
 0x23f   :  { %v8198_v18 = vpack.c.bf16 %v1082_v55, %v1081_v51  ;;  %v8200_v6 = vpack.c.bf16 %v1084_v22, %v1083_v8  ;;  %v8202_v30 = vpack.c.bf16 %v1086_v47, %v1085_v61  ;;  %v8204_v56 = vpack.c.bf16 %v1088_v32, %v1087_v45  ;;  %v12964_v61 = vld [vmem:[#allocation6_spill] sm:$0xff]  ;;  %v12965_v45 = vld [vmem:[#allocation8_spill] sm:$0xff] }
 0x240   :  { %v8206_v12 = vpack.c.bf16 %v1090_v40, %v1089_v24  ;;  %v8208_v4 = vpack.c.bf16 %v1092_v43, %v1091_v38  ;;  %v8210_v16 = vpack.c.bf16 %v1094_v49, %v1093_v53  ;;  %v8212_v7 = vpack.c.bf16 %v1096_v9, %v1095_v5  ;;  %v12966_v43 = vld [vmem:[#allocation9_spill] sm:$0xff]  ;;  %v12967_v49 = vld [vmem:[#allocation11_spill] sm:$0xff] }
 0x241   :  { %v8214_v1 = vpack.c.bf16 %v1098_v19, %v1097_v15  ;;  %v8216_v0 = vpack.c.bf16 %v1100_v17, %v1099_v13  ;;  %v8218_v36 = vpack.c.bf16 %v1102_v27, %v1101_v23  ;;  %v8220_v63 = vpack.c.bf16 %v1104_v25, %v1103_v21  ;;  %v7111_v15 = vld [vmem:[%s12512_s2 + $0x100] sm:$0xff]  }
 0x242   :  { %v8222_v42 = vpack.c.bf16 %v1106_v29, %v1105_v35  ;;  %v8224_v14 = vpack.c.bf16 %v1108_v39, %v1107_v33  ;;  %v8226_v26 = vpack.c.bf16 %v1112_v37, %v1111_v50  ;;  %v921_v3 = vmul.f32 %v7881_v11, %v12962_v28  ;;  %3309 = vmatpush1.bf16.msra.mxu1 %v7111_v15  ;;  %v12968_v29 = vld [vmem:[#allocation14_spill] sm:$0xff]  ;;  %v12969_v50 = vld [vmem:[#allocation16_spill] sm:$0xff] }
 0x243   :  { %v922_v52 = vmul.f32 %v7881_v11, %v12963_v59  ;;  %v1051_v51 = vmax.f32 %v8131_v20, 0.0  ;;  %v1052_v55 = vmax.f32 %v8134_v48, 0.0  ;;  %v917_v47 = vmul.f32 %v7881_v11, %v12964_v61  ;;  %3310 = vmatprep.subr.bf16.mxu1 %v12935_v44 }
 0x244   :  { %v989_v8 = vadd.f32 %v7891_v41, %v921_v3  ;;  %v918_v32 = vmul.f32 %v7881_v11, %v12965_v45  ;;  %v923_v20 = vmul.f32 %v12966_v43, %v7881_v11  ;;  %v924_v5 = vmul.f32 %v12967_v49, %v7881_v11 }
 0x245   :  { %v990_v22 = vadd.f32 %v7891_v41, %v922_v52  ;;  %v985_v24 = vadd.f32 %v7891_v41, %v917_v47  ;;  %v1114_v38 = vpack.c.bf16 %v1052_v55, %v1051_v51  ;;  %v925_v33 = vmul.f32 %v7881_v11, %v12968_v29  ;;  %v12971_v47 = vld [vmem:[#allocation26_spill] sm:$0xff] }
 0x246   :  { %v986_v40 = vadd.f32 %v7891_v41, %v918_v32  ;;  %v1053_v53 = vmax.f32 %v989_v8, 0.0  ;;  %v991_v9 = vadd.f32 %v7891_v41, %v923_v20  ;;  %v992_v19 = vadd.f32 %v7891_v41, %v924_v5 }
 0x247   :  { %v1054_v48 = vmax.f32 %v990_v22, 0.0  ;;  %v1049_v13 = vmax.f32 %v985_v24, 0.0  ;;  %v1160_v23 = vshrl.u32 %v1114_v38, 16  ;;  %v926_v37 = vmul.f32 %v7881_v11, %v12969_v50  ;;  %v12970_v22 = vld [vmem:[#allocation24_spill] sm:$0xff] }
 0x248   :  { %v1050_v17 = vmax.f32 %v986_v40, 0.0  ;;  %v1055_v21 = vmax.f32 %v991_v9, 0.0  ;;  %v1056_v25 = vmax.f32 %v992_v19, 0.0  ;;  %v1163_v28 = vshll.u32 %v1114_v38, 16  ;;  %v7112_v50 = vld [vmem:[%s12512_s2 + $0x178] sm:$0xff]  }
 0x249   :  { %v1115_v27 = vpack.c.bf16 %v1054_v48, %v1053_v53  ;;  %v1162_v35 = vrot.slane %v1160_v23, 7  ;;  %v993_v3 = vadd.f32 %v7891_v41, %v925_v33  ;;  %v994_v59 = vadd.f32 %v7891_v41, %v926_v37  ;;  %v12975_v23 = vld [vmem:[#allocation15_spill] sm:$0xff]  ;;  %3311 = vmatpush2.bf16.msra.mxu1 %v7112_v50 }
 0x24a   :  { %v1113_v31 = vpack.c.bf16 %v1050_v17, %v1049_v13  ;;  %v1116_v52 = vpack.c.bf16 %v1056_v25, %v1055_v21  ;;  %v1978_v61 = vrot.slane %v12970_v22, 1  ;;  %v1979_v45 = vrot.slane %v12971_v47, 1  ;;  %v12974_v13 = vld [vmem:[#allocation13_spill] sm:$0xff]  ;;  %3312 = vmatprep.subr.bf16.mxu1 %v12935_v44 }
 0x24b   :  { %v1167_v39 = vshrl.u32 %v1115_v27, 16  ;;  %v1165_v55 = vor.u32 %v1163_v28, %v1162_v35  ;;  %v1170_v8 = vshll.u32 %v1115_v27, 16  ;;  %v1057_v38 = vmax.f32 %v993_v3, 0.0 }
 0x24c   :  { %v1153_v51 = vshrl.u32 %v1113_v31, 16  ;;  %v1156_v40 = vshll.u32 %v1113_v31, 16  ;;  %v1058_v49 = vmax.f32 %v994_v59, 0.0  ;;  %v1174_v5 = vshrl.u32 %v1116_v52, 16 }
 0x24d   :  { %v1169_v32 = vrot.slane %v1167_v39, 7  ;;  %v8262_v20 = vsel %vm7796_vm2, 0, %v1165_v55  ;;  %v8268_v19 = vsel %vm1977_vm4, %v1978_v61, %v1979_v45  ;;  %v927_v17 = vmul.f32 %v12974_v13, %v7881_v11  ;;  %v7113_v61 = vld [vmem:[%s12512_s2 + $0x1b8] sm:$0xff]   ;;  %v12976_v13 = vld [vmem:[#allocation18_spill] sm:$0xff] }
 0x24e   :  { %v1155_v24 = vrot.slane %v1153_v51, 7  ;;  %v1539_v53 = vshll.u32 %v8262_v20, 16  ;;  %12973 = vst [vmem:[#allocation27_spill] sm:$0xff] %v8268_v19  ;;  %v928_v27 = vmul.f32 %v12975_v23, %v7881_v11  ;;  %v8278_v25 = vsel %vm7796_vm2, %v1162_v35, 0 }
 0x24f   :  { %v1172_v48 = vor.u32 %v1170_v8, %v1169_v32  ;;  %v995_v37 = vadd.f32 %v7891_v41, %v927_v17  ;;  %v1117_v3 = vpack.c.bf16 %v1058_v49, %v1057_v38  ;;  %v1176_v59 = vrot.slane %v1174_v5, 7 }
 0x250   :  { %v1158_v9 = vor.u32 %v1156_v40, %v1155_v24  ;;  %v1479_v15 = vsel %vm7796_vm2, %v1155_v24, 0  ;;  %v1541_v33 = vrot.slane %v1539_v53, 1  ;;  %v996_v28 = vadd.f32 %v7891_v41, %v928_v27 }
 0x251   :  { %v1532_v29 = vshll.u32 %v1479_v15, 16  ;;  %v8282_v39 = vsel %vm7796_vm2, 0, %v1172_v48  ;;  %v1537_v55 = vshrl.u32 %v8262_v20, 16  ;;  %v1544_v8 = vshll.u32 %v8278_v25, 16 }
 0x252   :  { %v1446_v21 = vsel %vm7796_vm2, 0, %v1158_v9  ;;  %v1177_v47 = vshll.u32 %v1116_v52, 16  ;;  %v1551_v45 = vshll.u32 %v8282_v39, 16  ;;  %v1059_v48 = vmax.f32 %v995_v37, 0.0 }
 0x253   :  { %3037 = vmatprep.mubr.bf16.mxu0 %v1446_v21  ;;  %v1527_v31 = vshll.u32 %v1446_v21, 16  ;;  %v1525_v35 = vshrl.u32 %v1446_v21, 16  ;;  %v1534_v40 = vrot.slane %v1532_v29, 1  ;;  %v1542_v38 = vor.u32 %v1541_v33, %v1537_v55 }
 0x254   :  { %3038 = vmatmul.mubr.bf16.vlgmr.msra.gmra.mxu0 %v8268_v19  ;;  %v1981_v53 = vrot.slane %v1446_v21, 1  ;;  %v1060_v49 = vmax.f32 %v996_v28, 0.0  ;;  %v1181_v5 = vshrl.u32 %v1117_v3, 16  ;;  %v1179_v9 = vor.u32 %v1177_v47, %v1176_v59 }
 0x255   :  { %3045 = vmatprep.mubr.bf16.mxu0 %v8262_v20  ;;  %v1529_v51 = vrot.slane %v1527_v31, 1  ;;  %3584 = vmatpush1.bf16.msra.mxu0 %v7113_v61  ;;  %v929_v17 = vmul.f32 %v7881_v11, %v12976_v13  ;;  %v1546_v23 = vrot.slane %v1544_v8, 1  ;;  %v1982_v27 = vrot.slane %v1479_v15, 1  ;;  %v12977_v31 = vld [vmem:[#allocation20_spill] sm:$0xff] }
 0x256   :  { %3585 = vmatprep.subr.bf16.mxu0 %v12935_v44  ;;  %v930_v29 = vmul.f32 %v7881_v11, %v12977_v31  ;;  %v8309_v33 = vsel %vm7796_vm2, %v1169_v32, 0  ;;  %v8323_v32 = vsel %vm7796_vm2, 0, %v1179_v9  ;;  %v1183_v55 = vrot.slane %v1181_v5, 7 }
 0x257   :  { %v1530_v24 = vor.u32 %v1529_v51, %v1525_v35  ;;  %v997_v50 = vadd.f32 %v7891_v41, %v929_v17  ;;  %v8313_v37 = vsel %vm1511_vm3, %v1542_v38, %v1546_v23  ;;  %v8316_v28 = vsel %vm1977_vm4, %v1981_v53, %v1982_v27  ;;  %v12979_v17 = vld [vmem:[#allocation19_spill] sm:$0xff] }
 0x258   :  { %v1553_v35 = vrot.slane %v1551_v45, 1  ;;  %v998_v15 = vadd.f32 %v7891_v41, %v930_v29  ;;  %v1118_v51 = vpack.c.bf16 %v1060_v49, %v1059_v48  ;;  %v1556_v8 = vshll.u32 %v8309_v33, 16  ;;  %v12978_v49 = vld [vmem:[#allocation17_spill] sm:$0xff] }
 0x259   :  { %v8302_v52 = vsel %vm1511_vm3, %v1530_v24, %v1534_v40  ;;  %v1184_v61 = vshll.u32 %v1117_v3, 16  ;;  %v1984_v45 = vrot.slane %v8262_v20, 1  ;;  %v1563_v24 = vshll.u32 %v8323_v32, 16 }
 0x25a   :  { %2756 = vmatprep.mubr.bf16.mxu1 %v8302_v52  ;;  %v1061_v40 = vmax.f32 %v997_v50, 0.0  ;;  %v1062_v38 = vmax.f32 %v998_v15, 0.0  ;;  %v1188_v53 = vshrl.u32 %v1118_v51, 16  ;;  %v931_v9 = vmul.f32 %v12978_v49, %v7881_v11 }
 0x25b   :  { %2757 = vmatmul.mubr.bf16.gmra.mxu1 %v1446_v21  ;;  %v1549_v21 = vshrl.u32 %v8282_v39, 16  ;;  %v1186_v48 = vor.u32 %v1184_v61, %v1183_v55  ;;  %v1558_v5 = vrot.slane %v1556_v8, 1  ;;  %v1985_v13 = vrot.slane %v8278_v25, 1  ;;  %v7114_v25 = vld [vmem:[%s12512_s2 + $0x170] sm:$0xff]  }
 0x25c   :  { %2764 = vmatprep.mubr.bf16.mxu1 %v8313_v37  ;;  %3046 = vmatmul.mubr.bf16.gmra.mxu0 %v8316_v28  ;;  %v932_v23 = vmul.f32 %v12979_v17, %v7881_v11  ;;  %v8337_v3 = vsel %vm7796_vm2, %v1176_v59, 0  ;;  %v999_v27 = vadd.f32 %v7891_v41, %v931_v9  ;;  %v1565_v50 = vrot.slane %v1563_v24, 1 }
 0x25d   :  { %3053 = vmatprep.mubr.bf16.mxu0 %v8282_v39  ;;  %v1554_v47 = vor.u32 %v1553_v35, %v1549_v21  ;;  %v8345_v29 = vsel %vm1977_vm4, %v1984_v45, %v1985_v13  ;;  %v1119_v15 = vpack.c.bf16 %v1062_v38, %v1061_v40  ;;  %v1190_v59 = vrot.slane %v1188_v53, 7  ;;  %3313 = vmatpush2.bf16.msra.mxu1 %v7114_v25 }
 0x25e   :  { %v1000_v35 = vadd.f32 %v7891_v41, %v932_v23  ;;  %v8355_v21 = vsel %vm7796_vm2, 0, %v1186_v48  ;;  %v1561_v8 = vshrl.u32 %v8323_v32, 16  ;;  %v1568_v61 = vshll.u32 %v8337_v3, 16  ;;  %3314 = vmatprep.subr.bf16.mxu1 %v12935_v44  ;;  %v12981_v23 = vld [vmem:[#allocation22_spill] sm:$0xff] }
 0x25f   :  { %v8342_v31 = vsel %vm1511_vm3, %v1554_v47, %v1558_v5  ;;  %v7115_v47 = vld [vmem:[%s12512_s2 + $0x1b0] sm:$0xff]   ;;  %v1191_v45 = vshll.u32 %v1118_v51, 16  ;;  %v1987_v40 = vrot.slane %v8282_v39, 1  ;;  %v1575_v38 = vshll.u32 %v8355_v21, 16  ;;  %v12980_v5 = vld [vmem:[#allocation21_spill] sm:$0xff] }
 0x260   :  { %v1566_v24 = vor.u32 %v1565_v50, %v1561_v8  ;;  %3586 = vmatpush1.bf16.msra.mxu0 %v7115_v47  ;;  %v1063_v53 = vmax.f32 %v999_v27, 0.0  ;;  %v1064_v48 = vmax.f32 %v1000_v35, 0.0  ;;  %v1195_v49 = vshrl.u32 %v1119_v15, 16 }
 0x261   :  { %v1193_v9 = vor.u32 %v1191_v45, %v1190_v59  ;;  %3587 = vmatprep.subr.bf16.mxu0 %v12935_v44  ;;  %v933_v13 = vmul.f32 %v7881_v11, %v12980_v5  ;;  %v1570_v17 = vrot.slane %v1568_v61, 1  ;;  %v1988_v51 = vrot.slane %v8309_v33, 1 }
 0x262   :  { %v934_v50 = vmul.f32 %v7881_v11, %v12981_v23  ;;  %v1483_v25 = vsel %vm7796_vm2, %v1183_v55, 0  ;;  %v1577_v47 = vrot.slane %v1575_v38, 1  ;;  %v1120_v33 = vpack.c.bf16 %v1064_v48, %v1063_v53 }
 0x263   :  { %2765 = vmatmul.mubr.bf16.gmra.mxu1 %v8262_v20  ;;  %v1001_v8 = vadd.f32 %v7891_v41, %v933_v13  ;;  %v8377_v27 = vsel %vm1511_vm3, %v1566_v24, %v1570_v17  ;;  %v8380_v35 = vsel %vm1977_vm4, %v1987_v40, %v1988_v51  ;;  %v8387_v11 = vsel %vm7796_vm2, 0, %v1193_v9 }
 0x264   :  { %2772 = vmatprep.mubr.bf16.mxu1 %v8342_v31  ;;  %3054 = vmatmul.mubr.bf16.gmra.mxu0 %v8345_v29  ;;  %v1002_v61 = vadd.f32 %v7891_v41, %v934_v50  ;;  %12982 = vst [vmem:[#allocation30_spill] sm:$0xff] %v8387_v11  ;;  %v1197_v55 = vrot.slane %v1195_v49, 7  ;;  %v1573_v45 = vshrl.u32 %v8355_v21, 16  ;;  %v1580_v24 = vshll.u32 %v1483_v25, 16 }
 0x265   :  { %3061 = vmatprep.mubr.bf16.mxu0 %v8323_v32  ;;  %v1198_v40 = vshll.u32 %v1119_v15, 16  ;;  %v1990_v38 = vrot.slane %v8323_v32, 1  ;;  %v1587_v41 = vshll.u32 %v8387_v11, 16  ;;  %v1065_v53 = vmax.f32 %v1001_v8, 0.0  ;;  %v7116_v8 = vld [vmem:[%s12512_s2 + $0x168] sm:$0xff]  }
 0x266   :  { %v1578_v5 = vor.u32 %v1577_v47, %v1573_v45  ;;  %v1066_v48 = vmax.f32 %v1002_v61, 0.0  ;;  %v1202_v13 = vshrl.u32 %v1120_v33, 16  ;;  %v1582_v51 = vrot.slane %v1580_v24, 1  ;;  %3315 = vmatpush2.bf16.msra.mxu1 %v7116_v8  ;;  %v7117_v24 = vld [vmem:[%s12512_s2 + $0x1a8] sm:$0xff]  }
 0x267   :  { %v1200_v17 = vor.u32 %v1198_v40, %v1197_v55  ;;  %v1991_v9 = vrot.slane %v8337_v3, 1  ;;  %v1484_v49 = vsel %vm7796_vm2, %v1190_v59, 0  ;;  %v1589_v50 = vrot.slane %v1587_v41, 1  ;;  %3316 = vmatprep.subr.bf16.mxu1 %v12935_v44  ;;  %3588 = vmatpush1.bf16.msra.mxu0 %v7117_v24 }
 0x268   :  { %v8398_v23 = vsel %vm1511_vm3, %v1578_v5, %v1582_v51  ;;  %v1121_v47 = vpack.c.bf16 %v1066_v48, %v1065_v53  ;;  %v1204_v61 = vrot.slane %v1202_v13, 7  ;;  %v1585_v59 = vshrl.u32 %v8387_v11, 16  ;;  %3589 = vmatprep.subr.bf16.mxu0 %v12935_v44 }
 0x269   :  { %v8401_v15 = vsel %vm1977_vm4, %v1990_v38, %v1991_v9  ;;  %v8410_v3 = vsel %vm7796_vm2, 0, %v1200_v17  ;;  %v1592_v45 = vshll.u32 %v1484_v49, 16  ;;  %v1205_v40 = vshll.u32 %v1120_v33, 16 }
 0x26a   :  { %12983 = vst [vmem:[#allocation32_spill] sm:$0xff] %v8410_v3  ;;  %v1590_v5 = vor.u32 %v1589_v50, %v1585_v59  ;;  %v1993_v38 = vrot.slane %v8355_v21, 1  ;;  %v1599_v41 = vshll.u32 %v8410_v3, 16  ;;  %v1209_v53 = vshrl.u32 %v1121_v47, 16 }
 0x26b   :  { %2773 = vmatmul.mubr.bf16.gmra.mxu1 %v8282_v39  ;;  %v1207_v48 = vor.u32 %v1205_v40, %v1204_v61  ;;  %v1594_v13 = vrot.slane %v1592_v45, 1  ;;  %v1994_v17 = vrot.slane %v1483_v25, 1  ;;  %v1485_v51 = vsel %vm7796_vm2, %v1197_v55, 0 }
 0x26c   :  { %2780 = vmatprep.mubr.bf16.mxu1 %v8377_v27  ;;  %3062 = vmatmul.mubr.bf16.gmra.mxu0 %v8380_v35  ;;  %v1601_v50 = vrot.slane %v1599_v41, 1  ;;  %v1211_v25 = vrot.slane %v1209_v53, 7  ;;  %v1597_v55 = vshrl.u32 %v8410_v3, 16  ;;  %v1604_v59 = vshll.u32 %v1485_v51, 16 }
 0x26d   :  { %3069 = vmatprep.mubr.bf16.mxu0 %v8355_v21  ;;  %v8425_v33 = vsel %vm1511_vm3, %v1590_v5, %v1594_v13  ;;  %v8428_v9 = vsel %vm1977_vm4, %v1993_v38, %v1994_v17  ;;  %v8434_v8 = vsel %vm7796_vm2, 0, %v1207_v48  ;;  %v1212_v45 = vshll.u32 %v1121_v47, 16 }
 0x26e   :  { %v1602_v24 = vor.u32 %v1601_v50, %v1597_v55  ;;  %v1996_v40 = vrot.slane %v8387_v11, 1  ;;  %v1611_v5 = vshll.u32 %v8434_v8, 16  ;;  %v1216_v38 = vshrl.u32 %v8183_v46, 16  ;;  %v7118_v55 = vld [vmem:[%s12512_s2 + $0x160] sm:$0xff]  }
 0x26f   :  { %v1214_v41 = vor.u32 %v1212_v45, %v1211_v25  ;;  %v1606_v13 = vrot.slane %v1604_v59, 1  ;;  %v1997_v17 = vrot.slane %v1484_v49, 1  ;;  %v1486_v48 = vsel %vm7796_vm2, %v1204_v61, 0  ;;  %3317 = vmatpush2.bf16.msra.mxu1 %v7118_v55  ;;  %v7119_v45 = vld [vmem:[%s12512_s2 + $0x1a0] sm:$0xff]  }
 0x270   :  { %v1613_v50 = vrot.slane %v1611_v5, 1  ;;  %v1218_v57 = vrot.slane %v1216_v38, 7  ;;  %v1609_v61 = vshrl.u32 %v8434_v8, 16  ;;  %v1616_v59 = vshll.u32 %v1486_v48, 16  ;;  %3318 = vmatprep.subr.bf16.mxu1 %v12935_v44  ;;  %3590 = vmatpush1.bf16.msra.mxu0 %v7119_v45 }
 0x271   :  { %v8445_v53 = vsel %vm1511_vm3, %v1602_v24, %v1606_v13  ;;  %v8448_v47 = vsel %vm1977_vm4, %v1996_v40, %v1997_v17  ;;  %v8457_v49 = vsel %vm7796_vm2, 0, %v1214_v41  ;;  %v1219_v24 = vshll.u32 %v8183_v46, 16  ;;  %3591 = vmatprep.subr.bf16.mxu0 %v12935_v44 }
 0x272   :  { %12984 = vst [vmem:[#allocation29_spill] sm:$0xff] %v8445_v53  ;;  %12985 = vst [vmem:[#allocation31_spill] sm:$0xff] %v8457_v49  ;;  %v1614_v40 = vor.u32 %v1613_v50, %v1609_v61  ;;  %v1999_v5 = vrot.slane %v8410_v3, 1  ;;  %v1623_v38 = vshll.u32 %v8457_v49, 16  ;;  %v1223_v41 = vshrl.u32 %v8185_v58, 16 }
 0x273   :  { %2781 = vmatmul.mubr.bf16.gmra.mxu1 %v8323_v32  ;;  %v1221_v13 = vor.u32 %v1219_v24, %v1218_v57  ;;  %v1618_v17 = vrot.slane %v1616_v59, 1  ;;  %v2000_v55 = vrot.slane %v1485_v51, 1 }
 0x274   :  { %2788 = vmatprep.mubr.bf16.mxu1 %v8398_v23  ;;  %3070 = vmatmul.mubr.bf16.gmra.mxu0 %v8401_v15  ;;  %v1625_v61 = vrot.slane %v1623_v38, 1  ;;  %v1225_v51 = vrot.slane %v1223_v41, 7 }
 0x275   :  { %3077 = vmatprep.mubr.bf16.mxu0 %v8387_v11  ;;  %v8474_v46 = vsel %vm1511_vm3, %v1614_v40, %v1618_v17  ;;  %v8477_v50 = vsel %vm1977_vm4, %v1999_v5, %v2000_v55  ;;  %v8483_v59 = vsel %vm7796_vm2, 0, %v1221_v13  ;;  %v1226_v40 = vshll.u32 %v8185_v58, 16 }
 0x276   :  { %12986 = vst [vmem:[#allocation34_spill] sm:$0xff] %v8474_v46  ;;  %12987 = vst [vmem:[#allocation37_spill] sm:$0xff] %v8477_v50  ;;  %v2002_v17 = vrot.slane %v8434_v8, 1  ;;  %v1635_v55 = vshll.u32 %v8483_v59, 16 }
 0x277   :  { %v1228_v13 = vor.u32 %v1226_v40, %v1225_v51  ;;  %v7120_v40 = vld [vmem:[%s12512_s2 + $0x158] sm:$0xff]  }
 0x278   :  { %3319 = vmatpush2.bf16.msra.mxu1 %v7120_v40 }
 0x279   :  { %3320 = vmatprep.subr.bf16.mxu1 %v12935_v44 }
 0x27b   :  { %2789 = vmatmul.mubr.bf16.gmra.mxu1 %v8355_v21 }
 0x27c   :  { %2796 = vmatprep.mubr.bf16.mxu1 %v8425_v33  ;;  %3078 = vmatmul.mubr.bf16.gmra.mxu0 %v8428_v9 }
 0x27d   :  { %3085 = vmatprep.mubr.bf16.mxu0 %v8410_v3 }
 0x283   :  { %2797 = vmatmul.mubr.bf16.gmra.mxu1 %v8387_v11 }
 0x284   :  { %2804 = vmatprep.mubr.bf16.mxu1 %v8445_v53  ;;  %3086 = vmatmul.mubr.bf16.gmra.mxu0 %v8448_v47  ;;  %v1487_v53 = vsel %vm7796_vm2, %v1211_v25, 0  ;;  %v1621_v25 = vshrl.u32 %v8457_v49, 16 }
 0x285   :  { %3093 = vmatprep.mubr.bf16.mxu0 %v8434_v8  ;;  %v1628_v24 = vshll.u32 %v1487_v53, 16 }
 0x286   :  { %v1626_v38 = vor.u32 %v1625_v61, %v1621_v25  ;;  %v1637_v25 = vrot.slane %v1635_v55, 1  ;;  %v1237_v55 = vshrl.u32 %v8189_v34, 16 }
 0x287   :  { %v1630_v41 = vrot.slane %v1628_v24, 1 }
 0x289   :  { %v8499_v58 = vsel %vm1511_vm3, %v1626_v38, %v1630_v41  ;;  %v2005_v38 = vrot.slane %v8457_v49, 1 }
 0x28b   :  { %2805 = vmatmul.mubr.bf16.gmra.mxu1 %v8410_v3 }
 0x28c   :  { %2812 = vmatprep.mubr.bf16.mxu1 %v8474_v46  ;;  %3094 = vmatmul.mubr.bf16.gmra.mxu0 %v8477_v50  ;;  %v1230_v46 = vshrl.u32 %v8187_v2, 16  ;;  %v1488_v50 = vsel %vm7796_vm2, %v1218_v57, 0  ;;  %v8511_v57 = vsel %vm7796_vm2, 0, %v1228_v13 }
 0x28d   :  { %3101 = vmatprep.mubr.bf16.mxu0 %v8457_v49  ;;  %12990 = vst [vmem:[#allocation35_spill] sm:$0xff] %v8511_v57 }
 0x293   :  { %2813 = vmatmul.mubr.bf16.gmra.mxu1 %v8434_v8 }
 0x294   :  { %2820 = vmatprep.mubr.bf16.mxu1 %v8499_v58 }
 0x29b   :  { %2821 = vmatmul.mubr.bf16.gmra.mxu1 %v8457_v49  ;;  %v2009_v49 = vrot.slane %v1488_v50, 1 }
 0x2a1   :  { %v8485_v45 = vpop.f32.mrf.mxu1 }
 0x2a2   :  { %12988 = vst [vmem:[#allocation36_spill] sm:$0xff] %v8485_v45  ;;  %v2003_v45 = vrot.slane %v1486_v48, 1  ;;  %v1640_v48 = vshll.u32 %v1488_v50, 16 }
 0x2a3   :  { %v2752_v5 = vpop.f32.mrf.mxu1 }
 0x2a4   :  { %v8502_v61 = vsel %vm1977_vm4, %v2002_v17, %v2003_v45  ;;  %v1232_v5 = vrot.slane %v1230_v46, 7  ;;  %v1233_v45 = vshll.u32 %v8187_v2, 16  ;;  %v7121_v46 = vld [vmem:[%s12512_s2 + $0x198] sm:$0xff]   ;;  %v1647_v17 = vshll.u32 %v8511_v57, 16 }
 0x2a5   :  { %v8493_v3 = vpop.f32.mrf.mxu1  ;;  %3102 = vmatmul.mubr.bf16.gmra.mxu0 %v8502_v61  ;;  %v1642_v41 = vrot.slane %v1640_v48, 1  ;;  %v1489_v2 = vsel %vm7796_vm2, %v1225_v51, 0  ;;  %v1239_v48 = vrot.slane %v1237_v55, 7  ;;  %v1645_v51 = vshrl.u32 %v8511_v57, 16 }
 0x2a6   :  { %12989 = vst [vmem:[#allocation33_spill] sm:$0xff] %v8493_v3  ;;  %3109 = vmatprep.mubr.bf16.mxu0 %v8483_v59  ;;  %v1235_v13 = vor.u32 %v1233_v45, %v1232_v5  ;;  %3592 = vmatpush1.bf16.msra.mxu0 %v7121_v46  ;;  %v2006_v3 = vrot.slane %v1487_v53, 1  ;;  %v1652_v45 = vshll.u32 %v1489_v2, 16  ;;  %v1240_v46 = vshll.u32 %v8189_v34, 16 }
 0x2a7   :  { %v2755_v11 = vpop.f32.mrf.mxu1  ;;  %3593 = vmatprep.subr.bf16.mxu0 %v12935_v44  ;;  %v1490_v55 = vsel %vm7796_vm2, %v1232_v5, 0 }
 0x2a8   :  { %v1633_v11 = vshrl.u32 %v8483_v59, 16  ;;  %v8537_v53 = vsel %vm7796_vm2, 0, %v1235_v13 }
 0x2a9   :  { %12993 = vst [vmem:[#allocation10_spill] sm:$0xff] %v8537_v53  ;;  %v1657_v5 = vshrl.u32 %v8537_v53, 16 }
 0x2aa   :  { %v1638_v24 = vor.u32 %v1637_v25, %v1633_v11  ;;  %v8531_v25 = vsel %vm1977_vm4, %v2005_v38, %v2006_v3  ;;  %v1649_v11 = vrot.slane %v1647_v17, 1  ;;  %v2008_v3 = vrot.slane %v8483_v59, 1 }
 0x2ab   :  { %12992 = vst [vmem:[#allocation7_spill] sm:$0xff] %v8531_v25  ;;  %v1659_v38 = vshll.u32 %v8537_v53, 16  ;;  %v1244_v17 = vshrl.u32 %v8191_v54, 16 }
 0x2ac   :  { %v8528_v40 = vsel %vm1511_vm3, %v1638_v24, %v1642_v41  ;;  %v1650_v24 = vor.u32 %v1649_v11, %v1645_v51  ;;  %v1242_v41 = vor.u32 %v1240_v46, %v1239_v48  ;;  %v8552_v34 = vsel %vm1977_vm4, %v2008_v3, %v2009_v49  ;;  %v7122_v51 = vld [vmem:[%s12512_s2 + $0x150] sm:$0xff]  }
 0x2ad   :  { %12991 = vst [vmem:[#allocation5_spill] sm:$0xff] %v8528_v40  ;;  %2828 = vmatprep.mubr.bf16.mxu1 %v8528_v40  ;;  %3110 = vmatmul.mubr.bf16.gmra.mxu0 %v8531_v25  ;;  %v1654_v40 = vrot.slane %v1652_v45, 1  ;;  %v1661_v11 = vrot.slane %v1659_v38, 1  ;;  %v1246_v25 = vrot.slane %v1244_v17, 7  ;;  %v1664_v49 = vshll.u32 %v1490_v55, 16  ;;  %v7123_v3 = vld [vmem:[%s12512_s2 + $0x190] sm:$0xff]  }
 0x2ae   :  { %3117 = vmatprep.mubr.bf16.mxu0 %v8511_v57  ;;  %2829 = vmatmul.mubr.bf16.gmra.mxu1 %v8483_v59  ;;  %v8561_v50 = vsel %vm7796_vm2, 0, %v1242_v41  ;;  %v2011_v46 = vrot.slane %v8511_v57, 1  ;;  %v1251_v38 = vshrl.u32 %v8193_v62, 16 }
 0x2af   :  { %v8549_v13 = vsel %vm1511_vm3, %v1650_v24, %v1654_v40  ;;  %12995 = vst [vmem:[#allocation6_spill] sm:$0xff] %v8561_v50  ;;  %3321 = vmatpush2.bf16.msra.mxu1 %v7122_v51  ;;  %v1247_v40 = vshll.u32 %v8191_v54, 16  ;;  %v1662_v45 = vor.u32 %v1661_v11, %v1657_v5  ;;  %v1671_v24 = vshll.u32 %v8561_v50, 16  ;;  %3594 = vmatpush1.bf16.msra.mxu0 %v7123_v3 }
 0x2b0   :  { %12994 = vst [vmem:[#allocation12_spill] sm:$0xff] %v8549_v13  ;;  %2836 = vmatprep.mubr.bf16.mxu1 %v8549_v13  ;;  %3322 = vmatprep.subr.bf16.mxu1 %v12935_v44  ;;  %v1666_v41 = vrot.slane %v1664_v49, 1  ;;  %v2012_v13 = vrot.slane %v1489_v2, 1  ;;  %v1491_v54 = vsel %vm7796_vm2, %v1239_v48, 0  ;;  %v1253_v48 = vrot.slane %v1251_v38, 7 }
 0x2b1   :  { %v1249_v17 = vor.u32 %v1247_v40, %v1246_v25  ;;  %3595 = vmatprep.subr.bf16.mxu0 %v12935_v44  ;;  %v1673_v5 = vrot.slane %v1671_v24, 1  ;;  %v1669_v49 = vshrl.u32 %v8561_v50, 16  ;;  %v1676_v40 = vshll.u32 %v1491_v54, 16 }
 0x2b2   :  { %v8578_v11 = vsel %vm1511_vm3, %v1662_v45, %v1666_v41  ;;  %v8581_v51 = vsel %vm1977_vm4, %v2011_v46, %v2012_v13  ;;  %v7124_v13 = vld [vmem:[%s12512_s2 + $0x188] sm:$0xff]   ;;  %v1254_v45 = vshll.u32 %v8193_v62, 16  ;;  %v2014_v24 = vrot.slane %v8537_v53, 1 }
 0x2b3   :  { %12996 = vst [vmem:[#allocation8_spill] sm:$0xff] %v8578_v11  ;;  %v8587_v2 = vsel %vm7796_vm2, 0, %v1249_v17  ;;  %v1674_v46 = vor.u32 %v1673_v5, %v1669_v49  ;;  %3596 = vmatpush1.bf16.msra.mxu0 %v7124_v13  ;;  %v1678_v38 = vrot.slane %v1676_v40, 1  ;;  %v2015_v41 = vrot.slane %v1490_v55, 1  ;;  %v7126_v55 = vld [vmem:[%s12512_s2 + $0x148] sm:$0xff]  }
 0x2b4   :  { %v1683_v3 = vshll.u32 %v8587_v2, 16  ;;  %v1256_v17 = vor.u32 %v1254_v45, %v1253_v48  ;;  %3597 = vmatprep.subr.bf16.mxu0 %v12935_v44  ;;  %v1681_v40 = vshrl.u32 %v8587_v2, 16  ;;  %3323 = vmatpush2.bf16.msra.mxu1 %v7126_v55  ;;  %v7128_v55 = vld [vmem:[%s12512_s2 + $0x1f0] sm:$0xff]  }
 0x2b5   :  { %3118 = vmatmul.mubr.bf16.gmra.mxu0 %v8552_v34  ;;  %v8605_v62 = vsel %vm1511_vm3, %v1674_v46, %v1678_v38  ;;  %v8608_v5 = vsel %vm1977_vm4, %v2014_v24, %v2015_v41  ;;  %3324 = vmatprep.subr.bf16.mxu1 %v12935_v44  ;;  %v2017_v46 = vrot.slane %v8561_v50, 1  ;;  %v2018_v41 = vrot.slane %v1491_v54, 1 }
 0x2b6   :  { %3125 = vmatprep.mubr.bf16.mxu0 %v8537_v53  ;;  %2837 = vmatmul.mubr.bf16.gmra.mxu1 %v8511_v57  ;;  %v1492_v57 = vsel %vm7796_vm2, %v1246_v25, 0  ;;  %12997 = vst [vmem:[#allocation9_spill] sm:$0xff] %v8605_v62  ;;  %v1685_v49 = vrot.slane %v1683_v3, 1  ;;  %v8617_v25 = vsel %vm7796_vm2, 0, %v1256_v17  ;;  %v1258_v3 = vshrl.u32 %v8196_v10, 16 }
 0x2b7   :  { %2844 = vmatprep.mubr.bf16.mxu1 %v8578_v11  ;;  %v7125_v11 = vld [vmem:[%s12512_s2 + $0x180] sm:$0xff]   ;;  %12998 = vst [vmem:[#allocation11_spill] sm:$0xff] %v8617_v25  ;;  %v1688_v13 = vshll.u32 %v1492_v57, 16  ;;  %v1695_v24 = vshll.u32 %v8617_v25, 16  ;;  %v1265_v17 = vshrl.u32 %v8198_v18, 16 }
 0x2b8   :  { %3598 = vmatpush1.bf16.msra.mxu0 %v7125_v11  ;;  %v7127_v11 = vld [vmem:[%s12512_s2 + $0x1f8] sm:$0xff]   ;;  %v1686_v45 = vor.u32 %v1685_v49, %v1681_v40  ;;  %v1493_v49 = vsel %vm7796_vm2, %v1253_v48, 0  ;;  %v8645_v54 = vrot.slane %v1258_v3, 7  ;;  %v1693_v48 = vshrl.u32 %v8617_v25, 16 }
 0x2b9   :  { %3599 = vmatprep.subr.bf16.mxu0 %v12935_v44  ;;  %v1690_v38 = vrot.slane %v1688_v13, 1  ;;  %v1267_v13 = vrot.slane %v1265_v17, 7  ;;  %v2020_v3 = vrot.slane %v8587_v2, 1  ;;  %v1272_v17 = vshrl.u32 %v8200_v6, 16 }
 0x2bb   :  { %v8638_v40 = vsel %vm1511_vm3, %v1686_v45, %v1690_v38  ;;  %v7129_v45 = vld [vmem:[%s12512_s2 + $0x1e8] sm:$0xff]  }
 0x2bc   :  { %3600 = vmatpush2.bf16.msra.mxu0 %v7127_v11  ;;  %12999 = vst [vmem:[#allocation14_spill] sm:$0xff] %v8638_v40  ;;  %v8641_v11 = vsel %vm1977_vm4, %v2017_v46, %v2018_v41  ;;  %v1261_v46 = vshll.u32 %v8196_v10, 16 }
 0x2bd   :  { %3126 = vmatmul.mubr.bf16.gmra.mxu0 %v8581_v51  ;;  %3601 = vmatprep.subr.bf16.mxu0 %v12935_v44  ;;  %13000 = vst [vmem:[#allocation16_spill] sm:$0xff] %v8641_v11 }
 0x2be   :  { %3133 = vmatprep.mubr.bf16.mxu0 %v8561_v50  ;;  %2845 = vmatmul.mubr.bf16.gmra.mxu1 %v8537_v53  ;;  %v1263_v41 = vor.u32 %v1261_v46, %v8645_v54  ;;  %v7130_v53 = vld [vmem:[%s12512_s2 + $0x1e0] sm:$0xff]   ;;  %v1279_v46 = vshrl.u32 %v8202_v30, 16 }
 0x2bf   :  { %2852 = vmatprep.mubr.bf16.mxu1 %v8605_v62  ;;  %v1697_v62 = vrot.slane %v1695_v24, 1  ;;  %v1268_v24 = vshll.u32 %v8198_v18, 16 }
 0x2c0   :  { %3602 = vmatpush2.bf16.msra.mxu0 %v7128_v55 }
 0x2c1   :  { %3603 = vmatprep.subr.bf16.mxu0 %v12935_v44  ;;  %v1698_v38 = vor.u32 %v1697_v62, %v1693_v48  ;;  %v1270_v55 = vor.u32 %v1268_v24, %v1267_v13  ;;  %v7131_v62 = vld [vmem:[%s12512_s2 + $0x140] sm:$0xff]   ;;  %v1274_v48 = vrot.slane %v1272_v17, 7 }
 0x2c2   :  { %3325 = vmatpush2.bf16.msra.mxu1 %v7131_v62  ;;  %v1281_v62 = vrot.slane %v1279_v46, 7 }
 0x2c4   :  { %3604 = vmatpush2.bf16.msra.mxu0 %v7129_v45 }
 0x2c5   :  { %3134 = vmatmul.mubr.bf16.gmra.mxu0 %v8608_v5  ;;  %3605 = vmatprep.subr.bf16.mxu0 %v12935_v44 }
 0x2c6   :  { %3141 = vmatprep.mubr.bf16.mxu0 %v8587_v2  ;;  %2853 = vmatmul.mubr.bf16.gmra.mxu1 %v8561_v50  ;;  %v1700_v50 = vshll.u32 %v1493_v49, 16 }
 0x2c7   :  { %2860 = vmatprep.mubr.bf16.mxu1 %v8638_v40 }
 0x2c8   :  { %v1702_v40 = vrot.slane %v1700_v50, 1  ;;  %3606 = vmatpush2.bf16.msra.mxu0 %v7130_v53  ;;  %v8680_v50 = vsel %vm7796_vm2, 0, %v1270_v55  ;;  %v7132_v53 = vld [vmem:[%s12512_s2 + $0x1d8] sm:$0xff]  }
 0x2c9   :  { %3607 = vmatprep.subr.bf16.mxu0 %v12935_v44  ;;  %v1707_v45 = vshll.u32 %v8680_v50, 16  ;;  %v13001_v55 = vld [vmem:[#allocation28_spill] sm:$0xff] }
 0x2ca   :  { %v8664_v10 = vsel %vm1511_vm3, %v1698_v38, %v1702_v40  ;;  %v1275_v40 = vshll.u32 %v8200_v6, 16  ;;  %v2024_v38 = vrot.slane %v1493_v49, 1  ;;  %v1495_v6 = vsel %vm7796_vm2, %v1267_v13, 0 }
 0x2cb   :  { %v1705_v13 = vshrl.u32 %v8680_v50, 16 }
 0x2cc   :  { %3608 = vmatpush2.bf16.msra.mxu0 %v7132_v53  ;;  %v1277_v24 = vor.u32 %v1275_v40, %v1274_v48  ;;  %v1712_v53 = vshll.u32 %v1495_v6, 16  ;;  %v7134_v40 = vld [vmem:[%s12512_s2 + $0x1c8] sm:$0xff]  }
 0x2cd   :  { %3142 = vmatmul.mubr.bf16.gmra.mxu0 %v8641_v11  ;;  %v2021_v11 = vrot.slane %v1492_v57, 1  ;;  %v8676_v57 = vsel %vm7796_vm2, 0, %v1263_v41  ;;  %3609 = vmatprep.subr.bf16.mxu0 %v12935_v44  ;;  %v1709_v41 = vrot.slane %v1707_v45, 1 }
 0x2ce   :  { %3149 = vmatprep.mubr.bf16.mxu0 %v8617_v25  ;;  %2861 = vmatmul.mubr.bf16.gmra.mxu1 %v8587_v2  ;;  %v8705_v49 = vsel %vm7796_vm2, 0, %v1277_v24  ;;  %v1286_v24 = vshrl.u32 %v8204_v56, 16 }
 0x2cf   :  { %v8667_v18 = vsel %vm1977_vm4, %v2020_v3, %v2021_v11  ;;  %2868 = vmatprep.mubr.bf16.mxu1 %v8664_v10  ;;  %v2023_v11 = vrot.slane %v8617_v25, 1  ;;  %v7133_v3 = vld [vmem:[%s12512_s2 + $0x1d0] sm:$0xff]   ;;  %13002 = vst [vmem:[#allocation26_spill] sm:$0xff] %v8705_v49  ;;  %v1710_v45 = vor.u32 %v1709_v41, %v1705_v13 }
 0x2d0   :  { %3610 = vmatpush2.bf16.msra.mxu0 %v7133_v3  ;;  %v1714_v3 = vrot.slane %v1712_v53, 1  ;;  %v1717_v53 = vshrl.u32 %v8705_v49, 16 }
 0x2d1   :  { %v8699_v17 = vsel %vm1977_vm4, %v2023_v11, %v2024_v38  ;;  %3611 = vmatprep.subr.bf16.mxu0 %v12935_v44  ;;  %v1282_v11 = vshll.u32 %v8202_v30, 16  ;;  %v1719_v38 = vshll.u32 %v8705_v49, 16  ;;  %v8725_v30 = vld [vmem:[%s12512_s2 + $0x238] sm:$0xff]  }
 0x2d2   :  { %v8729_v41 = vsel %vm1511_vm3, %v1710_v45, %v1714_v3  ;;  %6772 = vmatprep.subr.bf16.mxu1 %v8725_v30 }
 0x2d3   :  { %v1284_v46 = vor.u32 %v1282_v11, %v1281_v62  ;;  %13003 = vst [vmem:[#allocation23_spill] sm:$0xff] %v8729_v41  ;;  %v1721_v13 = vrot.slane %v1719_v38, 1  ;;  %v1289_v11 = vshll.u32 %v8204_v56, 16 }
 0x2d4   :  { %3612 = vmatpush2.bf16.msra.mxu0 %v7134_v40 }
 0x2d5   :  { %3150 = vmatmul.mubr.bf16.gmra.mxu0 %v8667_v18  ;;  %3613 = vmatprep.subr.bf16.mxu0 %v12935_v44  ;;  %v1288_v44 = vrot.slane %v1286_v24, 7  ;;  %v1722_v45 = vor.u32 %v1721_v13, %v1717_v53  ;;  %v1293_v24 = vshrl.u32 %v8206_v12, 16 }
 0x2d6   :  { %3157 = vmatprep.mubr.bf16.mxu0 %v8676_v57  ;;  %2869 = vmatmul.mubr.bf16.gmra.mxu1 %v8617_v25  ;;  %v1496_v25 = vsel %vm7796_vm2, %v1274_v48, 0  ;;  %v8735_v48 = vsel %vm7796_vm2, 0, %v1284_v46  ;;  %v2027_v46 = vrot.slane %v1495_v6, 1 }
 0x2d7   :  { %2876 = vmatprep.mubr.bf16.mxu1 %v13001_v55  ;;  %v7135_v55 = vld [vmem:[%s12512_s2 + $0x1c0] sm:$0xff]   ;;  %13004 = vst [vmem:[#allocation13_spill] sm:$0xff] %v8735_v48  ;;  %v1724_v40 = vshll.u32 %v1496_v25, 16  ;;  %v1731_v38 = vshll.u32 %v8735_v48, 16  ;;  %v1291_v3 = vor.u32 %v1289_v11, %v1288_v44  ;;  %v1295_v6 = vrot.slane %v1293_v24, 7 }
 0x2d8   :  { %3614 = vmatpush2.bf16.msra.mxu0 %v7135_v55  ;;  %v2026_v55 = vrot.slane %v8680_v50, 1  ;;  %v2029_v11 = vrot.slane %v8705_v49, 1  ;;  %v1498_v24 = vsel %vm7796_vm2, %v1288_v44, 0 }
 0x2d9   :  { %v1733_v13 = vrot.slane %v1731_v38, 1  ;;  %v8757_v53 = vsel %vm7796_vm2, 0, %v1291_v3 }
 0x2da   :  { %v8751_v56 = vsel %vm1977_vm4, %v2026_v55, %v2027_v46  ;;  %13006 = vst [vmem:[#allocation18_spill] sm:$0xff] %v8757_v53  ;;  %v1300_v55 = vshrl.u32 %v8208_v4, 16  ;;  %v1741_v44 = vshrl.u32 %v8757_v53, 16 }
 0x2dd   :  { %3158 = vmatmul.mubr.bf16.gmra.mxu0 %v8699_v17 }
 0x2de   :  { %3165 = vmatprep.mubr.bf16.mxu0 %v8680_v50  ;;  %2877 = vmatmul.mubr.bf16.gmra.mxu1 %v12970_v22 }
 0x2df   :  { %2884 = vmatprep.mubr.bf16.mxu1 %v8729_v41  ;;  %v1497_v41 = vsel %vm7796_vm2, %v1281_v62, 0 }
 0x2e0   :  { %v1736_v62 = vshll.u32 %v1497_v41, 16 }
 0x2e2   :  { %v1738_v46 = vrot.slane %v1736_v62, 1  ;;  %v1748_v62 = vshll.u32 %v1498_v24, 16 }
 0x2e5   :  { %3166 = vmatmul.mubr.bf16.gmra.mxu0 %v8268_v19  ;;  %v1726_v19 = vrot.slane %v1724_v40, 1 }
 0x2e6   :  { %3173 = vmatprep.mubr.bf16.mxu0 %v8705_v49  ;;  %2885 = vmatmul.mubr.bf16.gmra.mxu1 %v8680_v50  ;;  %v1729_v50 = vshrl.u32 %v8735_v48, 16 }
 0x2e7   :  { %v8748_v22 = vsel %vm1511_vm3, %v1722_v45, %v1726_v19  ;;  %v1296_v19 = vshll.u32 %v8206_v12, 16  ;;  %v1743_v45 = vshll.u32 %v8757_v53, 16 }
 0x2e8   :  { %13005 = vst [vmem:[#allocation15_spill] sm:$0xff] %v8748_v22  ;;  %2892 = vmatprep.mubr.bf16.mxu1 %v8748_v22  ;;  %v1734_v40 = vor.u32 %v1733_v13, %v1729_v50  ;;  %v2030_v22 = vrot.slane %v1496_v25, 1  ;;  %v1302_v50 = vrot.slane %v1300_v55, 7 }
 0x2e9   :  { %v1298_v38 = vor.u32 %v1296_v19, %v1295_v6  ;;  %v1745_v13 = vrot.slane %v1743_v45, 1  ;;  %v1303_v19 = vshll.u32 %v8208_v4, 16  ;;  %v1307_v45 = vshrl.u32 %v8210_v16, 16 }
 0x2ea   :  { %v8769_v3 = vsel %vm1511_vm3, %v1734_v40, %v1738_v46  ;;  %v8772_v12 = vsel %vm1977_vm4, %v2029_v11, %v2030_v22  ;;  %v2032_v22 = vrot.slane %v8735_v48, 1  ;;  %v1750_v46 = vrot.slane %v1748_v62, 1 }
 0x2eb   :  { %13007 = vst [vmem:[#allocation20_spill] sm:$0xff] %v8769_v3  ;;  %v8778_v25 = vsel %vm7796_vm2, 0, %v1298_v38  ;;  %v1746_v40 = vor.u32 %v1745_v13, %v1741_v44  ;;  %v1305_v55 = vor.u32 %v1303_v19, %v1302_v50  ;;  %v1499_v38 = vsel %vm7796_vm2, %v1295_v6, 0 }
 0x2ec   :  { %13008 = vst [vmem:[#allocation17_spill] sm:$0xff] %v8778_v25  ;;  %v1755_v11 = vshll.u32 %v8778_v25, 16  ;;  %v1753_v6 = vshrl.u32 %v8778_v25, 16  ;;  %v1760_v62 = vshll.u32 %v1499_v38, 16  ;;  %v1310_v19 = vshll.u32 %v8210_v16, 16 }
 0x2ed   :  { %3174 = vmatmul.mubr.bf16.gmra.mxu0 %v8751_v56  ;;  %v8799_v44 = vsel %vm7796_vm2, 0, %v1305_v55 }
 0x2ee   :  { %3181 = vmatprep.mubr.bf16.mxu0 %v8735_v48  ;;  %2893 = vmatmul.mubr.bf16.gmra.mxu1 %v8705_v49  ;;  %v8790_v49 = vsel %vm1511_vm3, %v1746_v40, %v1750_v46  ;;  %v1757_v13 = vrot.slane %v1755_v11, 1  ;;  %13010 = vst [vmem:[#allocation21_spill] sm:$0xff] %v8799_v44  ;;  %v1314_v11 = vshrl.u32 %v8212_v7, 16 }
 0x2ef   :  { %2900 = vmatprep.mubr.bf16.mxu1 %v8769_v3  ;;  %v2033_v3 = vrot.slane %v1497_v41, 1  ;;  %13009 = vst [vmem:[#allocation19_spill] sm:$0xff] %v8790_v49  ;;  %v1309_v41 = vrot.slane %v1307_v45, 7  ;;  %v1500_v45 = vsel %vm7796_vm2, %v1302_v50, 0  ;;  %v1765_v50 = vshrl.u32 %v8799_v44, 16 }
 0x2f0   :  { %v1758_v40 = vor.u32 %v1757_v13, %v1753_v6  ;;  %v1316_v6 = vrot.slane %v1314_v11, 7 }
 0x2f1   :  { %v8793_v4 = vsel %vm1977_vm4, %v2032_v22, %v2033_v3  ;;  %v2035_v3 = vrot.slane %v8757_v53, 1  ;;  %v1767_v22 = vshll.u32 %v8799_v44, 16  ;;  %v1312_v46 = vor.u32 %v1310_v19, %v1309_v41 }
 0x2f3   :  { %v1769_v13 = vrot.slane %v1767_v22, 1 }
 0x2f5   :  { %3182 = vmatmul.mubr.bf16.gmra.mxu0 %v8772_v12  ;;  %v1770_v19 = vor.u32 %v1769_v13, %v1765_v50 }
 0x2f6   :  { %3189 = vmatprep.mubr.bf16.mxu0 %v8757_v53  ;;  %2901 = vmatmul.mubr.bf16.gmra.mxu1 %v8735_v48  ;;  %v2036_v48 = vrot.slane %v1498_v24, 1  ;;  %v8820_v24 = vsel %vm7796_vm2, 0, %v1312_v46  ;;  %v1501_v46 = vsel %vm7796_vm2, %v1309_v41, 0 }
 0x2f7   :  { %2908 = vmatprep.mubr.bf16.mxu1 %v8790_v49  ;;  %v1762_v49 = vrot.slane %v1760_v62, 1  ;;  %13012 = vst [vmem:[#allocation38_spill] sm:$0xff] %v8820_v24  ;;  %v1772_v62 = vshll.u32 %v1500_v45, 16  ;;  %v1777_v41 = vshrl.u32 %v8820_v24, 16 }
 0x2f8   :  { %v8814_v16 = vsel %vm1977_vm4, %v2035_v3, %v2036_v48  ;;  %v2038_v48 = vrot.slane %v8778_v25, 1  ;;  %v1321_v3 = vshrl.u32 %v8214_v1, 16 }
 0x2f9   :  { %v8811_v55 = vsel %vm1511_vm3, %v1758_v40, %v1762_v49  ;;  %v1317_v49 = vshll.u32 %v8212_v7, 16  ;;  %v1779_v40 = vshll.u32 %v8820_v24, 16  ;;  %v1774_v11 = vrot.slane %v1772_v62, 1 }
 0x2fa   :  { %13011 = vst [vmem:[#allocation22_spill] sm:$0xff] %v8811_v55  ;;  %v1784_v62 = vshll.u32 %v1501_v46, 16 }
 0x2fb   :  { %v1319_v22 = vor.u32 %v1317_v49, %v1316_v6  ;;  %v1781_v13 = vrot.slane %v1779_v40, 1  ;;  %v1324_v49 = vshll.u32 %v8214_v1, 16  ;;  %v1328_v40 = vshrl.u32 %v8216_v0, 16 }
 0x2fd   :  { %3190 = vmatmul.mubr.bf16.gmra.mxu0 %v8793_v4  ;;  %v8841_v50 = vsel %vm7796_vm2, 0, %v1319_v22 }
 0x2fe   :  { %3197 = vmatprep.mubr.bf16.mxu0 %v8778_v25  ;;  %2909 = vmatmul.mubr.bf16.gmra.mxu1 %v8757_v53  ;;  %v8832_v53 = vsel %vm1511_vm3, %v1770_v19, %v1774_v11  ;;  %13014 = vst [vmem:[#allocation40_spill] sm:$0xff] %v8841_v50  ;;  %v1782_v19 = vor.u32 %v1781_v13, %v1777_v41  ;;  %v1330_v41 = vrot.slane %v1328_v40, 7 }
 0x2ff   :  { %2916 = vmatprep.mubr.bf16.mxu1 %v8811_v55  ;;  %v2039_v55 = vrot.slane %v1499_v38, 1  ;;  %13013 = vst [vmem:[#allocation39_spill] sm:$0xff] %v8832_v53  ;;  %v1323_v38 = vrot.slane %v1321_v3, 7  ;;  %v1502_v3 = vsel %vm7796_vm2, %v1316_v6, 0  ;;  %v1789_v6 = vshrl.u32 %v8841_v50, 16 }
 0x301   :  { %v8835_v7 = vsel %vm1977_vm4, %v2038_v48, %v2039_v55  ;;  %v2041_v55 = vrot.slane %v8799_v44, 1  ;;  %v1791_v48 = vshll.u32 %v8841_v50, 16  ;;  %v1326_v11 = vor.u32 %v1324_v49, %v1323_v38 }
 0x303   :  { %v1793_v13 = vrot.slane %v1791_v48, 1 }
 0x305   :  { %3198 = vmatmul.mubr.bf16.gmra.mxu0 %v8814_v16  ;;  %v1794_v49 = vor.u32 %v1793_v13, %v1789_v6 }
 0x306   :  { %3205 = vmatprep.mubr.bf16.mxu0 %v8799_v44  ;;  %2917 = vmatmul.mubr.bf16.gmra.mxu1 %v8778_v25  ;;  %v2042_v25 = vrot.slane %v1500_v45, 1  ;;  %v8862_v45 = vsel %vm7796_vm2, 0, %v1326_v11  ;;  %v1503_v11 = vsel %vm7796_vm2, %v1323_v38, 0 }
 0x307   :  { %2924 = vmatprep.mubr.bf16.mxu1 %v8832_v53  ;;  %v1786_v53 = vrot.slane %v1784_v62, 1  ;;  %13017 = vst [vmem:[#allocation43_spill] sm:$0xff] %v8862_v45  ;;  %v1796_v62 = vshll.u32 %v1502_v3, 16  ;;  %v1801_v38 = vshrl.u32 %v8862_v45, 16 }
 0x308   :  { %v8856_v1 = vsel %vm1977_vm4, %v2041_v55, %v2042_v25  ;;  %v2044_v25 = vrot.slane %v8820_v24, 1  ;;  %v1335_v55 = vshrl.u32 %v8218_v36, 16 }
 0x309   :  { %v8853_v22 = vsel %vm1511_vm3, %v1782_v19, %v1786_v53  ;;  %13016 = vst [vmem:[#allocation42_spill] sm:$0xff] %v8856_v1  ;;  %v1331_v53 = vshll.u32 %v8216_v0, 16  ;;  %v1803_v19 = vshll.u32 %v8862_v45, 16  ;;  %v1798_v40 = vrot.slane %v1796_v62, 1 }
 0x30a   :  { %13015 = vst [vmem:[#allocation41_spill] sm:$0xff] %v8853_v22  ;;  %v1808_v62 = vshll.u32 %v1503_v11, 16 }
 0x30b   :  { %v1333_v48 = vor.u32 %v1331_v53, %v1330_v41  ;;  %v1805_v13 = vrot.slane %v1803_v19, 1  ;;  %v1338_v53 = vshll.u32 %v8218_v36, 16  ;;  %v1342_v19 = vshrl.u32 %v8220_v63, 16 }
 0x30d   :  { %3206 = vmatmul.mubr.bf16.gmra.mxu0 %v8835_v7  ;;  %v8883_v6 = vsel %vm7796_vm2, 0, %v1333_v48 }
 0x30e   :  { %3213 = vmatprep.mubr.bf16.mxu0 %v8820_v24  ;;  %2925 = vmatmul.mubr.bf16.gmra.mxu1 %v8799_v44  ;;  %v8874_v44 = vsel %vm1511_vm3, %v1794_v49, %v1798_v40  ;;  %13020 = vst [vmem:[#allocation46_spill] sm:$0xff] %v8883_v6  ;;  %v1806_v49 = vor.u32 %v1805_v13, %v1801_v38  ;;  %v1344_v38 = vrot.slane %v1342_v19, 7 }
 0x30f   :  { %2932 = vmatprep.mubr.bf16.mxu1 %v8853_v22  ;;  %v2045_v22 = vrot.slane %v1501_v46, 1  ;;  %13018 = vst [vmem:[#allocation44_spill] sm:$0xff] %v8874_v44  ;;  %v1337_v46 = vrot.slane %v1335_v55, 7  ;;  %v1504_v55 = vsel %vm7796_vm2, %v1330_v41, 0 }
 0x310   :  { %v1820_v41 = vshll.u32 %v1504_v55, 16 }
 0x311   :  { %v8877_v0 = vsel %vm1977_vm4, %v2044_v25, %v2045_v22  ;;  %v2047_v22 = vrot.slane %v8841_v50, 1  ;;  %v1815_v25 = vshll.u32 %v8883_v6, 16  ;;  %v1340_v40 = vor.u32 %v1338_v53, %v1337_v46 }
 0x312   :  { %13019 = vst [vmem:[#allocation45_spill] sm:$0xff] %v8877_v0 }
 0x313   :  { %v1817_v13 = vrot.slane %v1815_v25, 1  ;;  %v1349_v25 = vshrl.u32 %v8222_v42, 16 }
 0x315   :  { %3214 = vmatmul.mubr.bf16.gmra.mxu0 %v8856_v1 }
 0x316   :  { %3221 = vmatprep.mubr.bf16.mxu0 %v8841_v50  ;;  %2933 = vmatmul.mubr.bf16.gmra.mxu1 %v8820_v24  ;;  %v2048_v24 = vrot.slane %v1502_v3, 1  ;;  %v8906_v3 = vsel %vm7796_vm2, 0, %v1340_v40  ;;  %v1822_v40 = vrot.slane %v1820_v41, 1 }
 0x317   :  { %2940 = vmatprep.mubr.bf16.mxu1 %v8874_v44  ;;  %v1810_v44 = vrot.slane %v1808_v62, 1  ;;  %13024 = vst [vmem:[#allocation50_spill] sm:$0xff] %v8906_v3 }
 0x318   :  { %v8898_v36 = vsel %vm1977_vm4, %v2047_v22, %v2048_v24  ;;  %v1345_v24 = vshll.u32 %v8220_v63, 16  ;;  %v1827_v22 = vshll.u32 %v8906_v3, 16 }
 0x319   :  { %v8895_v48 = vsel %vm1511_vm3, %v1806_v49, %v1810_v44  ;;  %13022 = vst [vmem:[#allocation48_spill] sm:$0xff] %v8898_v36  ;;  %v1813_v44 = vshrl.u32 %v8883_v6, 16  ;;  %v2050_v49 = vrot.slane %v8862_v45, 1 }
 0x31a   :  { %13021 = vst [vmem:[#allocation47_spill] sm:$0xff] %v8895_v48 }
 0x31b   :  { %v1818_v53 = vor.u32 %v1817_v13, %v1813_v44  ;;  %v2758_v1 = vpop.f32.mrf.mxu1  ;;  %v1829_v44 = vrot.slane %v1827_v22, 1 }
 0x31d   :  { %3222 = vmatmul.mubr.bf16.gmra.mxu0 %v8877_v0  ;;  %v8901_v0 = vpop.f32.mrf.mxu0  ;;  %v8922_v63 = vsel %vm1511_vm3, %v1818_v53, %v1822_v40  ;;  %v2760_v41 = vpop.f32.mrf.mxu1  ;;  %v1352_v53 = vshll.u32 %v8222_v42, 16  ;;  %v8946_v42 = vsel %vm7796_vm2, %v1344_v38, 0 }
 0x31e   :  { %3229 = vmatprep.mubr.bf16.mxu0 %v8862_v45  ;;  %2941 = vmatmul.mubr.bf16.gmra.mxu1 %v8841_v50  ;;  %13023 = vst [vmem:[#allocation49_spill] sm:$0xff] %v8901_v0  ;;  %v1347_v0 = vor.u32 %v1345_v24, %v1344_v38  ;;  %13026 = vst [vmem:[#allocation52_spill] sm:$0xff] %v8922_v63 }
 0x31f   :  { %2948 = vmatprep.mubr.bf16.mxu1 %v8895_v48  ;;  %v3041_v62 = vpop.f32.mrf.mxu0  ;;  %v2051_v48 = vrot.slane %v1503_v11, 1  ;;  %v1351_v11 = vrot.slane %v1349_v25, 7  ;;  %v2761_v22 = vpop.f32.mrf.mxu1  ;;  %v1356_v25 = vshrl.u32 %v8224_v14, 16 }
 0x320   :  { %v1825_v62 = vshrl.u32 %v8906_v3, 16 }
 0x321   :  { %v8914_v19 = vpop.f32.mrf.mxu0  ;;  %v8925_v13 = vsel %vm1977_vm4, %v2050_v49, %v2051_v48 }
 0x322   :  { %13025 = vst [vmem:[#allocation51_spill] sm:$0xff] %v8914_v19  ;;  %13027 = vst [vmem:[#allocation53_spill] sm:$0xff] %v8925_v13  ;;  %v1830_v40 = vor.u32 %v1829_v44, %v1825_v62  ;;  %v2053_v19 = vrot.slane %v8883_v6, 1 }
 0x323   :  { %v3044_v50 = vpop.f32.mrf.mxu0 }
 0x324   :  { %v8931_v50 = vsel %vm7796_vm2, 0, %v1347_v0 }
 0x325   :  { %3230 = vmatmul.mubr.bf16.gmra.mxu0 %v8898_v36  ;;  %v8918_v36 = vsel %vm7796_vm2, %v1337_v46, 0  ;;  %v3047_v24 = vpop.f32.mrf.mxu0  ;;  %v1839_v0 = vshll.u32 %v8931_v50, 16 }
 0x326   :  { %3237 = vmatprep.mubr.bf16.mxu0 %v8883_v6  ;;  %2949 = vmatmul.mubr.bf16.gmra.mxu1 %v8862_v45  ;;  %v8933_v46 = vadd.f32 %v3047_v24, %v2758_v1  ;;  %v1832_v48 = vshll.u32 %v8918_v36, 16  ;;  %v1354_v24 = vor.u32 %v1352_v53, %v1351_v11  ;;  %v2054_v45 = vrot.slane %v1504_v55, 1 }
 0x327   :  { %2956 = vmatprep.mubr.bf16.mxu1 %v8922_v63  ;;  %v3049_v49 = vpop.f32.mrf.mxu0  ;;  %v1841_v53 = vrot.slane %v1839_v0, 1 }
 0x328   :  { %13028 = vst [vmem:[#allocation54_spill] sm:$0xff] %v8933_v46  ;;  %v2763_v46 = vpop.f32.mrf.mxu1  ;;  %v1834_v63 = vrot.slane %v1832_v48, 1  ;;  %v8953_v62 = vsel %vm1977_vm4, %v2053_v19, %v2054_v45  ;;  %v8959_v55 = vsel %vm7796_vm2, 0, %v1354_v24  ;;  %v1844_v45 = vshll.u32 %v8946_v42, 16 }
 0x329   :  { %v3050_v1 = vpop.f32.mrf.mxu0  ;;  %v1359_v19 = vshll.u32 %v8224_v14, 16  ;;  %v1363_v24 = vshrl.u32 %v7896_v60, 16  ;;  %v1507_v14 = vsel %vm7796_vm2, %v1351_v11, 0 }
 0x32a   :  { %v8942_v41 = vadd.f32 %v3050_v1, %v2761_v22  ;;  %v2766_v49 = vpop.f32.mrf.mxu1  ;;  %v8950_v44 = vsel %vm1511_vm3, %v1830_v40, %v1834_v63  ;;  %v1358_v22 = vrot.slane %v1356_v25, 7  ;;  %v1837_v63 = vshrl.u32 %v8931_v50, 16 }
 0x32b   :  { %13030 = vst [vmem:[#allocation56_spill] sm:$0xff] %v8950_v44  ;;  %v2056_v25 = vrot.slane %v8906_v3, 1  ;;  %v1851_v1 = vshll.u32 %v8959_v55, 16 }
 0x32c   :  { %13029 = vst [vmem:[#allocation55_spill] sm:$0xff] %v8942_v41  ;;  %v1842_v0 = vor.u32 %v1841_v53, %v1837_v63  ;;  %v1846_v41 = vrot.slane %v1844_v45, 1 }
 0x32d   :  { %3238 = vmatmul.mubr.bf16.gmra.mxu0 %v8925_v13  ;;  %v3052_v13 = vpop.f32.mrf.mxu0 }
 0x32e   :  { %3245 = vmatprep.mubr.bf16.mxu0 %v8906_v3  ;;  %2957 = vmatmul.mubr.bf16.gmra.mxu1 %v8883_v6  ;;  %v2768_v13 = vpop.f32.mrf.mxu1  ;;  %v8977_v53 = vsel %vm1511_vm3, %v1842_v0, %v1846_v41  ;;  %v1849_v41 = vshrl.u32 %v8959_v55, 16 }
 0x32f   :  { %2964 = vmatprep.mubr.bf16.mxu1 %v8950_v44  ;;  %v3055_v46 = vpop.f32.mrf.mxu0  ;;  %v2057_v44 = vrot.slane %v8918_v36, 1  ;;  %13033 = vst [vmem:[#allocation59_spill] sm:$0xff] %v8977_v53  ;;  %v1365_v36 = vrot.slane %v1363_v24, 7 }
 0x330   :  { %v8961_v38 = vadd.f32 %v3055_v46, %v2766_v49  ;;  %v2769_v40 = vpop.f32.mrf.mxu1  ;;  %v1361_v46 = vor.u32 %v1359_v19, %v1358_v22  ;;  %v1853_v19 = vrot.slane %v1851_v1, 1 }
 0x331   :  { %v3057_v48 = vpop.f32.mrf.mxu0  ;;  %v8980_v63 = vsel %vm1977_vm4, %v2056_v25, %v2057_v44  ;;  %v1856_v44 = vshll.u32 %v1507_v14, 16 }
 0x332   :  { %13031 = vst [vmem:[#allocation57_spill] sm:$0xff] %v8961_v38  ;;  %v2771_v38 = vpop.f32.mrf.mxu1  ;;  %v1854_v1 = vor.u32 %v1853_v19, %v1849_v41 }
 0x333   :  { %v3058_v49 = vpop.f32.mrf.mxu0 }
 0x334   :  { %v8970_v13 = vadd.f32 %v3058_v49, %v2769_v40  ;;  %v2774_v48 = vpop.f32.mrf.mxu1  ;;  %v1366_v40 = vshll.u32 %v7896_v60, 16  ;;  %v2059_v49 = vrot.slane %v8931_v50, 1 }
 0x335   :  { %3246 = vmatmul.mubr.bf16.gmra.mxu0 %v8953_v62  ;;  %v3060_v6 = vpop.f32.mrf.mxu0 }
 0x336   :  { %3253 = vmatprep.mubr.bf16.mxu0 %v8931_v50  ;;  %13032 = vst [vmem:[#allocation58_spill] sm:$0xff] %v8970_v13  ;;  %2965 = vmatmul.mubr.bf16.gmra.mxu1 %v8906_v3  ;;  %v8986_v6 = vsel %vm7796_vm2, 0, %v1361_v46  ;;  %v2776_v45 = vpop.f32.mrf.mxu1  ;;  %v1508_v3 = vsel %vm7796_vm2, %v1358_v22, 0 }
 0x337   :  { %2972 = vmatprep.mubr.bf16.mxu1 %v8977_v53  ;;  %v3063_v38 = vpop.f32.mrf.mxu0  ;;  %v1863_v13 = vshll.u32 %v8986_v6, 16  ;;  %v1368_v53 = vor.u32 %v1366_v40, %v1365_v36  ;;  %v2060_v45 = vrot.slane %v8946_v42, 1 }
 0x338   :  { %v8988_v11 = vadd.f32 %v3063_v38, %v2774_v48  ;;  %v2777_v25 = vpop.f32.mrf.mxu1  ;;  %v1858_v38 = vrot.slane %v1856_v44, 1  ;;  %v1861_v44 = vshrl.u32 %v8986_v6, 16 }
 0x339   :  { %v3065_v0 = vpop.f32.mrf.mxu0  ;;  %v9005_v41 = vsel %vm1977_vm4, %v2059_v49, %v2060_v45  ;;  %v1865_v40 = vrot.slane %v1863_v13, 1  ;;  %v9011_v42 = vsel %vm7796_vm2, 0, %v1368_v53 }
 0x33a   :  { %13034 = vst [vmem:[#allocation60_spill] sm:$0xff] %v8988_v11  ;;  %v2779_v48 = vpop.f32.mrf.mxu1  ;;  %v9002_v19 = vsel %vm1511_vm3, %v1854_v1, %v1858_v38  ;;  %v1370_v38 = vshrl.u32 %v8226_v26, 16 }
 0x33b   :  { %v3066_v46 = vpop.f32.mrf.mxu0  ;;  %13036 = vst [vmem:[#allocation62_spill] sm:$0xff] %v9002_v19  ;;  %v1866_v13 = vor.u32 %v1865_v40, %v1861_v44  ;;  %v1875_v48 = vshll.u32 %v9011_v42, 16 }
 0x33c   :  { %v8995_v24 = vadd.f32 %v3066_v46, %v2777_v25  ;;  %v2782_v60 = vpop.f32.mrf.mxu1  ;;  %v1868_v25 = vshll.u32 %v1508_v3, 16  ;;  %v2062_v46 = vrot.slane %v8959_v55, 1 }
 0x33d   :  { %3254 = vmatmul.mubr.bf16.gmra.mxu0 %v8980_v63  ;;  %v3068_v11 = vpop.f32.mrf.mxu0 }
 0x33e   :  { %3261 = vmatprep.mubr.bf16.mxu0 %v8959_v55  ;;  %13035 = vst [vmem:[#allocation61_spill] sm:$0xff] %v8995_v24  ;;  %2973 = vmatmul.mubr.bf16.gmra.mxu1 %v8931_v50  ;;  %v2784_v11 = vpop.f32.mrf.mxu1  ;;  %v1509_v24 = vsel %vm7796_vm2, %v1365_v36, 0 }
 0x33f   :  { %2980 = vmatprep.mubr.bf16.mxu1 %v9002_v19  ;;  %v3071_v0 = vpop.f32.mrf.mxu0  ;;  %v2063_v11 = vrot.slane %v1507_v14, 1  ;;  %v9033_v14 = vrot.slane %v1370_v38, 7 }
 0x340   :  { %v9013_v22 = vadd.f32 %v3071_v0, %v2782_v60  ;;  %v2785_v49 = vpop.f32.mrf.mxu1  ;;  %v1870_v0 = vrot.slane %v1868_v25, 1  ;;  %v1873_v25 = vshrl.u32 %v9011_v42, 16 }
 0x341   :  { %v3073_v1 = vpop.f32.mrf.mxu0  ;;  %v9029_v44 = vsel %vm1977_vm4, %v2062_v46, %v2063_v11  ;;  %v1373_v46 = vshll.u32 %v8226_v26, 16 }
 0x342   :  { %13037 = vst [vmem:[#allocation63_spill] sm:$0xff] %v9013_v22  ;;  %v2787_v60 = vpop.f32.mrf.mxu1  ;;  %v9026_v40 = vsel %vm1511_vm3, %v1866_v13, %v1870_v0  ;;  %v1877_v1 = vrot.slane %v1875_v48, 1  ;;  %v1880_v13 = vshll.u32 %v1509_v24, 16  ;;  %v2065_v0 = vrot.slane %v8986_v6, 1 }
 0x343   :  { %v3074_v45 = vpop.f32.mrf.mxu0  ;;  %13039 = vst [vmem:[#allocation65_spill] sm:$0xff] %v9026_v40 }
 0x344   :  { %v9020_v53 = vadd.f32 %v3074_v45, %v2785_v49  ;;  %v2790_v19 = vpop.f32.mrf.mxu1  ;;  %v1878_v48 = vor.u32 %v1877_v1, %v1873_v25 }
 0x345   :  { %3262 = vmatmul.mubr.bf16.gmra.mxu0 %v9005_v41  ;;  %v3076_v22 = vpop.f32.mrf.mxu0 }
 0x346   :  { %3269 = vmatprep.mubr.bf16.mxu0 %v8986_v6  ;;  %13038 = vst [vmem:[#allocation64_spill] sm:$0xff] %v9020_v53  ;;  %2981 = vmatmul.mubr.bf16.gmra.mxu1 %v8959_v55  ;;  %v2792_v36 = vpop.f32.mrf.mxu1  ;;  %v1375_v53 = vor.u32 %v1373_v46, %v9033_v14 }
 0x347   :  { %2988 = vmatprep.mubr.bf16.mxu1 %v9026_v40  ;;  %v3079_v49 = vpop.f32.mrf.mxu0  ;;  %v2066_v36 = vrot.slane %v1508_v3, 1 }
 0x348   :  { %v9035_v22 = vadd.f32 %v3079_v49, %v2790_v19  ;;  %v2793_v60 = vpop.f32.mrf.mxu1  ;;  %v1882_v49 = vrot.slane %v1880_v13, 1  ;;  %v9055_v25 = vsel %vm7796_vm2, 0, %v1375_v53 }
 0x349   :  { %v3081_v45 = vpop.f32.mrf.mxu0  ;;  %v9049_v26 = vsel %vm1977_vm4, %v2065_v0, %v2066_v36 }
 0x34a   :  { %13040 = vst [vmem:[#allocation66_spill] sm:$0xff] %v9035_v22  ;;  %v2795_v19 = vpop.f32.mrf.mxu1  ;;  %v9046_v45 = vsel %vm1511_vm3, %v1878_v48, %v1882_v49 }
 0x34b   :  { %v3082_v11 = vpop.f32.mrf.mxu0  ;;  %v2069_v19 = vrot.slane %v1509_v24, 1 }
 0x34c   :  { %v9042_v38 = vadd.f32 %v3082_v11, %v2793_v60  ;;  %v2798_v40 = vpop.f32.mrf.mxu1  ;;  %v2068_v60 = vrot.slane %v9011_v42, 1 }
 0x34d   :  { %3270 = vmatmul.mubr.bf16.gmra.mxu0 %v9029_v44  ;;  %v3084_v22 = vpop.f32.mrf.mxu0 }
 0x34e   :  { %3277 = vmatprep.mubr.bf16.mxu0 %v9011_v42  ;;  %2989 = vmatmul.mubr.bf16.gmra.mxu1 %v8986_v6  ;;  %v2800_v22 = vpop.f32.mrf.mxu1  ;;  %v9065_v53 = vsel %vm1977_vm4, %v2068_v60, %v2069_v19  ;;  %v7137_v60 = vld [vmem:[%s12512_s2 + $0x230] sm:$0xff]  }
 0x34f   :  { %2996 = vmatprep.mubr.bf16.mxu1 %v9046_v45  ;;  %v3087_v1 = vpop.f32.mrf.mxu0 }
 0x350   :  { %v9057_v3 = vadd.f32 %v3087_v1, %v2798_v40  ;;  %v2801_v46 = vpop.f32.mrf.mxu1 }
 0x351   :  { %v3089_v13 = vpop.f32.mrf.mxu0 }
 0x352   :  { %v2803_v11 = vpop.f32.mrf.mxu1 }
 0x353   :  { %v3090_v48 = vpop.f32.mrf.mxu0 }
 0x354   :  { %v9061_v0 = vadd.f32 %v3090_v48, %v2801_v46  ;;  %v2806_v36 = vpop.f32.mrf.mxu1 }
 0x355   :  { %3278 = vmatmul.mubr.bf16.gmra.mxu0 %v9049_v26  ;;  %v3092_v49 = vpop.f32.mrf.mxu0 }
 0x356   :  { %3285 = vmatprep.mubr.bf16.mxu0 %v9055_v25  ;;  %2997 = vmatmul.mubr.bf16.gmra.mxu1 %v9011_v42  ;;  %v2808_v22 = vpop.f32.mrf.mxu1 }
 0x357   :  { %v3095_v40 = vpop.f32.mrf.mxu0  ;;  %3326 = vmatprep.mubr.bf16.mxu1 %v8316_v28  ;;  %v7138_v22 = vld [vmem:[%s12512_s2 + $0x228] sm:$0xff]  }
 0x358   :  { %v9069_v1 = vadd.f32 %v3095_v40, %v2806_v36  ;;  %v2809_v46 = vpop.f32.mrf.mxu1 }
 0x359   :  { %v3097_v13 = vpop.f32.mrf.mxu0 }
 0x35a   :  { %v2811_v11 = vpop.f32.mrf.mxu1 }
 0x35b   :  { %v3098_v24 = vpop.f32.mrf.mxu0 }
 0x35c   :  { %v9072_v48 = vadd.f32 %v3098_v24, %v2809_v46  ;;  %v2814_v49 = vpop.f32.mrf.mxu1 }
 0x35d   :  { %3286 = vmatmul.mubr.bf16.gmra.mxu0 %v9065_v53  ;;  %v3100_v19 = vpop.f32.mrf.mxu0 }
 0x35e   :  { %3615 = vmatprep.mubr.bf16.mxu0 %v8313_v37  ;;  %3327 = vmatmul.mubr.bf16.vlgmr.msra.gmra.mxu1 %v8302_v52  ;;  %v2816_v40 = vpop.f32.mrf.mxu1 }
 0x35f   :  { %6773 = vmatpush3.bf16.msra.mxu1 %v8725_v30  ;;  %3334 = vmatprep.mubr.bf16.mxu1 %v8345_v29  ;;  %v7140_v40 = vld [vmem:[%s12512_s2 + $0x218] sm:$0xff]  }
 0x360   :  { %6774 = vmatprep.subr.bf16.mxu1 %v7137_v60  ;;  %v2817_v46 = vpop.f32.mrf.mxu1 }
 0x362   :  { %v2819_v24 = vpop.f32.mrf.mxu1 }
 0x363   :  { %6775 = vmatpush3.bf16.msra.mxu1 %v7137_v60 }
 0x364   :  { %6776 = vmatprep.subr.bf16.mxu1 %v7138_v22  ;;  %v2822_v19 = vpop.f32.mrf.mxu1 }
 0x365   :  { %v3103_v28 = vpop.f32.mrf.mxu0  ;;  %3616 = vmatmul.mubr.bf16.vlgmr.msra.gmra.mxu0 %v8262_v20  ;;  %v7139_v20 = vld [vmem:[%s12512_s2 + $0x220] sm:$0xff]  }
 0x366   :  { %v9080_v36 = vadd.f32 %v3103_v28, %v2814_v49  ;;  %3623 = vmatprep.mubr.bf16.mxu0 %v8342_v31  ;;  %3335 = vmatmul.mubr.bf16.gmra.mxu1 %v8313_v37  ;;  %v2824_v60 = vpop.f32.mrf.mxu1 }
 0x367   :  { %v3105_v13 = vpop.f32.mrf.mxu0  ;;  %3342 = vmatprep.mubr.bf16.mxu1 %v8380_v35  ;;  %6777 = vmatpush3.bf16.msra.mxu1 %v7138_v22 }
 0x368   :  { %6778 = vmatprep.subr.bf16.mxu1 %v7139_v20 }
 0x369   :  { %v3106_v52 = vpop.f32.mrf.mxu0 }
 0x36a   :  { %v9087_v30 = vadd.f32 %v3106_v52, %v2817_v46  ;;  %v2825_v46 = vpop.f32.mrf.mxu1 }
 0x36b   :  { %v3108_v11 = vpop.f32.mrf.mxu0  ;;  %6779 = vmatpush3.bf16.msra.mxu1 %v7139_v20 }
 0x36c   :  { %v2827_v24 = vpop.f32.mrf.mxu1  ;;  %6780 = vmatprep.subr.bf16.mxu1 %v7140_v40 }
 0x36d   :  { %v3111_v49 = vpop.f32.mrf.mxu0  ;;  %3624 = vmatmul.mubr.bf16.gmra.mxu0 %v8282_v39 }
 0x36e   :  { %v9094_v28 = vadd.f32 %v3111_v49, %v2822_v19  ;;  %3631 = vmatprep.mubr.bf16.mxu0 %v8377_v27  ;;  %v2830_v11 = vpop.f32.mrf.mxu1  ;;  %3343 = vmatmul.mubr.bf16.gmra.mxu1 %v8342_v31 }
 0x36f   :  { %v3113_v13 = vpop.f32.mrf.mxu0  ;;  %3350 = vmatprep.mubr.bf16.mxu1 %v8401_v15  ;;  %6781 = vmatpush3.bf16.msra.mxu1 %v7140_v40 }
 0x370   :  { %v2832_v49 = vpop.f32.mrf.mxu1 }
 0x371   :  { %v3114_v52 = vpop.f32.mrf.mxu0 }
 0x372   :  { %v9101_v37 = vadd.f32 %v3114_v52, %v2825_v46  ;;  %v2833_v60 = vpop.f32.mrf.mxu1 }
 0x373   :  { %v3116_v22 = vpop.f32.mrf.mxu0 }
 0x374   :  { %v2835_v52 = vpop.f32.mrf.mxu1 }
 0x375   :  { %v3119_v39 = vpop.f32.mrf.mxu0  ;;  %3632 = vmatmul.mubr.bf16.gmra.mxu0 %v8323_v32 }
 0x376   :  { %v9105_v19 = vadd.f32 %v3119_v39, %v2830_v11  ;;  %3639 = vmatprep.mubr.bf16.mxu0 %v8398_v23  ;;  %v2838_v22 = vpop.f32.mrf.mxu1  ;;  %3351 = vmatmul.mubr.bf16.gmra.mxu1 %v8377_v27  ;;  %v7141_v27 = vld [vmem:[%s12512_s2 + $0x210] sm:$0xff]  }
 0x377   :  { %v3121_v20 = vpop.f32.mrf.mxu0  ;;  %3358 = vmatprep.mubr.bf16.mxu1 %v8428_v9  ;;  %6782 = vmatprep.subr.bf16.mxu1 %v7141_v27 }
 0x378   :  { %v2840_v32 = vpop.f32.mrf.mxu1  ;;  %6783 = vmatpush3.bf16.msra.mxu1 %v7141_v27 }
 0x379   :  { %v3122_v13 = vpop.f32.mrf.mxu0  ;;  %v13046_v32 = vld [vmem:[#allocation29_spill] sm:$0xff] }
 0x37a   :  { %v9109_v46 = vadd.f32 %v3122_v13, %v2833_v60  ;;  %v2841_v39 = vpop.f32.mrf.mxu1 }
 0x37b   :  { %v3124_v24 = vpop.f32.mrf.mxu0 }
 0x37c   :  { %13041 = vst [vmem:[#allocation67_spill] sm:$0xff] %v9109_v46  ;;  %v2843_v60 = vpop.f32.mrf.mxu1  ;;  %v13047_v46 = vld [vmem:[#allocation37_spill] sm:$0xff] }
 0x37d   :  { %v3127_v31 = vpop.f32.mrf.mxu0  ;;  %3640 = vmatmul.mubr.bf16.gmra.mxu0 %v8355_v21 }
 0x37e   :  { %v9113_v40 = vadd.f32 %v3127_v31, %v2838_v22  ;;  %3647 = vmatprep.mubr.bf16.mxu0 %v8425_v33  ;;  %v2846_v52 = vpop.f32.mrf.mxu1  ;;  %3359 = vmatmul.mubr.bf16.gmra.mxu1 %v8398_v23  ;;  %v13045_v22 = vld [vmem:[#allocation30_spill] sm:$0xff] }
 0x37f   :  { %v3129_v11 = vpop.f32.mrf.mxu0  ;;  %3366 = vmatprep.mubr.bf16.mxu1 %v8448_v47 }
 0x380   :  { %13042 = vst [vmem:[#allocation68_spill] sm:$0xff] %v9113_v40  ;;  %v2848_v31 = vpop.f32.mrf.mxu1 }
 0x381   :  { %v3130_v49 = vpop.f32.mrf.mxu0 }
 0x382   :  { %v9117_v20 = vadd.f32 %v3130_v49, %v2841_v39  ;;  %v2849_v39 = vpop.f32.mrf.mxu1 }
 0x383   :  { %v3132_v13 = vpop.f32.mrf.mxu0 }
 0x384   :  { %13043 = vst [vmem:[#allocation69_spill] sm:$0xff] %v9117_v20  ;;  %v2851_v13 = vpop.f32.mrf.mxu1 }
 0x385   :  { %v3135_v24 = vpop.f32.mrf.mxu0  ;;  %3648 = vmatmul.mubr.bf16.gmra.mxu0 %v13045_v22  ;;  %v13050_v22 = vld [vmem:[#allocation34_spill] sm:$0xff] }
 0x386   :  { %v9124_v21 = vadd.f32 %v3135_v24, %v2846_v52  ;;  %3655 = vmatprep.mubr.bf16.mxu0 %v13046_v32  ;;  %v2854_v23 = vpop.f32.mrf.mxu1  ;;  %3367 = vmatmul.mubr.bf16.gmra.mxu1 %v8425_v33  ;;  %v13049_v24 = vld [vmem:[#allocation32_spill] sm:$0xff] }
 0x387   :  { %v3137_v11 = vpop.f32.mrf.mxu0  ;;  %3374 = vmatprep.mubr.bf16.mxu1 %v13047_v46 }
 0x388   :  { %13044 = vst [vmem:[#allocation70_spill] sm:$0xff] %v9124_v21  ;;  %v2856_v27 = vpop.f32.mrf.mxu1 }
 0x389   :  { %v3138_v49 = vpop.f32.mrf.mxu0 }
 0x38a   :  { %v9128_v60 = vadd.f32 %v3138_v49, %v2849_v39  ;;  %v2857_v11 = vpop.f32.mrf.mxu1 }
 0x38b   :  { %v3140_v20 = vpop.f32.mrf.mxu0 }
 0x38c   :  { %v2859_v49 = vpop.f32.mrf.mxu1 }
 0x38d   :  { %v3143_v40 = vpop.f32.mrf.mxu0  ;;  %3656 = vmatmul.mubr.bf16.gmra.mxu0 %v13049_v24 }
 0x38e   :  { %v9132_v52 = vadd.f32 %v3143_v40, %v2854_v23  ;;  %3663 = vmatprep.mubr.bf16.mxu0 %v13050_v22  ;;  %v2862_v13 = vpop.f32.mrf.mxu1  ;;  %3375 = vmatmul.mubr.bf16.gmra.mxu1 %v13046_v32 }
 0x38f   :  { %v3145_v31 = vpop.f32.mrf.mxu0  ;;  %3382 = vmatprep.mubr.bf16.mxu1 %v8502_v61 }
 0x390   :  { %13048 = vst [vmem:[#allocation30_spill] sm:$0xff] %v9132_v52  ;;  %v2864_v23 = vpop.f32.mrf.mxu1 }
 0x391   :  { %v3146_v21 = vpop.f32.mrf.mxu0  ;;  %v13057_v23 = vld [vmem:[#allocation5_spill] sm:$0xff] }
 0x392   :  { %v9136_v39 = vadd.f32 %v3146_v21, %v2857_v11  ;;  %v2865_v27 = vpop.f32.mrf.mxu1 }
 0x393   :  { %v3148_v20 = vpop.f32.mrf.mxu0 }
 0x394   :  { %13051 = vst [vmem:[#allocation29_spill] sm:$0xff] %v9136_v39  ;;  %v2867_v11 = vpop.f32.mrf.mxu1  ;;  %v13054_v39 = vld [vmem:[#allocation7_spill] sm:$0xff] }
 0x395   :  { %v3151_v33 = vpop.f32.mrf.mxu0  ;;  %3664 = vmatmul.mubr.bf16.gmra.mxu0 %v8434_v8 }
 0x396   :  { %v9140_v40 = vadd.f32 %v3151_v33, %v2862_v13  ;;  %3671 = vmatprep.mubr.bf16.mxu0 %v8499_v58  ;;  %v2870_v20 = vpop.f32.mrf.mxu1  ;;  %3383 = vmatmul.mubr.bf16.gmra.mxu1 %v13050_v22  ;;  %v13056_v33 = vld [vmem:[#allocation31_spill] sm:$0xff]  ;;  %v7142_v22 = vld [vmem:[%s12512_s2 + $0x208] sm:$0xff]  }
 0x397   :  { %v3153_v24 = vpop.f32.mrf.mxu0  ;;  %3390 = vmatprep.mubr.bf16.mxu1 %v13054_v39  ;;  %6784 = vmatprep.subr.bf16.mxu1 %v7142_v22 }
 0x398   :  { %13052 = vst [vmem:[#allocation37_spill] sm:$0xff] %v9140_v40  ;;  %v2872_v8 = vpop.f32.mrf.mxu1  ;;  %6785 = vmatpush3.bf16.msra.mxu1 %v7142_v22 }
 0x399   :  { %v3154_v31 = vpop.f32.mrf.mxu0 }
 0x39a   :  { %v9144_v21 = vadd.f32 %v3154_v31, %v2865_v27  ;;  %v2873_v40 = vpop.f32.mrf.mxu1 }
 0x39b   :  { %v3156_v49 = vpop.f32.mrf.mxu0 }
 0x39c   :  { %13053 = vst [vmem:[#allocation32_spill] sm:$0xff] %v9144_v21  ;;  %v2875_v31 = vpop.f32.mrf.mxu1 }
 0x39d   :  { %v3159_v32 = vpop.f32.mrf.mxu0  ;;  %3672 = vmatmul.mubr.bf16.gmra.mxu0 %v13056_v33 }
 0x39e   :  { %v9148_v13 = vadd.f32 %v3159_v32, %v2870_v20  ;;  %3679 = vmatprep.mubr.bf16.mxu0 %v13057_v23  ;;  %v2878_v49 = vpop.f32.mrf.mxu1  ;;  %3391 = vmatmul.mubr.bf16.gmra.mxu1 %v8499_v58 }
 0x39f   :  { %v3161_v24 = vpop.f32.mrf.mxu0  ;;  %3398 = vmatprep.mubr.bf16.mxu1 %v8552_v34 }
 0x3a0   :  { %13055 = vst [vmem:[#allocation34_spill] sm:$0xff] %v9148_v13  ;;  %v2880_v33 = vpop.f32.mrf.mxu1 }
 0x3a1   :  { %v3162_v52 = vpop.f32.mrf.mxu0 }
 0x3a2   :  { %v9152_v27 = vadd.f32 %v3162_v52, %v2873_v40  ;;  %v13060_v52 = vld [vmem:[#allocation12_spill] sm:$0xff]  ;;  %v2881_v8 = vpop.f32.mrf.mxu1 }
 0x3a3   :  { %v3164_v11 = vpop.f32.mrf.mxu0 }
 0x3a4   :  { %13058 = vst [vmem:[#allocation7_spill] sm:$0xff] %v9152_v27  ;;  %v2883_v11 = vpop.f32.mrf.mxu1 }
 0x3a5   :  { %v3167_v20 = vpop.f32.mrf.mxu0  ;;  %3680 = vmatmul.mubr.bf16.gmra.mxu0 %v8483_v59  ;;  %v13063_v59 = vld [vmem:[#allocation35_spill] sm:$0xff] }
 0x3a6   :  { %v9159_v32 = vadd.f32 %v3167_v20, %v2878_v49  ;;  %3687 = vmatprep.mubr.bf16.mxu0 %v13060_v52  ;;  %v2886_v58 = vpop.f32.mrf.mxu1  ;;  %3399 = vmatmul.mubr.bf16.gmra.mxu1 %v13057_v23  ;;  %v13064_v20 = vld [vmem:[#allocation8_spill] sm:$0xff] }
 0x3a7   :  { %v3169_v40 = vpop.f32.mrf.mxu0  ;;  %3406 = vmatprep.mubr.bf16.mxu1 %v8581_v51 }
 0x3a8   :  { %13059 = vst [vmem:[#allocation31_spill] sm:$0xff] %v9159_v32  ;;  %v2888_v22 = vpop.f32.mrf.mxu1 }
 0x3a9   :  { %v3170_v24 = vpop.f32.mrf.mxu0  ;;  %v13068_v22 = vld [vmem:[#allocation9_spill] sm:$0xff] }
 0x3aa   :  { %v9163_v31 = vadd.f32 %v3170_v24, %v2881_v8  ;;  %v2889_v40 = vpop.f32.mrf.mxu1 }
 0x3ab   :  { %v3172_v27 = vpop.f32.mrf.mxu0 }
 0x3ac   :  { %13061 = vst [vmem:[#allocation5_spill] sm:$0xff] %v9163_v31  ;;  %v2891_v24 = vpop.f32.mrf.mxu1 }
 0x3ad   :  { %v3175_v13 = vpop.f32.mrf.mxu0  ;;  %3688 = vmatmul.mubr.bf16.gmra.mxu0 %v13063_v59 }
 0x3ae   :  { %v9167_v49 = vadd.f32 %v3175_v13, %v2886_v58  ;;  %3695 = vmatprep.mubr.bf16.mxu0 %v13064_v20  ;;  %v2894_v11 = vpop.f32.mrf.mxu1  ;;  %3407 = vmatmul.mubr.bf16.gmra.mxu1 %v13060_v52  ;;  %v13067_v58 = vld [vmem:[#allocation10_spill] sm:$0xff] }
 0x3af   :  { %v3177_v33 = vpop.f32.mrf.mxu0  ;;  %3414 = vmatprep.mubr.bf16.mxu1 %v8608_v5 }
 0x3b0   :  { %13062 = vst [vmem:[#allocation12_spill] sm:$0xff] %v9167_v49  ;;  %v2896_v59 = vpop.f32.mrf.mxu1 }
 0x3b1   :  { %v3178_v32 = vpop.f32.mrf.mxu0  ;;  %v13073_v59 = vld [vmem:[#allocation14_spill] sm:$0xff] }
 0x3b2   :  { %v9171_v8 = vadd.f32 %v3178_v32, %v2889_v40  ;;  %v2897_v49 = vpop.f32.mrf.mxu1 }
 0x3b3   :  { %v3180_v27 = vpop.f32.mrf.mxu0 }
 0x3b4   :  { %13065 = vst [vmem:[#allocation35_spill] sm:$0xff] %v9171_v8  ;;  %v2899_v40 = vpop.f32.mrf.mxu1  ;;  %v13070_v8 = vld [vmem:[#allocation16_spill] sm:$0xff] }
 0x3b5   :  { %v3183_v23 = vpop.f32.mrf.mxu0  ;;  %3696 = vmatmul.mubr.bf16.gmra.mxu0 %v13067_v58  ;;  %v2105_v40 = vshll.u32 %v8676_v57, 16 }
 0x3b6   :  { %v9175_v13 = vadd.f32 %v3183_v23, %v2894_v11  ;;  %3703 = vmatprep.mubr.bf16.mxu0 %v13068_v22  ;;  %v2902_v27 = vpop.f32.mrf.mxu1  ;;  %3415 = vmatmul.mubr.bf16.gmra.mxu1 %v13064_v20  ;;  %v13072_v23 = vld [vmem:[#allocation6_spill] sm:$0xff] }
 0x3b7   :  { %v3185_v33 = vpop.f32.mrf.mxu0  ;;  %3422 = vmatprep.mubr.bf16.mxu1 %v13070_v8 }
 0x3b8   :  { %13066 = vst [vmem:[#allocation8_spill] sm:$0xff] %v9175_v13  ;;  %v2904_v58 = vpop.f32.mrf.mxu1 }
 0x3b9   :  { %v3186_v31 = vpop.f32.mrf.mxu0  ;;  %v2107_v58 = vrot.slane %v2105_v40, 1 }
 0x3ba   :  { %v9179_v32 = vadd.f32 %v3186_v31, %v2897_v49  ;;  %v2905_v13 = vpop.f32.mrf.mxu1 }
 0x3bb   :  { %v3188_v24 = vpop.f32.mrf.mxu0 }
 0x3bc   :  { %13069 = vst [vmem:[#allocation10_spill] sm:$0xff] %v9179_v32  ;;  %v2907_v49 = vpop.f32.mrf.mxu1 }
 0x3bd   :  { %v3191_v52 = vpop.f32.mrf.mxu0  ;;  %3704 = vmatmul.mubr.bf16.gmra.mxu0 %v13072_v23  ;;  %v1494_v23 = vsel %vm7796_vm2, %v8645_v54, 0  ;;  %v2103_v49 = vshrl.u32 %v8676_v57, 16 }
 0x3be   :  { %v9183_v11 = vadd.f32 %v3191_v52, %v2902_v27  ;;  %3711 = vmatprep.mubr.bf16.mxu0 %v13073_v59  ;;  %v2910_v20 = vpop.f32.mrf.mxu1  ;;  %3423 = vmatmul.mubr.bf16.gmra.mxu1 %v13068_v22  ;;  %v7143_v27 = vld [vmem:[%s12512_s2 + $0x200] sm:$0xff]  }
 0x3bf   :  { %v3193_v33 = vpop.f32.mrf.mxu0  ;;  %3430 = vmatprep.mubr.bf16.mxu1 %v8667_v18  ;;  %6786 = vmatprep.subr.bf16.mxu1 %v7143_v27  ;;  %v2108_v54 = vor.u32 %v2107_v58, %v2103_v49 }
 0x3c0   :  { %13071 = vst [vmem:[#allocation9_spill] sm:$0xff] %v9183_v11  ;;  %6787 = vmatpush3.bf16.msra.mxu1 %v7143_v27  ;;  %v13078_v27 = vld [vmem:[#allocation11_spill] sm:$0xff] }
 0x3c1   :  { %v3194_v21 = vpop.f32.mrf.mxu0 }
 0x3c2   :  { %v9187_v31 = vadd.f32 %v3194_v21, %v2905_v13  ;;  %v2912_v13 = vpop.f32.mrf.mxu1 }
 0x3c3   :  { %v3196_v24 = vpop.f32.mrf.mxu0 }
 0x3c4   :  { %13074 = vst [vmem:[#allocation16_spill] sm:$0xff] %v9187_v31  ;;  %v2913_v33 = vpop.f32.mrf.mxu1  ;;  %v2110_v24 = vshll.u32 %v1494_v23, 16 }
 0x3c5   :  { %v3199_v52 = vpop.f32.mrf.mxu0  ;;  %3712 = vmatmul.mubr.bf16.gmra.mxu0 %v8587_v2 }
 0x3c6   :  { %v9198_v21 = vadd.f32 %v3199_v52, %v2910_v20  ;;  %3719 = vmatprep.mubr.bf16.mxu0 %v8664_v10  ;;  %v2915_v32 = vpop.f32.mrf.mxu1  ;;  %3431 = vmatmul.mubr.bf16.gmra.mxu1 %v13073_v59  ;;  %v2112_v2 = vrot.slane %v2110_v24, 1  ;;  %v2133_v24 = vrot.slane %v1494_v23, 1 }
 0x3c7   :  { %v3201_v22 = vpop.f32.mrf.mxu0  ;;  %3438 = vmatprep.mubr.bf16.mxu1 %v8699_v17  ;;  %v2132_v32 = vrot.slane %v8676_v57, 1 }
 0x3c8   :  { %13075 = vst [vmem:[#allocation6_spill] sm:$0xff] %v9198_v21  ;;  %v2918_v52 = vpop.f32.mrf.mxu1  ;;  %v2113_v21 = vsel %vm1511_vm3, %v2108_v54, %v2112_v2 }
 0x3c9   :  { %v3202_v31 = vpop.f32.mrf.mxu0 }
 0x3ca   :  { %v9203_v11 = vadd.f32 %v3202_v31, %v2913_v33  ;;  %v2920_v22 = vpop.f32.mrf.mxu1 }
 0x3cb   :  { %v3204_v20 = vpop.f32.mrf.mxu0  ;;  %v13081_v22 = vld [vmem:[#allocation28_spill] sm:$0xff] }
 0x3cc   :  { %13076 = vst [vmem:[#allocation14_spill] sm:$0xff] %v9203_v11  ;;  %v2921_v33 = vpop.f32.mrf.mxu1 }
 0x3cd   :  { %v3207_v40 = vpop.f32.mrf.mxu0  ;;  %3720 = vmatmul.mubr.bf16.gmra.mxu0 %v13078_v27 }
 0x3ce   :  { %v9207_v13 = vadd.f32 %v3207_v40, %v2918_v52  ;;  %3727 = vmatprep.mubr.bf16.mxu0 %v2113_v21  ;;  %v2923_v59 = vpop.f32.mrf.mxu1  ;;  %3439 = vmatmul.mubr.bf16.gmra.mxu1 %v8664_v10  ;;  %v9216_v52 = vsel %vm1977_vm4, %v2132_v32, %v2133_v24 }
 0x3cf   :  { %v3209_v31 = vpop.f32.mrf.mxu0  ;;  %3446 = vmatprep.mubr.bf16.mxu1 %v9216_v52 }
 0x3d0   :  { %13077 = vst [vmem:[#allocation71_spill] sm:$0xff] %v9207_v13  ;;  %v2926_v11 = vpop.f32.mrf.mxu1 }
 0x3d1   :  { %v3210_v58 = vpop.f32.mrf.mxu0 }
 0x3d2   :  { %v9212_v49 = vadd.f32 %v3210_v58, %v2921_v33  ;;  %v2928_v2 = vpop.f32.mrf.mxu1 }
 0x3d3   :  { %v3212_v20 = vpop.f32.mrf.mxu0 }
 0x3d4   :  { %13079 = vst [vmem:[#allocation11_spill] sm:$0xff] %v9212_v49  ;;  %v2929_v31 = vpop.f32.mrf.mxu1  ;;  %v13085_v20 = vld [vmem:[#allocation15_spill] sm:$0xff] }
 0x3d5   :  { %v3215_v40 = vpop.f32.mrf.mxu0  ;;  %3728 = vmatmul.mubr.bf16.gmra.mxu0 %v8676_v57 }
 0x3d6   :  { %v9219_v54 = vadd.f32 %v3215_v40, %v2926_v11  ;;  %3735 = vmatprep.mubr.bf16.mxu0 %v13081_v22  ;;  %v2931_v58 = vpop.f32.mrf.mxu1  ;;  %3447 = vmatmul.mubr.bf16.gmra.mxu1 %v2113_v21  ;;  %v13084_v11 = vld [vmem:[#allocation24_spill] sm:$0xff] }
 0x3d7   :  { %v3217_v27 = vpop.f32.mrf.mxu0  ;;  %3454 = vmatprep.mubr.bf16.mxu1 %v8751_v56 }
 0x3d8   :  { %13080 = vst [vmem:[#allocation72_spill] sm:$0xff] %v9219_v54  ;;  %v2934_v59 = vpop.f32.mrf.mxu1 }
 0x3d9   :  { %v3218_v23 = vpop.f32.mrf.mxu0 }
 0x3da   :  { %v9223_v33 = vadd.f32 %v3218_v23, %v2929_v31  ;;  %v2936_v57 = vpop.f32.mrf.mxu1 }
 0x3db   :  { %v3220_v10 = vpop.f32.mrf.mxu0  ;;  %v13090_v57 = vld [vmem:[#allocation20_spill] sm:$0xff] }
 0x3dc   :  { %13082 = vst [vmem:[#allocation28_spill] sm:$0xff] %v9223_v33  ;;  %v2937_v2 = vpop.f32.mrf.mxu1  ;;  %v13087_v10 = vld [vmem:[#allocation23_spill] sm:$0xff] }
 0x3dd   :  { %v3223_v32 = vpop.f32.mrf.mxu0  ;;  %3736 = vmatmul.mubr.bf16.gmra.mxu0 %v13084_v11 }
 0x3de   :  { %v9226_v24 = vadd.f32 %v3223_v32, %v2934_v59  ;;  %3743 = vmatprep.mubr.bf16.mxu0 %v13085_v20  ;;  %v2939_v31 = vpop.f32.mrf.mxu1  ;;  %3455 = vmatmul.mubr.bf16.gmra.mxu1 %v13087_v10  ;;  %v13089_v59 = vld [vmem:[#allocation26_spill] sm:$0xff] }
 0x3df   :  { %v3225_v40 = vpop.f32.mrf.mxu0  ;;  %3462 = vmatprep.mubr.bf16.mxu1 %v8772_v12 }
 0x3e0   :  { %13083 = vst [vmem:[#allocation73_spill] sm:$0xff] %v9226_v24  ;;  %v2942_v58 = vpop.f32.mrf.mxu1 }
 0x3e1   :  { %v3226_v27 = vpop.f32.mrf.mxu0 }
 0x3e2   :  { %v9230_v54 = vadd.f32 %v3226_v27, %v2937_v2  ;;  %v2944_v32 = vpop.f32.mrf.mxu1 }
 0x3e3   :  { %v3228_v23 = vpop.f32.mrf.mxu0  ;;  %v13094_v32 = vld [vmem:[#allocation19_spill] sm:$0xff] }
 0x3e4   :  { %13086 = vst [vmem:[#allocation24_spill] sm:$0xff] %v9230_v54  ;;  %v2945_v24 = vpop.f32.mrf.mxu1 }
 0x3e5   :  { %v3231_v21 = vpop.f32.mrf.mxu0  ;;  %3744 = vmatmul.mubr.bf16.gmra.mxu0 %v13089_v59 }
 0x3e6   :  { %v9234_v56 = vadd.f32 %v3231_v21, %v2942_v58  ;;  %3751 = vmatprep.mubr.bf16.mxu0 %v13090_v57  ;;  %v2947_v27 = vpop.f32.mrf.mxu1  ;;  %3463 = vmatmul.mubr.bf16.gmra.mxu1 %v13085_v20  ;;  %v13093_v21 = vld [vmem:[#allocation13_spill] sm:$0xff] }
 0x3e7   :  { %v3233_v40 = vpop.f32.mrf.mxu0  ;;  %3470 = vmatprep.mubr.bf16.mxu1 %v8793_v4 }
 0x3e8   :  { %13088 = vst [vmem:[#allocation15_spill] sm:$0xff] %v9234_v56  ;;  %v2950_v23 = vpop.f32.mrf.mxu1 }
 0x3e9   :  { %v3234_v33 = vpop.f32.mrf.mxu0 }
 0x3ea   :  { %v9238_v2 = vadd.f32 %v3234_v33, %v2945_v24  ;;  %v2952_v59 = vpop.f32.mrf.mxu1 }
 0x3eb   :  { %v3236_v31 = vpop.f32.mrf.mxu0  ;;  %v13098_v59 = vld [vmem:[#allocation22_spill] sm:$0xff] }
 0x3ec   :  { %13091 = vst [vmem:[#allocation23_spill] sm:$0xff] %v9238_v2  ;;  %v2953_v56 = vpop.f32.mrf.mxu1 }
 0x3ed   :  { %v3239_v10 = vpop.f32.mrf.mxu0  ;;  %3752 = vmatmul.mubr.bf16.gmra.mxu0 %v13093_v21 }
 0x3ee   :  { %v9242_v58 = vadd.f32 %v3239_v10, %v2950_v23  ;;  %3759 = vmatprep.mubr.bf16.mxu0 %v13094_v32  ;;  %v2955_v24 = vpop.f32.mrf.mxu1  ;;  %3471 = vmatmul.mubr.bf16.gmra.mxu1 %v13090_v57  ;;  %v13097_v10 = vld [vmem:[#allocation18_spill] sm:$0xff] }
 0x3ef   :  { %v3241_v40 = vpop.f32.mrf.mxu0  ;;  %3478 = vmatprep.mubr.bf16.mxu1 %v8814_v16 }
 0x3f0   :  { %13092 = vst [vmem:[#allocation26_spill] sm:$0xff] %v9242_v58  ;;  %v2958_v31 = vpop.f32.mrf.mxu1 }
 0x3f1   :  { %v3242_v54 = vpop.f32.mrf.mxu0 }
 0x3f2   :  { %v9246_v33 = vadd.f32 %v3242_v54, %v2953_v56  ;;  %v2960_v21 = vpop.f32.mrf.mxu1 }
 0x3f3   :  { %v3244_v27 = vpop.f32.mrf.mxu0  ;;  %v13102_v21 = vld [vmem:[#allocation39_spill] sm:$0xff] }
 0x3f4   :  { %13095 = vst [vmem:[#allocation20_spill] sm:$0xff] %v9246_v33  ;;  %v2961_v58 = vpop.f32.mrf.mxu1 }
 0x3f5   :  { %v3247_v20 = vpop.f32.mrf.mxu0  ;;  %3760 = vmatmul.mubr.bf16.gmra.mxu0 %v13097_v10 }
 0x3f6   :  { %v9250_v23 = vadd.f32 %v3247_v20, %v2958_v31  ;;  %3767 = vmatprep.mubr.bf16.mxu0 %v13098_v59  ;;  %v2963_v56 = vpop.f32.mrf.mxu1  ;;  %3479 = vmatmul.mubr.bf16.gmra.mxu1 %v13094_v32  ;;  %v13101_v20 = vld [vmem:[#allocation17_spill] sm:$0xff] }
 0x3f7   :  { %v3249_v40 = vpop.f32.mrf.mxu0  ;;  %3486 = vmatprep.mubr.bf16.mxu1 %v8835_v7 }
 0x3f8   :  { %13096 = vst [vmem:[#allocation13_spill] sm:$0xff] %v9250_v23  ;;  %v2966_v27 = vpop.f32.mrf.mxu1 }
 0x3f9   :  { %v3250_v2 = vpop.f32.mrf.mxu0 }
 0x3fa   :  { %v9254_v54 = vadd.f32 %v3250_v2, %v2961_v58  ;;  %v2968_v10 = vpop.f32.mrf.mxu1 }
 0x3fb   :  { %v3252_v24 = vpop.f32.mrf.mxu0  ;;  %v13107_v10 = vld [vmem:[#allocation41_spill] sm:$0xff] }
 0x3fc   :  { %13099 = vst [vmem:[#allocation19_spill] sm:$0xff] %v9254_v54  ;;  %v2969_v23 = vpop.f32.mrf.mxu1  ;;  %v13104_v54 = vld [vmem:[#allocation42_spill] sm:$0xff] }
 0x3fd   :  { %v3255_v57 = vpop.f32.mrf.mxu0  ;;  %3768 = vmatmul.mubr.bf16.gmra.mxu0 %v13101_v20 }
 0x3fe   :  { %v9258_v31 = vadd.f32 %v3255_v57, %v2966_v27  ;;  %3775 = vmatprep.mubr.bf16.mxu0 %v13102_v21  ;;  %v2971_v58 = vpop.f32.mrf.mxu1  ;;  %3487 = vmatmul.mubr.bf16.gmra.mxu1 %v13098_v59  ;;  %v13106_v57 = vld [vmem:[#allocation21_spill] sm:$0xff] }
 0x3ff   :  { %v3257_v40 = vpop.f32.mrf.mxu0  ;;  %3494 = vmatprep.mubr.bf16.mxu1 %v13104_v54 }
 0x400   :  { %13100 = vst [vmem:[#allocation18_spill] sm:$0xff] %v9258_v31  ;;  %v2974_v24 = vpop.f32.mrf.mxu1 }
 0x401   :  { %v3258_v33 = vpop.f32.mrf.mxu0 }
 0x402   :  { %v9262_v2 = vadd.f32 %v3258_v33, %v2969_v23  ;;  %v2976_v20 = vpop.f32.mrf.mxu1 }
 0x403   :  { %v3260_v56 = vpop.f32.mrf.mxu0  ;;  %v13112_v20 = vld [vmem:[#allocation44_spill] sm:$0xff] }
 0x404   :  { %13103 = vst [vmem:[#allocation22_spill] sm:$0xff] %v9262_v2  ;;  %v2977_v31 = vpop.f32.mrf.mxu1  ;;  %v13109_v2 = vld [vmem:[#allocation45_spill] sm:$0xff] }
 0x405   :  { %v3263_v32 = vpop.f32.mrf.mxu0  ;;  %3776 = vmatmul.mubr.bf16.gmra.mxu0 %v13106_v57 }
 0x406   :  { %v9266_v27 = vadd.f32 %v3263_v32, %v2974_v24  ;;  %3783 = vmatprep.mubr.bf16.mxu0 %v13107_v10  ;;  %v2979_v23 = vpop.f32.mrf.mxu1  ;;  %3495 = vmatmul.mubr.bf16.gmra.mxu1 %v13102_v21  ;;  %v13111_v32 = vld [vmem:[#allocation38_spill] sm:$0xff] }
 0x407   :  { %v3265_v40 = vpop.f32.mrf.mxu0  ;;  %3502 = vmatprep.mubr.bf16.mxu1 %v13109_v2 }
 0x408   :  { %13105 = vst [vmem:[#allocation17_spill] sm:$0xff] %v9266_v27  ;;  %v2982_v56 = vpop.f32.mrf.mxu1 }
 0x409   :  { %v3266_v49 = vpop.f32.mrf.mxu0 }
 0x40a   :  { %v9270_v33 = vadd.f32 %v3266_v49, %v2977_v31  ;;  %v2984_v57 = vpop.f32.mrf.mxu1 }
 0x40b   :  { %v3268_v58 = vpop.f32.mrf.mxu0  ;;  %v13117_v57 = vld [vmem:[#allocation47_spill] sm:$0xff] }
 0x40c   :  { %13108 = vst [vmem:[#allocation39_spill] sm:$0xff] %v9270_v33  ;;  %v2985_v27 = vpop.f32.mrf.mxu1  ;;  %v13114_v33 = vld [vmem:[#allocation48_spill] sm:$0xff] }
 0x40d   :  { %v3271_v59 = vpop.f32.mrf.mxu0  ;;  %3784 = vmatmul.mubr.bf16.gmra.mxu0 %v13111_v32 }
 0x40e   :  { %v9274_v24 = vadd.f32 %v3271_v59, %v2982_v56  ;;  %3791 = vmatprep.mubr.bf16.mxu0 %v13112_v20  ;;  %v2987_v31 = vpop.f32.mrf.mxu1  ;;  %3503 = vmatmul.mubr.bf16.gmra.mxu1 %v13107_v10  ;;  %v13116_v59 = vld [vmem:[#allocation40_spill] sm:$0xff] }
 0x40f   :  { %v3273_v40 = vpop.f32.mrf.mxu0  ;;  %3510 = vmatprep.mubr.bf16.mxu1 %v13114_v33 }
 0x410   :  { %13110 = vst [vmem:[#allocation21_spill] sm:$0xff] %v9274_v24  ;;  %v2990_v58 = vpop.f32.mrf.mxu1 }
 0x411   :  { %v3274_v13 = vpop.f32.mrf.mxu0 }
 0x412   :  { %v9278_v49 = vadd.f32 %v3274_v13, %v2985_v27  ;;  %v2992_v32 = vpop.f32.mrf.mxu1 }
 0x413   :  { %v3276_v23 = vpop.f32.mrf.mxu0  ;;  %v13122_v32 = vld [vmem:[#allocation52_spill] sm:$0xff] }
 0x414   :  { %13113 = vst [vmem:[#allocation41_spill] sm:$0xff] %v9278_v49  ;;  %v2993_v24 = vpop.f32.mrf.mxu1  ;;  %v13119_v49 = vld [vmem:[#allocation53_spill] sm:$0xff] }
 0x415   :  { %v3279_v21 = vpop.f32.mrf.mxu0  ;;  %3792 = vmatmul.mubr.bf16.gmra.mxu0 %v13116_v59 }
 0x416   :  { %v9282_v56 = vadd.f32 %v3279_v21, %v2990_v58  ;;  %3799 = vmatprep.mubr.bf16.mxu0 %v13117_v57  ;;  %v2995_v27 = vpop.f32.mrf.mxu1  ;;  %3511 = vmatmul.mubr.bf16.gmra.mxu1 %v13112_v20  ;;  %v13121_v21 = vld [vmem:[#allocation43_spill] sm:$0xff] }
 0x417   :  { %v3281_v40 = vpop.f32.mrf.mxu0  ;;  %3518 = vmatprep.mubr.bf16.mxu1 %v13119_v49  ;;  %v13124_v27 = vld [vmem:[#allocation36_spill] sm:$0xff] }
 0x418   :  { %13115 = vst [vmem:[#allocation38_spill] sm:$0xff] %v9282_v56  ;;  %v2998_v23 = vpop.f32.mrf.mxu1 }
 0x419   :  { %v3282_v2 = vpop.f32.mrf.mxu0 }
 0x41a   :  { %v9286_v13 = vadd.f32 %v3282_v2, %v2993_v24  ;;  %v3000_v59 = vpop.f32.mrf.mxu1 }
 0x41b   :  { %v3284_v31 = vpop.f32.mrf.mxu0 }
 0x41c   :  { %13118 = vst [vmem:[#allocation44_spill] sm:$0xff] %v9286_v13  ;;  %v3001_v56 = vpop.f32.mrf.mxu1  ;;  %v13125_v31 = vld [vmem:[#allocation49_spill] sm:$0xff] }
 0x41d   :  { %v3287_v10 = vpop.f32.mrf.mxu0  ;;  %3800 = vmatmul.mubr.bf16.gmra.mxu0 %v13121_v21  ;;  %v3040_v13 = vadd.f32 %v13125_v31, %v13124_v27  ;;  %v13126_v21 = vld [vmem:[#allocation46_spill] sm:$0xff] }
 0x41e   :  { %v9290_v58 = vadd.f32 %v3287_v10, %v2998_v23  ;;  %3807 = vmatprep.mubr.bf16.mxu0 %v13122_v32  ;;  %v3003_v24 = vpop.f32.mrf.mxu1  ;;  %3519 = vmatmul.mubr.bf16.gmra.mxu1 %v13117_v57 }
 0x41f   :  { %v3289_v40 = vpop.f32.mrf.mxu0  ;;  %3526 = vmatprep.mubr.bf16.mxu1 %v8953_v62 }
 0x420   :  { %13120 = vst [vmem:[#allocation40_spill] sm:$0xff] %v9290_v58  ;;  %v3328_v54 = vpop.f32.mrf.mxu1  ;;  %v13127_v40 = vld [vmem:[#allocation33_spill] sm:$0xff]  ;;  %v13128_v58 = vld [vmem:[#allocation51_spill] sm:$0xff] }
 0x421   :  { %v3290_v33 = vpop.f32.mrf.mxu0  ;;  %v3329_v23 = vadd.f32 %v3328_v54, %v3040_v13  ;;  %v3043_v49 = vadd.f32 %v13128_v58, %v13127_v40 }
 0x422   :  { %v9294_v2 = vadd.f32 %v3290_v33, %v3001_v56  ;;  %v3330_v59 = vpop.f32.mrf.mxu1  ;;  %v13130_v56 = vld [vmem:[#allocation56_spill] sm:$0xff] }
 0x423   :  { %v3292_v20 = vpop.f32.mrf.mxu0 }
 0x424   :  { %13123 = vst [vmem:[#allocation47_spill] sm:$0xff] %v9294_v2  ;;  %v3331_v27 = vpop.f32.mrf.mxu1 }
 0x425   :  { %v3617_v10 = vpop.f32.mrf.mxu0  ;;  %3808 = vmatmul.mubr.bf16.gmra.mxu0 %v13126_v21  ;;  %v3332_v31 = vadd.f32 %v3331_v27, %v3043_v49  ;;  %v13132_v21 = vld [vmem:[#allocation54_spill] sm:$0xff]  ;;  %v13135_v27 = vld [vmem:[#allocation55_spill] sm:$0xff] }
 0x426   :  { %v9303_v33 = vadd.f32 %v3617_v10, %v3329_v23  ;;  %3815 = vmatprep.mubr.bf16.mxu0 %v13130_v56  ;;  %v3333_v2 = vpop.f32.mrf.mxu1  ;;  %3527 = vmatmul.mubr.bf16.gmra.mxu1 %v13122_v32  ;;  %v13133_v23 = vld [vmem:[#allocation50_spill] sm:$0xff] }
 0x427   :  { %v3619_v24 = vpop.f32.mrf.mxu0  ;;  %3534 = vmatprep.mubr.bf16.mxu1 %v8980_v63 }
 0x428   :  { %13129 = vst [vmem:[#allocation43_spill] sm:$0xff] %v9303_v33  ;;  %v3336_v13 = vpop.f32.mrf.mxu1  ;;  %v13134_v24 = vld [vmem:[#allocation59_spill] sm:$0xff] }
 0x429   :  { %v3620_v20 = vpop.f32.mrf.mxu0  ;;  %v3337_v59 = vadd.f32 %v3336_v13, %v13132_v21  ;;  %v13137_v21 = vld [vmem:[#allocation57_spill] sm:$0xff] }
 0x42a   :  { %v9306_v57 = vadd.f32 %v3620_v20, %v3332_v31  ;;  %v3338_v10 = vpop.f32.mrf.mxu1 }
 0x42b   :  { %v3622_v54 = vpop.f32.mrf.mxu0  ;;  %v13138_v10 = vld [vmem:[#allocation62_spill] sm:$0xff] }
 0x42c   :  { %13131 = vst [vmem:[#allocation52_spill] sm:$0xff] %v9306_v57  ;;  %v3339_v2 = vpop.f32.mrf.mxu1 }
 0x42d   :  { %v3625_v58 = vpop.f32.mrf.mxu0  ;;  %3816 = vmatmul.mubr.bf16.gmra.mxu0 %v13133_v23  ;;  %v3340_v31 = vadd.f32 %v3339_v2, %v13135_v27  ;;  %v13139_v27 = vld [vmem:[#allocation58_spill] sm:$0xff] }
 0x42e   :  { %v9312_v40 = vadd.f32 %v3625_v58, %v3337_v59  ;;  %3823 = vmatprep.mubr.bf16.mxu0 %v13134_v24  ;;  %v3341_v54 = vpop.f32.mrf.mxu1  ;;  %3535 = vmatmul.mubr.bf16.gmra.mxu1 %v13130_v56 }
 0x42f   :  { %v3627_v49 = vpop.f32.mrf.mxu0  ;;  %3542 = vmatprep.mubr.bf16.mxu1 %v9005_v41 }
 0x430   :  { %v3344_v13 = vpop.f32.mrf.mxu1 }
 0x431   :  { %v3628_v20 = vpop.f32.mrf.mxu0  ;;  %v3345_v33 = vadd.f32 %v3344_v13, %v13137_v21  ;;  %v13140_v21 = vld [vmem:[#allocation60_spill] sm:$0xff] }
 0x432   :  { %v9316_v57 = vadd.f32 %v3628_v20, %v3340_v31  ;;  %v3346_v58 = vpop.f32.mrf.mxu1 }
 0x433   :  { %v3630_v32 = vpop.f32.mrf.mxu0  ;;  %v13142_v58 = vld [vmem:[#allocation65_spill] sm:$0xff] }
 0x434   :  { %13136 = vst [vmem:[#allocation36_spill] sm:$0xff] %v9316_v57  ;;  %v3347_v2 = vpop.f32.mrf.mxu1 }
 0x435   :  { %v3633_v59 = vpop.f32.mrf.mxu0  ;;  %3824 = vmatmul.mubr.bf16.gmra.mxu0 %v8931_v50  ;;  %v3348_v31 = vadd.f32 %v3347_v2, %v13139_v27  ;;  %v13143_v27 = vld [vmem:[#allocation61_spill] sm:$0xff] }
 0x436   :  { %v9322_v23 = vadd.f32 %v3633_v59, %v3345_v33  ;;  %3831 = vmatprep.mubr.bf16.mxu0 %v13138_v10  ;;  %v3349_v54 = vpop.f32.mrf.mxu1  ;;  %3543 = vmatmul.mubr.bf16.gmra.mxu1 %v13134_v24  ;;  %v2117_v24 = vshll.u32 %v9055_v25, 16 }
 0x437   :  { %v3635_v49 = vpop.f32.mrf.mxu0  ;;  %3550 = vmatprep.mubr.bf16.mxu1 %v9029_v44 }
 0x438   :  { %v3352_v13 = vpop.f32.mrf.mxu1 }
 0x439   :  { %v3636_v20 = vpop.f32.mrf.mxu0  ;;  %v3353_v57 = vadd.f32 %v3352_v13, %v13140_v21 }
 0x43a   :  { %v9326_v32 = vadd.f32 %v3636_v20, %v3348_v31  ;;  %v3354_v33 = vpop.f32.mrf.mxu1 }
 0x43b   :  { %v3638_v56 = vpop.f32.mrf.mxu0 }
 0x43c   :  { %v3355_v2 = vpop.f32.mrf.mxu1 }
 0x43d   :  { %v3641_v50 = vpop.f32.mrf.mxu0  ;;  %3832 = vmatmul.mubr.bf16.gmra.mxu0 %v8959_v55  ;;  %v3356_v31 = vadd.f32 %v3355_v2, %v13143_v27  ;;  %v13145_v55 = vld [vmem:[#allocation63_spill] sm:$0xff]  ;;  %v2119_v2 = vrot.slane %v2117_v24, 1 }
 0x43e   :  { %v9332_v59 = vadd.f32 %v3641_v50, %v3353_v57  ;;  %3839 = vmatprep.mubr.bf16.mxu0 %v13142_v58  ;;  %v3357_v54 = vpop.f32.mrf.mxu1  ;;  %3551 = vmatmul.mubr.bf16.gmra.mxu1 %v13138_v10  ;;  %v1510_v57 = vsel %vm7796_vm2, %v9033_v14, 0  ;;  %v2115_v10 = vshrl.u32 %v9055_v25, 16 }
 0x43f   :  { %v3643_v49 = vpop.f32.mrf.mxu0  ;;  %3558 = vmatprep.mubr.bf16.mxu1 %v9049_v26  ;;  %v2122_v54 = vshll.u32 %v1510_v57, 16 }
 0x440   :  { %13141 = vst [vmem:[#allocation49_spill] sm:$0xff] %v9332_v59  ;;  %v3360_v21 = vpop.f32.mrf.mxu1  ;;  %v2120_v43 = vor.u32 %v2119_v2, %v2115_v10 }
 0x441   :  { %v3644_v20 = vpop.f32.mrf.mxu0  ;;  %v3361_v33 = vadd.f32 %v3360_v21, %v13145_v55  ;;  %v2124_v24 = vrot.slane %v2122_v54, 1 }
 0x442   :  { %v9337_v56 = vadd.f32 %v3644_v20, %v3356_v31  ;;  %v3362_v49 = vpop.f32.mrf.mxu1 }
 0x443   :  { %v3646_v13 = vpop.f32.mrf.mxu0 }
 0x444   :  { %13144 = vst [vmem:[#allocation46_spill] sm:$0xff] %v9337_v56  ;;  %v3363_v20 = vpop.f32.mrf.mxu1  ;;  %v13146_v13 = vld [vmem:[#allocation64_spill] sm:$0xff] }
 0x445   :  { %v3649_v50 = vpop.f32.mrf.mxu0  ;;  %3840 = vmatmul.mubr.bf16.gmra.mxu0 %v8986_v6  ;;  %v3364_v21 = vadd.f32 %v3363_v20, %v13146_v13  ;;  %v2125_v20 = vsel %vm1511_vm3, %v2120_v43, %v2124_v24 }
 0x446   :  { %v9346_v27 = vadd.f32 %v3649_v50, %v3361_v33  ;;  %3847 = vmatprep.mubr.bf16.mxu0 %v9046_v45  ;;  %v3365_v56 = vpop.f32.mrf.mxu1  ;;  %3559 = vmatmul.mubr.bf16.gmra.mxu1 %v13142_v58  ;;  %v13147_v33 = vld [vmem:[#allocation66_spill] sm:$0xff] }
 0x447   :  { %v3651_v31 = vpop.f32.mrf.mxu0  ;;  %3566 = vmatprep.mubr.bf16.mxu1 %v9065_v53 }
 0x448   :  { %v3368_v6 = vpop.f32.mrf.mxu1 }
 0x449   :  { %v3652_v55 = vpop.f32.mrf.mxu0  ;;  %v3369_v50 = vadd.f32 %v3368_v6, %v13147_v33 }
 0x44a   :  { %v9351_v14 = vadd.f32 %v3652_v55, %v3364_v21  ;;  %v3370_v31 = vpop.f32.mrf.mxu1  ;;  %v2136_v21 = vrot.slane %v1510_v57, 1 }
 0x44b   :  { %v3654_v59 = vpop.f32.mrf.mxu0 }
 0x44c   :  { %v3371_v2 = vpop.f32.mrf.mxu1  ;;  %v2135_v59 = vrot.slane %v9055_v25, 1 }
 0x44d   :  { %v3657_v49 = vpop.f32.mrf.mxu0  ;;  %3848 = vmatmul.mubr.bf16.gmra.mxu0 %v9011_v42  ;;  %v3372_v58 = vadd.f32 %v3371_v2, %v9042_v38 }
 0x44e   :  { %v9358_v13 = vadd.f32 %v3657_v49, %v3369_v50  ;;  %3855 = vmatprep.mubr.bf16.mxu0 %v2125_v20  ;;  %v3373_v54 = vpop.f32.mrf.mxu1  ;;  %3567 = vmatmul.mubr.bf16.gmra.mxu1 %v9046_v45  ;;  %v9366_v42 = vsel %vm1977_vm4, %v2135_v59, %v2136_v21 }
 0x44f   :  { %v3659_v56 = vpop.f32.mrf.mxu0  ;;  %3574 = vmatprep.mubr.bf16.mxu1 %v9366_v42 }
 0x450   :  { %v3376_v33 = vpop.f32.mrf.mxu1 }
 0x451   :  { %v3660_v10 = vpop.f32.mrf.mxu0  ;;  %v3377_v43 = vadd.f32 %v3376_v33, %v9057_v3 }
 0x452   :  { %v9362_v55 = vadd.f32 %v3660_v10, %v3372_v58  ;;  %v3378_v38 = vpop.f32.mrf.mxu1 }
 0x453   :  { %v3662_v6 = vpop.f32.mrf.mxu0 }
 0x454   :  { %v3379_v49 = vpop.f32.mrf.mxu1 }
 0x455   :  { %v3665_v24 = vpop.f32.mrf.mxu0  ;;  %3856 = vmatmul.mubr.bf16.gmra.mxu0 %v9055_v25  ;;  %v3380_v31 = vadd.f32 %v3379_v49, %v9061_v0 }
 0x456   :  { %v9371_v50 = vadd.f32 %v3665_v24, %v3377_v43  ;;  %3863 = vmatprep.mubr.bf16.mxu0 %v13081_v22  ;;  %v3381_v56 = vpop.f32.mrf.mxu1  ;;  %3575 = vmatmul.mubr.bf16.gmra.mxu1 %v2125_v20 }
 0x457   :  { %v3667_v57 = vpop.f32.mrf.mxu0  ;;  %6788 = vmatprep.mubr.bf16.mxu1 %v8345_v29 }
 0x458   :  { %v3384_v3 = vpop.f32.mrf.mxu1 }
 0x459   :  { %v3668_v45 = vpop.f32.mrf.mxu0  ;;  %v3385_v58 = vadd.f32 %v3384_v3, %v9069_v1 }
 0x45a   :  { %v9375_v2 = vadd.f32 %v3668_v45, %v3380_v31  ;;  %v3386_v10 = vpop.f32.mrf.mxu1 }
 0x45b   :  { %v3670_v59 = vpop.f32.mrf.mxu0 }
 0x45c   :  { %v3387_v21 = vpop.f32.mrf.mxu1 }
 0x45d   :  { %v3673_v25 = vpop.f32.mrf.mxu0  ;;  %3864 = vmatmul.mubr.bf16.gmra.mxu0 %v13084_v11  ;;  %v3388_v0 = vadd.f32 %v3387_v21, %v9072_v48 }
 0x45e   :  { %v9380_v22 = vadd.f32 %v3673_v25, %v3385_v58  ;;  %v3389_v33 = vpop.f32.mrf.mxu1  ;;  %6789 = vmatmul.mubr.bf16.vlgmr.msra.gmra.mxu1 %v8380_v35 }
 0x45f   :  { %v3675_v54 = vpop.f32.mrf.mxu0  ;;  %6792 = vmatprep.mubr.bf16.mxu1 %v8401_v15 }
 0x460   :  { %v3392_v20 = vpop.f32.mrf.mxu1 }
 0x461   :  { %v3676_v6 = vpop.f32.mrf.mxu0  ;;  %v3393_v29 = vadd.f32 %v3392_v20, %v9080_v36 }
 0x462   :  { %v9383_v43 = vadd.f32 %v3676_v6, %v3388_v0  ;;  %v3394_v11 = vpop.f32.mrf.mxu1 }
 0x463   :  { %v3678_v24 = vpop.f32.mrf.mxu0 }
 0x464   :  { %v3395_v49 = vpop.f32.mrf.mxu1 }
 0x465   :  { %v3681_v1 = vpop.f32.mrf.mxu0  ;;  %v3396_v48 = vadd.f32 %v3395_v49, %v9087_v30 }
 0x466   :  { %v9388_v38 = vadd.f32 %v3681_v1, %v3393_v29  ;;  %v3397_v45 = vpop.f32.mrf.mxu1  ;;  %6793 = vmatmul.mubr.bf16.gmra.mxu1 %v8428_v9  ;;  %v13148_v1 = vld [vmem:[#allocation67_spill] sm:$0xff] }
 0x467   :  { %v3683_v57 = vpop.f32.mrf.mxu0  ;;  %6796 = vmatprep.mubr.bf16.mxu1 %v8448_v47 }
 0x468   :  { %v3400_v3 = vpop.f32.mrf.mxu1 }
 0x469   :  { %v3684_v31 = vpop.f32.mrf.mxu0  ;;  %v3401_v35 = vadd.f32 %v3400_v3, %v9094_v28 }
 0x46a   :  { %v9391_v56 = vadd.f32 %v3684_v31, %v3396_v48  ;;  %v3402_v36 = vpop.f32.mrf.mxu1 }
 0x46b   :  { %v3686_v59 = vpop.f32.mrf.mxu0 }
 0x46c   :  { %v3403_v10 = vpop.f32.mrf.mxu1 }
 0x46d   :  { %v3689_v15 = vpop.f32.mrf.mxu0  ;;  %v3404_v30 = vadd.f32 %v3403_v10, %v9101_v37 }
 0x46e   :  { %v9396_v58 = vadd.f32 %v3689_v15, %v3401_v35  ;;  %v3405_v21 = vpop.f32.mrf.mxu1  ;;  %6797 = vmatmul.mubr.bf16.gmra.mxu1 %v13047_v46  ;;  %v13149_v46 = vld [vmem:[#allocation68_spill] sm:$0xff]  ;;  %v13150_v15 = vld [vmem:[#allocation69_spill] sm:$0xff] }
 0x46f   :  { %v3691_v25 = vpop.f32.mrf.mxu0  ;;  %6800 = vmatprep.mubr.bf16.mxu1 %v8502_v61 }
 0x470   :  { %v3408_v33 = vpop.f32.mrf.mxu1 }
 0x471   :  { %v3692_v54 = vpop.f32.mrf.mxu0  ;;  %v3409_v9 = vadd.f32 %v3408_v33, %v9105_v19 }
 0x472   :  { %v9399_v0 = vadd.f32 %v3692_v54, %v3404_v30  ;;  %v3410_v28 = vpop.f32.mrf.mxu1 }
 0x473   :  { %v3694_v6 = vpop.f32.mrf.mxu0 }
 0x474   :  { %v3411_v29 = vpop.f32.mrf.mxu1 }
 0x475   :  { %v3697_v47 = vpop.f32.mrf.mxu0  ;;  %v3412_v37 = vadd.f32 %v3411_v29, %v13148_v1 }
 0x476   :  { %v9404_v24 = vadd.f32 %v3697_v47, %v3409_v9  ;;  %v3413_v57 = vpop.f32.mrf.mxu1  ;;  %6801 = vmatmul.mubr.bf16.gmra.mxu1 %v13054_v39  ;;  %v13151_v39 = vld [vmem:[#allocation70_spill] sm:$0xff] }
 0x477   :  { %v3699_v20 = vpop.f32.mrf.mxu0  ;;  %6804 = vmatprep.mubr.bf16.mxu1 %v8552_v34 }
 0x478   :  { %v3416_v31 = vpop.f32.mrf.mxu1 }
 0x479   :  { %v3700_v11 = vpop.f32.mrf.mxu0  ;;  %v3417_v19 = vadd.f32 %v3416_v31, %v13149_v46 }
 0x47a   :  { %v9407_v49 = vadd.f32 %v3700_v11, %v3412_v37  ;;  %v3418_v45 = vpop.f32.mrf.mxu1 }
 0x47b   :  { %v3702_v48 = vpop.f32.mrf.mxu0  ;;  %v13153_v45 = vld [vmem:[#allocation29_spill] sm:$0xff] }
 0x47c   :  { %v3419_v35 = vpop.f32.mrf.mxu1 }
 0x47d   :  { %v3705_v61 = vpop.f32.mrf.mxu0  ;;  %v3420_v36 = vadd.f32 %v3419_v35, %v13150_v15 }
 0x47e   :  { %v9412_v59 = vadd.f32 %v3705_v61, %v3417_v19  ;;  %v3421_v10 = vpop.f32.mrf.mxu1  ;;  %6805 = vmatmul.mubr.bf16.gmra.mxu1 %v8581_v51  ;;  %v13152_v51 = vld [vmem:[#allocation30_spill] sm:$0xff] }
 0x47f   :  { %v3707_v3 = vpop.f32.mrf.mxu0  ;;  %6808 = vmatprep.mubr.bf16.mxu1 %v8608_v5 }
 0x480   :  { %v3424_v21 = vpop.f32.mrf.mxu1 }
 0x481   :  { %v3708_v25 = vpop.f32.mrf.mxu0  ;;  %v3425_v6 = vadd.f32 %v3424_v21, %v13151_v39 }
 0x482   :  { %v9415_v30 = vadd.f32 %v3708_v25, %v3420_v36  ;;  %v3426_v33 = vpop.f32.mrf.mxu1 }
 0x483   :  { %v3710_v54 = vpop.f32.mrf.mxu0 }
 0x484   :  { %v3427_v28 = vpop.f32.mrf.mxu1 }
 0x485   :  { %v3713_v34 = vpop.f32.mrf.mxu0  ;;  %v3428_v20 = vadd.f32 %v3427_v28, %v9128_v60 }
 0x486   :  { %v9420_v9 = vadd.f32 %v3713_v34, %v3425_v6  ;;  %v3429_v1 = vpop.f32.mrf.mxu1  ;;  %6809 = vmatmul.mubr.bf16.gmra.mxu1 %v13070_v8  ;;  %v13154_v8 = vld [vmem:[#allocation37_spill] sm:$0xff]  ;;  %v13155_v34 = vld [vmem:[#allocation32_spill] sm:$0xff] }
 0x487   :  { %v3715_v47 = vpop.f32.mrf.mxu0  ;;  %6812 = vmatprep.mubr.bf16.mxu1 %v8667_v18 }
 0x488   :  { %v3432_v57 = vpop.f32.mrf.mxu1 }
 0x489   :  { %v3716_v29 = vpop.f32.mrf.mxu0  ;;  %v3433_v48 = vadd.f32 %v3432_v57, %v13152_v51 }
 0x48a   :  { %v9423_v37 = vadd.f32 %v3716_v29, %v3428_v20  ;;  %v3434_v31 = vpop.f32.mrf.mxu1 }
 0x48b   :  { %v3718_v11 = vpop.f32.mrf.mxu0 }
 0x48c   :  { %v3435_v61 = vpop.f32.mrf.mxu1  ;;  %v13156_v11 = vld [vmem:[#allocation27_spill] sm:$0xff] }
 0x48d   :  { %v3721_v5 = vpop.f32.mrf.mxu0  ;;  %v3436_v60 = vadd.f32 %v3435_v61, %v13153_v45 }
 0x48e   :  { %v9428_v46 = vadd.f32 %v3721_v5, %v3433_v48  ;;  %v3437_v35 = vpop.f32.mrf.mxu1  ;;  %6813 = vmatmul.mubr.bf16.gmra.mxu1 %v8699_v17  ;;  %v13157_v17 = vld [vmem:[#allocation34_spill] sm:$0xff] }
 0x48f   :  { %v3723_v19 = vpop.f32.mrf.mxu0  ;;  %6816 = vmatprep.mubr.bf16.mxu1 %v9216_v52 }
 0x490   :  { %v3440_v25 = vpop.f32.mrf.mxu1  ;;  %v13158_v19 = vld [vmem:[#allocation7_spill] sm:$0xff] }
 0x491   :  { %v3724_v3 = vpop.f32.mrf.mxu0  ;;  %v3441_v10 = vadd.f32 %v3440_v25, %v13154_v8  ;;  %v13159_v25 = vld [vmem:[#allocation31_spill] sm:$0xff] }
 0x492   :  { %v9431_v15 = vadd.f32 %v3724_v3, %v3436_v60  ;;  %v3442_v54 = vpop.f32.mrf.mxu1 }
 0x493   :  { %v3726_v36 = vpop.f32.mrf.mxu0 }
 0x494   :  { %v3443_v6 = vpop.f32.mrf.mxu1 }
 0x495   :  { %v3729_v18 = vpop.f32.mrf.mxu0  ;;  %v3444_v33 = vadd.f32 %v3443_v6, %v13155_v34  ;;  %v13160_v6 = vld [vmem:[#allocation5_spill] sm:$0xff] }
 0x496   :  { %v9436_v21 = vadd.f32 %v3729_v18, %v3441_v10  ;;  %v3445_v28 = vpop.f32.mrf.mxu1  ;;  %6817 = vmatmul.mubr.bf16.gmra.mxu1 %v13156_v11 }
 0x497   :  { %v3731_v39 = vpop.f32.mrf.mxu0  ;;  %6820 = vmatprep.mubr.bf16.mxu1 %v8772_v12 }
 0x498   :  { %v3448_v1 = vpop.f32.mrf.mxu1 }
 0x499   :  { %v3732_v47 = vpop.f32.mrf.mxu0  ;;  %v3449_v57 = vadd.f32 %v3448_v1, %v13157_v17 }
 0x49a   :  { %v9439_v20 = vadd.f32 %v3732_v47, %v3444_v33  ;;  %v3450_v51 = vpop.f32.mrf.mxu1 }
 0x49b   :  { %v3734_v29 = vpop.f32.mrf.mxu0 }
 0x49c   :  { %v3451_v31 = vpop.f32.mrf.mxu1 }
 0x49d   :  { %v3737_v52 = vpop.f32.mrf.mxu0  ;;  %v3452_v61 = vadd.f32 %v3451_v31, %v13158_v19  ;;  %v13163_v19 = vld [vmem:[#allocation35_spill] sm:$0xff] }
 0x49e   :  { %v9444_v48 = vadd.f32 %v3737_v52, %v3449_v57  ;;  %v3453_v60 = vpop.f32.mrf.mxu1  ;;  %6821 = vmatmul.mubr.bf16.gmra.mxu1 %v8793_v4  ;;  %v13161_v4 = vld [vmem:[#allocation12_spill] sm:$0xff]  ;;  %v13162_v57 = vld [vmem:[#allocation42_spill] sm:$0xff] }
 0x49f   :  { %v3739_v5 = vpop.f32.mrf.mxu0  ;;  %6824 = vmatprep.mubr.bf16.mxu1 %v8814_v16 }
 0x4a0   :  { %v3456_v36 = vpop.f32.mrf.mxu1 }
 0x4a1   :  { %v3740_v45 = vpop.f32.mrf.mxu0  ;;  %v3457_v8 = vadd.f32 %v3456_v36, %v13159_v25 }
 0x4a2   :  { %v9447_v3 = vadd.f32 %v3740_v45, %v3452_v61  ;;  %v3458_v10 = vpop.f32.mrf.mxu1 }
 0x4a3   :  { %v3742_v35 = vpop.f32.mrf.mxu0  ;;  %v13166_v10 = vld [vmem:[#allocation48_spill] sm:$0xff] }
 0x4a4   :  { %v3459_v39 = vpop.f32.mrf.mxu1 }
 0x4a5   :  { %v3745_v12 = vpop.f32.mrf.mxu0  ;;  %v3460_v34 = vadd.f32 %v3459_v39, %v13160_v6 }
 0x4a6   :  { %v9452_v18 = vadd.f32 %v3745_v12, %v3457_v8  ;;  %v3461_v47 = vpop.f32.mrf.mxu1  ;;  %6825 = vmatmul.mubr.bf16.gmra.mxu1 %v8835_v7  ;;  %v13164_v8 = vld [vmem:[#allocation45_spill] sm:$0xff]  ;;  %v13165_v7 = vld [vmem:[#allocation8_spill] sm:$0xff] }
 0x4a7   :  { %v3747_v54 = vpop.f32.mrf.mxu0  ;;  %6828 = vmatprep.mubr.bf16.mxu1 %v13162_v57  ;;  %v13167_v47 = vld [vmem:[#allocation10_spill] sm:$0xff] }
 0x4a8   :  { %v3464_v1 = vpop.f32.mrf.mxu1 }
 0x4a9   :  { %v3748_v33 = vpop.f32.mrf.mxu0  ;;  %v3465_v17 = vadd.f32 %v3464_v1, %v13161_v4 }
 0x4aa   :  { %v9455_v28 = vadd.f32 %v3748_v33, %v3460_v34  ;;  %v3466_v52 = vpop.f32.mrf.mxu1 }
 0x4ab   :  { %v3750_v29 = vpop.f32.mrf.mxu0  ;;  %v13168_v52 = vld [vmem:[#allocation53_spill] sm:$0xff] }
 0x4ac   :  { %v3467_v31 = vpop.f32.mrf.mxu1 }
 0x4ad   :  { %v3753_v16 = vpop.f32.mrf.mxu0  ;;  %v3468_v61 = vadd.f32 %v3467_v31, %v13163_v19 }
 0x4ae   :  { %v9460_v51 = vadd.f32 %v3753_v16, %v3465_v17  ;;  %v3469_v60 = vpop.f32.mrf.mxu1  ;;  %6829 = vmatmul.mubr.bf16.gmra.mxu1 %v13164_v8 }
 0x4af   :  { %v3755_v5 = vpop.f32.mrf.mxu0  ;;  %6832 = vmatprep.mubr.bf16.mxu1 %v13166_v10 }
 0x4b0   :  { %v3472_v25 = vpop.f32.mrf.mxu1  ;;  %v13169_v5 = vld [vmem:[#allocation9_spill] sm:$0xff] }
 0x4b1   :  { %v3756_v45 = vpop.f32.mrf.mxu0  ;;  %v3473_v12 = vadd.f32 %v3472_v25, %v13165_v7  ;;  %v13170_v25 = vld [vmem:[#allocation16_spill] sm:$0xff] }
 0x4b2   :  { %v9463_v35 = vadd.f32 %v3756_v45, %v3468_v61  ;;  %v3474_v39 = vpop.f32.mrf.mxu1 }
 0x4b3   :  { %v3758_v36 = vpop.f32.mrf.mxu0 }
 0x4b4   :  { %v3475_v33 = vpop.f32.mrf.mxu1 }
 0x4b5   :  { %v3761_v54 = vpop.f32.mrf.mxu0  ;;  %v3476_v29 = vadd.f32 %v3475_v33, %v13167_v47 }
 0x4b6   :  { %v9468_v6 = vadd.f32 %v3761_v54, %v3473_v12  ;;  %v3477_v4 = vpop.f32.mrf.mxu1  ;;  %6833 = vmatmul.mubr.bf16.gmra.mxu1 %v13168_v52 }
 0x4b7   :  { %v3763_v34 = vpop.f32.mrf.mxu0  ;;  %6836 = vmatprep.mubr.bf16.mxu1 %v8953_v62 }
 0x4b8   :  { %v3480_v16 = vpop.f32.mrf.mxu1  ;;  %v13171_v34 = vld [vmem:[#allocation6_spill] sm:$0xff] }
 0x4b9   :  { %v3764_v1 = vpop.f32.mrf.mxu0  ;;  %v3481_v31 = vadd.f32 %v3480_v16, %v13169_v5 }
 0x4ba   :  { %v9471_v17 = vadd.f32 %v3764_v1, %v3476_v29  ;;  %v3482_v61 = vpop.f32.mrf.mxu1 }
 0x4bb   :  { %v3766_v57 = vpop.f32.mrf.mxu0 }
 0x4bc   :  { %v3483_v36 = vpop.f32.mrf.mxu1  ;;  %v13172_v57 = vld [vmem:[#allocation14_spill] sm:$0xff] }
 0x4bd   :  { %v3769_v19 = vpop.f32.mrf.mxu0  ;;  %v3484_v8 = vadd.f32 %v3483_v36, %v13170_v25 }
 0x4be   :  { %v9476_v45 = vadd.f32 %v3769_v19, %v3481_v31  ;;  %v3485_v12 = vpop.f32.mrf.mxu1  ;;  %6837 = vmatmul.mubr.bf16.gmra.mxu1 %v8980_v63  ;;  %v13173_v63 = vld [vmem:[#allocation71_spill] sm:$0xff] }
 0x4bf   :  { %v3771_v60 = vpop.f32.mrf.mxu0  ;;  %6840 = vmatprep.mubr.bf16.mxu1 %v9005_v41  ;;  %v13174_v12 = vld [vmem:[#allocation11_spill] sm:$0xff] }
 0x4c0   :  { %v3488_v39 = vpop.f32.mrf.mxu1 }
 0x4c1   :  { %v3772_v7 = vpop.f32.mrf.mxu0  ;;  %v3489_v33 = vadd.f32 %v3488_v39, %v13171_v34 }
 0x4c2   :  { %v9479_v10 = vadd.f32 %v3772_v7, %v3484_v8  ;;  %v3490_v47 = vpop.f32.mrf.mxu1 }
 0x4c3   :  { %v3774_v54 = vpop.f32.mrf.mxu0 }
 0x4c4   :  { %v3491_v4 = vpop.f32.mrf.mxu1 }
 0x4c5   :  { %v3777_v62 = vpop.f32.mrf.mxu0  ;;  %v3492_v16 = vadd.f32 %v3491_v4, %v13172_v57 }
 0x4c6   :  { %v9484_v29 = vadd.f32 %v3777_v62, %v3489_v33  ;;  %v3493_v5 = vpop.f32.mrf.mxu1  ;;  %6841 = vmatmul.mubr.bf16.gmra.mxu1 %v9029_v44  ;;  %v13175_v44 = vld [vmem:[#allocation72_spill] sm:$0xff] }
 0x4c7   :  { %v3779_v1 = vpop.f32.mrf.mxu0  ;;  %6844 = vmatprep.mubr.bf16.mxu1 %v9049_v26  ;;  %v13176_v5 = vld [vmem:[#allocation28_spill] sm:$0xff] }
 0x4c8   :  { %v3496_v61 = vpop.f32.mrf.mxu1 }
 0x4c9   :  { %v3780_v52 = vpop.f32.mrf.mxu0  ;;  %v3497_v60 = vadd.f32 %v3496_v61, %v13173_v63 }
 0x4ca   :  { %v9487_v31 = vadd.f32 %v3780_v52, %v3492_v16  ;;  %v3498_v36 = vpop.f32.mrf.mxu1 }
 0x4cb   :  { %v3782_v19 = vpop.f32.mrf.mxu0 }
 0x4cc   :  { %v3499_v7 = vpop.f32.mrf.mxu1 }
 0x4cd   :  { %v3785_v41 = vpop.f32.mrf.mxu0  ;;  %v3500_v54 = vadd.f32 %v3499_v7, %v13174_v12 }
 0x4ce   :  { %v9492_v25 = vadd.f32 %v3785_v41, %v3497_v60  ;;  %v3501_v34 = vpop.f32.mrf.mxu1  ;;  %6845 = vmatmul.mubr.bf16.gmra.mxu1 %v9065_v53  ;;  %v13177_v53 = vld [vmem:[#allocation73_spill] sm:$0xff] }
 0x4cf   :  { %v3787_v8 = vpop.f32.mrf.mxu0  ;;  %6848 = vmatprep.mubr.bf16.mxu1 %v9366_v42  ;;  %v7168_v42 = vld [vmem:[%s12510_s0 + $0x20] sm:$0xff]  }
 0x4d0   :  { %v3504_v47 = vpop.f32.mrf.mxu1 }
 0x4d1   :  { %v3788_v39 = vpop.f32.mrf.mxu0  ;;  %v3505_v1 = vadd.f32 %v3504_v47, %v13175_v44 }
 0x4d2   :  { %v9495_v33 = vadd.f32 %v3788_v39, %v3500_v54  ;;  %v3506_v4 = vpop.f32.mrf.mxu1 }
 0x4d3   :  { %v3790_v62 = vpop.f32.mrf.mxu0 }
 0x4d4   :  { %v3507_v52 = vpop.f32.mrf.mxu1  ;;  %v13178_v62 = vld [vmem:[#allocation24_spill] sm:$0xff] }
 0x4d5   :  { %v3793_v26 = vpop.f32.mrf.mxu0  ;;  %v3508_v19 = vadd.f32 %v3507_v52, %v13176_v5 }
 0x4d6   :  { %v9500_v57 = vadd.f32 %v3793_v26, %v3505_v1  ;;  %v3509_v63 = vpop.f32.mrf.mxu1  ;;  %6849 = vmatmul.mubr.bf16.gmra.mxu1 %v13156_v11 }
 0x4d7   :  { %v3795_v16 = vpop.f32.mrf.mxu0  ;;  %6956 = vmatprep.mubr.bf16.mxu1 %v7168_v42 }
 0x4d8   :  { %v3512_v36 = vpop.f32.mrf.mxu1  ;;  %v13179_v16 = vld [vmem:[#allocation15_spill] sm:$0xff] }
 0x4d9   :  { %v3796_v61 = vpop.f32.mrf.mxu0  ;;  %v3513_v8 = vadd.f32 %v3512_v36, %v13177_v53  ;;  %v13180_v36 = vld [vmem:[#allocation23_spill] sm:$0xff] }
 0x4da   :  { %v9503_v60 = vadd.f32 %v3796_v61, %v3508_v19  ;;  %v3514_v12 = vpop.f32.mrf.mxu1 }
 0x4db   :  { %v3798_v41 = vpop.f32.mrf.mxu0  ;;  %v7144_v12 = vld [vmem:[%s12513_s3 + $0x38] sm:$0xff]  }
 0x4dc   :  { %v3515_v34 = vpop.f32.mrf.mxu1  ;;  %6852 = vmatprep.subr.bf16.mxu0 %v7144_v12 }
 0x4dd   :  { %v3801_v7 = vpop.f32.mrf.mxu0  ;;  %v3516_v47 = vadd.f32 %v3515_v34, %v13178_v62  ;;  %v13182_v62 = vld [vmem:[#allocation26_spill] sm:$0xff]  ;;  %6853 = vmatpush3.bf16.msra.mxu0 %v7144_v12 }
 0x4de   :  { %v9510_v54 = vadd.f32 %v3801_v7, %v3513_v8  ;;  %v3517_v1 = vpop.f32.mrf.mxu1 }
 0x4df   :  { %v3803_v39 = vpop.f32.mrf.mxu0 }
 0x4e0   :  { %v3520_v4 = vpop.f32.mrf.mxu1 }
 0x4e1   :  { %v3804_v44 = vpop.f32.mrf.mxu0  ;;  %v3521_v52 = vadd.f32 %v3520_v4, %v13179_v16 }
 0x4e2   :  { %v9513_v26 = vadd.f32 %v3804_v44, %v3516_v47  ;;  %v3522_v19 = vpop.f32.mrf.mxu1 }
 0x4e3   :  { %v3806_v11 = vpop.f32.mrf.mxu0 }
 0x4e4   :  { %v3523_v41 = vpop.f32.mrf.mxu1 }
 0x4e5   :  { %v3809_v5 = vpop.f32.mrf.mxu0  ;;  %v3524_v53 = vadd.f32 %v3523_v41, %v13180_v36 }
 0x4e6   :  { %v9516_v61 = vadd.f32 %v3809_v5, %v3521_v52  ;;  %v3525_v42 = vpop.f32.mrf.mxu1  ;;  %v13184_v52 = vld [vmem:[#allocation20_spill] sm:$0xff] }
 0x4e7   :  { %v3811_v63 = vpop.f32.mrf.mxu0 }
 0x4e8   :  { %v3528_v34 = vpop.f32.mrf.mxu1 }
 0x4e9   :  { %v3812_v8 = vpop.f32.mrf.mxu0  ;;  %v3529_v47 = vadd.f32 %v3528_v34, %v13182_v62 }
 0x4ea   :  { %v9519_v7 = vadd.f32 %v3812_v8, %v3524_v53  ;;  %v3530_v1 = vpop.f32.mrf.mxu1  ;;  %v13186_v8 = vld [vmem:[#allocation13_spill] sm:$0xff] }
 0x4eb   :  { %v3814_v39 = vpop.f32.mrf.mxu0 }
 0x4ec   :  { %13181 = vst [vmem:[#allocation33_spill] sm:$0xff] %v9519_v7  ;;  %v3531_v16 = vpop.f32.mrf.mxu1 }
 0x4ed   :  { %v3817_v44 = vpop.f32.mrf.mxu0  ;;  %v3532_v5 = vadd.f32 %v3531_v16, %v13184_v52 }
 0x4ee   :  { %v9525_v11 = vadd.f32 %v3817_v44, %v3529_v47  ;;  %v3533_v63 = vpop.f32.mrf.mxu1  ;;  %v13188_v47 = vld [vmem:[#allocation19_spill] sm:$0xff] }
 0x4ef   :  { %v3819_v4 = vpop.f32.mrf.mxu0 }
 0x4f0   :  { %13183 = vst [vmem:[#allocation51_spill] sm:$0xff] %v9525_v11  ;;  %v3536_v53 = vpop.f32.mrf.mxu1 }
 0x4f1   :  { %v3820_v19 = vpop.f32.mrf.mxu0  ;;  %v3537_v42 = vadd.f32 %v3536_v53, %v13186_v8 }
 0x4f2   :  { %v9528_v41 = vadd.f32 %v3820_v19, %v3532_v5  ;;  %v3538_v34 = vpop.f32.mrf.mxu1  ;;  %v13190_v5 = vld [vmem:[#allocation18_spill] sm:$0xff] }
 0x4f3   :  { %v3822_v36 = vpop.f32.mrf.mxu0 }
 0x4f4   :  { %13185 = vst [vmem:[#allocation56_spill] sm:$0xff] %v9528_v41  ;;  %v3539_v12 = vpop.f32.mrf.mxu1 }
 0x4f5   :  { %v3825_v39 = vpop.f32.mrf.mxu0  ;;  %v3540_v44 = vadd.f32 %v3539_v12, %v13188_v47  ;;  %v13194_v47 = vld [vmem:[#allocation17_spill] sm:$0xff] }
 0x4f6   :  { %v9531_v62 = vadd.f32 %v3825_v39, %v3537_v42  ;;  %v3541_v11 = vpop.f32.mrf.mxu1  ;;  %v13192_v42 = vld [vmem:[#allocation22_spill] sm:$0xff] }
 0x4f7   :  { %v3827_v1 = vpop.f32.mrf.mxu0 }
 0x4f8   :  { %13187 = vst [vmem:[#allocation54_spill] sm:$0xff] %v9531_v62  ;;  %v3544_v52 = vpop.f32.mrf.mxu1 }
 0x4f9   :  { %v3828_v4 = vpop.f32.mrf.mxu0  ;;  %v3545_v19 = vadd.f32 %v3544_v52, %v13190_v5 }
 0x4fa   :  { %v9534_v7 = vadd.f32 %v3828_v4, %v3540_v44  ;;  %v3546_v36 = vpop.f32.mrf.mxu1 }
 0x4fb   :  { %v3830_v16 = vpop.f32.mrf.mxu0 }
 0x4fc   :  { %13189 = vst [vmem:[#allocation50_spill] sm:$0xff] %v9534_v7  ;;  %v3547_v8 = vpop.f32.mrf.mxu1 }
 0x4fd   :  { %v3833_v63 = vpop.f32.mrf.mxu0  ;;  %v3548_v39 = vadd.f32 %v3547_v8, %v13192_v42  ;;  %v7145_v8 = vld [vmem:[%s12513_s3 + $0x30] sm:$0xff]  }
 0x4fe   :  { %v9537_v41 = vadd.f32 %v3833_v63, %v3545_v19  ;;  %v3549_v1 = vpop.f32.mrf.mxu1  ;;  %v13196_v19 = vld [vmem:[#allocation39_spill] sm:$0xff]  ;;  %6854 = vmatprep.subr.bf16.mxu0 %v7145_v8 }
 0x4ff   :  { %v3835_v53 = vpop.f32.mrf.mxu0  ;;  %6855 = vmatpush3.bf16.msra.mxu0 %v7145_v8 }
 0x500   :  { %13191 = vst [vmem:[#allocation59_spill] sm:$0xff] %v9537_v41  ;;  %v3552_v11 = vpop.f32.mrf.mxu1 }
 0x501   :  { %v3836_v34 = vpop.f32.mrf.mxu0  ;;  %v3553_v44 = vadd.f32 %v3552_v11, %v13194_v47 }
 0x502   :  { %v9540_v62 = vadd.f32 %v3836_v34, %v3548_v39  ;;  %v3554_v16 = vpop.f32.mrf.mxu1  ;;  %v13198_v34 = vld [vmem:[#allocation21_spill] sm:$0xff] }
 0x503   :  { %v3838_v12 = vpop.f32.mrf.mxu0  ;;  %v13200_v16 = vld [vmem:[#allocation41_spill] sm:$0xff] }
 0x504   :  { %13193 = vst [vmem:[#allocation55_spill] sm:$0xff] %v9540_v62  ;;  %v3555_v5 = vpop.f32.mrf.mxu1 }
 0x505   :  { %v3841_v4 = vpop.f32.mrf.mxu0  ;;  %v3556_v63 = vadd.f32 %v3555_v5, %v13196_v19 }
 0x506   :  { %v9543_v7 = vadd.f32 %v3841_v4, %v3553_v44  ;;  %v3557_v53 = vpop.f32.mrf.mxu1 }
 0x507   :  { %v3843_v52 = vpop.f32.mrf.mxu0 }
 0x508   :  { %13195 = vst [vmem:[#allocation57_spill] sm:$0xff] %v9543_v7  ;;  %v3560_v39 = vpop.f32.mrf.mxu1 }
 0x509   :  { %v3844_v36 = vpop.f32.mrf.mxu0  ;;  %v3561_v1 = vadd.f32 %v3560_v39, %v13198_v34 }
 0x50a   :  { %v9546_v41 = vadd.f32 %v3844_v36, %v3556_v63  ;;  %v3562_v11 = vpop.f32.mrf.mxu1 }
 0x50b   :  { %v3846_v42 = vpop.f32.mrf.mxu0 }
 0x50c   :  { %13197 = vst [vmem:[#allocation62_spill] sm:$0xff] %v9546_v41  ;;  %v3563_v4 = vpop.f32.mrf.mxu1  ;;  %v13202_v42 = vld [vmem:[#allocation38_spill] sm:$0xff] }
 0x50d   :  { %v3849_v12 = vpop.f32.mrf.mxu0  ;;  %v3564_v52 = vadd.f32 %v3563_v4, %v13200_v16 }
 0x50e   :  { %v9552_v47 = vadd.f32 %v3849_v12, %v3561_v1  ;;  %v3565_v19 = vpop.f32.mrf.mxu1  ;;  %v13204_v1 = vld [vmem:[#allocation44_spill] sm:$0xff] }
 0x50f   :  { %v3851_v44 = vpop.f32.mrf.mxu0 }
 0x510   :  { %13199 = vst [vmem:[#allocation58_spill] sm:$0xff] %v9552_v47  ;;  %v3568_v53 = vpop.f32.mrf.mxu1 }
 0x511   :  { %v3852_v5 = vpop.f32.mrf.mxu0  ;;  %v3569_v41 = vadd.f32 %v3568_v53, %v13202_v42 }
 0x512   :  { %v9555_v63 = vadd.f32 %v3852_v5, %v3564_v52  ;;  %v3570_v39 = vpop.f32.mrf.mxu1  ;;  %v13206_v52 = vld [vmem:[#allocation40_spill] sm:$0xff] }
 0x513   :  { %v3854_v36 = vpop.f32.mrf.mxu0 }
 0x514   :  { %13201 = vst [vmem:[#allocation60_spill] sm:$0xff] %v9555_v63  ;;  %v3571_v8 = vpop.f32.mrf.mxu1 }
 0x515   :  { %v3857_v7 = vpop.f32.mrf.mxu0  ;;  %v3572_v12 = vadd.f32 %v3571_v8, %v13204_v1 }
 0x516   :  { %v9558_v34 = vadd.f32 %v3857_v7, %v3569_v41  ;;  %v3573_v47 = vpop.f32.mrf.mxu1  ;;  %v13207_v7 = vld [vmem:[#allocation47_spill] sm:$0xff] }
 0x517   :  { %v3859_v11 = vpop.f32.mrf.mxu0 }
 0x518   :  { %13203 = vst [vmem:[#allocation65_spill] sm:$0xff] %v9558_v34  ;;  %v3576_v16 = vpop.f32.mrf.mxu1 }
 0x519   :  { %v3860_v44 = vpop.f32.mrf.mxu0  ;;  %v3577_v5 = vadd.f32 %v3576_v16, %v13206_v52  ;;  %v13209_v16 = vld [vmem:[#allocation52_spill] sm:$0xff] }
 0x51a   :  { %v9561_v62 = vadd.f32 %v3860_v44, %v3572_v12  ;;  %v3578_v19 = vpop.f32.mrf.mxu1 }
 0x51b   :  { %v3862_v4 = vpop.f32.mrf.mxu0 }
 0x51c   :  { %13205 = vst [vmem:[#allocation61_spill] sm:$0xff] %v9561_v62  ;;  %v3579_v53 = vpop.f32.mrf.mxu1  ;;  %v13208_v4 = vld [vmem:[#allocation43_spill] sm:$0xff] }
 0x51d   :  { %v3865_v36 = vpop.f32.mrf.mxu0  ;;  %v3580_v41 = vadd.f32 %v3579_v53, %v13207_v7 }
 0x51e   :  { %v9564_v63 = vadd.f32 %v3865_v36, %v3577_v5  ;;  %v3581_v39 = vpop.f32.mrf.mxu1 }
 0x51f   :  { %v3867_v42 = vpop.f32.mrf.mxu0 }
 0x520   :  { %v6790_v8 = vpop.f32.mrf.mxu1  ;;  %v13211_v42 = vld [vmem:[#allocation36_spill] sm:$0xff] }
 0x521   :  { %v3868_v11 = vpop.f32.mrf.mxu0  ;;  %v9576_v19 = vadd.f32 %v6790_v8, %v9312_v40 }
 0x522   :  { %v9567_v34 = vadd.f32 %v3868_v11, %v3580_v41  ;;  %v3906_v1 = vpop.f32.mrf.mxu1 }
 0x523   :  { %v3870_v47 = vpop.f32.mrf.mxu0  ;;  %v9570_v62 = vadd.f32 %v3906_v1, %v13208_v4  ;;  %13210 = vst [vmem:[#allocation63_spill] sm:$0xff] %v9576_v19  ;;  %v13214_v4 = vld [vmem:[#allocation49_spill] sm:$0xff] }
 0x524   :  { %v6791_v12 = vpop.f32.mrf.mxu1 }
 0x525   :  { %v9581_v7 = vadd.f32 %v6791_v12, %v13211_v42 }
 0x526   :  { %v3909_v44 = vpop.f32.mrf.mxu1 }
 0x527   :  { %v9573_v52 = vadd.f32 %v3909_v44, %v13209_v16  ;;  %13212 = vst [vmem:[#allocation64_spill] sm:$0xff] %v9581_v7 }
 0x528   :  { %v6794_v5 = vpop.f32.mrf.mxu1 }
 0x529   :  { %v4163_v36 = vadd.f32 %v9573_v52, %v9570_v62  ;;  %v9593_v16 = vadd.f32 %v6794_v5, %v13214_v4 }
 0x52a   :  { %v3922_v53 = vpop.f32.mrf.mxu1 }
 0x52b   :  { %v4164_v41 = vadd.f32 %v4163_v36, %v9576_v19  ;;  %v9585_v11 = vadd.f32 %v3922_v53, %v9322_v23  ;;  %v13215_v36 = vld [vmem:[#allocation46_spill] sm:$0xff] }
 0x52c   :  { %v6795_v39 = vpop.f32.mrf.mxu1 }
 0x52d   :  { %13213 = vst [vmem:[#allocation66_spill] sm:$0xff] %v9585_v11  ;;  %v4165_v47 = vadd.f32 %v4164_v41, %v9581_v7  ;;  %v9597_v19 = vadd.f32 %v6795_v39, %v13215_v36 }
 0x52e   :  { %v3925_v1 = vpop.f32.mrf.mxu1 }
 0x52f   :  { %v4166_v44 = vadd.f32 %v4165_v47, %v9585_v11  ;;  %v9590_v40 = vadd.f32 %v3925_v1, %v9326_v32 }
 0x530   :  { %v6798_v8 = vpop.f32.mrf.mxu1 }
 0x531   :  { %v4167_v12 = vadd.f32 %v4166_v44, %v9590_v40  ;;  %v9609_v44 = vadd.f32 %v6798_v8, %v9358_v13 }
 0x532   :  { %v3938_v42 = vpop.f32.mrf.mxu1 }
 0x533   :  { %v4168_v23 = vadd.f32 %v4167_v12, %v9593_v16  ;;  %v9601_v41 = vadd.f32 %v3938_v42, %v9346_v27 }
 0x534   :  { %v6799_v53 = vpop.f32.mrf.mxu1 }
 0x535   :  { %v4169_v47 = vadd.f32 %v4168_v23, %v9597_v19  ;;  %v9613_v12 = vadd.f32 %v6799_v53, %v9362_v55 }
 0x536   :  { %v3941_v32 = vpop.f32.mrf.mxu1 }
 0x537   :  { %v4170_v1 = vadd.f32 %v4169_v47, %v9601_v41  ;;  %v9606_v5 = vadd.f32 %v3941_v32, %v9351_v14 }
 0x538   :  { %v6802_v4 = vpop.f32.mrf.mxu1 }
 0x539   :  { %v4171_v39 = vadd.f32 %v4170_v1, %v9606_v5  ;;  %v9625_v1 = vadd.f32 %v6802_v4, %v9380_v22 }
 0x53a   :  { %v3954_v36 = vpop.f32.mrf.mxu1 }
 0x53b   :  { %v4172_v27 = vadd.f32 %v4171_v39, %v9609_v44  ;;  %v9617_v23 = vadd.f32 %v3954_v36, %v9371_v50 }
 0x53c   :  { %v6803_v42 = vpop.f32.mrf.mxu1 }
 0x53d   :  { %v4173_v47 = vadd.f32 %v4172_v27, %v9613_v12  ;;  %v9629_v39 = vadd.f32 %v6803_v42, %v9383_v43 }
 0x53e   :  { %v3957_v14 = vpop.f32.mrf.mxu1 }
 0x53f   :  { %v4174_v32 = vadd.f32 %v4173_v47, %v9617_v23  ;;  %v9622_v13 = vadd.f32 %v3957_v14, %v9375_v2 }
 0x540   :  { %v6806_v8 = vpop.f32.mrf.mxu1 }
 0x541   :  { %v4175_v55 = vadd.f32 %v4174_v32, %v9622_v13  ;;  %v9641_v32 = vadd.f32 %v6806_v8, %v9396_v58 }
 0x542   :  { %v3970_v53 = vpop.f32.mrf.mxu1 }
 0x543   :  { %v4176_v50 = vadd.f32 %v4175_v55, %v9625_v1  ;;  %v9633_v27 = vadd.f32 %v3970_v53, %v9388_v38  ;;  %13216 = vst [vmem:[#allocation67_spill] sm:$0xff] %v9641_v32 }
 0x544   :  { %v6807_v36 = vpop.f32.mrf.mxu1 }
 0x545   :  { %v4177_v47 = vadd.f32 %v4176_v50, %v9629_v39  ;;  %v9645_v55 = vadd.f32 %v6807_v36, %v9399_v0 }
 0x546   :  { %v3973_v2 = vpop.f32.mrf.mxu1 }
 0x547   :  { %v4178_v14 = vadd.f32 %v4177_v47, %v9633_v27  ;;  %v9638_v22 = vadd.f32 %v3973_v2, %v9391_v56  ;;  %13217 = vst [vmem:[#allocation68_spill] sm:$0xff] %v9645_v55 }
 0x548   :  { %v6810_v4 = vpop.f32.mrf.mxu1 }
 0x549   :  { %v4179_v43 = vadd.f32 %v4178_v14, %v9638_v22  ;;  %v9657_v14 = vadd.f32 %v6810_v4, %v9412_v59 }
 0x54a   :  { %v3986_v42 = vpop.f32.mrf.mxu1 }
 0x54b   :  { %v4180_v38 = vadd.f32 %v4179_v43, %v9641_v32  ;;  %v9649_v50 = vadd.f32 %v3986_v42, %v9404_v24  ;;  %13220 = vst [vmem:[#allocation30_spill] sm:$0xff] %v9657_v14 }
 0x54c   :  { %v6811_v53 = vpop.f32.mrf.mxu1 }
 0x54d   :  { %13218 = vst [vmem:[#allocation69_spill] sm:$0xff] %v9649_v50  ;;  %v4181_v47 = vadd.f32 %v4180_v38, %v9645_v55  ;;  %v9661_v43 = vadd.f32 %v6811_v53, %v9415_v30 }
 0x54e   :  { %v3989_v56 = vpop.f32.mrf.mxu1 }
 0x54f   :  { %v4182_v2 = vadd.f32 %v4181_v47, %v9649_v50  ;;  %v9654_v58 = vadd.f32 %v3989_v56, %v9407_v49  ;;  %13221 = vst [vmem:[#allocation29_spill] sm:$0xff] %v9661_v43 }
 0x550   :  { %v6814_v8 = vpop.f32.mrf.mxu1 }
 0x551   :  { %13219 = vst [vmem:[#allocation70_spill] sm:$0xff] %v9654_v58  ;;  %v4183_v0 = vadd.f32 %v4182_v2, %v9654_v58  ;;  %v9673_v2 = vadd.f32 %v6814_v8, %v9428_v46 }
 0x552   :  { %v4002_v36 = vpop.f32.mrf.mxu1 }
 0x553   :  { %v4184_v24 = vadd.f32 %v4183_v0, %v9657_v14  ;;  %v9665_v38 = vadd.f32 %v4002_v36, %v9420_v9  ;;  %13224 = vst [vmem:[#allocation27_spill] sm:$0xff] %v9673_v2 }
 0x554   :  { %v6815_v42 = vpop.f32.mrf.mxu1 }
 0x555   :  { %13222 = vst [vmem:[#allocation37_spill] sm:$0xff] %v9665_v38  ;;  %v4185_v47 = vadd.f32 %v4184_v24, %v9661_v43  ;;  %v9677_v0 = vadd.f32 %v6815_v42, %v9431_v15 }
 0x556   :  { %v4005_v49 = vpop.f32.mrf.mxu1 }
 0x557   :  { %v4186_v56 = vadd.f32 %v4185_v47, %v9665_v38  ;;  %v9670_v59 = vadd.f32 %v4005_v49, %v9423_v37  ;;  %13225 = vst [vmem:[#allocation34_spill] sm:$0xff] %v9677_v0 }
 0x558   :  { %v6818_v4 = vpop.f32.mrf.mxu1 }
 0x559   :  { %13223 = vst [vmem:[#allocation32_spill] sm:$0xff] %v9670_v59  ;;  %v4187_v30 = vadd.f32 %v4186_v56, %v9670_v59  ;;  %v9689_v56 = vadd.f32 %v6818_v4, %v9444_v48 }
 0x55a   :  { %v4018_v53 = vpop.f32.mrf.mxu1 }
 0x55b   :  { %v4188_v9 = vadd.f32 %v4187_v30, %v9673_v2  ;;  %v9681_v24 = vadd.f32 %v4018_v53, %v9436_v21  ;;  %13228 = vst [vmem:[#allocation5_spill] sm:$0xff] %v9689_v56 }
 0x55c   :  { %v6819_v36 = vpop.f32.mrf.mxu1 }
 0x55d   :  { %13226 = vst [vmem:[#allocation7_spill] sm:$0xff] %v9681_v24  ;;  %v4189_v47 = vadd.f32 %v4188_v9, %v9677_v0  ;;  %v9693_v30 = vadd.f32 %v6819_v36, %v9447_v3 }
 0x55e   :  { %v4021_v37 = vpop.f32.mrf.mxu1 }
 0x55f   :  { %v4190_v49 = vadd.f32 %v4189_v47, %v9681_v24  ;;  %v9686_v46 = vadd.f32 %v4021_v37, %v9439_v20  ;;  %13229 = vst [vmem:[#allocation12_spill] sm:$0xff] %v9693_v30 }
 0x560   :  { %v6822_v8 = vpop.f32.mrf.mxu1 }
 0x561   :  { %13227 = vst [vmem:[#allocation31_spill] sm:$0xff] %v9686_v46  ;;  %v4191_v15 = vadd.f32 %v4190_v49, %v9686_v46  ;;  %v9705_v49 = vadd.f32 %v6822_v8, %v9460_v51 }
 0x562   :  { %v4034_v42 = vpop.f32.mrf.mxu1 }
 0x563   :  { %v4192_v21 = vadd.f32 %v4191_v15, %v9689_v56  ;;  %v9697_v9 = vadd.f32 %v4034_v42, %v9452_v18 }
 0x564   :  { %v6823_v53 = vpop.f32.mrf.mxu1 }
 0x565   :  { %13230 = vst [vmem:[#allocation42_spill] sm:$0xff] %v9697_v9  ;;  %v4193_v47 = vadd.f32 %v4192_v21, %v9693_v30  ;;  %v9709_v15 = vadd.f32 %v6823_v53, %v9463_v35 }
 0x566   :  { %v4037_v20 = vpop.f32.mrf.mxu1 }
 0x567   :  { %v4194_v37 = vadd.f32 %v4193_v47, %v9697_v9  ;;  %v9702_v48 = vadd.f32 %v4037_v20, %v9455_v28 }
 0x568   :  { %v6826_v4 = vpop.f32.mrf.mxu1 }
 0x569   :  { %13231 = vst [vmem:[#allocation35_spill] sm:$0xff] %v9702_v48  ;;  %v4195_v3 = vadd.f32 %v4194_v37, %v9702_v48  ;;  %v9721_v37 = vadd.f32 %v6826_v4, %v9476_v45 }
 0x56a   :  { %v4050_v36 = vpop.f32.mrf.mxu1 }
 0x56b   :  { %v4196_v18 = vadd.f32 %v4195_v3, %v9705_v49  ;;  %v9713_v21 = vadd.f32 %v4050_v36, %v9468_v6 }
 0x56c   :  { %v6827_v42 = vpop.f32.mrf.mxu1 }
 0x56d   :  { %v4197_v47 = vadd.f32 %v4196_v18, %v9709_v15  ;;  %v9725_v3 = vadd.f32 %v6827_v42, %v9479_v10 }
 0x56e   :  { %v4053_v28 = vpop.f32.mrf.mxu1 }
 0x56f   :  { %v4198_v20 = vadd.f32 %v4197_v47, %v9713_v21  ;;  %v9718_v51 = vadd.f32 %v4053_v28, %v9471_v17 }
 0x570   :  { %v6830_v8 = vpop.f32.mrf.mxu1 }
 0x571   :  { %v4199_v35 = vadd.f32 %v4198_v20, %v9718_v51  ;;  %v9737_v20 = vadd.f32 %v6830_v8, %v9492_v25 }
 0x572   :  { %v4066_v53 = vpop.f32.mrf.mxu1 }
 0x573   :  { %v4200_v6 = vadd.f32 %v4199_v35, %v9721_v37  ;;  %v9729_v18 = vadd.f32 %v4066_v53, %v9484_v29 }
 0x574   :  { %v6831_v36 = vpop.f32.mrf.mxu1 }
 0x575   :  { %v4201_v47 = vadd.f32 %v4200_v6, %v9725_v3  ;;  %v9741_v35 = vadd.f32 %v6831_v36, %v9495_v33 }
 0x576   :  { %v4069_v17 = vpop.f32.mrf.mxu1 }
 0x577   :  { %v4202_v28 = vadd.f32 %v4201_v47, %v9729_v18  ;;  %v9734_v45 = vadd.f32 %v4069_v17, %v9487_v31 }
 0x578   :  { %v6834_v4 = vpop.f32.mrf.mxu1 }
 0x579   :  { %v4203_v10 = vadd.f32 %v4202_v28, %v9734_v45  ;;  %v9753_v28 = vadd.f32 %v6834_v4, %v9510_v54 }
 0x57a   :  { %v4082_v42 = vpop.f32.mrf.mxu1 }
 0x57b   :  { %v4204_v29 = vadd.f32 %v4203_v10, %v9737_v20  ;;  %v9745_v6 = vadd.f32 %v4082_v42, %v9500_v57  ;;  %13234 = vst [vmem:[#allocation48_spill] sm:$0xff] %v9753_v28 }
 0x57c   :  { %v6835_v53 = vpop.f32.mrf.mxu1 }
 0x57d   :  { %13232 = vst [vmem:[#allocation45_spill] sm:$0xff] %v9745_v6  ;;  %v4205_v47 = vadd.f32 %v4204_v29, %v9741_v35  ;;  %v9757_v10 = vadd.f32 %v6835_v53, %v9513_v26 }
 0x57e   :  { %v4085_v31 = vpop.f32.mrf.mxu1 }
 0x57f   :  { %v4206_v17 = vadd.f32 %v4205_v47, %v9745_v6  ;;  %v9750_v25 = vadd.f32 %v4085_v31, %v9503_v60  ;;  %13235 = vst [vmem:[#allocation10_spill] sm:$0xff] %v9757_v10  ;;  %v13237_v6 = vld [vmem:[#allocation33_spill] sm:$0xff] }
 0x580   :  { %v6838_v8 = vpop.f32.mrf.mxu1 }
 0x581   :  { %13233 = vst [vmem:[#allocation8_spill] sm:$0xff] %v9750_v25  ;;  %v4207_v33 = vadd.f32 %v4206_v17, %v9750_v25  ;;  %v13239_v17 = vld [vmem:[#allocation51_spill] sm:$0xff] }
 0x582   :  { %v4098_v36 = vpop.f32.mrf.mxu1  ;;  %v9769_v25 = vadd.f32 %v6838_v8, %v13239_v17 }
 0x583   :  { %v4208_v57 = vadd.f32 %v4207_v33, %v9753_v28  ;;  %v9761_v29 = vadd.f32 %v4098_v36, %v9516_v61  ;;  %v13241_v33 = vld [vmem:[#allocation56_spill] sm:$0xff] }
 0x584   :  { %v6839_v42 = vpop.f32.mrf.mxu1  ;;  %13240 = vst [vmem:[#allocation16_spill] sm:$0xff] %v9769_v25 }
 0x585   :  { %13236 = vst [vmem:[#allocation53_spill] sm:$0xff] %v9761_v29  ;;  %v4209_v47 = vadd.f32 %v4208_v57, %v9757_v10  ;;  %v9773_v28 = vadd.f32 %v6839_v42, %v13241_v33  ;;  %v13243_v57 = vld [vmem:[#allocation54_spill] sm:$0xff] }
 0x586   :  { %v4101_v60 = vpop.f32.mrf.mxu1 }
 0x587   :  { %v4210_v31 = vadd.f32 %v4209_v47, %v9761_v29  ;;  %v9766_v54 = vadd.f32 %v4101_v60, %v13237_v6  ;;  %13242 = vst [vmem:[#allocation6_spill] sm:$0xff] %v9773_v28  ;;  %v13245_v29 = vld [vmem:[#allocation50_spill] sm:$0xff] }
 0x588   :  { %v6842_v4 = vpop.f32.mrf.mxu1 }
 0x589   :  { %13238 = vst [vmem:[#allocation9_spill] sm:$0xff] %v9766_v54  ;;  %v4211_v26 = vadd.f32 %v4210_v31, %v9766_v54  ;;  %v13247_v31 = vld [vmem:[#allocation59_spill] sm:$0xff] }
 0x58a   :  { %v4114_v53 = vpop.f32.mrf.mxu1  ;;  %v9785_v54 = vadd.f32 %v6842_v4, %v13247_v31 }
 0x58b   :  { %v4212_v61 = vadd.f32 %v4211_v26, %v9769_v25  ;;  %v9777_v10 = vadd.f32 %v4114_v53, %v13243_v57  ;;  %v13249_v26 = vld [vmem:[#allocation55_spill] sm:$0xff] }
 0x58c   :  { %v6843_v36 = vpop.f32.mrf.mxu1  ;;  %13248 = vst [vmem:[#allocation11_spill] sm:$0xff] %v9785_v54 }
 0x58d   :  { %13244 = vst [vmem:[#allocation14_spill] sm:$0xff] %v9777_v10  ;;  %v4213_v47 = vadd.f32 %v4212_v61, %v9773_v28  ;;  %v9789_v25 = vadd.f32 %v6843_v36, %v13249_v26  ;;  %v13251_v61 = vld [vmem:[#allocation57_spill] sm:$0xff] }
 0x58e   :  { %v4117_v6 = vpop.f32.mrf.mxu1 }
 0x58f   :  { %v4214_v60 = vadd.f32 %v4213_v47, %v9777_v10  ;;  %v9782_v8 = vadd.f32 %v4117_v6, %v13245_v29  ;;  %13250 = vst [vmem:[#allocation72_spill] sm:$0xff] %v9789_v25  ;;  %v13253_v10 = vld [vmem:[#allocation62_spill] sm:$0xff] }
 0x590   :  { %v6846_v17 = vpop.f32.mrf.mxu1 }
 0x591   :  { %13246 = vst [vmem:[#allocation71_spill] sm:$0xff] %v9782_v8  ;;  %v4215_v42 = vadd.f32 %v4214_v60, %v9782_v8  ;;  %v13254_v60 = vld [vmem:[#allocation58_spill] sm:$0xff] }
 0x592   :  { %v4130_v33 = vpop.f32.mrf.mxu1  ;;  %v9801_v8 = vadd.f32 %v6846_v17, %v13254_v60 }
 0x593   :  { %v4216_v53 = vadd.f32 %v4215_v42, %v9785_v54  ;;  %v9793_v28 = vadd.f32 %v4130_v33, %v13251_v61  ;;  %v13255_v42 = vld [vmem:[#allocation60_spill] sm:$0xff] }
 0x594   :  { %v6847_v57 = vpop.f32.mrf.mxu1 }
 0x595   :  { %13252 = vst [vmem:[#allocation28_spill] sm:$0xff] %v9793_v28  ;;  %v4217_v47 = vadd.f32 %v4216_v53, %v9789_v25  ;;  %v9805_v54 = vadd.f32 %v6847_v57, %v13255_v42 }
 0x596   :  { %v4133_v29 = vpop.f32.mrf.mxu1 }
 0x597   :  { %v4218_v6 = vadd.f32 %v4217_v47, %v9793_v28  ;;  %v9798_v4 = vadd.f32 %v4133_v29, %v13253_v10  ;;  %13256 = vst [vmem:[#allocation73_spill] sm:$0xff] %v9805_v54  ;;  %v13257_v47 = vld [vmem:[#allocation65_spill] sm:$0xff] }
 0x598   :  { %v6850_v31 = vpop.f32.mrf.mxu1  ;;  %v13259_v29 = vld [vmem:[#allocation61_spill] sm:$0xff] }
 0x599   :  { %v4219_v36 = vadd.f32 %v4218_v6, %v9798_v4  ;;  %v9818_v60 = vadd.f32 %v6850_v31, %v9564_v63  ;;  %v13260_v31 = vld [vmem:[#allocation63_spill] sm:$0xff] }
 0x59a   :  { %v4146_v26 = vpop.f32.mrf.mxu1 }
 0x59b   :  { %v4220_v33 = vadd.f32 %v4219_v36, %v9801_v8  ;;  %v9810_v28 = vadd.f32 %v4146_v26, %v13257_v47 }
 0x59c   :  { %v6851_v61 = vpop.f32.mrf.mxu1 }
 0x59d   :  { %v4221_v53 = vadd.f32 %v4220_v33, %v9805_v54  ;;  %13258 = vst [vmem:[#allocation24_spill] sm:$0xff] %v9810_v28  ;;  %v9822_v36 = vadd.f32 %v6851_v61, %v9567_v34 }
 0x59e   :  { %v4149_v25 = vpop.f32.mrf.mxu1 }
 0x59f   :  { %v4222_v10 = vadd.f32 %v4221_v53, %v9810_v28  ;;  %v9814_v17 = vadd.f32 %v4149_v25, %v13259_v29 }
 0x5a1   :  { %v4223_v6 = vadd.f32 %v4222_v10, %v9814_v17 }
 0x5a3   :  { %v4224_v57 = vadd.f32 %v4223_v6, %v9818_v60 }
 0x5a5   :  { %v4225_v42 = vadd.f32 %v4224_v57, %v9822_v36 }
 0x5a7   :  { %v4226_v33 = vrot.slane %v4225_v42, 4 }
 0x5a9   :  { %v4227_v26 = vadd.f32 %v4226_v33, %v4225_v42 }
 0x5ab   :  { %v4228_v47 = vrot.slane %v4227_v26, 2 }
 0x5ad   :  { %v4229_v54 = vadd.f32 %v4228_v47, %v4227_v26 }
 0x5af   :  { %v4230_v53 = vrot.slane %v4229_v54, 1 }
 0x5b1   :  { %v4231_v28 = vadd.f32 %v4230_v53, %v4229_v54 }
 0x5b3   :  { %v9825_v25 = vmul.f32 0.001953125, %v4231_v28 }
 0x5b5   :  { %v4233_v10 = vsub.f32 %v9570_v62, %v9825_v25  ;;  %v4234_v63 = vsub.f32 %v9573_v52, %v9825_v25  ;;  %v4235_v34 = vsub.f32 %v13260_v31, %v9825_v25  ;;  %v4236_v6 = vsub.f32 %v9581_v7, %v9825_v25 }
 0x5b6   :  { %v4237_v57 = vsub.f32 %v9585_v11, %v9825_v25  ;;  %v4238_v42 = vsub.f32 %v9590_v40, %v9825_v25  ;;  %v4239_v47 = vsub.f32 %v9593_v16, %v9825_v25  ;;  %v4241_v11 = vsub.f32 %v9601_v41, %v9825_v25 }
 0x5b7   :  { %v4297_v61 = vmul.f32 %v4233_v10, %v4233_v10  ;;  %v4298_v29 = vmul.f32 %v4234_v63, %v4234_v63  ;;  %v4299_v54 = vmul.f32 %v4235_v34, %v4235_v34  ;;  %v4300_v33 = vmul.f32 %v4236_v6, %v4236_v6 }
 0x5b8   :  { %v4301_v53 = vmul.f32 %v4237_v57, %v4237_v57  ;;  %v4240_v10 = vsub.f32 %v9597_v19, %v9825_v25  ;;  %v4302_v63 = vmul.f32 %v4238_v42, %v4238_v42  ;;  %v4303_v34 = vmul.f32 %v4239_v47, %v4239_v47 }
 0x5b9   :  { %v4361_v28 = vadd.f32 %v4298_v29, %v4297_v61  ;;  %v4242_v29 = vsub.f32 %v9606_v5, %v9825_v25  ;;  %v4305_v57 = vmul.f32 %v4241_v11, %v4241_v11 }
 0x5ba   :  { %v4304_v6 = vmul.f32 %v4240_v10, %v4240_v10 }
 0x5bb   :  { %v4362_v26 = vadd.f32 %v4361_v28, %v4299_v54  ;;  %v4243_v28 = vsub.f32 %v9609_v44, %v9825_v25  ;;  %v4306_v42 = vmul.f32 %v4242_v29, %v4242_v29 }
 0x5bd   :  { %v4363_v31 = vadd.f32 %v4362_v26, %v4300_v33  ;;  %v4244_v26 = vsub.f32 %v9613_v12, %v9825_v25  ;;  %v4307_v47 = vmul.f32 %v4243_v28, %v4243_v28 }
 0x5bf   :  { %v4364_v7 = vadd.f32 %v4363_v31, %v4301_v53  ;;  %v4245_v53 = vsub.f32 %v9617_v23, %v9825_v25  ;;  %v4308_v10 = vmul.f32 %v4244_v26, %v4244_v26 }
 0x5c1   :  { %v4365_v61 = vadd.f32 %v4364_v7, %v4302_v63  ;;  %v4246_v63 = vsub.f32 %v9622_v13, %v9825_v25  ;;  %v4309_v11 = vmul.f32 %v4245_v53, %v4245_v53 }
 0x5c3   :  { %v4366_v54 = vadd.f32 %v4365_v61, %v4303_v34  ;;  %v4247_v61 = vsub.f32 %v9625_v1, %v9825_v25  ;;  %v4310_v29 = vmul.f32 %v4246_v63, %v4246_v63 }
 0x5c5   :  { %v4367_v33 = vadd.f32 %v4366_v54, %v4304_v6  ;;  %v4248_v54 = vsub.f32 %v9629_v39, %v9825_v25  ;;  %v4311_v28 = vmul.f32 %v4247_v61, %v4247_v61 }
 0x5c7   :  { %v4368_v31 = vadd.f32 %v4367_v33, %v4305_v57  ;;  %v4249_v33 = vsub.f32 %v9633_v27, %v9825_v25  ;;  %v4312_v26 = vmul.f32 %v4248_v54, %v4248_v54 }
 0x5c9   :  { %v4369_v7 = vadd.f32 %v4368_v31, %v4306_v42  ;;  %v4250_v31 = vsub.f32 %v9638_v22, %v9825_v25  ;;  %v4313_v53 = vmul.f32 %v4249_v33, %v4249_v33 }
 0x5cb   :  { %v4370_v34 = vadd.f32 %v4369_v7, %v4307_v47  ;;  %v4251_v7 = vsub.f32 %v9641_v32, %v9825_v25  ;;  %v4314_v63 = vmul.f32 %v4250_v31, %v4250_v31  ;;  %v13277_v32 = vld [vmem:[#allocation73_spill] sm:$0xff] }
 0x5cd   :  { %v4371_v6 = vadd.f32 %v4370_v34, %v4308_v10  ;;  %v4252_v34 = vsub.f32 %v9645_v55, %v9825_v25  ;;  %v4315_v61 = vmul.f32 %v4251_v7, %v4251_v7 }
 0x5cf   :  { %v4372_v57 = vadd.f32 %v4371_v6, %v4309_v11  ;;  %v4253_v6 = vsub.f32 %v9649_v50, %v9825_v25  ;;  %v4316_v54 = vmul.f32 %v4252_v34, %v4252_v34 }
 0x5d1   :  { %v4373_v42 = vadd.f32 %v4372_v57, %v4310_v29  ;;  %v4254_v57 = vsub.f32 %v9654_v58, %v9825_v25  ;;  %v4317_v33 = vmul.f32 %v4253_v6, %v4253_v6 }
 0x5d3   :  { %v4374_v47 = vadd.f32 %v4373_v42, %v4311_v28  ;;  %v4255_v42 = vsub.f32 %v9657_v14, %v9825_v25  ;;  %v4318_v31 = vmul.f32 %v4254_v57, %v4254_v57  ;;  %v13276_v14 = vld [vmem:[#allocation28_spill] sm:$0xff] }
 0x5d4   :  { %v4289_v58 = vsub.f32 %v13276_v14, %v9825_v25 }
 0x5d5   :  { %v4375_v10 = vadd.f32 %v4374_v47, %v4312_v26  ;;  %v4256_v47 = vsub.f32 %v9661_v43, %v9825_v25  ;;  %v4319_v7 = vmul.f32 %v4255_v42, %v4255_v42 }
 0x5d7   :  { %v4376_v11 = vadd.f32 %v4375_v10, %v4313_v53  ;;  %v4257_v10 = vsub.f32 %v9665_v38, %v9825_v25  ;;  %v4320_v34 = vmul.f32 %v4256_v47, %v4256_v47 }
 0x5d9   :  { %v4377_v29 = vadd.f32 %v4376_v11, %v4314_v63  ;;  %v4258_v11 = vsub.f32 %v9670_v59, %v9825_v25  ;;  %v4321_v6 = vmul.f32 %v4257_v10, %v4257_v10 }
 0x5db   :  { %v4378_v28 = vadd.f32 %v4377_v29, %v4315_v61  ;;  %v4259_v29 = vsub.f32 %v9673_v2, %v9825_v25  ;;  %v4322_v57 = vmul.f32 %v4258_v11, %v4258_v11 }
 0x5dd   :  { %v4379_v26 = vadd.f32 %v4378_v28, %v4316_v54  ;;  %v4260_v28 = vsub.f32 %v9677_v0, %v9825_v25  ;;  %v4323_v42 = vmul.f32 %v4259_v29, %v4259_v29 }
 0x5df   :  { %v4380_v53 = vadd.f32 %v4379_v26, %v4317_v33  ;;  %v4261_v26 = vsub.f32 %v9681_v24, %v9825_v25  ;;  %v4324_v47 = vmul.f32 %v4260_v28, %v4260_v28  ;;  %v13269_v24 = vld [vmem:[#allocation16_spill] sm:$0xff] }
 0x5e0   :  { %v4283_v0 = vsub.f32 %v13269_v24, %v9825_v25 }
 0x5e1   :  { %v4381_v63 = vadd.f32 %v4380_v53, %v4318_v31  ;;  %v4262_v53 = vsub.f32 %v9686_v46, %v9825_v25  ;;  %v4325_v10 = vmul.f32 %v4261_v26, %v4261_v26  ;;  %v13268_v46 = vld [vmem:[#allocation9_spill] sm:$0xff] }
 0x5e3   :  { %v4382_v61 = vadd.f32 %v4381_v63, %v4319_v7  ;;  %v4263_v63 = vsub.f32 %v9689_v56, %v9825_v25  ;;  %v4326_v11 = vmul.f32 %v4262_v53, %v4262_v53 }
 0x5e5   :  { %v4383_v54 = vadd.f32 %v4382_v61, %v4320_v34  ;;  %v4264_v61 = vsub.f32 %v9693_v30, %v9825_v25  ;;  %v4327_v29 = vmul.f32 %v4263_v63, %v4263_v63 }
 0x5e7   :  { %v4384_v33 = vadd.f32 %v4383_v54, %v4321_v6  ;;  %v4265_v54 = vsub.f32 %v9697_v9, %v9825_v25  ;;  %v4328_v28 = vmul.f32 %v4264_v61, %v4264_v61  ;;  %v7146_v61 = vld [vmem:[%s12513_s3 + $0x28] sm:$0xff]  }
 0x5e8   :  { %6856 = vmatprep.subr.bf16.mxu0 %v7146_v61 }
 0x5e9   :  { %v4385_v31 = vadd.f32 %v4384_v33, %v4322_v57  ;;  %v4266_v33 = vsub.f32 %v9702_v48, %v9825_v25  ;;  %v4329_v26 = vmul.f32 %v4265_v54, %v4265_v54  ;;  %v4270_v54 = vsub.f32 %v9718_v51, %v9825_v25  ;;  %6857 = vmatpush3.bf16.msra.mxu0 %v7146_v61  ;;  %v13266_v48 = vld [vmem:[#allocation10_spill] sm:$0xff] }
 0x5ea   :  { %v4274_v61 = vsub.f32 %v9734_v45, %v9825_v25  ;;  %v4280_v9 = vsub.f32 %v13266_v48, %v9825_v25 }
 0x5eb   :  { %v4386_v7 = vadd.f32 %v4385_v31, %v4323_v42  ;;  %v4267_v31 = vsub.f32 %v9705_v49, %v9825_v25  ;;  %v4330_v53 = vmul.f32 %v4266_v33, %v4266_v33  ;;  %v4271_v33 = vsub.f32 %v9721_v37, %v9825_v25 }
 0x5ed   :  { %v4387_v34 = vadd.f32 %v4386_v7, %v4324_v47  ;;  %v4268_v7 = vsub.f32 %v9709_v15, %v9825_v25  ;;  %v4331_v63 = vmul.f32 %v4267_v31, %v4267_v31  ;;  %v7148_v31 = vld [vmem:[%s12513_s3 + $0x18] sm:$0xff]  }
 0x5ef   :  { %v4388_v6 = vadd.f32 %v4387_v34, %v4325_v10  ;;  %v4269_v34 = vsub.f32 %v9713_v21, %v9825_v25 }
 0x5f1   :  { %v4389_v57 = vadd.f32 %v4388_v6, %v4326_v11  ;;  %v7147_v6 = vld [vmem:[%s12513_s3 + $0x20] sm:$0xff]  }
 0x5f2   :  { %6858 = vmatprep.subr.bf16.mxu0 %v7147_v6 }
 0x5f3   :  { %v4390_v42 = vadd.f32 %v4389_v57, %v4327_v29  ;;  %v4332_v29 = vmul.f32 %v4268_v7, %v4268_v7  ;;  %6859 = vmatpush3.bf16.msra.mxu0 %v7147_v6  ;;  %v9919_v7 = vld [vmem:[%s12514_s4 + $0x38] sm:$0xff]  }
 0x5f4   :  { %13261 = vst [vmem:[#allocation15_spill] sm:$0xff] %v9919_v7  ;;  %6860 = vmatprep.subr.bf16.mxu0 %v7148_v31  ;;  %7012 = vmatprep.subr.bf16.mxu1 %v9919_v7 }
 0x5f5   :  { %v4391_v47 = vadd.f32 %v4390_v42, %v4328_v28  ;;  %v4333_v28 = vmul.f32 %v4269_v34, %v4269_v34  ;;  %v4335_v34 = vmul.f32 %v4271_v33, %v4271_v33  ;;  %7020 = vmatpush3.bf16.msra.mxu1 %v9919_v7 }
 0x5f7   :  { %v4392_v10 = vadd.f32 %v4391_v47, %v4329_v26  ;;  %v4272_v26 = vsub.f32 %v9725_v3, %v9825_v25  ;;  %v4334_v47 = vmul.f32 %v4270_v54, %v4270_v54  ;;  %6861 = vmatpush3.bf16.msra.mxu0 %v7148_v31 }
 0x5f9   :  { %v4393_v11 = vadd.f32 %v4392_v10, %v4330_v53  ;;  %v4273_v10 = vsub.f32 %v9729_v18, %v9825_v25  ;;  %v4336_v6 = vmul.f32 %v4272_v26, %v4272_v26  ;;  %v13262_v26 = vld [vmem:[#allocation45_spill] sm:$0xff] }
 0x5fb   :  { %v4394_v57 = vadd.f32 %v4393_v11, %v4331_v63  ;;  %v7149_v11 = vld [vmem:[%s12513_s3 + $0x10] sm:$0xff]  }
 0x5fc   :  { %6862 = vmatprep.subr.bf16.mxu0 %v7149_v11 }
 0x5fd   :  { %v4395_v42 = vadd.f32 %v4394_v57, %v4332_v29  ;;  %v4275_v29 = vsub.f32 %v9737_v20, %v9825_v25  ;;  %v4337_v57 = vmul.f32 %v4273_v10, %v4273_v10  ;;  %6863 = vmatpush3.bf16.msra.mxu0 %v7149_v11  ;;  %v7151_v10 = vld [vmem:[%s12513_s3] sm:$0xff]  }
 0x5ff   :  { %v4396_v53 = vadd.f32 %v4395_v42, %v4333_v28  ;;  %v7150_v28 = vld [vmem:[%s12513_s3 + $0x8] sm:$0xff]   ;;  %v4276_v42 = vsub.f32 %v9741_v35, %v9825_v25  ;;  %v4339_v31 = vmul.f32 %v4275_v29, %v4275_v29  ;;  %v13265_v29 = vld [vmem:[#allocation48_spill] sm:$0xff] }
 0x600   :  { %6864 = vmatprep.subr.bf16.mxu0 %v7150_v28 }
 0x601   :  { %v4397_v63 = vadd.f32 %v4396_v53, %v4334_v47  ;;  %v4338_v47 = vmul.f32 %v4274_v61, %v4274_v61  ;;  %6865 = vmatpush3.bf16.msra.mxu0 %v7150_v28 }
 0x602   :  { %6866 = vmatprep.subr.bf16.mxu0 %v7151_v10 }
 0x603   :  { %v4398_v54 = vadd.f32 %v4397_v63, %v4335_v34  ;;  %v4277_v34 = vsub.f32 %v13262_v26, %v9825_v25 }
 0x605   :  { %v4399_v33 = vadd.f32 %v4398_v54, %v4336_v6  ;;  %v9945_v6 = vld [vmem:[%s12514_s4 + $0x30] sm:$0xff]   ;;  %v13264_v54 = vld [vmem:[#allocation8_spill] sm:$0xff]  ;;  %6867 = vmatpush3.bf16.msra.mxu0 %v7151_v10 }
 0x606   :  { %13263 = vst [vmem:[#allocation23_spill] sm:$0xff] %v9945_v6  ;;  %v4278_v61 = vsub.f32 %v13264_v54, %v9825_v25  ;;  %7013 = vmatprep.subr.bf16.mxu1 %v9945_v6  ;;  %6932 = vmatprep.subr.bf16.mxu0 %v9919_v7 }
 0x607   :  { %v4400_v53 = vadd.f32 %v4399_v33, %v4337_v57  ;;  %v4340_v57 = vmul.f32 %v4276_v42, %v4276_v42  ;;  %v4279_v33 = vsub.f32 %v13265_v29, %v9825_v25  ;;  %7021 = vmatpush3.bf16.msra.mxu1 %v9945_v6  ;;  %v13267_v42 = vld [vmem:[#allocation53_spill] sm:$0xff] }
 0x608   :  { %v4342_v30 = vmul.f32 %v4278_v61, %v4278_v61  ;;  %v13270_v61 = vld [vmem:[#allocation6_spill] sm:$0xff] }
 0x609   :  { %v4401_v63 = vadd.f32 %v4400_v53, %v4338_v47  ;;  %v4341_v47 = vmul.f32 %v4277_v34, %v4277_v34  ;;  %v4343_v28 = vmul.f32 %v4279_v33, %v4279_v33  ;;  %v4282_v34 = vsub.f32 %v13268_v46, %v9825_v25  ;;  %v13271_v33 = vld [vmem:[#allocation14_spill] sm:$0xff] }
 0x60a   :  { %v4284_v10 = vsub.f32 %v13270_v61, %v9825_v25 }
 0x60b   :  { %v4402_v11 = vadd.f32 %v4401_v63, %v4339_v31  ;;  %v4281_v31 = vsub.f32 %v13267_v42, %v9825_v25 }
 0x60d   :  { %v4403_v53 = vadd.f32 %v4402_v11, %v4340_v57  ;;  %v4344_v57 = vmul.f32 %v4280_v9, %v4280_v9  ;;  %v4345_v2 = vmul.f32 %v4281_v31, %v4281_v31  ;;  %v9969_v9 = vld [vmem:[%s12514_s4 + $0x28] sm:$0xff]   ;;  %v4348_v31 = vmul.f32 %v4284_v10, %v4284_v10 }
 0x60e   :  { %13272 = vst [vmem:[#allocation26_spill] sm:$0xff] %v9969_v9  ;;  %7014 = vmatprep.subr.bf16.mxu1 %v9969_v9 }
 0x60f   :  { %v4404_v56 = vadd.f32 %v4403_v53, %v4341_v47  ;;  %v4346_v47 = vmul.f32 %v4282_v34, %v4282_v34  ;;  %v13274_v34 = vld [vmem:[#allocation11_spill] sm:$0xff]  ;;  %7022 = vmatpush3.bf16.msra.mxu1 %v9969_v9  ;;  %v4292_v9 = vsub.f32 %v13277_v32, %v9825_v25 }
 0x611   :  { %v4405_v63 = vadd.f32 %v4404_v56, %v4342_v30  ;;  %v4285_v56 = vsub.f32 %v13271_v33, %v9825_v25  ;;  %v4347_v30 = vmul.f32 %v4283_v0, %v4283_v0  ;;  %v13275_v0 = vld [vmem:[#allocation72_spill] sm:$0xff] }
 0x613   :  { %v4406_v11 = vadd.f32 %v4405_v63, %v4343_v28  ;;  %v13273_v28 = vld [vmem:[#allocation71_spill] sm:$0xff] }
 0x614   :  { %v4286_v63 = vsub.f32 %v13273_v28, %v9825_v25 }
 0x615   :  { %v4407_v59 = vadd.f32 %v4406_v11, %v4344_v57 }
 0x617   :  { %v4408_v53 = vadd.f32 %v4407_v59, %v4345_v2  ;;  %v4287_v59 = vsub.f32 %v13274_v34, %v9825_v25  ;;  %v4349_v2 = vmul.f32 %v4285_v56, %v4285_v56  ;;  %v4291_v56 = vsub.f32 %v9801_v8, %v9825_v25 }
 0x619   :  { %v4409_v38 = vadd.f32 %v4408_v53, %v4346_v47  ;;  %v4288_v47 = vsub.f32 %v13275_v0, %v9825_v25  ;;  %v4350_v53 = vmul.f32 %v4286_v63, %v4286_v63  ;;  %v4351_v50 = vmul.f32 %v4287_v59, %v4287_v59 }
 0x61a   :  { %v4355_v59 = vmul.f32 %v4291_v56, %v4291_v56 }
 0x61b   :  { %v4410_v57 = vadd.f32 %v4409_v38, %v4347_v30  ;;  %v4290_v38 = vsub.f32 %v9798_v4, %v9825_v25  ;;  %v4352_v30 = vmul.f32 %v4288_v47, %v4288_v47  ;;  %v9992_v47 = vld [vmem:[%s12514_s4 + $0x20] sm:$0xff]  }
 0x61c   :  { %7015 = vmatprep.subr.bf16.mxu1 %v9992_v47 }
 0x61d   :  { %v4411_v11 = vadd.f32 %v4410_v57, %v4348_v31  ;;  %v4353_v31 = vmul.f32 %v4289_v58, %v4289_v58  ;;  %v4354_v63 = vmul.f32 %v4290_v38, %v4290_v38  ;;  %v4356_v58 = vmul.f32 %v4292_v9, %v4292_v9  ;;  %7023 = vmatpush3.bf16.msra.mxu1 %v9992_v47 }
 0x61f   :  { %v4412_v43 = vadd.f32 %v4411_v11, %v4349_v2  ;;  %v13278_v11 = vld [vmem:[#allocation24_spill] sm:$0xff] }
 0x620   :  { %v4293_v6 = vsub.f32 %v13278_v11, %v9825_v25  ;;  %v10005_v11 = vld [vmem:[%s12514_s4 + $0x18] sm:$0xff]  }
 0x621   :  { %v4413_v10 = vadd.f32 %v4412_v43, %v4350_v53  ;;  %v4295_v53 = vsub.f32 %v9818_v60, %v9825_v25  ;;  %7016 = vmatprep.subr.bf16.mxu1 %v10005_v11 }
 0x622   :  { %7024 = vmatpush3.bf16.msra.mxu1 %v10005_v11 }
 0x623   :  { %v4414_v55 = vadd.f32 %v4413_v10, %v4351_v50  ;;  %v4294_v50 = vsub.f32 %v9814_v17, %v9825_v25  ;;  %v4357_v10 = vmul.f32 %v4293_v6, %v4293_v6 }
 0x625   :  { %v4415_v57 = vadd.f32 %v4414_v55, %v4352_v30  ;;  %v4296_v30 = vsub.f32 %v9822_v36, %v9825_v25  ;;  %v4358_v56 = vmul.f32 %v4294_v50, %v4294_v50 }
 0x627   :  { %v4416_v2 = vadd.f32 %v4415_v57, %v4353_v31  ;;  %v4359_v57 = vmul.f32 %v4295_v53, %v4295_v53 }
 0x629   :  { %v4417_v43 = vadd.f32 %v4416_v2, %v4354_v63  ;;  %v4360_v2 = vmul.f32 %v4296_v30, %v4296_v30  ;;  %v4161_v30 = vld [vmem:[%s12515_s5 + $0x2] sm:$0x1] }
 0x62b   :  { %v4418_v55 = vadd.f32 %v4417_v43, %v4355_v59 }
 0x62d   :  { %v4419_v38 = vadd.f32 %v4418_v55, %v4356_v58 }
 0x62f   :  { %v4420_v31 = vadd.f32 %v4419_v38, %v4357_v10 }
 0x631   :  { %v4421_v63 = vadd.f32 %v4420_v31, %v4358_v56  ;;  %v10022_v56 = vld [vmem:[%s12514_s4 + $0x8] sm:$0xff]  }
 0x632   :  { %13280 = vst [vmem:[#allocation13_spill] sm:$0xff] %v10022_v56 }
 0x633   :  { %v4422_v7 = vadd.f32 %v4421_v63, %v4359_v57  ;;  %v4162_v63 = vld [vmem:[%s12515_s5 + $0x3] sm:$0x1] }
 0x635   :  { %v4423_v9 = vadd.f32 %v4422_v7, %v4360_v2  ;;  %v10012_v7 = vld [vmem:[%s12514_s4 + $0x10] sm:$0xff]  }
 0x636   :  { %13279 = vst [vmem:[#allocation20_spill] sm:$0xff] %v10012_v7  ;;  %7017 = vmatprep.subr.bf16.mxu1 %v10012_v7 }
 0x637   :  { %v4424_v59 = vrot.slane %v4423_v9, 4  ;;  %7025 = vmatpush3.bf16.msra.mxu1 %v10012_v7 }
 0x638   :  { %7018 = vmatprep.subr.bf16.mxu1 %v10022_v56 }
 0x639   :  { %v4425_v43 = vadd.f32 %v4424_v59, %v4423_v9  ;;  %v13281_v9 = vld [vmem:[#allocation25_spill] sm:$0xff] }
 0x63b   :  { %v4426_v6 = vrot.slane %v4425_v43, 2  ;;  %7026 = vmatpush3.bf16.msra.mxu1 %v10022_v56 }
 0x63d   :  { %v4427_v58 = vadd.f32 %v4426_v6, %v4425_v43 }
 0x63f   :  { %v4428_v50 = vrot.slane %v4427_v58, 1 }
 0x641   :  { %v4429_v55 = vadd.f32 %v4428_v50, %v4427_v58 }
 0x643   :  { %v4430_v53 = vmul.f32 0.001953125, %v4429_v55 }
 0x645   :  { %v4431_v10 = vadd.f32 1e-05, %v4430_v53 }
 0x647   :  { %7162 = vrsqrt.f32 %v4431_v10  ;;  %v10055_v10 = vld [vmem:[%s12514_s4] sm:$0xff]  }
 0x648   :  { %13282 = vst [vmem:[#allocation19_spill] sm:$0xff] %v10055_v10  ;;  %7019 = vmatprep.subr.bf16.mxu1 %v10055_v10 }
 0x649   :  { %7027 = vmatpush3.bf16.msra.mxu1 %v10055_v10 }
 0x654   :  { %v7163_v38 = vpop.eup %7162 }
 0x655   :  { %v4433_v31 = vmul.f32 %v7163_v38, %v4161_v30 }
 0x657   :  { %v4434_v57 = vmul.f32 %v4433_v31, %v9825_v25  ;;  %v10031_v59 = vrot.slane %v4433_v31, %v13281_v9 }
 0x659   :  { %v4435_v2 = vsub.f32 %v4162_v63, %v4434_v57  ;;  %v10035_v43 = vmul.f32 %v10031_v59, %v9814_v17  ;;  %v4474_v58 = vmul.f32 %v10031_v59, %v9705_v49  ;;  %v4475_v25 = vmul.f32 %v10031_v59, %v9709_v15 }
 0x65a   :  { %v4478_v50 = vmul.f32 %v10031_v59, %v9721_v37  ;;  %v4479_v55 = vmul.f32 %v10031_v59, %v9725_v3  ;;  %v4482_v53 = vmul.f32 %v10031_v59, %v9737_v20  ;;  %v4483_v17 = vmul.f32 %v10031_v59, %v9741_v35 }
 0x65b   :  { %v10038_v6 = vrot.slane %v4435_v2, %v13281_v9  ;;  %v4486_v49 = vmul.f32 %v10031_v59, %v13265_v29  ;;  %v4487_v15 = vmul.f32 %v10031_v59, %v13266_v48  ;;  %v4490_v37 = vmul.f32 %v10031_v59, %v13269_v24 }
 0x65c   :  { %v4491_v3 = vmul.f32 %v10031_v59, %v13270_v61  ;;  %v4494_v20 = vmul.f32 %v10031_v59, %v13274_v34  ;;  %v4495_v35 = vmul.f32 %v10031_v59, %v13275_v0  ;;  %v4498_v38 = vmul.f32 %v10031_v59, %v9801_v8 }
 0x65d   :  { %v4499_v29 = vmul.f32 %v10031_v59, %v13277_v32  ;;  %v4502_v24 = vmul.f32 %v10031_v59, %v9818_v60  ;;  %v4503_v48 = vmul.f32 %v10031_v59, %v9822_v36  ;;  %v10079_v61 = vadd.f32 %v10038_v6, %v4474_v58 }
 0x65e   :  { %v10082_v34 = vadd.f32 %v10038_v6, %v4475_v25  ;;  %v10086_v8 = vadd.f32 %v10038_v6, %v4478_v50  ;;  %v10089_v32 = vadd.f32 %v10038_v6, %v4479_v55  ;;  %v10092_v0 = vadd.f32 %v10038_v6, %v4482_v53  ;;  %v7169_v50 = vld [vmem:[%s12510_s0 + $0x28] sm:$0xff]  }
 0x65f   :  { %v10095_v60 = vadd.f32 %v10038_v6, %v4483_v17  ;;  %v10098_v36 = vadd.f32 %v10038_v6, %v4486_v49  ;;  %v10101_v30 = vadd.f32 %v10038_v6, %v4487_v15  ;;  %v10104_v31 = vadd.f32 %v10038_v6, %v4490_v37  ;;  %6957 = vmatmul.mubr.bf16.vlgmr.msra.gmra.mxu1 %v7169_v50  ;;  %v7170_v15 = vld [vmem:[%s12510_s0 + $0x30] sm:$0xff]  }
 0x660   :  { %v10107_v57 = vadd.f32 %v10038_v6, %v4491_v3  ;;  %v10110_v63 = vadd.f32 %v10038_v6, %v4494_v20  ;;  %v10113_v2 = vadd.f32 %v10038_v6, %v4495_v35  ;;  %v10116_v58 = vadd.f32 %v10038_v6, %v4498_v38  ;;  %6960 = vmatprep.mubr.bf16.mxu1 %v7170_v15  ;;  %v13283_v37 = vld [vmem:[#allocation63_spill] sm:$0xff]  ;;  %v13284_v20 = vld [vmem:[#allocation64_spill] sm:$0xff]  ;;  %v13285_v35 = vld [vmem:[#allocation66_spill] sm:$0xff] }
 0x661   :  { %v10119_v25 = vadd.f32 %v10038_v6, %v4499_v29  ;;  %v4440_v55 = vmul.f32 %v10031_v59, %v9570_v62  ;;  %v4441_v53 = vmul.f32 %v10031_v59, %v9573_v52  ;;  %v10129_v17 = vadd.f32 %v10038_v6, %v4502_v24 }
 0x662   :  { %v10132_v49 = vadd.f32 %v10038_v6, %v4503_v48  ;;  %v4442_v3 = vmul.f32 %v10031_v59, %v13283_v37  ;;  %v4443_v62 = vmul.f32 %v10031_v59, %v13284_v20  ;;  %v4444_v52 = vmul.f32 %v10031_v59, %v13285_v35 }
 0x663   :  { %v4445_v38 = vmul.f32 %v10031_v59, %v9590_v40  ;;  %v4446_v29 = vmul.f32 %v10031_v59, %v9593_v16  ;;  %v4447_v24 = vmul.f32 %v10031_v59, %v9597_v19  ;;  %v4448_v48 = vmul.f32 %v10031_v59, %v9601_v41 }
 0x664   :  { %v4449_v50 = vmul.f32 %v10031_v59, %v9606_v5  ;;  %v4450_v15 = vmul.f32 %v10031_v59, %v9609_v44  ;;  %v4451_v37 = vmul.f32 %v10031_v59, %v9613_v12  ;;  %v4452_v40 = vmul.f32 %v10031_v59, %v9617_v23 }
 0x665   :  { %v10161_v16 = vmul.f32 %v10031_v59, %v9622_v13  ;;  %v4454_v19 = vmul.f32 %v10031_v59, %v9625_v1  ;;  %v4455_v41 = vmul.f32 %v10031_v59, %v9629_v39  ;;  %v4510_v5 = vadd.f32 %v10038_v6, %v4442_v3 }
 0x666   :  { %v4511_v44 = vadd.f32 %v10038_v6, %v4443_v62  ;;  %v10171_v12 = vmul.f32 %v10031_v59, %v9633_v27  ;;  %v10175_v23 = vmul.f32 %v10031_v59, %v9638_v22  ;;  %v10179_v13 = vmul.f32 %v10031_v59, %v9713_v21 }
 0x667   :  { %v10183_v1 = vmul.f32 %v10031_v59, %v9718_v51  ;;  %v10187_v39 = vmul.f32 %v10031_v59, %v9729_v18  ;;  %v10191_v27 = vmul.f32 %v10031_v59, %v9734_v45  ;;  %v10195_v22 = vmul.f32 %v10031_v59, %v13262_v26  ;;  %v7171_v26 = vld [vmem:[%s12510_s0 + $0x38] sm:$0xff]  }
 0x668   :  { %v10199_v21 = vmul.f32 %v10031_v59, %v13264_v54  ;;  %v10203_v51 = vmul.f32 %v10031_v59, %v13267_v42  ;;  %v10207_v18 = vmul.f32 %v10031_v59, %v13268_v46  ;;  %v10211_v45 = vmul.f32 %v10031_v59, %v13271_v33  ;;  %6961 = vmatmul.mubr.bf16.gmra.mxu1 %v7171_v26  ;;  %v7172_v46 = vld [vmem:[%s12510_s0 + $0x40] sm:$0xff]  }
 0x669   :  { %v10214_v3 = vadd.f32 %v10038_v6, %v4446_v29  ;;  %v4515_v54 = vadd.f32 %v10038_v6, %v4447_v24  ;;  %v4574_v42 = vmax.f32 %v4510_v5, 0.0  ;;  %v4575_v20 = vmax.f32 %v4511_v44, 0.0  ;;  %6964 = vmatprep.mubr.bf16.mxu1 %v7172_v46  ;;  %v13286_v46 = vld [vmem:[#allocation24_spill] sm:$0xff] }
 0x66a   :  { %v4508_v62 = vadd.f32 %v10038_v6, %v4440_v55  ;;  %v4518_v33 = vadd.f32 %v10038_v6, %v4450_v15  ;;  %v4509_v35 = vadd.f32 %v10038_v6, %v4441_v53  ;;  %v4512_v29 = vadd.f32 %v10038_v6, %v4444_v52 }
 0x66b   :  { %v4513_v9 = vadd.f32 %v10038_v6, %v4445_v38  ;;  %v10230_v24 = vmul.f32 %v10031_v59, %v13273_v28  ;;  %v10234_v55 = vmul.f32 %v10031_v59, %v13276_v14  ;;  %v4519_v5 = vadd.f32 %v10038_v6, %v4451_v37 }
 0x66c   :  { %v4572_v44 = vmax.f32 %v4508_v62, 0.0  ;;  %v10239_v15 = vmul.f32 %v10031_v59, %v9798_v4  ;;  %v4573_v53 = vmax.f32 %v4509_v35, 0.0  ;;  %v4576_v26 = vmax.f32 %v4512_v29, 0.0 }
 0x66d   :  { %v4577_v52 = vmax.f32 %v4513_v9, 0.0  ;;  %v10243_v38 = vmul.f32 %v10031_v59, %v13286_v46  ;;  %v10246_v28 = vadd.f32 %v10038_v6, %v4454_v19  ;;  %v10249_v14 = vadd.f32 %v10038_v6, %v4455_v41 }
 0x66e   :  { %v4637_v10 = vpack.c.bf16 %v4575_v20, %v4574_v42  ;;  %v4578_v37 = vmax.f32 %v10214_v3, 0.0  ;;  %v4579_v62 = vmax.f32 %v4515_v54, 0.0  ;;  %v4582_v56 = vmax.f32 %v4518_v33, 0.0  ;;  %v7173_v3 = vld [vmem:[%s12510_s0 + $0x48] sm:$0xff]   ;;  %v13288_v33 = vld [vmem:[#allocation23_spill] sm:$0xff] }
 0x66f   :  { %v4636_v4 = vpack.c.bf16 %v4573_v53, %v4572_v44  ;;  %v4583_v7 = vmax.f32 %v4519_v5, 0.0  ;;  %v4606_v35 = vmax.f32 %v10079_v61, 0.0  ;;  %v4516_v9 = vadd.f32 %v10038_v6, %v4448_v48 }
 0x670   :  { %v4517_v29 = vadd.f32 %v10038_v6, %v4449_v50  ;;  %v4607_v46 = vmax.f32 %v10082_v34, 0.0  ;;  %v4610_v19 = vmax.f32 %v10086_v8, 0.0  ;;  %v4611_v41 = vmax.f32 %v10089_v32, 0.0  ;;  %6965 = vmatmul.mubr.bf16.gmra.mxu1 %v7173_v3  ;;  %v7174_v8 = vld [vmem:[%s12510_s0 + $0x50] sm:$0xff]  }
 0x671   :  { %6868 = vmatprep.mubr.bf16.mxu0 %v4636_v4  ;;  %v4638_v42 = vpack.c.bf16 %v4577_v52, %v4576_v26  ;;  %v4614_v54 = vmax.f32 %v10092_v0, 0.0  ;;  %v4615_v61 = vmax.f32 %v10095_v60, 0.0  ;;  %v4618_v48 = vmax.f32 %v10098_v36, 0.0  ;;  %6968 = vmatprep.mubr.bf16.mxu1 %v7174_v8  ;;  %v13287_v60 = vld [vmem:[#allocation15_spill] sm:$0xff] }
 0x672   :  { %6869 = vmatmul.mubr.bf16.vlgmr.msra.gmra.mxu0 %v4637_v10  ;;  %v10265_v34 = vadd.f32 %v10038_v6, %v4452_v40  ;;  %v4619_v32 = vmax.f32 %v10101_v30, 0.0  ;;  %v4622_v50 = vmax.f32 %v10104_v31, 0.0  ;;  %v4623_v20 = vmax.f32 %v10107_v57, 0.0 }
 0x673   :  { %v4626_v0 = vmax.f32 %v10110_v63, 0.0  ;;  %6933 = vmatpush3.bf16.msra.mxu0 %v13287_v60  ;;  %6872 = vmatprep.mubr.bf16.mxu0 %v4638_v42  ;;  %v4627_v10 = vmax.f32 %v10113_v2, 0.0  ;;  %v4580_v36 = vmax.f32 %v4516_v9, 0.0  ;;  %v4581_v40 = vmax.f32 %v4517_v29, 0.0  ;;  %v7176_v29 = vld [vmem:[%s12510_s0 + $0x60] sm:$0xff]  }
 0x674   :  { %6934 = vmatprep.subr.bf16.mxu0 %v13288_v33  ;;  %v4521_v5 = vadd.f32 %v10038_v6, %v10161_v16  ;;  %v4630_v30 = vmax.f32 %v10116_v58, 0.0  ;;  %v4631_v31 = vmax.f32 %v10119_v25, 0.0  ;;  %v4634_v57 = vmax.f32 %v10129_v17, 0.0 }
 0x675   :  { %v4635_v63 = vmax.f32 %v10132_v49, 0.0  ;;  %v4639_v44 = vpack.c.bf16 %v4579_v62, %v4578_v37  ;;  %v4641_v53 = vpack.c.bf16 %v4583_v7, %v4582_v56  ;;  %v4584_v26 = vmax.f32 %v10265_v34, 0.0  ;;  %v13289_v56 = vld [vmem:[#allocation26_spill] sm:$0xff] }
 0x676   :  { %v10284_v2 = vpack.c.bf16 %v4607_v46, %v4606_v35  ;;  %v10289_v52 = vadd.f32 %v10038_v6, %v10171_v12  ;;  %v4544_v58 = vadd.f32 %v10038_v6, %v10179_v13  ;;  %v4545_v25 = vadd.f32 %v10038_v6, %v10183_v1  ;;  %v7175_v1 = vld [vmem:[%s12510_s0 + $0x58] sm:$0xff]  }
 0x677   :  { %6935 = vmatpush3.bf16.msra.mxu0 %v13288_v33  ;;  %v10295_v17 = vpack.c.bf16 %v4611_v41, %v4610_v19  ;;  %v4640_v49 = vpack.c.bf16 %v4581_v40, %v4580_v36  ;;  %v4585_v7 = vmax.f32 %v4521_v5, 0.0  ;;  %v4548_v16 = vadd.f32 %v10038_v6, %v10187_v39  ;;  %v7177_v33 = vld [vmem:[%s12510_s0 + $0x68] sm:$0xff]  }
 0x678   :  { %6936 = vmatprep.subr.bf16.mxu0 %v13289_v56  ;;  %v4549_v37 = vadd.f32 %v10038_v6, %v10191_v27  ;;  %v4608_v12 = vmax.f32 %v4544_v58, 0.0  ;;  %v4609_v62 = vmax.f32 %v4545_v25, 0.0  ;;  %v10302_v4 = vpack.c.bf16 %v4615_v61, %v4614_v54  ;;  %6969 = vmatmul.mubr.bf16.gmra.mxu1 %v7175_v1  ;;  %v13292_v25 = vld [vmem:[#allocation68_spill] sm:$0xff] }
 0x679   :  { %v4552_v13 = vadd.f32 %v10038_v6, %v10195_v22  ;;  %v10311_v35 = vadd.f32 %v10038_v6, %v10175_v23  ;;  %v4612_v39 = vmax.f32 %v4548_v16, 0.0  ;;  %v4553_v27 = vadd.f32 %v10038_v6, %v10199_v21  ;;  %6972 = vmatprep.mubr.bf16.mxu1 %v7176_v29  ;;  %v7179_v1 = vld [vmem:[%s12510_s0 + $0x78] sm:$0xff]  }
 0x67a   :  { %6873 = vmatmul.mubr.bf16.gmra.mxu0 %v4639_v44  ;;  %v4613_v9 = vmax.f32 %v4549_v37, 0.0  ;;  %v10319_v22 = vpack.c.bf16 %v4609_v62, %v4608_v12  ;;  %v10321_v19 = vpack.c.bf16 %v4619_v32, %v4618_v48  ;;  %v4556_v23 = vadd.f32 %v10038_v6, %v10203_v51  ;;  %v13295_v37 = vld [vmem:[#allocation13_spill] sm:$0xff] }
 0x67b   :  { %6876 = vmatprep.mubr.bf16.mxu0 %v4640_v49  ;;  %6937 = vmatpush3.bf16.msra.mxu0 %v13289_v56  ;;  %v4616_v46 = vmax.f32 %v4552_v13, 0.0  ;;  %v4617_v21 = vmax.f32 %v4553_v27, 0.0  ;;  %v4557_v42 = vadd.f32 %v10038_v6, %v10207_v18  ;;  %v10330_v3 = vpack.c.bf16 %v4623_v20, %v4622_v50  ;;  %v13296_v27 = vld [vmem:[#allocation19_spill] sm:$0xff] }
 0x67c   :  { %6938 = vmatprep.subr.bf16.mxu0 %v9992_v47  ;;  %v10326_v41 = vpack.c.bf16 %v4613_v9, %v4612_v39  ;;  %v4620_v54 = vmax.f32 %v4556_v23, 0.0  ;;  %v4560_v61 = vadd.f32 %v10038_v6, %v10211_v45  ;;  %v4561_v48 = vadd.f32 %v10038_v6, %v10230_v24  ;;  %v13297_v23 = vld [vmem:[#allocation30_spill] sm:$0xff] }
 0x67d   :  { %v10336_v34 = vpack.c.bf16 %v4627_v10, %v4626_v0  ;;  %v10338_v51 = vpack.c.bf16 %v4617_v21, %v4616_v46  ;;  %v4621_v8 = vmax.f32 %v4557_v42, 0.0  ;;  %v4564_v32 = vadd.f32 %v10038_v6, %v10234_v55  ;;  %v13298_v42 = vld [vmem:[#allocation29_spill] sm:$0xff] }
 0x67e   :  { %v4565_v18 = vadd.f32 %v10038_v6, %v10239_v15  ;;  %v4624_v50 = vmax.f32 %v4560_v61, 0.0  ;;  %v4625_v20 = vmax.f32 %v4561_v48, 0.0  ;;  %v10345_v60 = vpack.c.bf16 %v4631_v31, %v4630_v30  ;;  %v7178_v30 = vld [vmem:[%s12510_s0 + $0x70] sm:$0xff]   ;;  %v13299_v61 = vld [vmem:[#allocation37_spill] sm:$0xff] }
 0x67f   :  { %6939 = vmatpush3.bf16.msra.mxu0 %v9992_v47  ;;  %v4568_v45 = vadd.f32 %v10038_v6, %v10243_v38  ;;  %v10350_v24 = vpack.c.bf16 %v4621_v8, %v4620_v54  ;;  %v4628_v0 = vmax.f32 %v4564_v32, 0.0  ;;  %v4569_v55 = vadd.f32 %v10038_v6, %v10035_v43  ;;  %v13300_v8 = vld [vmem:[#allocation32_spill] sm:$0xff] }
 0x680   :  { %6940 = vmatprep.subr.bf16.mxu0 %v10005_v11  ;;  %v4629_v10 = vmax.f32 %v4565_v18, 0.0  ;;  %v4642_v36 = vpack.c.bf16 %v4585_v7, %v4584_v26  ;;  %v10354_v15 = vpack.c.bf16 %v4625_v20, %v4624_v50  ;;  %v10356_v40 = vpack.c.bf16 %v4635_v63, %v4634_v57  ;;  %6973 = vmatmul.mubr.bf16.gmra.mxu1 %v7177_v33  ;;  %v13290_v57 = vld [vmem:[#allocation20_spill] sm:$0xff]  ;;  %v13291_v26 = vld [vmem:[#allocation67_spill] sm:$0xff]  ;;  %v13293_v7 = vld [vmem:[#allocation69_spill] sm:$0xff] }
 0x681   :  { %v4632_v47 = vmax.f32 %v4568_v45, 0.0  ;;  %v4633_v5 = vmax.f32 %v4569_v55, 0.0  ;;  %6976 = vmatprep.mubr.bf16.mxu1 %v7178_v30  ;;  %v4586_v43 = vmax.f32 %v10246_v28, 0.0  ;;  %v4587_v31 = vmax.f32 %v10249_v14, 0.0  ;;  %v13294_v28 = vld [vmem:[#allocation70_spill] sm:$0xff] }
 0x682   :  { %6877 = vmatmul.mubr.bf16.gmra.mxu0 %v4641_v53  ;;  %v10361_v38 = vpack.c.bf16 %v4629_v10, %v4628_v0  ;;  %v4588_v44 = vmax.f32 %v10289_v52, 0.0  ;;  %v4589_v53 = vmax.f32 %v10311_v35, 0.0  ;;  %v4458_v58 = vmul.f32 %v10031_v59, %v13291_v26  ;;  %v7180_v35 = vld [vmem:[%s12510_s0 + $0x80] sm:$0xff]   ;;  %v7181_v55 = vld [vmem:[%s12510_s0 + $0x88] sm:$0xff]  }
 0x683   :  { %6880 = vmatprep.mubr.bf16.mxu0 %v4642_v36  ;;  %6941 = vmatpush3.bf16.msra.mxu0 %v10005_v11  ;;  %v10370_v63 = vpack.c.bf16 %v4633_v5, %v4632_v47  ;;  %v4459_v49 = vmul.f32 %v10031_v59, %v13292_v25  ;;  %v4460_v11 = vmul.f32 %v10031_v59, %v13293_v7  ;;  %v7182_v36 = vld [vmem:[%s12510_s0 + $0x90] sm:$0xff]  }
 0x684   :  { %6942 = vmatprep.subr.bf16.mxu0 %v13290_v57  ;;  %v4461_v14 = vmul.f32 %v10031_v59, %v13294_v28  ;;  %v4526_v56 = vadd.f32 %v10038_v6, %v4458_v58  ;;  %v4643_v16 = vpack.c.bf16 %v4587_v31, %v4586_v43  ;;  %v4644_v12 = vpack.c.bf16 %v4589_v53, %v4588_v44  ;;  %v13301_v43 = vld [vmem:[#allocation27_spill] sm:$0xff] }
 0x685   :  { %v4527_v52 = vadd.f32 %v10038_v6, %v4459_v49  ;;  %v4528_v62 = vadd.f32 %v10038_v6, %v4460_v11  ;;  %v4462_v21 = vmul.f32 %v10031_v59, %v13297_v23  ;;  %v4463_v54 = vmul.f32 %v10031_v59, %v13298_v42  ;;  %v13303_v53 = vld [vmem:[#allocation7_spill] sm:$0xff] }
 0x686   :  { %v4529_v13 = vadd.f32 %v10038_v6, %v4461_v14  ;;  %v4590_v39 = vmax.f32 %v4526_v56, 0.0  ;;  %v4464_v48 = vmul.f32 %v10031_v59, %v13299_v61  ;;  %v4465_v32 = vmul.f32 %v10031_v59, %v13300_v8  ;;  %v13304_v58 = vld [vmem:[#allocation31_spill] sm:$0xff] }
 0x687   :  { %6943 = vmatpush3.bf16.msra.mxu0 %v13290_v57  ;;  %v4591_v9 = vmax.f32 %v4527_v52, 0.0  ;;  %v4592_v29 = vmax.f32 %v4528_v62, 0.0  ;;  %v4530_v18 = vadd.f32 %v10038_v6, %v4462_v21  ;;  %v4531_v50 = vadd.f32 %v10038_v6, %v4463_v54  ;;  %v13302_v57 = vld [vmem:[#allocation34_spill] sm:$0xff]  ;;  %v7183_v52 = vld [vmem:[%s12510_s0 + $0x98] sm:$0xff]  }
 0x688   :  { %6944 = vmatprep.subr.bf16.mxu0 %v13295_v37  ;;  %6977 = vmatmul.mubr.bf16.gmra.mxu1 %v7179_v1  ;;  %v4593_v46 = vmax.f32 %v4529_v13, 0.0  ;;  %v4532_v0 = vadd.f32 %v10038_v6, %v4464_v48  ;;  %v4533_v10 = vadd.f32 %v10038_v6, %v4465_v32  ;;  %v4466_v31 = vmul.f32 %v10031_v59, %v13301_v43  ;;  %v13305_v1 = vld [vmem:[#allocation5_spill] sm:$0xff]  ;;  %v7185_v32 = vld [vmem:[%s12510_s0 + $0xa8] sm:$0xff]  }
 0x689   :  { %6980 = vmatprep.mubr.bf16.mxu1 %v7180_v35  ;;  %v4645_v20 = vpack.c.bf16 %v4591_v9, %v4590_v39  ;;  %v4594_v47 = vmax.f32 %v4530_v18, 0.0  ;;  %v4595_v33 = vmax.f32 %v4531_v50, 0.0  ;;  %v4467_v44 = vmul.f32 %v10031_v59, %v13302_v57  ;;  %v13306_v39 = vld [vmem:[#allocation12_spill] sm:$0xff] }
 0x68a   :  { %6881 = vmatmul.mubr.bf16.gmra.mxu0 %v4643_v16  ;;  %v4646_v45 = vpack.c.bf16 %v4593_v46, %v4592_v29  ;;  %v4596_v5 = vmax.f32 %v4532_v0, 0.0  ;;  %v4597_v30 = vmax.f32 %v4533_v10, 0.0  ;;  %v4468_v26 = vmul.f32 %v10031_v59, %v13303_v53  ;;  %v7184_v16 = vld [vmem:[%s12510_s0 + $0xa0] sm:$0xff]   ;;  %v13308_v46 = vld [vmem:[#allocation35_spill] sm:$0xff] }
 0x68b   :  { %6884 = vmatprep.mubr.bf16.mxu0 %v4644_v12  ;;  %6945 = vmatpush3.bf16.msra.mxu0 %v13295_v37  ;;  %v4469_v25 = vmul.f32 %v10031_v59, %v13304_v58  ;;  %v4534_v49 = vadd.f32 %v10038_v6, %v4466_v31  ;;  %v4535_v7 = vadd.f32 %v10038_v6, %v4467_v44 }
 0x68c   :  { %6946 = vmatprep.subr.bf16.mxu0 %v13296_v27  ;;  %v4647_v11 = vpack.c.bf16 %v4595_v33, %v4594_v47  ;;  %v4648_v28 = vpack.c.bf16 %v4597_v30, %v4596_v5  ;;  %v4536_v14 = vadd.f32 %v10038_v6, %v4468_v26  ;;  %v4470_v35 = vmul.f32 %v10031_v59, %v13305_v1  ;;  %v7190_v47 = vld [vmem:[%s12510_s0 + $0xd0] sm:$0xff]   ;;  %v7191_v33 = vld [vmem:[%s12510_s0 + $0xd8] sm:$0xff]   ;;  %v7192_v5 = vld [vmem:[%s12510_s0 + $0xe0] sm:$0xff]  }
 0x68d   :  { %v4537_v56 = vadd.f32 %v10038_v6, %v4469_v25  ;;  %v4598_v37 = vmax.f32 %v4534_v49, 0.0  ;;  %v4599_v12 = vmax.f32 %v4535_v7, 0.0  ;;  %v4471_v9 = vmul.f32 %v10031_v59, %v13306_v39 }
 0x68e   :  { %v4600_v62 = vmax.f32 %v4536_v14, 0.0  ;;  %v4473_v23 = vmul.f32 %v10031_v59, %v13308_v46  ;;  %v4538_v21 = vadd.f32 %v10038_v6, %v4470_v35 }
 0x68f   :  { %6947 = vmatpush3.bf16.msra.mxu0 %v13296_v27  ;;  %v4601_v13 = vmax.f32 %v4537_v56, 0.0  ;;  %v13307_v27 = vld [vmem:[#allocation42_spill] sm:$0xff]  ;;  %v4539_v42 = vadd.f32 %v10038_v6, %v4471_v9  ;;  %v4649_v54 = vpack.c.bf16 %v4599_v12, %v4598_v37 }
 0x690   :  { %6981 = vmatmul.mubr.bf16.gmra.mxu1 %v7181_v55  ;;  %v4472_v29 = vmul.f32 %v10031_v59, %v13307_v27  ;;  %v4541_v8 = vadd.f32 %v10038_v6, %v4473_v23  ;;  %v7186_v59 = vld [vmem:[%s12510_s0 + $0xb0] sm:$0xff]   ;;  %v4602_v18 = vmax.f32 %v4538_v21, 0.0  ;;  %v7188_v55 = vld [vmem:[%s12510_s0 + $0xc0] sm:$0xff]  }
 0x691   :  { %6984 = vmatprep.mubr.bf16.mxu1 %v7182_v36  ;;  %v4650_v61 = vpack.c.bf16 %v4601_v13, %v4600_v62  ;;  %v4603_v50 = vmax.f32 %v4539_v42, 0.0  ;;  %v7189_v36 = vld [vmem:[%s12510_s0 + $0xc8] sm:$0xff]  }
 0x692   :  { %6885 = vmatmul.mubr.bf16.gmra.mxu0 %v4645_v20  ;;  %v4540_v48 = vadd.f32 %v10038_v6, %v4472_v29  ;;  %v7187_v6 = vld [vmem:[%s12510_s0 + $0xb8] sm:$0xff]  }
 0x693   :  { %6888 = vmatprep.mubr.bf16.mxu0 %v4646_v45  ;;  %v4605_v45 = vmax.f32 %v4541_v8, 0.0  ;;  %v4651_v0 = vpack.c.bf16 %v4603_v50, %v4602_v18 }
 0x694   :  { %v4604_v20 = vmax.f32 %v4540_v48, 0.0 }
 0x696   :  { %v4652_v10 = vpack.c.bf16 %v4605_v45, %v4604_v20 }
 0x698   :  { %6985 = vmatmul.mubr.bf16.gmra.mxu1 %v7183_v52 }
 0x699   :  { %6988 = vmatprep.mubr.bf16.mxu1 %v7184_v16 }
 0x69a   :  { %6889 = vmatmul.mubr.bf16.gmra.mxu0 %v4647_v11 }
 0x69b   :  { %6892 = vmatprep.mubr.bf16.mxu0 %v4648_v28 }
 0x6a0   :  { %6989 = vmatmul.mubr.bf16.gmra.mxu1 %v7185_v32 }
 0x6a1   :  { %6992 = vmatprep.mubr.bf16.mxu1 %v7186_v59 }
 0x6a2   :  { %6893 = vmatmul.mubr.bf16.gmra.mxu0 %v4649_v54 }
 0x6a3   :  { %6896 = vmatprep.mubr.bf16.mxu0 %v4650_v61 }
 0x6a8   :  { %6993 = vmatmul.mubr.bf16.gmra.mxu1 %v7187_v6 }
 0x6a9   :  { %6996 = vmatprep.mubr.bf16.mxu1 %v7188_v55 }
 0x6aa   :  { %6897 = vmatmul.mubr.bf16.gmra.mxu0 %v4651_v0 }
 0x6ab   :  { %6900 = vmatprep.mubr.bf16.mxu0 %v4652_v10 }
 0x6b0   :  { %6997 = vmatmul.mubr.bf16.gmra.mxu1 %v7189_v36 }
 0x6b1   :  { %7000 = vmatprep.mubr.bf16.mxu1 %v7190_v47 }
 0x6b2   :  { %6901 = vmatmul.mubr.bf16.gmra.mxu0 %v10284_v2  ;;  %v7193_v2 = vld [vmem:[%s12510_s0 + $0xe8] sm:$0xff]  }
 0x6b3   :  { %6904 = vmatprep.mubr.bf16.mxu0 %v10319_v22  ;;  %v7194_v22 = vld [vmem:[%s12510_s0 + $0xf0] sm:$0xff]  }
 0x6b8   :  { %7001 = vmatmul.mubr.bf16.gmra.mxu1 %v7191_v33 }
 0x6b9   :  { %7004 = vmatprep.mubr.bf16.mxu1 %v7192_v5 }
 0x6ba   :  { %6905 = vmatmul.mubr.bf16.gmra.mxu0 %v10295_v17  ;;  %v7195_v17 = vld [vmem:[%s12510_s0 + $0xf8] sm:$0xff]  }
 0x6bb   :  { %6908 = vmatprep.mubr.bf16.mxu0 %v10326_v41  ;;  %v7198_v41 = vld [vmem:[%s12510_s0 + $0x10] sm:$0xff]  }
 0x6c0   :  { %7005 = vmatmul.mubr.bf16.gmra.mxu1 %v7193_v2 }
 0x6c1   :  { %7008 = vmatprep.mubr.bf16.mxu1 %v7194_v22 }
 0x6c2   :  { %6909 = vmatmul.mubr.bf16.gmra.mxu0 %v10302_v4  ;;  %v7196_v4 = vld [vmem:[%s12510_s0] sm:$0xff]  }
 0x6c3   :  { %6912 = vmatprep.mubr.bf16.mxu0 %v10338_v51 }
 0x6c8   :  { %7009 = vmatmul.mubr.bf16.gmra.mxu1 %v7195_v17 }
 0x6ca   :  { %6913 = vmatmul.mubr.bf16.gmra.mxu0 %v10321_v19  ;;  %v7197_v19 = vld [vmem:[%s12510_s0 + $0x8] sm:$0xff]  }
 0x6cb   :  { %6916 = vmatprep.mubr.bf16.mxu0 %v10350_v24 }
 0x6d2   :  { %6917 = vmatmul.mubr.bf16.gmra.mxu0 %v10330_v3  ;;  %v7199_v3 = vld [vmem:[%s12510_s0 + $0x18] sm:$0xff]  }
 0x6d3   :  { %6920 = vmatprep.mubr.bf16.mxu0 %v10354_v15 }
 0x6da   :  { %6921 = vmatmul.mubr.bf16.gmra.mxu0 %v10336_v34 }
 0x6db   :  { %6924 = vmatprep.mubr.bf16.mxu0 %v10361_v38 }
 0x6e2   :  { %6925 = vmatmul.mubr.bf16.gmra.mxu0 %v10345_v60 }
 0x6e3   :  { %6928 = vmatprep.mubr.bf16.mxu0 %v10370_v63 }
 0x6ea   :  { %6929 = vmatmul.mubr.bf16.gmra.mxu0 %v10356_v40 }
 0x6eb   :  { %6948 = vmatprep.mubr.bf16.mxu0 %v7196_v4 }
 0x6f2   :  { %6949 = vmatmul.mubr.bf16.vlgmr.msra.gmra.mxu0 %v7197_v19 }
 0x6f3   :  { %6952 = vmatprep.mubr.bf16.mxu0 %v7198_v41 }
 0x6fa   :  { %6953 = vmatmul.mubr.bf16.gmra.mxu0 %v7199_v3 }
 0x732   :  { %v10505_v34 = vpop.f32.mrf.mxu0 }
 0x733   :  { %13309 = vst [vmem:[#allocation18_spill] sm:$0xff] %v10505_v34 }
 0x734   :  { %v10507_v51 = vpop.f32.mrf.mxu0 }
 0x735   :  { %13310 = vst [vmem:[#allocation22_spill] sm:$0xff] %v10507_v51 }
 0x736   :  { %v10509_v60 = vpop.f32.mrf.mxu0 }
 0x737   :  { %13311 = vst [vmem:[#allocation17_spill] sm:$0xff] %v10509_v60 }
 0x738   :  { %v10511_v24 = vpop.f32.mrf.mxu0 }
 0x739   :  { %13312 = vst [vmem:[#allocation39_spill] sm:$0xff] %v10511_v24  ;;  %v5023_v15 = vadd.f32 %v10511_v24, %v10507_v51 }
 0x73a   :  { %v10515_v40 = vpop.f32.mrf.mxu0 }
 0x73b   :  { %13313 = vst [vmem:[#allocation21_spill] sm:$0xff] %v10515_v40  ;;  %v5024_v38 = vadd.f32 %v10505_v34, %v5023_v15 }
 0x73c   :  { %v10518_v63 = vpop.f32.mrf.mxu0 }
 0x73d   :  { %13314 = vst [vmem:[#allocation41_spill] sm:$0xff] %v10518_v63  ;;  %v5025_v30 = vadd.f32 %v10509_v60, %v5024_v38 }
 0x73e   :  { %v10521_v43 = vpop.f32.mrf.mxu0 }
 0x73f   :  { %13315 = vst [vmem:[#allocation38_spill] sm:$0xff] %v10521_v43  ;;  %v5026_v31 = vadd.f32 %v5025_v30, %v10518_v63 }
 0x740   :  { %v10524_v57 = vpop.f32.mrf.mxu0 }
 0x741   :  { %13316 = vst [vmem:[#allocation44_spill] sm:$0xff] %v10524_v57  ;;  %v5027_v44 = vadd.f32 %v5026_v31, %v10524_v57 }
 0x742   :  { %v10527_v53 = vpop.f32.mrf.mxu0 }
 0x743   :  { %13317 = vst [vmem:[#allocation40_spill] sm:$0xff] %v10527_v53  ;;  %v5028_v26 = vadd.f32 %v10515_v40, %v5027_v44 }
 0x744   :  { %v10530_v58 = vpop.f32.mrf.mxu0 }
 0x745   :  { %13318 = vst [vmem:[#allocation47_spill] sm:$0xff] %v10530_v58  ;;  %v5029_v25 = vadd.f32 %v10521_v43, %v5028_v26 }
 0x746   :  { %v10533_v49 = vpop.f32.mrf.mxu0 }
 0x747   :  { %13319 = vst [vmem:[#allocation43_spill] sm:$0xff] %v10533_v49  ;;  %v5030_v7 = vadd.f32 %v5029_v25, %v10530_v58 }
 0x748   :  { %v10536_v11 = vpop.f32.mrf.mxu0 }
 0x749   :  { %13320 = vst [vmem:[#allocation52_spill] sm:$0xff] %v10536_v11  ;;  %v5031_v28 = vadd.f32 %v5030_v7, %v10536_v11 }
 0x74a   :  { %v10539_v14 = vpop.f32.mrf.mxu0 }
 0x74b   :  { %13321 = vst [vmem:[#allocation36_spill] sm:$0xff] %v10539_v14  ;;  %v5032_v56 = vadd.f32 %v10527_v53, %v5031_v28 }
 0x74c   :  { %v10542_v52 = vpop.f32.mrf.mxu0 }
 0x74d   :  { %13322 = vst [vmem:[#allocation49_spill] sm:$0xff] %v10542_v52  ;;  %v5033_v16 = vadd.f32 %v10533_v49, %v5032_v56 }
 0x74e   :  { %v10545_v37 = vpop.f32.mrf.mxu0 }
 0x74f   :  { %13323 = vst [vmem:[#allocation46_spill] sm:$0xff] %v10545_v37  ;;  %v5034_v12 = vadd.f32 %v5033_v16, %v10542_v52 }
 0x750   :  { %v10548_v62 = vpop.f32.mrf.mxu0 }
 0x751   :  { %13324 = vst [vmem:[#allocation33_spill] sm:$0xff] %v10548_v62  ;;  %v5035_v13 = vadd.f32 %v5034_v12, %v10548_v62 }
 0x752   :  { %v10551_v1 = vpop.f32.mrf.mxu0 }
 0x753   :  { %13325 = vst [vmem:[#allocation51_spill] sm:$0xff] %v10551_v1  ;;  %v5036_v35 = vadd.f32 %v10539_v14, %v5035_v13 }
 0x754   :  { %v10554_v39 = vpop.f32.mrf.mxu0 }
 0x755   :  { %13326 = vst [vmem:[#allocation56_spill] sm:$0xff] %v10554_v39  ;;  %v5037_v9 = vadd.f32 %v10545_v37, %v5036_v35 }
 0x756   :  { %v10557_v27 = vpop.f32.mrf.mxu0 }
 0x757   :  { %13327 = vst [vmem:[#allocation54_spill] sm:$0xff] %v10557_v27  ;;  %v5038_v29 = vadd.f32 %v5037_v9, %v10554_v39 }
 0x758   :  { %v10560_v46 = vpop.f32.mrf.mxu0 }
 0x759   :  { %13328 = vst [vmem:[#allocation50_spill] sm:$0xff] %v10560_v46  ;;  %v5039_v23 = vadd.f32 %v5038_v29, %v10560_v46 }
 0x75a   :  { %v10563_v21 = vpop.f32.mrf.mxu0 }
 0x75b   :  { %13329 = vst [vmem:[#allocation59_spill] sm:$0xff] %v10563_v21  ;;  %v5040_v42 = vadd.f32 %v10551_v1, %v5039_v23 }
 0x75c   :  { %v10566_v54 = vpop.f32.mrf.mxu0 }
 0x75d   :  { %13330 = vst [vmem:[#allocation55_spill] sm:$0xff] %v10566_v54  ;;  %v5041_v61 = vadd.f32 %v10557_v27, %v5040_v42 }
 0x75e   :  { %v10569_v48 = vpop.f32.mrf.mxu0 }
 0x75f   :  { %13331 = vst [vmem:[#allocation57_spill] sm:$0xff] %v10569_v48  ;;  %v5042_v8 = vadd.f32 %v5041_v61, %v10566_v54 }
 0x760   :  { %v10572_v32 = vpop.f32.mrf.mxu0 }
 0x761   :  { %13332 = vst [vmem:[#allocation62_spill] sm:$0xff] %v10572_v32  ;;  %v5043_v59 = vadd.f32 %v5042_v8, %v10572_v32 }
 0x762   :  { %v10575_v18 = vpop.f32.mrf.mxu0 }
 0x763   :  { %13333 = vst [vmem:[#allocation58_spill] sm:$0xff] %v10575_v18  ;;  %v5044_v50 = vadd.f32 %v10563_v21, %v5043_v59 }
 0x764   :  { %v10578_v20 = vpop.f32.mrf.mxu0 }
 0x765   :  { %13334 = vst [vmem:[#allocation60_spill] sm:$0xff] %v10578_v20  ;;  %v5045_v45 = vadd.f32 %v10569_v48, %v5044_v50 }
 0x766   :  { %v10581_v0 = vpop.f32.mrf.mxu0 }
 0x767   :  { %13335 = vst [vmem:[#allocation65_spill] sm:$0xff] %v10581_v0  ;;  %v5046_v10 = vadd.f32 %v5045_v45, %v10578_v20 }
 0x768   :  { %v10584_v6 = vpop.f32.mrf.mxu0 }
 0x769   :  { %13336 = vst [vmem:[#allocation61_spill] sm:$0xff] %v10584_v6  ;;  %v5047_v55 = vadd.f32 %v5046_v10, %v10584_v6 }
 0x76a   :  { %v10587_v36 = vpop.f32.mrf.mxu0 }
 0x76b   :  { %13337 = vst [vmem:[#allocation45_spill] sm:$0xff] %v10587_v36  ;;  %v5048_v47 = vadd.f32 %v10575_v18, %v5047_v55 }
 0x76c   :  { %v10590_v33 = vpop.f32.mrf.mxu0 }
 0x76d   :  { %13338 = vst [vmem:[#allocation8_spill] sm:$0xff] %v10590_v33  ;;  %v5049_v5 = vadd.f32 %v10581_v0, %v5048_v47 }
 0x76e   :  { %v10593_v2 = vpop.f32.mrf.mxu0 }
 0x76f   :  { %13339 = vst [vmem:[#allocation48_spill] sm:$0xff] %v10593_v2  ;;  %v5050_v22 = vadd.f32 %v5049_v5, %v10590_v33 }
 0x770   :  { %v10596_v17 = vpop.f32.mrf.mxu0 }
 0x771   :  { %13340 = vst [vmem:[#allocation10_spill] sm:$0xff] %v10596_v17  ;;  %v5051_v4 = vadd.f32 %v5050_v22, %v10596_v17 }
 0x772   :  { %v10599_v19 = vpop.f32.mrf.mxu0 }
 0x773   :  { %13341 = vst [vmem:[#allocation53_spill] sm:$0xff] %v10599_v19  ;;  %v5052_v41 = vadd.f32 %v10587_v36, %v5051_v4 }
 0x774   :  { %v10602_v3 = vpop.f32.mrf.mxu0 }
 0x775   :  { %13342 = vst [vmem:[#allocation9_spill] sm:$0xff] %v10602_v3  ;;  %v5053_v15 = vadd.f32 %v10593_v2, %v5052_v41 }
 0x776   :  { %v10605_v38 = vpop.f32.mrf.mxu0 }
 0x777   :  { %13343 = vst [vmem:[#allocation16_spill] sm:$0xff] %v10605_v38  ;;  %v5054_v30 = vadd.f32 %v5053_v15, %v10602_v3 }
 0x778   :  { %v10608_v31 = vpop.f32.mrf.mxu0 }
 0x779   :  { %13344 = vst [vmem:[#allocation6_spill] sm:$0xff] %v10608_v31  ;;  %v5055_v44 = vadd.f32 %v5054_v30, %v10608_v31 }
 0x77a   :  { %v10611_v26 = vpop.f32.mrf.mxu0 }
 0x77b   :  { %13345 = vst [vmem:[#allocation14_spill] sm:$0xff] %v10611_v26  ;;  %v5056_v25 = vadd.f32 %v10599_v19, %v5055_v44 }
 0x77c   :  { %v10614_v7 = vpop.f32.mrf.mxu0 }
 0x77d   :  { %13346 = vst [vmem:[#allocation71_spill] sm:$0xff] %v10614_v7  ;;  %v5057_v28 = vadd.f32 %v10605_v38, %v5056_v25 }
 0x77e   :  { %v10617_v56 = vpop.f32.mrf.mxu0 }
 0x77f   :  { %13347 = vst [vmem:[#allocation11_spill] sm:$0xff] %v10617_v56  ;;  %v5058_v16 = vadd.f32 %v5057_v28, %v10614_v7 }
 0x780   :  { %v10620_v12 = vpop.f32.mrf.mxu0 }
 0x781   :  { %13348 = vst [vmem:[#allocation72_spill] sm:$0xff] %v10620_v12  ;;  %v5059_v13 = vadd.f32 %v5058_v16, %v10620_v12 }
 0x782   :  { %v10623_v35 = vpop.f32.mrf.mxu0 }
 0x783   :  { %13349 = vst [vmem:[#allocation28_spill] sm:$0xff] %v10623_v35  ;;  %v5060_v9 = vadd.f32 %v10611_v26, %v5059_v13 }
 0x784   :  { %v10626_v29 = vpop.f32.mrf.mxu0 }
 0x785   :  { %13350 = vst [vmem:[#allocation73_spill] sm:$0xff] %v10626_v29  ;;  %v5061_v23 = vadd.f32 %v10617_v56, %v5060_v9 }
 0x786   :  { %v10629_v42 = vpop.f32.mrf.mxu0 }
 0x787   :  { %13351 = vst [vmem:[#allocation63_spill] sm:$0xff] %v10629_v42  ;;  %v5062_v61 = vadd.f32 %v5061_v23, %v10626_v29 }
 0x788   :  { %v10632_v8 = vpop.f32.mrf.mxu0 }
 0x789   :  { %13352 = vst [vmem:[#allocation64_spill] sm:$0xff] %v10632_v8  ;;  %v5063_v59 = vadd.f32 %v5062_v61, %v10632_v8  ;;  %v10662_v61 = vpop.f32.mrf.mxu1 }
 0x78a   :  { %v10635_v50 = vpop.f32.mrf.mxu0  ;;  %13362 = vst [vmem:[#allocation70_spill] sm:$0xff] %v10662_v61 }
 0x78b   :  { %13353 = vst [vmem:[#allocation66_spill] sm:$0xff] %v10635_v50  ;;  %v5064_v45 = vadd.f32 %v10623_v35, %v5063_v59 }
 0x78c   :  { %v10638_v10 = vpop.f32.mrf.mxu0 }
 0x78d   :  { %13354 = vst [vmem:[#allocation24_spill] sm:$0xff] %v10638_v10  ;;  %v5065_v55 = vadd.f32 %v10629_v42, %v5064_v45 }
 0x78e   :  { %v10641_v47 = vpop.f32.mrf.mxu0 }
 0x78f   :  { %13355 = vst [vmem:[#allocation15_spill] sm:$0xff] %v10641_v47  ;;  %v5066_v5 = vadd.f32 %v5065_v55, %v10638_v10 }
 0x790   :  { %v10644_v22 = vpop.f32.mrf.mxu0 }
 0x791   :  { %13356 = vst [vmem:[#allocation23_spill] sm:$0xff] %v10644_v22  ;;  %v5067_v4 = vadd.f32 %v5066_v5, %v10644_v22 }
 0x792   :  { %v10647_v41 = vpop.f32.mrf.mxu0 }
 0x793   :  { %13357 = vst [vmem:[#allocation26_spill] sm:$0xff] %v10647_v41  ;;  %v5068_v15 = vadd.f32 %v10635_v50, %v5067_v4  ;;  %v10670_v4 = vpop.f32.mrf.mxu1 }
 0x794   :  { %v10650_v30 = vpop.f32.mrf.mxu0  ;;  %13365 = vst [vmem:[#allocation30_spill] sm:$0xff] %v10670_v4 }
 0x795   :  { %13358 = vst [vmem:[#allocation20_spill] sm:$0xff] %v10650_v30  ;;  %v5069_v44 = vadd.f32 %v10641_v47, %v5068_v15 }
 0x796   :  { %v10653_v25 = vpop.f32.mrf.mxu0 }
 0x797   :  { %13359 = vst [vmem:[#allocation67_spill] sm:$0xff] %v10653_v25  ;;  %v5070_v28 = vadd.f32 %v5069_v44, %v10650_v30 }
 0x798   :  { %v10656_v16 = vpop.f32.mrf.mxu0 }
 0x799   :  { %13360 = vst [vmem:[#allocation68_spill] sm:$0xff] %v10656_v16  ;;  %v5071_v13 = vadd.f32 %v5070_v28, %v10656_v16 }
 0x79a   :  { %v10659_v9 = vpop.f32.mrf.mxu0 }
 0x79b   :  { %13361 = vst [vmem:[#allocation69_spill] sm:$0xff] %v10659_v9  ;;  %v5072_v23 = vadd.f32 %v10647_v41, %v5071_v13  ;;  %v10678_v41 = vpop.f32.mrf.mxu1 }
 0x79c   :  { %v10664_v59 = vpop.f32.mrf.mxu0  ;;  %13368 = vst [vmem:[#allocation32_spill] sm:$0xff] %v10678_v41 }
 0x79d   :  { %13363 = vst [vmem:[#allocation13_spill] sm:$0xff] %v10664_v59  ;;  %v5073_v45 = vadd.f32 %v10653_v25, %v5072_v23  ;;  %v10685_v30 = vpop.f32.mrf.mxu1 }
 0x79e   :  { %v10667_v55 = vpop.f32.mrf.mxu0  ;;  %13371 = vst [vmem:[#allocation7_spill] sm:$0xff] %v10685_v30 }
 0x79f   :  { %13364 = vst [vmem:[#allocation19_spill] sm:$0xff] %v10667_v55  ;;  %v5074_v5 = vadd.f32 %v5073_v45, %v10664_v59  ;;  %v10690_v47 = vpop.f32.mrf.mxu1 }
 0x7a0   :  { %v10672_v15 = vpop.f32.mrf.mxu0  ;;  %13373 = vst [vmem:[#allocation5_spill] sm:$0xff] %v10690_v47 }
 0x7a1   :  { %13366 = vst [vmem:[#allocation29_spill] sm:$0xff] %v10672_v15  ;;  %v5075_v44 = vadd.f32 %v5074_v5, %v10672_v15 }
 0x7a2   :  { %v10675_v28 = vpop.f32.mrf.mxu0 }
 0x7a3   :  { %13367 = vst [vmem:[#allocation37_spill] sm:$0xff] %v10675_v28  ;;  %v5076_v13 = vadd.f32 %v10659_v9, %v5075_v44  ;;  %v10695_v44 = vpop.f32.mrf.mxu1 }
 0x7a4   :  { %v10680_v16 = vpop.f32.mrf.mxu0  ;;  %13375 = vst [vmem:[#allocation42_spill] sm:$0xff] %v10695_v44 }
 0x7a5   :  { %13369 = vst [vmem:[#allocation27_spill] sm:$0xff] %v10680_v16  ;;  %v5077_v23 = vadd.f32 %v10667_v55, %v5076_v13  ;;  %v10700_v13 = vpop.f32.mrf.mxu1 }
 0x7a6   :  { %v10683_v25 = vpop.f32.mrf.mxu0  ;;  %13377 = vst [vmem:[#allocation74_spill] sm:$0xff] %v10700_v13 }
 0x7a7   :  { %13370 = vst [vmem:[#allocation34_spill] sm:$0xff] %v10683_v25  ;;  %v5078_v45 = vadd.f32 %v5077_v23, %v10680_v16  ;;  %v10705_v23 = vpop.f32.mrf.mxu1 }
 0x7a8   :  { %v10688_v59 = vpop.f32.mrf.mxu0  ;;  %13379 = vst [vmem:[#allocation76_spill] sm:$0xff] %v10705_v23 }
 0x7a9   :  { %13372 = vst [vmem:[#allocation31_spill] sm:$0xff] %v10688_v59  ;;  %v5079_v5 = vadd.f32 %v5078_v45, %v10688_v59  ;;  %v10710_v45 = vpop.f32.mrf.mxu1 }
 0x7aa   :  { %v10693_v15 = vpop.f32.mrf.mxu0  ;;  %13381 = vst [vmem:[#allocation78_spill] sm:$0xff] %v10710_v45 }
 0x7ab   :  { %13374 = vst [vmem:[#allocation12_spill] sm:$0xff] %v10693_v15  ;;  %v5080_v9 = vadd.f32 %v10675_v28, %v5079_v5  ;;  %v10715_v5 = vpop.f32.mrf.mxu1 }
 0x7ac   :  { %v10698_v50 = vpop.f32.mrf.mxu0  ;;  %13383 = vst [vmem:[#allocation80_spill] sm:$0xff] %v10715_v5 }
 0x7ad   :  { %13376 = vst [vmem:[#allocation35_spill] sm:$0xff] %v10698_v50  ;;  %v5081_v55 = vadd.f32 %v10683_v25, %v5080_v9  ;;  %v10720_v9 = vpop.f32.mrf.mxu1 }
 0x7ae   :  { %v10703_v22 = vpop.f32.mrf.mxu0  ;;  %13385 = vst [vmem:[#allocation82_spill] sm:$0xff] %v10720_v9 }
 0x7af   :  { %13378 = vst [vmem:[#allocation75_spill] sm:$0xff] %v10703_v22  ;;  %v5082_v16 = vadd.f32 %v5081_v55, %v10698_v50  ;;  %v10725_v55 = vpop.f32.mrf.mxu1 }
 0x7b0   :  { %v10708_v10 = vpop.f32.mrf.mxu0  ;;  %13387 = vst [vmem:[#allocation84_spill] sm:$0xff] %v10725_v55 }
 0x7b1   :  { %13380 = vst [vmem:[#allocation77_spill] sm:$0xff] %v10708_v10  ;;  %v5083_v59 = vadd.f32 %v5082_v16, %v10708_v10  ;;  %v10729_v16 = vpop.f32.mrf.mxu1 }
 0x7b2   :  { %v10713_v42 = vpop.f32.mrf.mxu0  ;;  %13389 = vst [vmem:[#allocation86_spill] sm:$0xff] %v10729_v16 }
 0x7b3   :  { %13382 = vst [vmem:[#allocation79_spill] sm:$0xff] %v10713_v42  ;;  %v5084_v28 = vadd.f32 %v10693_v15, %v5083_v59  ;;  %v10735_v15 = vpop.f32.mrf.mxu1 }
 0x7b4   :  { %v10718_v35 = vpop.f32.mrf.mxu0  ;;  %13391 = vst [vmem:[#allocation88_spill] sm:$0xff] %v10735_v15 }
 0x7b5   :  { %13384 = vst [vmem:[#allocation81_spill] sm:$0xff] %v10718_v35  ;;  %v5085_v25 = vadd.f32 %v10703_v22, %v5084_v28  ;;  %v10740_v12 = vpop.f32.mrf.mxu1 }
 0x7b6   :  { %v10723_v8 = vpop.f32.mrf.mxu0  ;;  %13393 = vst [vmem:[#allocation90_spill] sm:$0xff] %v10740_v12 }
 0x7b7   :  { %13386 = vst [vmem:[#allocation83_spill] sm:$0xff] %v10723_v8  ;;  %v5086_v50 = vrot.slane %v5085_v25, 4 }
 0x7b8   :  { %v10727_v29 = vpop.f32.mrf.mxu0 }
 0x7b9   :  { %13388 = vst [vmem:[#allocation85_spill] sm:$0xff] %v10727_v29  ;;  %v5087_v10 = vadd.f32 %v5086_v50, %v5085_v25  ;;  %v5787_v56 = vadd.f32 %v10727_v29, %v10718_v35  ;;  %v10745_v50 = vpop.f32.mrf.mxu1 }
 0x7ba   :  { %v10733_v59 = vpop.f32.mrf.mxu0  ;;  %13395 = vst [vmem:[#allocation92_spill] sm:$0xff] %v10745_v50 }
 0x7bb   :  { %13390 = vst [vmem:[#allocation87_spill] sm:$0xff] %v10733_v59  ;;  %v5088_v26 = vrot.slane %v5087_v10, 2  ;;  %v5788_v28 = vadd.f32 %v10713_v42, %v5787_v56  ;;  %v10750_v31 = vpop.f32.mrf.mxu1 }
 0x7bc   :  { %v10738_v22 = vpop.f32.mrf.mxu0  ;;  %13397 = vst [vmem:[#allocation94_spill] sm:$0xff] %v10750_v31 }
 0x7bd   :  { %13392 = vst [vmem:[#allocation89_spill] sm:$0xff] %v10738_v22  ;;  %v5089_v7 = vadd.f32 %v5088_v26, %v5087_v10  ;;  %v5789_v38 = vadd.f32 %v10723_v8, %v5788_v28  ;;  %v10753_v42 = vpop.f32.mrf.mxu1 }
 0x7be   :  { %v10743_v19 = vpop.f32.mrf.mxu0  ;;  %13398 = vst [vmem:[#allocation95_spill] sm:$0xff] %v10753_v42 }
 0x7bf   :  { %13394 = vst [vmem:[#allocation91_spill] sm:$0xff] %v10743_v19  ;;  %v5090_v25 = vrot.slane %v5089_v7, 1  ;;  %v5790_v29 = vadd.f32 %v5789_v38, %v10738_v22  ;;  %v10758_v10 = vpop.f32.mrf.mxu1 }
 0x7c0   :  { %v10748_v35 = vpop.f32.mrf.mxu0  ;;  %13399 = vst [vmem:[#allocation96_spill] sm:$0xff] %v10758_v10 }
 0x7c1   :  { %13396 = vst [vmem:[#allocation93_spill] sm:$0xff] %v10748_v35  ;;  %v5091_v3 = vadd.f32 %v5090_v25, %v5089_v7  ;;  %v5791_v56 = vadd.f32 %v5790_v29, %v10748_v35  ;;  %v10766_v25 = vpop.f32.mrf.mxu1 }
 0x7c2   :  { %13400 = vst [vmem:[#allocation97_spill] sm:$0xff] %v10766_v25 }
 0x7c3   :  { %v10755_v2 = vmul.f32 0.001953125, %v5091_v3  ;;  %v5792_v26 = vadd.f32 %v10733_v59, %v5791_v56  ;;  %v10772_v8 = vpop.f32.mrf.mxu1 }
 0x7c4   :  { %13401 = vst [vmem:[#allocation98_spill] sm:$0xff] %v10772_v8 }
 0x7c5   :  { %v5093_v28 = vsub.f32 %v10507_v51, %v10755_v2  ;;  %v5094_v38 = vsub.f32 %v10511_v24, %v10755_v2  ;;  %v5793_v22 = vadd.f32 %v10743_v19, %v5792_v26  ;;  %v5095_v56 = vsub.f32 %v10505_v34, %v10755_v2 }
 0x7c6   :  { %v5096_v26 = vsub.f32 %v10509_v60, %v10755_v2  ;;  %v5097_v34 = vsub.f32 %v10518_v63, %v10755_v2 }
 0x7c7   :  { %v5794_v7 = vadd.f32 %v5793_v22, %v10670_v4  ;;  %v5157_v29 = vmul.f32 %v5093_v28, %v5093_v28  ;;  %v5158_v35 = vmul.f32 %v5094_v38, %v5094_v38  ;;  %v5159_v22 = vmul.f32 %v5095_v56, %v5095_v56  ;;  %v10778_v28 = vpop.f32.mrf.mxu1 }
 0x7c8   :  { %13402 = vst [vmem:[#allocation99_spill] sm:$0xff] %v10778_v28  ;;  %v5098_v56 = vsub.f32 %v10524_v57, %v10755_v2 }
 0x7c9   :  { %v5795_v3 = vadd.f32 %v5794_v7, %v10685_v30  ;;  %v5221_v51 = vadd.f32 %v5158_v35, %v5157_v29  ;;  %v10784_v35 = vpop.f32.mrf.mxu1 }
 0x7ca   :  { %13403 = vst [vmem:[#allocation100_spill] sm:$0xff] %v10784_v35 }
 0x7cb   :  { %v5796_v59 = vadd.f32 %v10662_v61, %v5795_v3  ;;  %v5222_v38 = vadd.f32 %v5221_v51, %v5159_v22  ;;  %v5160_v3 = vmul.f32 %v5096_v26, %v5096_v26  ;;  %v10790_v51 = vpop.f32.mrf.mxu1  ;;  %v5099_v26 = vsub.f32 %v10515_v40, %v10755_v2 }
 0x7cc   :  { %13404 = vst [vmem:[#allocation101_spill] sm:$0xff] %v10790_v51 }
 0x7cd   :  { %v5797_v24 = vadd.f32 %v10678_v41, %v5796_v59  ;;  %v5223_v59 = vadd.f32 %v5222_v38, %v5160_v3  ;;  %v10796_v38 = vpop.f32.mrf.mxu1 }
 0x7ce   :  { %13405 = vst [vmem:[#allocation102_spill] sm:$0xff] %v10796_v38 }
 0x7cf   :  { %v5798_v4 = vadd.f32 %v5797_v24, %v10695_v44  ;;  %v5161_v24 = vmul.f32 %v5097_v34, %v5097_v34  ;;  %v5100_v34 = vsub.f32 %v10521_v43, %v10755_v2 }
 0x7d1   :  { %v5799_v7 = vadd.f32 %v5798_v4, %v10705_v23  ;;  %v5224_v4 = vadd.f32 %v5223_v59, %v5161_v24  ;;  %v10802_v59 = vpop.f32.mrf.mxu1 }
 0x7d2   :  { %13406 = vst [vmem:[#allocation103_spill] sm:$0xff] %v10802_v59 }
 0x7d3   :  { %v5800_v61 = vadd.f32 %v10690_v47, %v5799_v7  ;;  %v5162_v7 = vmul.f32 %v5098_v56, %v5098_v56  ;;  %v5101_v56 = vsub.f32 %v10530_v58, %v10755_v2 }
 0x7d5   :  { %v5801_v29 = vadd.f32 %v10700_v13, %v5800_v61  ;;  %v5225_v61 = vadd.f32 %v5224_v4, %v5162_v7  ;;  %v10808_v4 = vpop.f32.mrf.mxu1 }
 0x7d6   :  { %13407 = vst [vmem:[#allocation104_spill] sm:$0xff] %v10808_v4 }
 0x7d7   :  { %v5802_v60 = vadd.f32 %v5801_v29, %v10715_v5  ;;  %v5163_v29 = vmul.f32 %v5099_v26, %v5099_v26  ;;  %v5102_v26 = vsub.f32 %v10536_v11, %v10755_v2 }
 0x7d9   :  { %v5803_v22 = vadd.f32 %v5802_v60, %v10725_v55  ;;  %v5226_v60 = vadd.f32 %v5225_v61, %v5163_v29  ;;  %v10814_v61 = vpop.f32.mrf.mxu1 }
 0x7da   :  { %13408 = vst [vmem:[#allocation105_spill] sm:$0xff] %v10814_v61 }
 0x7db   :  { %v5804_v63 = vadd.f32 %v10710_v45, %v5803_v22  ;;  %v5164_v22 = vmul.f32 %v5100_v34, %v5100_v34  ;;  %v5103_v34 = vsub.f32 %v10527_v53, %v10755_v2 }
 0x7dd   :  { %v5805_v3 = vadd.f32 %v10720_v9, %v5804_v63  ;;  %v5227_v63 = vadd.f32 %v5226_v60, %v5164_v22  ;;  %v10820_v60 = vpop.f32.mrf.mxu1 }
 0x7de   :  { %13409 = vst [vmem:[#allocation106_spill] sm:$0xff] %v10820_v60 }
 0x7df   :  { %v5806_v57 = vadd.f32 %v5805_v3, %v10735_v15  ;;  %v5165_v3 = vmul.f32 %v5101_v56, %v5101_v56  ;;  %v5104_v56 = vsub.f32 %v10533_v49, %v10755_v2 }
 0x7e1   :  { %v5807_v24 = vadd.f32 %v5806_v57, %v10745_v50  ;;  %v5228_v57 = vadd.f32 %v5227_v63, %v5165_v3  ;;  %v10826_v63 = vpop.f32.mrf.mxu1 }
 0x7e2   :  { %13410 = vst [vmem:[#allocation107_spill] sm:$0xff] %v10826_v63 }
 0x7e3   :  { %v5808_v40 = vadd.f32 %v10729_v16, %v5807_v24  ;;  %v5166_v24 = vmul.f32 %v5102_v26, %v5102_v26  ;;  %v5105_v26 = vsub.f32 %v10542_v52, %v10755_v2 }
 0x7e5   :  { %v5809_v7 = vadd.f32 %v10740_v12, %v5808_v40  ;;  %v5229_v40 = vadd.f32 %v5228_v57, %v5166_v24  ;;  %v10832_v57 = vpop.f32.mrf.mxu1 }
 0x7e6   :  { %13411 = vst [vmem:[#allocation108_spill] sm:$0xff] %v10832_v57 }
 0x7e7   :  { %v5810_v43 = vadd.f32 %v5809_v7, %v10753_v42  ;;  %v5167_v7 = vmul.f32 %v5103_v34, %v5103_v34  ;;  %v5106_v34 = vsub.f32 %v10548_v62, %v10755_v2 }
 0x7e9   :  { %v5811_v29 = vadd.f32 %v5810_v43, %v10766_v25  ;;  %v5230_v43 = vadd.f32 %v5229_v40, %v5167_v7  ;;  %v10838_v40 = vpop.f32.mrf.mxu1 }
 0x7ea   :  { %13412 = vst [vmem:[#allocation109_spill] sm:$0xff] %v10838_v40 }
 0x7eb   :  { %v5812_v58 = vadd.f32 %v10750_v31, %v5811_v29  ;;  %v5168_v29 = vmul.f32 %v5104_v56, %v5104_v56  ;;  %v5107_v56 = vsub.f32 %v10539_v14, %v10755_v2 }
 0x7ed   :  { %v5813_v22 = vadd.f32 %v10758_v10, %v5812_v58  ;;  %v5231_v58 = vadd.f32 %v5230_v43, %v5168_v29  ;;  %v10844_v43 = vpop.f32.mrf.mxu1 }
 0x7ee   :  { %13413 = vst [vmem:[#allocation110_spill] sm:$0xff] %v10844_v43 }
 0x7ef   :  { %v5814_v11 = vadd.f32 %v5813_v22, %v10778_v28  ;;  %v5169_v22 = vmul.f32 %v5105_v26, %v5105_v26  ;;  %v5108_v26 = vsub.f32 %v10545_v37, %v10755_v2 }
 0x7f1   :  { %v5815_v3 = vadd.f32 %v5814_v11, %v10790_v51  ;;  %v5232_v11 = vadd.f32 %v5231_v58, %v5169_v22  ;;  %v10850_v58 = vpop.f32.mrf.mxu1 }
 0x7f2   :  { %13414 = vst [vmem:[#allocation111_spill] sm:$0xff] %v10850_v58 }
 0x7f3   :  { %v5816_v53 = vadd.f32 %v10772_v8, %v5815_v3  ;;  %v5170_v3 = vmul.f32 %v5106_v34, %v5106_v34  ;;  %v5109_v34 = vsub.f32 %v10554_v39, %v10755_v2 }
 0x7f5   :  { %v5817_v24 = vadd.f32 %v10784_v35, %v5816_v53  ;;  %v5233_v53 = vadd.f32 %v5232_v11, %v5170_v3  ;;  %v10856_v11 = vpop.f32.mrf.mxu1 }
 0x7f6   :  { %13415 = vst [vmem:[#allocation112_spill] sm:$0xff] %v10856_v11 }
 0x7f7   :  { %v5818_v49 = vadd.f32 %v5817_v24, %v10802_v59  ;;  %v5171_v24 = vmul.f32 %v5107_v56, %v5107_v56  ;;  %v5110_v56 = vsub.f32 %v10560_v46, %v10755_v2 }
 0x7f9   :  { %v5819_v7 = vadd.f32 %v5818_v49, %v10814_v61  ;;  %v5234_v49 = vadd.f32 %v5233_v53, %v5171_v24  ;;  %v10862_v53 = vpop.f32.mrf.mxu1 }
 0x7fa   :  { %13416 = vst [vmem:[#allocation113_spill] sm:$0xff] %v10862_v53 }
 0x7fb   :  { %v5820_v52 = vadd.f32 %v10796_v38, %v5819_v7  ;;  %v5172_v7 = vmul.f32 %v5108_v26, %v5108_v26  ;;  %v5111_v26 = vsub.f32 %v10551_v1, %v10755_v2  ;;  %v10867_v39 = vpop.f32.mrf.mxu1 }
 0x7fc   :  { %13417 = vst [vmem:[#allocation114_spill] sm:$0xff] %v10867_v39 }
 0x7fd   :  { %v5821_v29 = vadd.f32 %v10808_v4, %v5820_v52  ;;  %v5235_v52 = vadd.f32 %v5234_v49, %v5172_v7  ;;  %v5112_v7 = vsub.f32 %v10557_v27, %v10755_v2  ;;  %v10872_v46 = vpop.f32.mrf.mxu1 }
 0x7fe   :  { %13418 = vst [vmem:[#allocation115_spill] sm:$0xff] %v10872_v46 }
 0x7ff   :  { %v5822_v62 = vadd.f32 %v5821_v29, %v10826_v63  ;;  %v5173_v29 = vmul.f32 %v5109_v34, %v5109_v34  ;;  %v5175_v34 = vmul.f32 %v5111_v26, %v5111_v26  ;;  %v10877_v1 = vpop.f32.mrf.mxu1 }
 0x800   :  { %13419 = vst [vmem:[#allocation116_spill] sm:$0xff] %v10877_v1 }
 0x801   :  { %v5823_v22 = vadd.f32 %v5822_v62, %v10838_v40  ;;  %v5236_v62 = vadd.f32 %v5235_v52, %v5173_v29  ;;  %v5176_v29 = vmul.f32 %v5112_v7, %v5112_v7 }
 0x803   :  { %v5824_v14 = vadd.f32 %v10820_v60, %v5823_v22  ;;  %v5174_v22 = vmul.f32 %v5110_v56, %v5110_v56 }
 0x805   :  { %v5825_v3 = vadd.f32 %v10832_v57, %v5824_v14  ;;  %v5237_v14 = vadd.f32 %v5236_v62, %v5174_v22  ;;  %v5114_v62 = vsub.f32 %v10572_v32, %v10755_v2  ;;  %v10882_v22 = vpop.f32.mrf.mxu1 }
 0x806   :  { %13420 = vst [vmem:[#allocation117_spill] sm:$0xff] %v10882_v22 }
 0x807   :  { %v5826_v37 = vadd.f32 %v5825_v3, %v10850_v58  ;;  %v5238_v52 = vadd.f32 %v5237_v14, %v5175_v34  ;;  %v5178_v14 = vmul.f32 %v5114_v62, %v5114_v62  ;;  %v10887_v34 = vpop.f32.mrf.mxu1 }
 0x808   :  { %13421 = vst [vmem:[#allocation118_spill] sm:$0xff] %v10887_v34 }
 0x809   :  { %v5827_v24 = vadd.f32 %v5826_v37, %v10862_v53  ;;  %v5113_v37 = vsub.f32 %v10566_v54, %v10755_v2  ;;  %v5239_v53 = vadd.f32 %v5238_v52, %v5176_v29  ;;  %v10892_v29 = vpop.f32.mrf.mxu1 }
 0x80a   :  { %13422 = vst [vmem:[#allocation119_spill] sm:$0xff] %v10892_v29 }
 0x80b   :  { %v5828_v49 = vadd.f32 %v10844_v43, %v5827_v24  ;;  %v5177_v24 = vmul.f32 %v5113_v37, %v5113_v37 }
 0x80d   :  { %v5829_v3 = vadd.f32 %v10856_v11, %v5828_v49  ;;  %v5240_v27 = vadd.f32 %v5239_v53, %v5177_v24  ;;  %v5115_v49 = vsub.f32 %v10563_v21, %v10755_v2  ;;  %v5117_v53 = vsub.f32 %v10578_v20, %v10755_v2  ;;  %v10897_v24 = vpop.f32.mrf.mxu1 }
 0x80e   :  { %13423 = vst [vmem:[#allocation120_spill] sm:$0xff] %v10897_v24 }
 0x80f   :  { %v5830_v56 = vadd.f32 %v5829_v3, %v10872_v46  ;;  %v5241_v54 = vadd.f32 %v5240_v27, %v5178_v14  ;;  %v5116_v3 = vsub.f32 %v10569_v48, %v10755_v2  ;;  %v5179_v52 = vmul.f32 %v5115_v49, %v5115_v49  ;;  %v10902_v14 = vpop.f32.mrf.mxu1 }
 0x810   :  { %v5118_v27 = vsub.f32 %v10584_v6, %v10755_v2  ;;  %13424 = vst [vmem:[#allocation121_spill] sm:$0xff] %v10902_v14 }
 0x811   :  { %v5831_v26 = vadd.f32 %v5830_v56, %v10882_v22  ;;  %v5242_v32 = vadd.f32 %v5241_v54, %v5179_v52  ;;  %v5180_v56 = vmul.f32 %v5116_v3, %v5116_v3  ;;  %v5119_v54 = vsub.f32 %v10575_v18, %v10755_v2  ;;  %v10907_v52 = vpop.f32.mrf.mxu1 }
 0x812   :  { %13425 = vst [vmem:[#allocation122_spill] sm:$0xff] %v10907_v52 }
 0x813   :  { %v5832_v7 = vadd.f32 %v10867_v39, %v5831_v26  ;;  %v5243_v21 = vadd.f32 %v5242_v32, %v5180_v56  ;;  %v5181_v26 = vmul.f32 %v5117_v53, %v5117_v53  ;;  %v5120_v32 = vsub.f32 %v10581_v0, %v10755_v2  ;;  %v10912_v56 = vpop.f32.mrf.mxu1 }
 0x814   :  { %13426 = vst [vmem:[#allocation123_spill] sm:$0xff] %v10912_v56 }
 0x815   :  { %v5833_v37 = vadd.f32 %v10877_v1, %v5832_v7  ;;  %v5244_v48 = vadd.f32 %v5243_v21, %v5181_v26  ;;  %v5182_v7 = vmul.f32 %v5118_v27, %v5118_v27  ;;  %v5121_v21 = vsub.f32 %v10590_v33, %v10755_v2  ;;  %v10917_v26 = vpop.f32.mrf.mxu1 }
 0x816   :  { %13427 = vst [vmem:[#allocation124_spill] sm:$0xff] %v10917_v26 }
 0x817   :  { %v5834_v62 = vadd.f32 %v5833_v37, %v10892_v29  ;;  %v5245_v20 = vadd.f32 %v5244_v48, %v5182_v7  ;;  %v5183_v37 = vmul.f32 %v5119_v54, %v5119_v54  ;;  %v5122_v48 = vsub.f32 %v10596_v17, %v10755_v2  ;;  %v10922_v7 = vpop.f32.mrf.mxu1 }
 0x818   :  { %13428 = vst [vmem:[#allocation125_spill] sm:$0xff] %v10922_v7 }
 0x819   :  { %v5835_v49 = vadd.f32 %v5834_v62, %v10902_v14  ;;  %v5246_v6 = vadd.f32 %v5245_v20, %v5183_v37  ;;  %v5184_v62 = vmul.f32 %v5120_v32, %v5120_v32  ;;  %v5123_v20 = vsub.f32 %v10587_v36, %v10755_v2  ;;  %v10927_v37 = vpop.f32.mrf.mxu1 }
 0x81a   :  { %13429 = vst [vmem:[#allocation126_spill] sm:$0xff] %v10927_v37 }
 0x81b   :  { %v5836_v3 = vadd.f32 %v10887_v34, %v5835_v49  ;;  %v5247_v18 = vadd.f32 %v5246_v6, %v5184_v62  ;;  %v5185_v49 = vmul.f32 %v5121_v21, %v5121_v21  ;;  %v13430_v6 = vld [vmem:[#allocation48_spill] sm:$0xff]  ;;  %v5187_v62 = vmul.f32 %v5123_v20, %v5123_v20  ;;  %v10932_v17 = vpop.f32.mrf.mxu1 }
 0x81c   :  { %13431 = vst [vmem:[#allocation127_spill] sm:$0xff] %v10932_v17 }
 0x81d   :  { %v5837_v53 = vadd.f32 %v10897_v24, %v5836_v3  ;;  %v5248_v0 = vadd.f32 %v5247_v18, %v5185_v49  ;;  %v5186_v3 = vmul.f32 %v5122_v48, %v5122_v48  ;;  %v13432_v18 = vld [vmem:[#allocation9_spill] sm:$0xff]  ;;  %v10937_v36 = vpop.f32.mrf.mxu1 }
 0x81e   :  { %13433 = vst [vmem:[#allocation128_spill] sm:$0xff] %v10937_v36 }
 0x81f   :  { %v5838_v27 = vadd.f32 %v5837_v53, %v10912_v56  ;;  %v5249_v33 = vadd.f32 %v5248_v0, %v5186_v3  ;;  %v5124_v53 = vsub.f32 %v13430_v6, %v10755_v2  ;;  %v13434_v0 = vld [vmem:[#allocation6_spill] sm:$0xff]  ;;  %v10942_v6 = vpop.f32.mrf.mxu1 }
 0x820   :  { %13435 = vst [vmem:[#allocation129_spill] sm:$0xff] %v10942_v6 }
 0x821   :  { %v5839_v54 = vadd.f32 %v5838_v27, %v10922_v7  ;;  %v5250_v56 = vadd.f32 %v5249_v33, %v5187_v62  ;;  %v5125_v27 = vsub.f32 %v13432_v18, %v10755_v2  ;;  %v5188_v49 = vmul.f32 %v5124_v53, %v5124_v53  ;;  %v13436_v33 = vld [vmem:[#allocation53_spill] sm:$0xff]  ;;  %v10947_v18 = vpop.f32.mrf.mxu1 }
 0x822   :  { %13437 = vst [vmem:[#allocation130_spill] sm:$0xff] %v10947_v18 }
 0x823   :  { %v5840_v32 = vadd.f32 %v10907_v52, %v5839_v54  ;;  %v5251_v7 = vadd.f32 %v5250_v56, %v5188_v49  ;;  %v5126_v54 = vsub.f32 %v13434_v0, %v10755_v2  ;;  %v5189_v3 = vmul.f32 %v5125_v27, %v5125_v27  ;;  %v13438_v56 = vld [vmem:[#allocation16_spill] sm:$0xff]  ;;  %v10952_v0 = vpop.f32.mrf.mxu1 }
 0x824   :  { %13439 = vst [vmem:[#allocation131_spill] sm:$0xff] %v10952_v0 }
 0x825   :  { %v5841_v21 = vadd.f32 %v10917_v26, %v5840_v32  ;;  %v5252_v52 = vadd.f32 %v5251_v7, %v5189_v3  ;;  %v5127_v32 = vsub.f32 %v13436_v33, %v10755_v2  ;;  %v5190_v62 = vmul.f32 %v5126_v54, %v5126_v54  ;;  %v13440_v7 = vld [vmem:[#allocation71_spill] sm:$0xff]  ;;  %v10957_v33 = vpop.f32.mrf.mxu1 }
 0x826   :  { %13441 = vst [vmem:[#allocation132_spill] sm:$0xff] %v10957_v33 }
 0x827   :  { %v5842_v48 = vadd.f32 %v5841_v21, %v10932_v17  ;;  %v5253_v26 = vadd.f32 %v5252_v52, %v5190_v62  ;;  %v5128_v21 = vsub.f32 %v13438_v56, %v10755_v2  ;;  %v5191_v49 = vmul.f32 %v5127_v32, %v5127_v32  ;;  %v13442_v52 = vld [vmem:[#allocation72_spill] sm:$0xff]  ;;  %v10962_v56 = vpop.f32.mrf.mxu1 }
 0x828   :  { %13443 = vst [vmem:[#allocation133_spill] sm:$0xff] %v10962_v56 }
 0x829   :  { %v5843_v20 = vadd.f32 %v5842_v48, %v10942_v6  ;;  %v5254_v17 = vadd.f32 %v5253_v26, %v5191_v49  ;;  %v5129_v48 = vsub.f32 %v13440_v7, %v10755_v2  ;;  %v5192_v3 = vmul.f32 %v5128_v21, %v5128_v21  ;;  %v13444_v26 = vld [vmem:[#allocation14_spill] sm:$0xff] }
 0x82b   :  { %v5844_v53 = vadd.f32 %v10927_v37, %v5843_v20  ;;  %v5255_v6 = vadd.f32 %v5254_v17, %v5192_v3  ;;  %v5130_v20 = vsub.f32 %v13442_v52, %v10755_v2  ;;  %v5193_v62 = vmul.f32 %v5129_v48, %v5129_v48  ;;  %v13446_v48 = vld [vmem:[#allocation73_spill] sm:$0xff] }
 0x82d   :  { %v5845_v27 = vadd.f32 %v10937_v36, %v5844_v53  ;;  %v5256_v37 = vadd.f32 %v5255_v6, %v5193_v62  ;;  %v5131_v53 = vsub.f32 %v13444_v26, %v10755_v2  ;;  %v5194_v49 = vmul.f32 %v5130_v20, %v5130_v20  ;;  %v13445_v36 = vld [vmem:[#allocation11_spill] sm:$0xff]  ;;  %v13447_v62 = vld [vmem:[#allocation64_spill] sm:$0xff] }
 0x82e   :  { %v5134_v26 = vsub.f32 %v13447_v62, %v10755_v2 }
 0x82f   :  { %v5846_v54 = vadd.f32 %v5845_v27, %v10952_v0  ;;  %v5257_v7 = vadd.f32 %v5256_v37, %v5194_v49  ;;  %v5132_v27 = vsub.f32 %v13445_v36, %v10755_v2  ;;  %v5195_v17 = vmul.f32 %v5131_v53, %v5131_v53  ;;  %v13448_v37 = vld [vmem:[#allocation28_spill] sm:$0xff] }
 0x830   :  { %v5133_v0 = vsub.f32 %v13446_v48, %v10755_v2  ;;  %v5135_v49 = vsub.f32 %v13448_v37, %v10755_v2  ;;  %v5198_v36 = vmul.f32 %v5134_v26, %v5134_v26 }
 0x831   :  { %v5847_v32 = vadd.f32 %v5846_v54, %v10962_v56  ;;  %v5258_v52 = vadd.f32 %v5257_v7, %v5195_v17  ;;  %v5196_v24 = vmul.f32 %v5132_v27, %v5132_v27  ;;  %v13449_v7 = vld [vmem:[#allocation63_spill] sm:$0xff] }
 0x832   :  { %v5197_v20 = vmul.f32 %v5133_v0, %v5133_v0  ;;  %v5199_v17 = vmul.f32 %v5135_v49, %v5135_v49 }
 0x833   :  { %v5848_v21 = vadd.f32 %v10947_v18, %v5847_v32  ;;  %v5259_v6 = vadd.f32 %v5258_v52, %v5196_v24  ;;  %v13450_v24 = vld [vmem:[#allocation24_spill] sm:$0xff] }
 0x834   :  { %v5137_v52 = vsub.f32 %v13450_v24, %v10755_v2 }
 0x835   :  { %v5849_v3 = vadd.f32 %v10957_v33, %v5848_v21  ;;  %v5260_v32 = vadd.f32 %v5259_v6, %v5197_v20  ;;  %v5136_v21 = vsub.f32 %v13449_v7, %v10755_v2 }
 0x836   :  { %v5201_v6 = vmul.f32 %v5137_v52, %v5137_v52 }
 0x837   :  { %v5850_v54 = vrot.slane %v5849_v3, 4  ;;  %v5261_v18 = vadd.f32 %v5260_v32, %v5198_v36  ;;  %v5200_v33 = vmul.f32 %v5136_v21, %v5136_v21  ;;  %v13452_v36 = vld [vmem:[#allocation66_spill] sm:$0xff]  ;;  %v13455_v21 = vld [vmem:[#allocation81_spill] sm:$0xff] }
 0x838   :  { %v5139_v32 = vsub.f32 %v13452_v36, %v10755_v2  ;;  %v13460_v36 = vld [vmem:[#allocation68_spill] sm:$0xff] }
 0x839   :  { %v5851_v56 = vadd.f32 %v5850_v54, %v5849_v3  ;;  %v5262_v27 = vadd.f32 %v5261_v18, %v5199_v17  ;;  %v13451_v3 = vld [vmem:[#allocation23_spill] sm:$0xff]  ;;  %v13456_v17 = vld [vmem:[#allocation85_spill] sm:$0xff] }
 0x83a   :  { %v5138_v54 = vsub.f32 %v13451_v3, %v10755_v2  ;;  %v13454_v18 = vld [vmem:[#allocation15_spill] sm:$0xff] }
 0x83b   :  { %v5852_v53 = vrot.slane %v5851_v56, 2  ;;  %v5263_v0 = vadd.f32 %v5262_v27, %v5200_v33  ;;  %v5140_v49 = vsub.f32 %v13454_v18, %v10755_v2  ;;  %v13459_v18 = vld [vmem:[#allocation83_spill] sm:$0xff] }
 0x83c   :  { %v5202_v37 = vmul.f32 %v5138_v54, %v5138_v54  ;;  %v13458_v54 = vld [vmem:[#allocation79_spill] sm:$0xff] }
 0x83d   :  { %v5853_v48 = vadd.f32 %v5852_v53, %v5851_v56  ;;  %v5264_v26 = vadd.f32 %v5263_v0, %v5201_v6  ;;  %v5203_v53 = vmul.f32 %v5139_v32, %v5139_v32  ;;  %v5204_v0 = vmul.f32 %v5140_v49, %v5140_v49  ;;  %v13462_v49 = vld [vmem:[#allocation93_spill] sm:$0xff] }
 0x83f   :  { %v5854_v62 = vrot.slane %v5853_v48, 1  ;;  %v5265_v56 = vadd.f32 %v5264_v26, %v5202_v37 }
 0x841   :  { %v5855_v20 = vadd.f32 %v5854_v62, %v5853_v48  ;;  %v5266_v52 = vadd.f32 %v5265_v56, %v5203_v53  ;;  %v13457_v48 = vld [vmem:[#allocation20_spill] sm:$0xff] }
 0x842   :  { %v5141_v62 = vsub.f32 %v13457_v48, %v10755_v2 }
 0x843   :  { %v10985_v7 = vmul.f32 0.001953125, %v5855_v20  ;;  %v5267_v26 = vadd.f32 %v5266_v52, %v5204_v0 }
 0x844   :  { %v5205_v3 = vmul.f32 %v5141_v62, %v5141_v62 }
 0x845   :  { %13453 = vst [vmem:[#allocation134_spill] sm:$0xff] %v10985_v7  ;;  %v5857_v33 = vsub.f32 %v13455_v21, %v10985_v7  ;;  %v5858_v27 = vsub.f32 %v13456_v17, %v10985_v7  ;;  %v5859_v6 = vsub.f32 %v13458_v54, %v10985_v7  ;;  %v5860_v32 = vsub.f32 %v13459_v18, %v10985_v7  ;;  %v13461_v17 = vld [vmem:[#allocation89_spill] sm:$0xff]  ;;  %v13464_v18 = vld [vmem:[#allocation87_spill] sm:$0xff] }
 0x846   :  { %v5142_v21 = vsub.f32 %v13460_v36, %v10755_v2  ;;  %v5861_v56 = vsub.f32 %v13461_v17, %v10985_v7  ;;  %v5268_v48 = vadd.f32 %v5267_v26, %v5205_v3  ;;  %v5862_v34 = vsub.f32 %v13462_v49, %v10985_v7 }
 0x847   :  { %v5921_v20 = vmul.f32 %v5857_v33, %v5857_v33  ;;  %v5922_v37 = vmul.f32 %v5858_v27, %v5858_v27  ;;  %v5923_v53 = vmul.f32 %v5859_v6, %v5859_v6  ;;  %v5924_v54 = vmul.f32 %v5860_v32, %v5860_v32  ;;  %v13463_v27 = vld [vmem:[#allocation26_spill] sm:$0xff] }
 0x848   :  { %v5143_v52 = vsub.f32 %v13463_v27, %v10755_v2  ;;  %v5206_v0 = vmul.f32 %v5142_v21, %v5142_v21  ;;  %v5863_v14 = vsub.f32 %v13464_v18, %v10985_v7  ;;  %v5925_v36 = vmul.f32 %v5861_v56, %v5861_v56 }
 0x849   :  { %v5985_v24 = vadd.f32 %v5922_v37, %v5921_v20  ;;  %v5864_v6 = vsub.f32 %v10743_v19, %v10985_v7  ;;  %v5926_v20 = vmul.f32 %v5862_v34, %v5862_v34  ;;  %v13465_v37 = vld [vmem:[#allocation67_spill] sm:$0xff]  ;;  %v5866_v56 = vsub.f32 %v10685_v30, %v10985_v7 }
 0x84a   :  { %v5269_v29 = vadd.f32 %v5268_v48, %v5206_v0  ;;  %v5144_v26 = vsub.f32 %v13465_v37, %v10755_v2  ;;  %v5207_v32 = vmul.f32 %v5143_v52, %v5143_v52  ;;  %v5927_v49 = vmul.f32 %v5863_v14, %v5863_v14 }
 0x84b   :  { %v5986_v33 = vadd.f32 %v5985_v24, %v5923_v53  ;;  %v13466_v24 = vld [vmem:[#allocation30_spill] sm:$0xff]  ;;  %v5868_v14 = vsub.f32 %v10678_v41, %v10985_v7 }
 0x84c   :  { %v5865_v53 = vsub.f32 %v13466_v24, %v10985_v7  ;;  %v5270_v17 = vadd.f32 %v5269_v29, %v5207_v32  ;;  %v5208_v34 = vmul.f32 %v5144_v26, %v5144_v26  ;;  %v13540_v24 = vld [vmem:[#allocation14_spill] sm:$0xff] }
 0x84d   :  { %v5987_v62 = vadd.f32 %v5986_v33, %v5924_v54  ;;  %v5928_v54 = vmul.f32 %v5864_v6, %v5864_v6  ;;  %v13467_v33 = vld [vmem:[#allocation13_spill] sm:$0xff] }
 0x84e   :  { %v5145_v0 = vsub.f32 %v13467_v33, %v10755_v2  ;;  %v5929_v19 = vmul.f32 %v5865_v53, %v5865_v53  ;;  %v5271_v18 = vadd.f32 %v5270_v17, %v5208_v34  ;;  %v5870_v53 = vsub.f32 %v10705_v23, %v10985_v7 }
 0x84f   :  { %v5988_v3 = vadd.f32 %v5987_v62, %v5925_v36  ;;  %v13468_v36 = vld [vmem:[#allocation70_spill] sm:$0xff] }
 0x850   :  { %v5867_v62 = vsub.f32 %v13468_v36, %v10985_v7  ;;  %v5209_v6 = vmul.f32 %v5145_v0, %v5145_v0  ;;  %v13538_v36 = vld [vmem:[#allocation72_spill] sm:$0xff] }
 0x851   :  { %v5989_v21 = vadd.f32 %v5988_v3, %v5926_v20  ;;  %v5930_v20 = vmul.f32 %v5866_v56, %v5866_v56  ;;  %v13469_v3 = vld [vmem:[#allocation29_spill] sm:$0xff] }
 0x852   :  { %v5146_v32 = vsub.f32 %v13469_v3, %v10755_v2  ;;  %v5272_v30 = vadd.f32 %v5271_v18, %v5209_v6 }
 0x853   :  { %v5990_v48 = vadd.f32 %v5989_v21, %v5927_v49  ;;  %v5869_v49 = vsub.f32 %v10695_v44, %v10985_v7  ;;  %v5931_v21 = vmul.f32 %v5867_v62, %v5867_v62  ;;  %v5872_v62 = vsub.f32 %v10700_v13, %v10985_v7  ;;  %v13536_v44 = vld [vmem:[#allocation71_spill] sm:$0xff] }
 0x854   :  { %v5210_v56 = vmul.f32 %v5146_v32, %v5146_v32 }
 0x855   :  { %v5991_v52 = vadd.f32 %v5990_v48, %v5928_v54  ;;  %v5932_v54 = vmul.f32 %v5868_v14, %v5868_v14  ;;  %v13470_v48 = vld [vmem:[#allocation69_spill] sm:$0xff] }
 0x856   :  { %v5147_v34 = vsub.f32 %v13470_v48, %v10755_v2  ;;  %v5273_v41 = vadd.f32 %v5272_v30, %v5210_v56 }
 0x857   :  { %v5992_v29 = vadd.f32 %v5991_v52, %v5929_v19  ;;  %v5871_v19 = vsub.f32 %v10690_v47, %v10985_v7  ;;  %v5933_v52 = vmul.f32 %v5869_v49, %v5869_v49  ;;  %v5874_v49 = vsub.f32 %v10725_v55, %v10985_v7 }
 0x858   :  { %v5211_v14 = vmul.f32 %v5147_v34, %v5147_v34 }
 0x859   :  { %v5993_v26 = vadd.f32 %v5992_v29, %v5930_v20  ;;  %v5934_v20 = vmul.f32 %v5870_v53, %v5870_v53  ;;  %v13471_v29 = vld [vmem:[#allocation19_spill] sm:$0xff] }
 0x85a   :  { %v5148_v6 = vsub.f32 %v13471_v29, %v10755_v2  ;;  %v5274_v23 = vadd.f32 %v5273_v41, %v5211_v14 }
 0x85b   :  { %v5994_v17 = vadd.f32 %v5993_v26, %v5931_v21  ;;  %v5873_v21 = vsub.f32 %v10715_v5, %v10985_v7  ;;  %v5935_v26 = vmul.f32 %v5871_v19, %v5871_v19  ;;  %v5876_v19 = vsub.f32 %v10720_v9, %v10985_v7 }
 0x85c   :  { %v5212_v53 = vmul.f32 %v5148_v6, %v5148_v6 }
 0x85d   :  { %v5995_v0 = vadd.f32 %v5994_v17, %v5932_v54  ;;  %v5936_v54 = vmul.f32 %v5872_v62, %v5872_v62  ;;  %v13472_v17 = vld [vmem:[#allocation27_spill] sm:$0xff] }
 0x85e   :  { %v5149_v56 = vsub.f32 %v13472_v17, %v10755_v2  ;;  %v5275_v13 = vadd.f32 %v5274_v23, %v5212_v53 }
 0x85f   :  { %v5996_v18 = vadd.f32 %v5995_v0, %v5933_v52  ;;  %v5875_v52 = vsub.f32 %v10710_v45, %v10985_v7  ;;  %v5937_v0 = vmul.f32 %v5873_v21, %v5873_v21  ;;  %v5878_v21 = vsub.f32 %v10745_v50, %v10985_v7  ;;  %v13532_v45 = vld [vmem:[#allocation6_spill] sm:$0xff] }
 0x860   :  { %v5213_v62 = vmul.f32 %v5149_v56, %v5149_v56 }
 0x861   :  { %v5997_v32 = vadd.f32 %v5996_v18, %v5934_v20  ;;  %v5938_v20 = vmul.f32 %v5874_v49, %v5874_v49  ;;  %v13473_v18 = vld [vmem:[#allocation31_spill] sm:$0xff] }
 0x862   :  { %v5150_v14 = vsub.f32 %v13473_v18, %v10755_v2  ;;  %v5276_v55 = vadd.f32 %v5275_v13, %v5213_v62 }
 0x863   :  { %v5998_v30 = vadd.f32 %v5997_v32, %v5935_v26  ;;  %v5877_v26 = vsub.f32 %v10735_v15, %v10985_v7  ;;  %v5939_v32 = vmul.f32 %v5875_v52, %v5875_v52  ;;  %v5880_v52 = vsub.f32 %v10740_v12, %v10985_v7 }
 0x864   :  { %v5214_v49 = vmul.f32 %v5150_v14, %v5150_v14 }
 0x865   :  { %v5999_v34 = vadd.f32 %v5998_v30, %v5936_v54  ;;  %v5940_v54 = vmul.f32 %v5876_v19, %v5876_v19  ;;  %v13474_v30 = vld [vmem:[#allocation37_spill] sm:$0xff] }
 0x866   :  { %v5151_v53 = vsub.f32 %v13474_v30, %v10755_v2  ;;  %v5277_v9 = vadd.f32 %v5276_v55, %v5214_v49 }
 0x867   :  { %v6000_v41 = vadd.f32 %v5999_v34, %v5937_v0  ;;  %v5879_v0 = vsub.f32 %v10729_v16, %v10985_v7  ;;  %v5941_v34 = vmul.f32 %v5877_v26, %v5877_v26  ;;  %v5882_v26 = vsub.f32 %v10766_v25, %v10985_v7  ;;  %v13528_v16 = vld [vmem:[#allocation10_spill] sm:$0xff] }
 0x868   :  { %v5215_v19 = vmul.f32 %v5151_v53, %v5151_v53 }
 0x869   :  { %v6001_v6 = vadd.f32 %v6000_v41, %v5938_v20  ;;  %v5942_v20 = vmul.f32 %v5878_v21, %v5878_v21  ;;  %v13475_v41 = vld [vmem:[#allocation34_spill] sm:$0xff] }
 0x86a   :  { %v5152_v62 = vsub.f32 %v13475_v41, %v10755_v2  ;;  %v5278_v50 = vadd.f32 %v5277_v9, %v5215_v19 }
 0x86b   :  { %v6002_v23 = vadd.f32 %v6001_v6, %v5939_v32  ;;  %v5881_v32 = vsub.f32 %v10753_v42, %v10985_v7  ;;  %v5943_v6 = vmul.f32 %v5879_v0, %v5879_v0  ;;  %v5884_v0 = vsub.f32 %v10758_v10, %v10985_v7  ;;  %v13527_v42 = vld [vmem:[#allocation8_spill] sm:$0xff] }
 0x86c   :  { %v5216_v21 = vmul.f32 %v5152_v62, %v5152_v62 }
 0x86d   :  { %v6003_v56 = vadd.f32 %v6002_v23, %v5940_v54  ;;  %v5944_v54 = vmul.f32 %v5880_v52, %v5880_v52  ;;  %v13476_v23 = vld [vmem:[#allocation35_spill] sm:$0xff] }
 0x86e   :  { %v5153_v49 = vsub.f32 %v13476_v23, %v10755_v2  ;;  %v5279_v12 = vadd.f32 %v5278_v50, %v5216_v21 }
 0x86f   :  { %v6004_v13 = vadd.f32 %v6003_v56, %v5941_v34  ;;  %v5883_v34 = vsub.f32 %v10750_v31, %v10985_v7  ;;  %v5945_v56 = vmul.f32 %v5881_v32, %v5881_v32  ;;  %v5886_v32 = vsub.f32 %v10790_v51, %v10985_v7 }
 0x870   :  { %v5217_v52 = vmul.f32 %v5153_v49, %v5153_v49 }
 0x871   :  { %v6005_v14 = vadd.f32 %v6004_v13, %v5942_v20  ;;  %v5946_v20 = vmul.f32 %v5882_v26, %v5882_v26  ;;  %v13477_v13 = vld [vmem:[#allocation77_spill] sm:$0xff] }
 0x872   :  { %v5154_v19 = vsub.f32 %v13477_v13, %v10755_v2  ;;  %v5280_v25 = vadd.f32 %v5279_v12, %v5217_v52 }
 0x873   :  { %v6006_v55 = vadd.f32 %v6005_v14, %v5943_v6  ;;  %v5885_v6 = vsub.f32 %v10778_v28, %v10985_v7  ;;  %v5947_v14 = vmul.f32 %v5883_v34, %v5883_v34  ;;  %v5888_v34 = vsub.f32 %v10784_v35, %v10985_v7 }
 0x874   :  { %v5218_v26 = vmul.f32 %v5154_v19, %v5154_v19 }
 0x875   :  { %v6007_v53 = vadd.f32 %v6006_v55, %v5944_v54  ;;  %v5948_v54 = vmul.f32 %v5884_v0, %v5884_v0  ;;  %v13478_v55 = vld [vmem:[#allocation12_spill] sm:$0xff] }
 0x876   :  { %v5155_v21 = vsub.f32 %v13478_v55, %v10755_v2  ;;  %v5281_v10 = vadd.f32 %v5280_v25, %v5218_v26 }
 0x877   :  { %v6008_v9 = vadd.f32 %v6007_v53, %v5945_v56  ;;  %v5887_v56 = vsub.f32 %v10772_v8, %v10985_v7  ;;  %v5949_v53 = vmul.f32 %v5885_v6, %v5885_v6  ;;  %v5890_v6 = vsub.f32 %v10814_v61, %v10985_v7  ;;  %v13524_v61 = vld [vmem:[#allocation61_spill] sm:$0xff] }
 0x878   :  { %v5219_v0 = vmul.f32 %v5155_v21, %v5155_v21  ;;  %v5892_v21 = vsub.f32 %v10808_v4, %v10985_v7 }
 0x879   :  { %v6009_v62 = vadd.f32 %v6008_v9, %v5946_v20  ;;  %v5950_v20 = vmul.f32 %v5886_v32, %v5886_v32  ;;  %v13479_v9 = vld [vmem:[#allocation75_spill] sm:$0xff]  ;;  %v5891_v32 = vsub.f32 %v10796_v38, %v10985_v7  ;;  %v5954_v35 = vmul.f32 %v5890_v6, %v5890_v6  ;;  %v13523_v38 = vld [vmem:[#allocation60_spill] sm:$0xff] }
 0x87a   :  { %v5156_v52 = vsub.f32 %v13479_v9, %v10755_v2  ;;  %v5282_v51 = vadd.f32 %v5281_v10, %v5219_v0  ;;  %v5893_v10 = vsub.f32 %v10826_v63, %v10985_v7  ;;  %v5896_v6 = vsub.f32 %v10832_v57, %v10985_v7 }
 0x87b   :  { %v6010_v50 = vadd.f32 %v6009_v62, %v5947_v14  ;;  %v5889_v14 = vsub.f32 %v10802_v59, %v10985_v7  ;;  %v5951_v62 = vmul.f32 %v5887_v56, %v5887_v56  ;;  %v5955_v56 = vmul.f32 %v5891_v32, %v5891_v32 }
 0x87d   :  { %v6011_v49 = vadd.f32 %v6010_v50, %v5948_v54  ;;  %v5952_v54 = vmul.f32 %v5888_v34, %v5888_v34  ;;  %v5220_v50 = vmul.f32 %v5156_v52, %v5156_v52  ;;  %v5953_v26 = vmul.f32 %v5889_v14, %v5889_v14 }
 0x87e   :  { %v5894_v34 = vsub.f32 %v10838_v40, %v10985_v7  ;;  %v5956_v52 = vmul.f32 %v5892_v21, %v5892_v21  ;;  %v5895_v14 = vsub.f32 %v10820_v60, %v10985_v7  ;;  %v5960_v21 = vmul.f32 %v5896_v6, %v5896_v6  ;;  %v13519_v60 = vld [vmem:[#allocation55_spill] sm:$0xff]  ;;  %v13520_v40 = vld [vmem:[#allocation62_spill] sm:$0xff] }
 0x87f   :  { %v6012_v12 = vadd.f32 %v6011_v49, %v5949_v53  ;;  %v5283_v49 = vadd.f32 %v5282_v51, %v5220_v50  ;;  %v5957_v51 = vmul.f32 %v5893_v10, %v5893_v10  ;;  %v5899_v10 = vsub.f32 %v10844_v43, %v10985_v7  ;;  %v13514_v43 = vld [vmem:[#allocation46_spill] sm:$0xff] }
 0x880   :  { %v5902_v6 = vsub.f32 %v10882_v22, %v10985_v7 }
 0x881   :  { %v6013_v19 = vadd.f32 %v6012_v12, %v5950_v20  ;;  %v5284_v12 = vrot.slane %v5283_v49, 4 }
 0x883   :  { %v6014_v25 = vadd.f32 %v6013_v19, %v5951_v62  ;;  %v5285_v19 = vadd.f32 %v5284_v12, %v5283_v49 }
 0x885   :  { %v6015_v53 = vadd.f32 %v6014_v25, %v5952_v54  ;;  %v5958_v54 = vmul.f32 %v5894_v34, %v5894_v34  ;;  %v5286_v32 = vrot.slane %v5285_v19, 2  ;;  %v5900_v34 = vsub.f32 %v10856_v11, %v10985_v7  ;;  %v13513_v11 = vld [vmem:[#allocation36_spill] sm:$0xff] }
 0x887   :  { %v6016_v59 = vadd.f32 %v6015_v53, %v5953_v26  ;;  %v13480_v26 = vld [vmem:[#allocation113_spill] sm:$0xff]  ;;  %v5287_v12 = vadd.f32 %v5286_v32, %v5285_v19 }
 0x888   :  { %v5898_v53 = vsub.f32 %v13480_v26, %v10985_v7  ;;  %v13515_v26 = vld [vmem:[#allocation56_spill] sm:$0xff] }
 0x889   :  { %v6017_v20 = vadd.f32 %v6016_v59, %v5954_v35  ;;  %v5897_v35 = vsub.f32 %v10850_v58, %v10985_v7  ;;  %v5959_v59 = vmul.f32 %v5895_v14, %v5895_v14  ;;  %v5901_v14 = vsub.f32 %v10872_v46, %v10985_v7  ;;  %v13512_v46 = vld [vmem:[#allocation33_spill] sm:$0xff] }
 0x88b   :  { %v6018_v0 = vadd.f32 %v6017_v20, %v5955_v56  ;;  %v5961_v49 = vmul.f32 %v5897_v35, %v5897_v35  ;;  %v5903_v35 = vsub.f32 %v10867_v39, %v10985_v7  ;;  %v5965_v19 = vmul.f32 %v5901_v14, %v5901_v14  ;;  %v13483_v14 = vld [vmem:[#allocation118_spill] sm:$0xff] }
 0x88d   :  { %v6019_v62 = vadd.f32 %v6018_v0, %v5956_v52  ;;  %v5962_v52 = vmul.f32 %v5898_v53, %v5898_v53  ;;  %v5904_v53 = vsub.f32 %v10877_v1, %v10985_v7 }
 0x88f   :  { %v6020_v25 = vadd.f32 %v6019_v62, %v5957_v51  ;;  %v5963_v51 = vmul.f32 %v5899_v10, %v5899_v10  ;;  %v13481_v10 = vld [vmem:[#allocation119_spill] sm:$0xff] }
 0x891   :  { %v6021_v50 = vadd.f32 %v6020_v25, %v5958_v54  ;;  %v5288_v54 = vrot.slane %v5287_v12, 1  ;;  %v5964_v25 = vmul.f32 %v5900_v34, %v5900_v34  ;;  %v13482_v34 = vld [vmem:[#allocation121_spill] sm:$0xff] }
 0x893   :  { %v6022_v56 = vadd.f32 %v6021_v50, %v5959_v59  ;;  %v5289_v32 = vadd.f32 %v5288_v54, %v5287_v12 }
 0x895   :  { %v6023_v20 = vadd.f32 %v6022_v56, %v5960_v21  ;;  %v5966_v21 = vmul.f32 %v5902_v6, %v5902_v6  ;;  %v13484_v6 = vld [vmem:[#allocation120_spill] sm:$0xff] }
 0x897   :  { %v6024_v0 = vadd.f32 %v6023_v20, %v5961_v49  ;;  %v5905_v49 = vsub.f32 %v13481_v10, %v10985_v7  ;;  %v5967_v20 = vmul.f32 %v5903_v35, %v5903_v35  ;;  %v13485_v35 = vld [vmem:[#allocation123_spill] sm:$0xff] }
 0x899   :  { %v6025_v62 = vadd.f32 %v6024_v0, %v5962_v52  ;;  %v5290_v0 = vmul.f32 0.001953125, %v5289_v32  ;;  %v5969_v12 = vmul.f32 %v5905_v49, %v5905_v49  ;;  %v13487_v49 = vld [vmem:[#allocation122_spill] sm:$0xff] }
 0x89b   :  { %v6026_v59 = vadd.f32 %v6025_v62, %v5963_v51  ;;  %v5906_v51 = vsub.f32 %v13482_v34, %v10985_v7  ;;  %v5968_v62 = vmul.f32 %v5904_v53, %v5904_v53  ;;  %v13486_v53 = vld [vmem:[#allocation125_spill] sm:$0xff] }
 0x89d   :  { %v6027_v50 = vadd.f32 %v6026_v59, %v5964_v25  ;;  %v5907_v25 = vsub.f32 %v13483_v14, %v10985_v7  ;;  %v5291_v59 = vadd.f32 1e-05, %v5290_v0 }
 0x89f   :  { %v6028_v56 = vadd.f32 %v6027_v50, %v5965_v19  ;;  %v5908_v19 = vsub.f32 %v13484_v6, %v10985_v7  ;;  %v5970_v50 = vmul.f32 %v5906_v51, %v5906_v51  ;;  %v5971_v32 = vmul.f32 %v5907_v25, %v5907_v25  ;;  %v13488_v6 = vld [vmem:[#allocation124_spill] sm:$0xff] }
 0x8a0   :  { %7164 = vrsqrt.f32 %v5291_v59  ;;  %v5912_v51 = vsub.f32 %v13488_v6, %v10985_v7 }
 0x8a1   :  { %v6029_v52 = vadd.f32 %v6028_v56, %v5966_v21  ;;  %v5909_v21 = vsub.f32 %v13485_v35, %v10985_v7  ;;  %v13489_v35 = vld [vmem:[#allocation127_spill] sm:$0xff] }
 0x8a2   :  { %v5913_v25 = vsub.f32 %v13489_v35, %v10985_v7  ;;  %v13495_v35 = vld [vmem:[#allocation130_spill] sm:$0xff] }
 0x8a3   :  { %v6030_v22 = vadd.f32 %v6029_v52, %v5967_v20  ;;  %v5910_v20 = vsub.f32 %v13486_v53, %v10985_v7  ;;  %v5972_v52 = vmul.f32 %v5908_v19, %v5908_v19  ;;  %v5973_v0 = vmul.f32 %v5909_v21, %v5909_v21 }
 0x8a4   :  { %v5976_v19 = vmul.f32 %v5912_v51, %v5912_v51  ;;  %v5977_v21 = vmul.f32 %v5913_v25, %v5913_v25  ;;  %v5919_v6 = vsub.f32 %v13495_v35, %v10985_v7  ;;  %v13498_v35 = vld [vmem:[#allocation22_spill] sm:$0xff] }
 0x8a5   :  { %v6031_v54 = vadd.f32 %v6030_v22, %v5968_v62  ;;  %v5911_v22 = vsub.f32 %v13487_v49, %v10985_v7 }
 0x8a7   :  { %v6032_v1 = vadd.f32 %v6031_v54, %v5969_v12  ;;  %v5974_v12 = vmul.f32 %v5910_v20, %v5910_v20  ;;  %v5021_v20 = vld [vmem:[%s12516_s6] sm:$0x1] }
 0x8a9   :  { %v6033_v56 = vadd.f32 %v6032_v1, %v5970_v50  ;;  %v5975_v1 = vmul.f32 %v5911_v22, %v5911_v22  ;;  %v13490_v50 = vld [vmem:[#allocation129_spill] sm:$0xff] }
 0x8aa   :  { %v5914_v53 = vsub.f32 %v13490_v50, %v10985_v7 }
 0x8ab   :  { %v6034_v34 = vadd.f32 %v6033_v56, %v5971_v32  ;;  %v13491_v56 = vld [vmem:[#allocation126_spill] sm:$0xff] }
 0x8ac   :  { %v5915_v49 = vsub.f32 %v13491_v56, %v10985_v7  ;;  %v5978_v22 = vmul.f32 %v5914_v53, %v5914_v53  ;;  %v13494_v56 = vld [vmem:[#allocation133_spill] sm:$0xff] }
 0x8ad   :  { %v6035_v62 = vadd.f32 %v6034_v34, %v5972_v52  ;;  %v7165_v52 = vpop.eup %7164  ;;  %v5918_v25 = vsub.f32 %v13494_v56, %v10985_v7  ;;  %v5022_v53 = vld [vmem:[%s12516_s6 + $0x1] sm:$0x1]  ;;  %v13542_v56 = vld [vmem:[#allocation11_spill] sm:$0xff] }
 0x8ae   :  { %v5979_v51 = vmul.f32 %v5915_v49, %v5915_v49  ;;  %v13496_v49 = vld [vmem:[#allocation132_spill] sm:$0xff] }
 0x8af   :  { %v6036_v54 = vadd.f32 %v6035_v62, %v5973_v0  ;;  %v13492_v0 = vld [vmem:[#allocation128_spill] sm:$0xff] }
 0x8b0   :  { %v5916_v62 = vsub.f32 %v13492_v0, %v10985_v7 }
 0x8b1   :  { %v6037_v59 = vadd.f32 %v6036_v54, %v5974_v12  ;;  %v13493_v54 = vld [vmem:[#allocation131_spill] sm:$0xff] }
 0x8b2   :  { %v5917_v50 = vsub.f32 %v13493_v54, %v10985_v7  ;;  %v13510_v54 = vld [vmem:[#allocation49_spill] sm:$0xff] }
 0x8b3   :  { %v6038_v32 = vadd.f32 %v6037_v59, %v5975_v1  ;;  %v5293_v59 = vmul.f32 %v7165_v52, %v5021_v20  ;;  %v13497_v20 = vld [vmem:[#allocation25_spill] sm:$0xff] }
 0x8b4   :  { %v5981_v14 = vmul.f32 %v5917_v50, %v5917_v50 }
 0x8b5   :  { %v6039_v34 = vadd.f32 %v6038_v32, %v5976_v19  ;;  %v5980_v19 = vmul.f32 %v5916_v62, %v5916_v62  ;;  %v5294_v0 = vmul.f32 %v5293_v59, %v10755_v2  ;;  %v5983_v62 = vmul.f32 %v5919_v6, %v5919_v6  ;;  %v13500_v6 = vld [vmem:[#allocation18_spill] sm:$0xff] }
 0x8b7   :  { %v6040_v12 = vadd.f32 %v6039_v34, %v5977_v21  ;;  %v5920_v21 = vsub.f32 %v13496_v49, %v10985_v7  ;;  %v5982_v34 = vmul.f32 %v5918_v25, %v5918_v25  ;;  %v13543_v7 = vld [vmem:[#allocation73_spill] sm:$0xff] }
 0x8b9   :  { %v6041_v1 = vadd.f32 %v6040_v12, %v5978_v22  ;;  %v11157_v22 = vrot.slane %v5293_v59, %v13497_v20  ;;  %v13501_v59 = vld [vmem:[#allocation17_spill] sm:$0xff] }
 0x8bb   :  { %v6042_v32 = vadd.f32 %v6041_v1, %v5979_v51  ;;  %v5295_v51 = vsub.f32 %v5022_v53, %v5294_v0  ;;  %v5984_v1 = vmul.f32 %v5920_v21, %v5920_v21  ;;  %v5361_v2 = vmul.f32 %v11157_v22, %v13477_v13  ;;  %v13502_v13 = vld [vmem:[#allocation41_spill] sm:$0xff]  ;;  %v13503_v21 = vld [vmem:[#allocation44_spill] sm:$0xff] }
 0x8bc   :  { %v11166_v49 = vmul.f32 %v11157_v22, %v13498_v35  ;;  %v11174_v0 = vmul.f32 %v13500_v6, %v11157_v22  ;;  %v11178_v25 = vmul.f32 %v13501_v59, %v11157_v22  ;;  %v11182_v53 = vmul.f32 %v11157_v22, %v13502_v13  ;;  %v13508_v59 = vld [vmem:[#allocation40_spill] sm:$0xff] }
 0x8bd   :  { %v6043_v10 = vadd.f32 %v6042_v32, %v5980_v19  ;;  %v11162_v32 = vrot.slane %v5295_v51, %v13497_v20  ;;  %v11186_v35 = vmul.f32 %v11157_v22, %v13503_v21  ;;  %v11206_v13 = vmul.f32 %v13508_v59, %v11157_v22  ;;  %v13509_v21 = vld [vmem:[#allocation43_spill] sm:$0xff] }
 0x8be   :  { %v11225_v59 = vmul.f32 %v13513_v11, %v11157_v22  ;;  %v13518_v11 = vld [vmem:[#allocation54_spill] sm:$0xff] }
 0x8bf   :  { %v6044_v52 = vadd.f32 %v6043_v10, %v5981_v14  ;;  %v13499_v10 = vld [vmem:[#allocation39_spill] sm:$0xff]  ;;  %v11245_v57 = vmul.f32 %v13518_v11, %v11157_v22  ;;  %v11265_v11 = vmul.f32 %v11157_v22, %v13523_v38  ;;  %v11285_v38 = vmul.f32 %v11157_v22, %v13528_v16  ;;  %v13533_v16 = vld [vmem:[#allocation53_spill] sm:$0xff] }
 0x8c0   :  { %v11170_v14 = vmul.f32 %v11157_v22, %v13499_v10  ;;  %v13507_v10 = vld [vmem:[#allocation52_spill] sm:$0xff]  ;;  %v11305_v5 = vmul.f32 %v13533_v16, %v11157_v22  ;;  %v11325_v16 = vmul.f32 %v13542_v56, %v11157_v22 }
 0x8c1   :  { %v6045_v12 = vadd.f32 %v6044_v52, %v5982_v34  ;;  %v13504_v52 = vld [vmem:[#allocation21_spill] sm:$0xff]  ;;  %v11202_v6 = vmul.f32 %v11157_v22, %v13507_v10  ;;  %v11221_v10 = vmul.f32 %v11157_v22, %v13512_v46 }
 0x8c3   :  { %v6046_v50 = vadd.f32 %v6045_v12, %v5983_v62  ;;  %v11190_v62 = vmul.f32 %v13504_v52, %v11157_v22  ;;  %v13505_v12 = vld [vmem:[#allocation38_spill] sm:$0xff]  ;;  %v11210_v52 = vmul.f32 %v13509_v21, %v11157_v22  ;;  %v11229_v21 = vmul.f32 %v13514_v43, %v11157_v22 }
 0x8c4   :  { %v11194_v51 = vmul.f32 %v13505_v12, %v11157_v22  ;;  %v11214_v12 = vmul.f32 %v11157_v22, %v13510_v54  ;;  %v11233_v54 = vmul.f32 %v11157_v22, %v13515_v26  ;;  %v11249_v43 = vmul.f32 %v11157_v22, %v13519_v60 }
 0x8c5   :  { %v6047_v19 = vadd.f32 %v6046_v50, %v5984_v1  ;;  %v13506_v1 = vld [vmem:[#allocation47_spill] sm:$0xff]  ;;  %v11253_v26 = vmul.f32 %v11157_v22, %v13520_v40  ;;  %v11269_v60 = vmul.f32 %v11157_v22, %v13524_v61  ;;  %v13525_v40 = vld [vmem:[#allocation58_spill] sm:$0xff]  ;;  %v13529_v61 = vld [vmem:[#allocation45_spill] sm:$0xff] }
 0x8c6   :  { %v11198_v50 = vmul.f32 %v11157_v22, %v13506_v1  ;;  %v11217_v1 = vadd.f32 %v11162_v32, %v5361_v2  ;;  %v11273_v28 = vmul.f32 %v13525_v40, %v11157_v22  ;;  %v11289_v15 = vmul.f32 %v13529_v61, %v11157_v22  ;;  %v13531_v40 = vld [vmem:[#allocation9_spill] sm:$0xff]  ;;  %v13534_v61 = vld [vmem:[#allocation16_spill] sm:$0xff] }
 0x8c7   :  { %v6048_v34 = vrot.slane %v6047_v19, 4  ;;  %v11309_v47 = vmul.f32 %v13534_v61, %v11157_v22  ;;  %v11329_v61 = vmul.f32 %v11157_v22, %v13543_v7 }
 0x8c8   :  { %13511 = vst [vmem:[#allocation26_spill] sm:$0xff] %v11217_v1 }
 0x8c9   :  { %v6049_v39 = vadd.f32 %v6048_v34, %v6047_v19  ;;  %v13516_v19 = vld [vmem:[#allocation50_spill] sm:$0xff]  ;;  %v13517_v34 = vld [vmem:[#allocation51_spill] sm:$0xff]  ;;  %13535 = vst [vmem:[#allocation67_spill] sm:$0xff] %v11309_v47  ;;  %13544 = vst [vmem:[#allocation19_spill] sm:$0xff] %v11329_v61 }
 0x8ca   :  { %v11237_v2 = vmul.f32 %v11157_v22, %v13516_v19  ;;  %v11241_v46 = vmul.f32 %v13517_v34, %v11157_v22  ;;  %v13521_v19 = vld [vmem:[#allocation59_spill] sm:$0xff]  ;;  %v13522_v34 = vld [vmem:[#allocation57_spill] sm:$0xff]  ;;  %v13545_v47 = vld [vmem:[#allocation64_spill] sm:$0xff] }
 0x8cb   :  { %v6050_v58 = vrot.slane %v6049_v39, 2  ;;  %v11257_v63 = vmul.f32 %v13521_v19, %v11157_v22  ;;  %v11261_v4 = vmul.f32 %v13522_v34, %v11157_v22  ;;  %v13526_v19 = vld [vmem:[#allocation65_spill] sm:$0xff]  ;;  %v11281_v34 = vmul.f32 %v11157_v22, %v13527_v42  ;;  %v13555_v61 = vld [vmem:[#allocation20_spill] sm:$0xff] }
 0x8cc   :  { %v11277_v31 = vmul.f32 %v13526_v19, %v11157_v22  ;;  %v11297_v19 = vmul.f32 %v11157_v22, %v13531_v40  ;;  %v11301_v42 = vmul.f32 %v11157_v22, %v13532_v45  ;;  %v11317_v40 = vmul.f32 %v11157_v22, %v13538_v36  ;;  %v13547_v36 = vld [vmem:[#allocation28_spill] sm:$0xff] }
 0x8cd   :  { %v6051_v8 = vadd.f32 %v6050_v58, %v6049_v39  ;;  %v13530_v39 = vld [vmem:[#allocation48_spill] sm:$0xff]  ;;  %v11321_v45 = vmul.f32 %v13540_v24, %v11157_v22  ;;  %v13549_v24 = vld [vmem:[#allocation63_spill] sm:$0xff] }
 0x8ce   :  { %v11293_v58 = vmul.f32 %v13530_v39, %v11157_v22  ;;  %v11313_v39 = vmul.f32 %v11157_v22, %v13536_v44  ;;  %13539 = vst [vmem:[#allocation29_spill] sm:$0xff] %v11317_v40  ;;  %v11333_v44 = vmul.f32 %v11157_v22, %v13545_v47  ;;  %v11337_v40 = vmul.f32 %v13547_v36, %v11157_v22  ;;  %v13554_v36 = vld [vmem:[#allocation15_spill] sm:$0xff] }
 0x8cf   :  { %v6052_v1 = vrot.slane %v6051_v8, 1  ;;  %13541 = vst [vmem:[#allocation69_spill] sm:$0xff] %v11321_v45  ;;  %v11341_v45 = vmul.f32 %v13549_v24, %v11157_v22  ;;  %v11361_v24 = vmul.f32 %v11157_v22, %v13555_v61  ;;  %v11381_v61 = vmul.f32 %v11157_v22, %v13469_v3 }
 0x8d0   :  { %13537 = vst [vmem:[#allocation13_spill] sm:$0xff] %v11313_v39  ;;  %13546 = vst [vmem:[#allocation27_spill] sm:$0xff] %v11333_v44  ;;  %v13551_v39 = vld [vmem:[#allocation24_spill] sm:$0xff]  ;;  %v11401_v3 = vmul.f32 %v13474_v30, %v11157_v22  ;;  %v11421_v30 = vadd.f32 %v11162_v32, %v11166_v49  ;;  %v11441_v49 = vadd.f32 %v11162_v32, %v11186_v35 }
 0x8d1   :  { %v6053_v20 = vadd.f32 %v6052_v1, %v6051_v8  ;;  %13548 = vst [vmem:[#allocation31_spill] sm:$0xff] %v11337_v40  ;;  %13550 = vst [vmem:[#allocation37_spill] sm:$0xff] %v11341_v45  ;;  %v11345_v56 = vmul.f32 %v11157_v22, %v13551_v39  ;;  %v13552_v8 = vld [vmem:[#allocation23_spill] sm:$0xff]  ;;  %v13553_v1 = vld [vmem:[#allocation66_spill] sm:$0xff]  ;;  %v11357_v40 = vmul.f32 %v13554_v36, %v11157_v22 }
 0x8d2   :  { %v11349_v7 = vmul.f32 %v11157_v22, %v13552_v8  ;;  %v11353_v47 = vmul.f32 %v13553_v1, %v11157_v22  ;;  %v13556_v45 = vld [vmem:[#allocation68_spill] sm:$0xff]  ;;  %v11369_v8 = vmul.f32 %v13463_v27, %v11157_v22  ;;  %v11373_v1 = vmul.f32 %v13465_v37, %v11157_v22  ;;  %13557 = vst [vmem:[#allocation34_spill] sm:$0xff] %v11421_v30  ;;  %v13693_v30 = vld [vmem:[#allocation127_spill] sm:$0xff] }
 0x8d3   :  { %v6054_v44 = vmul.f32 0.001953125, %v6053_v20  ;;  %v11365_v39 = vmul.f32 %v11157_v22, %v13556_v45  ;;  %v11377_v20 = vmul.f32 %v11157_v22, %v13467_v33  ;;  %v11385_v45 = vmul.f32 %v13470_v48, %v11157_v22  ;;  %13562 = vst [vmem:[#allocation22_spill] sm:$0xff] %v11441_v49  ;;  %v13683_v49 = vld [vmem:[#allocation120_spill] sm:$0xff] }
 0x8d4   :  { %v11389_v27 = vmul.f32 %v13471_v29, %v11157_v22  ;;  %v11393_v37 = vmul.f32 %v11157_v22, %v13472_v17  ;;  %v11397_v33 = vmul.f32 %v11157_v22, %v13473_v18  ;;  %v11405_v48 = vmul.f32 %v13475_v41, %v11157_v22 }
 0x8d5   :  { %v6055_v36 = vadd.f32 1e-05, %v6054_v44  ;;  %v11409_v29 = vmul.f32 %v11157_v22, %v13476_v23  ;;  %v11413_v17 = vmul.f32 %v13478_v55, %v11157_v22  ;;  %v11417_v18 = vmul.f32 %v13479_v9, %v11157_v22 }
 0x8d6   :  { %v11425_v41 = vadd.f32 %v11162_v32, %v11170_v14  ;;  %v11429_v23 = vadd.f32 %v11162_v32, %v11174_v0  ;;  %v11433_v55 = vadd.f32 %v11162_v32, %v11178_v25  ;;  %v11437_v9 = vadd.f32 %v11162_v32, %v11182_v53 }
 0x8d7   :  { %7166 = vrsqrt.f32 %v6055_v36  ;;  %v11445_v22 = vadd.f32 %v11162_v32, %v11190_v62  ;;  %v11449_v14 = vadd.f32 %v11162_v32, %v11194_v51  ;;  %v11453_v0 = vadd.f32 %v11162_v32, %v11198_v50  ;;  %v13594_v44 = vld [vmem:[#allocation13_spill] sm:$0xff] }
 0x8d8   :  { %13558 = vst [vmem:[#allocation35_spill] sm:$0xff] %v11425_v41  ;;  %13559 = vst [vmem:[#allocation77_spill] sm:$0xff] %v11429_v23  ;;  %v11457_v25 = vadd.f32 %v11162_v32, %v11202_v6  ;;  %v11461_v53 = vadd.f32 %v11162_v32, %v11206_v13  ;;  %v11465_v35 = vadd.f32 %v11162_v32, %v11210_v52  ;;  %v13596_v36 = vld [vmem:[#allocation29_spill] sm:$0xff]  ;;  %v13689_v23 = vld [vmem:[#allocation122_spill] sm:$0xff] }
 0x8d9   :  { %13560 = vst [vmem:[#allocation12_spill] sm:$0xff] %v11433_v55  ;;  %13561 = vst [vmem:[#allocation75_spill] sm:$0xff] %v11437_v9  ;;  %v11469_v62 = vadd.f32 %v11162_v32, %v11214_v12  ;;  %v11473_v51 = vadd.f32 %v11162_v32, %v11221_v10  ;;  %v11477_v50 = vadd.f32 %v11162_v32, %v11225_v59  ;;  %v13685_v9 = vld [vmem:[#allocation123_spill] sm:$0xff]  ;;  %v13687_v55 = vld [vmem:[#allocation125_spill] sm:$0xff] }
 0x8da   :  { %13563 = vst [vmem:[#allocation39_spill] sm:$0xff] %v11445_v22  ;;  %13564 = vst [vmem:[#allocation18_spill] sm:$0xff] %v11449_v14  ;;  %v11481_v6 = vadd.f32 %v11162_v32, %v11229_v21  ;;  %v11485_v13 = vadd.f32 %v11162_v32, %v11233_v54  ;;  %v11489_v52 = vadd.f32 %v11162_v32, %v11237_v2  ;;  %v13681_v14 = vld [vmem:[#allocation121_spill] sm:$0xff]  ;;  %v13682_v22 = vld [vmem:[#allocation118_spill] sm:$0xff] }
 0x8db   :  { %13565 = vst [vmem:[#allocation17_spill] sm:$0xff] %v11453_v0  ;;  %13566 = vst [vmem:[#allocation41_spill] sm:$0xff] %v11457_v25  ;;  %v11493_v12 = vadd.f32 %v11162_v32, %v11241_v46  ;;  %v11497_v10 = vadd.f32 %v11162_v32, %v11245_v57  ;;  %v11501_v59 = vadd.f32 %v11162_v32, %v11249_v43  ;;  %v13679_v25 = vld [vmem:[#allocation116_spill] sm:$0xff]  ;;  %v13680_v0 = vld [vmem:[#allocation119_spill] sm:$0xff] }
 0x8dc   :  { %13567 = vst [vmem:[#allocation44_spill] sm:$0xff] %v11461_v53  ;;  %13568 = vst [vmem:[#allocation21_spill] sm:$0xff] %v11465_v35  ;;  %v11505_v21 = vadd.f32 %v11162_v32, %v11253_v26  ;;  %v11509_v54 = vadd.f32 %v11162_v32, %v11257_v63  ;;  %v11513_v2 = vadd.f32 %v11162_v32, %v11261_v4  ;;  %v13677_v35 = vld [vmem:[#allocation117_spill] sm:$0xff]  ;;  %v13678_v53 = vld [vmem:[#allocation114_spill] sm:$0xff] }
 0x8dd   :  { %13569 = vst [vmem:[#allocation38_spill] sm:$0xff] %v11469_v62  ;;  %13570 = vst [vmem:[#allocation47_spill] sm:$0xff] %v11473_v51  ;;  %v11517_v57 = vadd.f32 %v11162_v32, %v11265_v11  ;;  %v11521_v46 = vadd.f32 %v11162_v32, %v11269_v60  ;;  %v11525_v43 = vadd.f32 %v11162_v32, %v11273_v28  ;;  %v13675_v51 = vld [vmem:[#allocation112_spill] sm:$0xff]  ;;  %v13676_v62 = vld [vmem:[#allocation115_spill] sm:$0xff] }
 0x8de   :  { %13571 = vst [vmem:[#allocation52_spill] sm:$0xff] %v11477_v50  ;;  %13572 = vst [vmem:[#allocation40_spill] sm:$0xff] %v11481_v6  ;;  %v11529_v63 = vadd.f32 %v11162_v32, %v11277_v31  ;;  %v11533_v4 = vadd.f32 %v11162_v32, %v11281_v34  ;;  %v11537_v26 = vadd.f32 %v11162_v32, %v11285_v38  ;;  %v13592_v38 = vld [vmem:[#allocation67_spill] sm:$0xff]  ;;  %v13673_v6 = vld [vmem:[#allocation113_spill] sm:$0xff] }
 0x8df   :  { %13573 = vst [vmem:[#allocation43_spill] sm:$0xff] %v11485_v13  ;;  %13574 = vst [vmem:[#allocation49_spill] sm:$0xff] %v11489_v52  ;;  %v11541_v11 = vadd.f32 %v11162_v32, %v11289_v15  ;;  %v11545_v28 = vadd.f32 %v11162_v32, %v11293_v58  ;;  %v11549_v31 = vadd.f32 %v11162_v32, %v11297_v19  ;;  %v13672_v13 = vld [vmem:[#allocation111_spill] sm:$0xff]  ;;  %v13674_v50 = vld [vmem:[#allocation110_spill] sm:$0xff] }
 0x8e0   :  { %13575 = vst [vmem:[#allocation33_spill] sm:$0xff] %v11493_v12  ;;  %13576 = vst [vmem:[#allocation36_spill] sm:$0xff] %v11497_v10  ;;  %v11553_v60 = vadd.f32 %v11162_v32, %v11301_v42  ;;  %v11557_v34 = vadd.f32 %v11162_v32, %v11305_v5  ;;  %v11561_v15 = vadd.f32 %v11162_v32, %v13592_v38  ;;  %v13668_v10 = vld [vmem:[#allocation107_spill] sm:$0xff]  ;;  %v13669_v12 = vld [vmem:[#allocation109_spill] sm:$0xff] }
 0x8e1   :  { %13577 = vst [vmem:[#allocation46_spill] sm:$0xff] %v11501_v59  ;;  %13578 = vst [vmem:[#allocation56_spill] sm:$0xff] %v11505_v21  ;;  %v11565_v58 = vadd.f32 %v11162_v32, %v13594_v44  ;;  %v11569_v19 = vadd.f32 %v11162_v32, %v13596_v36  ;;  %v11577_v5 = vadd.f32 %v11162_v32, %v11325_v16  ;;  %v5785_v36 = vld [vmem:[%s12516_s6 + $0x2] sm:$0x1]  ;;  %v13691_v41 = vld [vmem:[#allocation124_spill] sm:$0xff] }
 0x8e2   :  { %13579 = vst [vmem:[#allocation50_spill] sm:$0xff] %v11509_v54  ;;  %13580 = vst [vmem:[#allocation51_spill] sm:$0xff] %v11513_v2  ;;  %v13665_v54 = vld [vmem:[#allocation105_spill] sm:$0xff] }
 0x8e3   :  { %13581 = vst [vmem:[#allocation54_spill] sm:$0xff] %v11517_v57  ;;  %13582 = vst [vmem:[#allocation55_spill] sm:$0xff] %v11521_v46  ;;  %v13661_v46 = vld [vmem:[#allocation101_spill] sm:$0xff] }
 0x8e4   :  { %13583 = vst [vmem:[#allocation62_spill] sm:$0xff] %v11525_v43  ;;  %13584 = vst [vmem:[#allocation59_spill] sm:$0xff] %v11529_v63  ;;  %v13660_v43 = vld [vmem:[#allocation99_spill] sm:$0xff] }
 0x8e5   :  { %13585 = vst [vmem:[#allocation57_spill] sm:$0xff] %v11533_v4  ;;  %13586 = vst [vmem:[#allocation60_spill] sm:$0xff] %v11537_v26 }
 0x8e6   :  { %13587 = vst [vmem:[#allocation61_spill] sm:$0xff] %v11541_v11  ;;  %13588 = vst [vmem:[#allocation58_spill] sm:$0xff] %v11545_v28 }
 0x8e7   :  { %13589 = vst [vmem:[#allocation65_spill] sm:$0xff] %v11549_v31  ;;  %13590 = vst [vmem:[#allocation8_spill] sm:$0xff] %v11553_v60  ;;  %v13598_v31 = vld [vmem:[#allocation69_spill] sm:$0xff] }
 0x8e8   :  { %13591 = vst [vmem:[#allocation10_spill] sm:$0xff] %v11557_v34  ;;  %13593 = vst [vmem:[#allocation45_spill] sm:$0xff] %v11561_v15  ;;  %v11573_v42 = vadd.f32 %v11162_v32, %v13598_v31  ;;  %v13601_v34 = vld [vmem:[#allocation19_spill] sm:$0xff] }
 0x8e9   :  { %13595 = vst [vmem:[#allocation48_spill] sm:$0xff] %v11565_v58  ;;  %13597 = vst [vmem:[#allocation9_spill] sm:$0xff] %v11569_v19  ;;  %v11581_v38 = vadd.f32 %v11162_v32, %v13601_v34  ;;  %v13603_v15 = vld [vmem:[#allocation27_spill] sm:$0xff]  ;;  %v11600_v34 = vadd.f32 %v11162_v32, %v11345_v56  ;;  %v11620_v56 = vadd.f32 %v11162_v32, %v11365_v39 }
 0x8ea   :  { %13599 = vst [vmem:[#allocation6_spill] sm:$0xff] %v11573_v42  ;;  %13600 = vst [vmem:[#allocation53_spill] sm:$0xff] %v11577_v5  ;;  %v11585_v44 = vadd.f32 %v11162_v32, %v13603_v15  ;;  %v13605_v19 = vld [vmem:[#allocation31_spill] sm:$0xff]  ;;  %v13607_v42 = vld [vmem:[#allocation37_spill] sm:$0xff]  ;;  %v11604_v15 = vadd.f32 %v11162_v32, %v11349_v7  ;;  %v11624_v7 = vadd.f32 %v11162_v32, %v11369_v8 }
 0x8eb   :  { %13602 = vst [vmem:[#allocation16_spill] sm:$0xff] %v11581_v38  ;;  %v11592_v31 = vadd.f32 %v11162_v32, %v13605_v19  ;;  %v11596_v16 = vadd.f32 %v11162_v32, %v13607_v42  ;;  %13609 = vst [vmem:[#allocation11_spill] sm:$0xff] %v11600_v34  ;;  %v11608_v38 = vadd.f32 %v11162_v32, %v11353_v47 }
 0x8ec   :  { %13604 = vst [vmem:[#allocation71_spill] sm:$0xff] %v11585_v44  ;;  %13610 = vst [vmem:[#allocation73_spill] sm:$0xff] %v11604_v15  ;;  %v7167_v44 = vpop.eup %7166  ;;  %v11612_v19 = vadd.f32 %v11162_v32, %v11357_v40  ;;  %v11616_v42 = vadd.f32 %v11162_v32, %v11361_v24  ;;  %v11628_v47 = vadd.f32 %v11162_v32, %v11373_v1 }
 0x8ed   :  { %13606 = vst [vmem:[#allocation72_spill] sm:$0xff] %v11592_v31  ;;  %13608 = vst [vmem:[#allocation14_spill] sm:$0xff] %v11596_v16  ;;  %v11632_v40 = vadd.f32 %v11162_v32, %v11377_v20  ;;  %v11636_v24 = vadd.f32 %v11162_v32, %v11381_v61  ;;  %v11640_v39 = vadd.f32 %v11162_v32, %v11385_v45  ;;  %v5786_v20 = vld [vmem:[%s12516_s6 + $0x3] sm:$0x1]  ;;  %v13650_v16 = vld [vmem:[#allocation82_spill] sm:$0xff]  ;;  %s7223_s6 = smov [#allocation2]  }
 0x8ee   :  { %13611 = vst [vmem:[#allocation64_spill] sm:$0xff] %v11608_v38  ;;  %13612 = vst [vmem:[#allocation28_spill] sm:$0xff] %v11612_v19  ;;  %v6057_v19 = vmul.f32 %v7167_v44, %v5785_v36  ;;  %v11644_v8 = vadd.f32 %v11162_v32, %v11389_v27  ;;  %v11648_v1 = vadd.f32 %v11162_v32, %v11393_v37  ;;  %v13624_v44 = vld [vmem:[#allocation134_spill] sm:$0xff]  ;;  %v13625_v27 = vld [vmem:[#allocation25_spill] sm:$0xff]  ;;  %s6393_s10 = sshll.u32 %s7223_s6, 4  ;;  %s6394_s10 = int_to_ptr.vmem [resolvable:$true] %s6393_s10 }
 0x8ef   :  { %13613 = vst [vmem:[#allocation63_spill] sm:$0xff] %v11616_v42  ;;  %13614 = vst [vmem:[#allocation24_spill] sm:$0xff] %v11620_v56  ;;  %v11655_v61 = vadd.f32 %v11162_v32, %v11397_v33  ;;  %v11659_v45 = vadd.f32 %v11162_v32, %v11401_v3  ;;  %v11667_v37 = vadd.f32 %v11162_v32, %v11405_v48  ;;  %v13651_v31 = vld [vmem:[#allocation26_spill] sm:$0xff]  ;;  %s7200_s11 = scalar_lea.vmem %s6394_s10, 8192  ;;  %p7205_p1 = scmp.lt.s32.totalorder %s6394_s10, %s6394_s10 }
 0x8f0   :  { %13615 = vst [vmem:[#allocation23_spill] sm:$0xff] %v11624_v7  ;;  %13616 = vst [vmem:[#allocation66_spill] sm:$0xff] %v11628_v47  ;;  %v6058_v36 = vmul.f32 %v6057_v19, %v13624_v44  ;;  %v11675_v33 = vadd.f32 %v11162_v32, %v11413_v17  ;;  %v11679_v3 = vadd.f32 %v11162_v32, %v11417_v18  ;;  %v13635_v18 = vld [vmem:[#allocation89_spill] sm:$0xff]  ;;  %v13643_v47 = vld [vmem:[#allocation42_spill] sm:$0xff]  ;;  %p7201_p0 = scmp.ne.s32.totalorder %s6394_s10, %s7200_s11  ;;  %p7206_p2 = scmp.lt.s32.totalorder %s7200_s11, %s7200_s11 }
 0x8f1   :  { %13617 = vst [vmem:[#allocation15_spill] sm:$0xff] %v11632_v40  ;;  %13618 = vst [vmem:[#allocation20_spill] sm:$0xff] %v11636_v24 }
 0x8f2   :  { %13619 = vst [vmem:[#allocation68_spill] sm:$0xff] %v11640_v39  ;;  %13620 = vst [vmem:[#allocation67_spill] sm:$0xff] %v11644_v8  ;;  %v11663_v8 = vrot.slane %v6057_v19, %v13625_v27  ;;  %v6059_v44 = vsub.f32 %v5786_v20, %v6058_v36  ;;  %p7207_p3 = por %p7206_p2, %p7205_p1 }
 0x8f3   :  { %13621 = vst [vmem:[#allocation13_spill] sm:$0xff] %v11648_v1  ;;  %13622 = vst [vmem:[#allocation29_spill] sm:$0xff] %v11655_v61  ;;  %v11671_v1 = vadd.f32 %v11162_v32, %v11409_v29  ;;  %v13631_v61 = vld [vmem:[#allocation81_spill] sm:$0xff] }
 0x8f4   :  { %13623 = vst [vmem:[#allocation69_spill] sm:$0xff] %v11659_v45  ;;  %13626 = vst [vmem:[#allocation19_spill] sm:$0xff] %v11667_v37  ;;  %v13630_v45 = vld [vmem:[#allocation133_spill] sm:$0xff]  ;;  %v11685_v48 = vmul.f32 %v11663_v8, %v13631_v61  ;;  %v11701_v20 = vmul.f32 %v11663_v8, %v13635_v18  ;;  %v11708_v36 = vrot.slane %v6059_v44, %v13625_v27  ;;  %v13640_v18 = vld [vmem:[#allocation7_spill] sm:$0xff]  ;;  %p7208_p4 = pnand %p7207_p3, %p7201_p0 }
 0x8f5   :  { %13627 = vst [vmem:[#allocation27_spill] sm:$0xff] %v11671_v1  ;;  %13628 = vst [vmem:[#allocation31_spill] sm:$0xff] %v11675_v33  ;;  %v6125_v19 = vmul.f32 %v11663_v8, %v13630_v45  ;;  %v13632_v37 = vld [vmem:[#allocation85_spill] sm:$0xff]  ;;  %v13633_v1 = vld [vmem:[#allocation79_spill] sm:$0xff]  ;;  %v11724_v40 = vmul.f32 %v11663_v8, %v13640_v18 }
 0x8f6   :  { %13629 = vst [vmem:[#allocation37_spill] sm:$0xff] %v11679_v3  ;;  %v11689_v29 = vmul.f32 %v11663_v8, %v13632_v37  ;;  %v11693_v17 = vmul.f32 %v13633_v1, %v11663_v8  ;;  %v13634_v33 = vld [vmem:[#allocation83_spill] sm:$0xff]  ;;  %v13636_v45 = vld [vmem:[#allocation93_spill] sm:$0xff]  ;;  %v13642_v44 = vld [vmem:[#allocation32_spill] sm:$0xff] }
 0x8f7   :  { %v11697_v32 = vmul.f32 %v13634_v33, %v11663_v8  ;;  %v11705_v61 = vmul.f32 %v11663_v8, %v13636_v45  ;;  %v13637_v37 = vld [vmem:[#allocation87_spill] sm:$0xff]  ;;  %v13639_v33 = vld [vmem:[#allocation30_spill] sm:$0xff]  ;;  %v6193_v7 = vadd.f32 %v11708_v36, %v6125_v19  ;;  %v13645_v18 = vld [vmem:[#allocation5_spill] sm:$0xff] }
 0x8f8   :  { %v11712_v3 = vmul.f32 %v13637_v37, %v11663_v8  ;;  %v13638_v1 = vld [vmem:[#allocation91_spill] sm:$0xff]  ;;  %v11720_v24 = vmul.f32 %v11663_v8, %v13639_v33  ;;  %v13641_v45 = vld [vmem:[#allocation70_spill] sm:$0xff]  ;;  %v11732_v37 = vmul.f32 %v13642_v44, %v11663_v8  ;;  %v13644_v33 = vld [vmem:[#allocation76_spill] sm:$0xff]  ;;  %v11745_v42 = vmul.f32 %v13645_v18, %v11663_v8 }
 0x8f9   :  { %v11716_v39 = vmul.f32 %v13638_v1, %v11663_v8  ;;  %v11728_v27 = vmul.f32 %v13641_v45, %v11663_v8  ;;  %v11736_v1 = vmul.f32 %v11663_v8, %v13643_v47  ;;  %v11741_v56 = vmul.f32 %v11663_v8, %v13644_v33  ;;  %v13646_v45 = vld [vmem:[#allocation74_spill] sm:$0xff]  ;;  %v13647_v44 = vld [vmem:[#allocation80_spill] sm:$0xff] }
 0x8fa   :  { %v11749_v38 = vmul.f32 %v13646_v45, %v11663_v8  ;;  %v11753_v15 = vmul.f32 %v11663_v8, %v13647_v44  ;;  %v13648_v47 = vld [vmem:[#allocation84_spill] sm:$0xff]  ;;  %v13649_v19 = vld [vmem:[#allocation78_spill] sm:$0xff]  ;;  %v11765_v18 = vmul.f32 %v13650_v16, %v11663_v8  ;;  %v6257_v5 = vadd.f32 %v6193_v7, %v13651_v31  ;;  %v13656_v16 = vld [vmem:[#allocation95_spill] sm:$0xff] }
 0x8fb   :  { %v11757_v34 = vmul.f32 %v11663_v8, %v13648_v47  ;;  %v11761_v33 = vmul.f32 %v13649_v19, %v11663_v8  ;;  %v13652_v45 = vld [vmem:[#allocation88_spill] sm:$0xff]  ;;  %v13654_v47 = vld [vmem:[#allocation86_spill] sm:$0xff]  ;;  %v11786_v26 = vmul.f32 %v11663_v8, %v13656_v16  ;;  %v13657_v31 = vld [vmem:[#allocation97_spill] sm:$0xff]  ;;  %v11806_v16 = vmul.f32 %v11663_v8, %v13661_v46 }
 0x8fc   :  { %v11770_v58 = vmul.f32 %v11663_v8, %v13652_v45  ;;  %v13653_v44 = vld [vmem:[#allocation92_spill] sm:$0xff]  ;;  %v11778_v28 = vmul.f32 %v13654_v47, %v11663_v8  ;;  %v13655_v19 = vld [vmem:[#allocation90_spill] sm:$0xff]  ;;  %v11790_v7 = vmul.f32 %v11663_v8, %v13657_v31  ;;  %v6321_v4 = vmax.f32 %v6257_v5, 0.0  ;;  %v13664_v5 = vld [vmem:[#allocation103_spill] sm:$0xff] }
 0x8fd   :  { %v11774_v60 = vmul.f32 %v11663_v8, %v13653_v44  ;;  %v11782_v11 = vmul.f32 %v13655_v19, %v11663_v8  ;;  %v13658_v45 = vld [vmem:[#allocation94_spill] sm:$0xff]  ;;  %v13659_v47 = vld [vmem:[#allocation96_spill] sm:$0xff]  ;;  %v11802_v19 = vmul.f32 %v11663_v8, %v13660_v43  ;;  %v11822_v43 = vmul.f32 %v11663_v8, %v13665_v54 }
 0x8fe   :  { %v11794_v44 = vmul.f32 %v13658_v45, %v11663_v8  ;;  %v11798_v63 = vmul.f32 %v13659_v47, %v11663_v8  ;;  %v13662_v31 = vld [vmem:[#allocation98_spill] sm:$0xff]  ;;  %v13663_v45 = vld [vmem:[#allocation100_spill] sm:$0xff]  ;;  %v11818_v47 = vmul.f32 %v11663_v8, %v13664_v5  ;;  %6385 = vst [vmem:[#allocation2 + $0x1e8] sm:$0xff] %v6321_v4  ;;  %v11838_v5 = vmul.f32 %v11663_v8, %v13669_v12 }
 0x8ff   :  { %v11810_v57 = vmul.f32 %v13662_v31, %v11663_v8  ;;  %v11814_v2 = vmul.f32 %v13663_v45, %v11663_v8  ;;  %v13666_v46 = vld [vmem:[#allocation102_spill] sm:$0xff]  ;;  %v13667_v31 = vld [vmem:[#allocation104_spill] sm:$0xff]  ;;  %v11834_v45 = vmul.f32 %v11663_v8, %v13668_v10  ;;  %v11854_v10 = vmul.f32 %v11663_v8, %v13673_v6 }
 0x900   :  { %v11826_v21 = vmul.f32 %v13666_v46, %v11663_v8  ;;  %v11830_v59 = vmul.f32 %v13667_v31, %v11663_v8  ;;  %v13670_v54 = vld [vmem:[#allocation106_spill] sm:$0xff]  ;;  %v13671_v4 = vld [vmem:[#allocation108_spill] sm:$0xff]  ;;  %v11850_v31 = vmul.f32 %v11663_v8, %v13672_v13  ;;  %v11858_v12 = vmul.f32 %v13674_v50, %v11663_v8 }
 0x901   :  { %v11842_v52 = vmul.f32 %v13670_v54, %v11663_v8  ;;  %v11846_v46 = vmul.f32 %v13671_v4, %v11663_v8  ;;  %v11862_v54 = vmul.f32 %v13675_v51, %v11663_v8  ;;  %v11866_v4 = vmul.f32 %v11663_v8, %v13676_v62 }
 0x902   :  { %v11870_v13 = vmul.f32 %v11663_v8, %v13677_v35  ;;  %v11874_v6 = vmul.f32 %v13678_v53, %v11663_v8  ;;  %v11878_v50 = vmul.f32 %v13679_v25, %v11663_v8  ;;  %v11882_v51 = vmul.f32 %v11663_v8, %v13680_v0 }
 0x903   :  { %v11886_v62 = vmul.f32 %v11663_v8, %v13681_v14  ;;  %v11890_v35 = vmul.f32 %v13682_v22, %v11663_v8  ;;  %v11894_v53 = vmul.f32 %v13683_v49, %v11663_v8  ;;  %v11898_v25 = vmul.f32 %v11663_v8, %v13685_v9 }
 0x904   :  { %v11902_v0 = vmul.f32 %v11663_v8, %v13687_v55  ;;  %v11906_v14 = vmul.f32 %v13689_v23, %v11663_v8  ;;  %v11910_v22 = vmul.f32 %v13691_v41, %v11663_v8  ;;  %v11914_v49 = vmul.f32 %v11663_v8, %v13693_v30 }
 0x905   :  { %13684 = vst [vmem:[#allocation134_spill] sm:$0xff] %v11894_v53  ;;  %13686 = vst [vmem:[#allocation25_spill] sm:$0xff] %v11898_v25  ;;  %v13695_v53 = vld [vmem:[#allocation129_spill] sm:$0xff]  ;;  %v13696_v25 = vld [vmem:[#allocation126_spill] sm:$0xff] }
 0x906   :  { %13688 = vst [vmem:[#allocation133_spill] sm:$0xff] %v11902_v0  ;;  %13690 = vst [vmem:[#allocation81_spill] sm:$0xff] %v11906_v14  ;;  %v11918_v9 = vmul.f32 %v11663_v8, %v13695_v53  ;;  %v11922_v55 = vmul.f32 %v13696_v25, %v11663_v8  ;;  %v13697_v0 = vld [vmem:[#allocation128_spill] sm:$0xff]  ;;  %v13698_v14 = vld [vmem:[#allocation131_spill] sm:$0xff]  ;;  %v11942_v25 = vadd.f32 %v11708_v36, %v11685_v48 }
 0x907   :  { %13692 = vst [vmem:[#allocation85_spill] sm:$0xff] %v11910_v22  ;;  %13694 = vst [vmem:[#allocation79_spill] sm:$0xff] %v11914_v49  ;;  %v11926_v23 = vmul.f32 %v13697_v0, %v11663_v8  ;;  %v11930_v41 = vmul.f32 %v11663_v8, %v13698_v14  ;;  %v13699_v22 = vld [vmem:[#allocation130_spill] sm:$0xff]  ;;  %v13700_v49 = vld [vmem:[#allocation132_spill] sm:$0xff]  ;;  %v11946_v0 = vadd.f32 %v11708_v36, %v11689_v29 }
 0x908   :  { %v11934_v30 = vmul.f32 %v13699_v22, %v11663_v8  ;;  %v11938_v53 = vmul.f32 %v13700_v49, %v11663_v8  ;;  %v11950_v14 = vadd.f32 %v11708_v36, %v11693_v17  ;;  %v11954_v22 = vadd.f32 %v11708_v36, %v11697_v32 }
 0x909   :  { %v11958_v8 = vadd.f32 %v11708_v36, %v11701_v20  ;;  %v11962_v48 = vadd.f32 %v11708_v36, %v11705_v61  ;;  %v11966_v29 = vadd.f32 %v11708_v36, %v11712_v3  ;;  %v11970_v17 = vadd.f32 %v11708_v36, %v11716_v39 }
 0x90a   :  { %v11974_v32 = vadd.f32 %v11708_v36, %v11720_v24  ;;  %v11978_v20 = vadd.f32 %v11708_v36, %v11724_v40  ;;  %v11982_v61 = vadd.f32 %v11708_v36, %v11728_v27  ;;  %v11986_v3 = vadd.f32 %v11708_v36, %v11732_v37 }
 0x90b   :  { %v11990_v39 = vadd.f32 %v11708_v36, %v11736_v1  ;;  %v11994_v24 = vadd.f32 %v11708_v36, %v11741_v56  ;;  %v11998_v40 = vadd.f32 %v11708_v36, %v11745_v42  ;;  %v12002_v27 = vadd.f32 %v11708_v36, %v11749_v38 }
 0x90c   :  { %v12006_v37 = vadd.f32 %v11708_v36, %v11753_v15  ;;  %v12010_v1 = vadd.f32 %v11708_v36, %v11757_v34  ;;  %v12014_v56 = vadd.f32 %v11708_v36, %v11761_v33  ;;  %v12018_v42 = vadd.f32 %v11708_v36, %v11765_v18  ;;  %v13706_v49 = vld [vmem:[#allocation134_spill] sm:$0xff] }
 0x90d   :  { %v12022_v38 = vadd.f32 %v11708_v36, %v11770_v58  ;;  %v12026_v15 = vadd.f32 %v11708_v36, %v11774_v60  ;;  %v12030_v34 = vadd.f32 %v11708_v36, %v11778_v28  ;;  %v12034_v33 = vadd.f32 %v11708_v36, %v11782_v11 }
 0x90e   :  { %v12038_v18 = vadd.f32 %v11708_v36, %v11786_v26  ;;  %v12042_v58 = vadd.f32 %v11708_v36, %v11790_v7  ;;  %v12046_v60 = vadd.f32 %v11708_v36, %v11794_v44  ;;  %v12050_v28 = vadd.f32 %v11708_v36, %v11798_v63 }
 0x90f   :  { %v12054_v11 = vadd.f32 %v11708_v36, %v11802_v19  ;;  %v12058_v26 = vadd.f32 %v11708_v36, %v11806_v16  ;;  %v12062_v7 = vadd.f32 %v11708_v36, %v11810_v57  ;;  %v12066_v44 = vadd.f32 %v11708_v36, %v11814_v2 }
 0x910   :  { %v12070_v63 = vadd.f32 %v11708_v36, %v11818_v47  ;;  %v12074_v19 = vadd.f32 %v11708_v36, %v11822_v43  ;;  %v12078_v16 = vadd.f32 %v11708_v36, %v11826_v21  ;;  %v12082_v57 = vadd.f32 %v11708_v36, %v11830_v59 }
 0x911   :  { %v12086_v2 = vadd.f32 %v11708_v36, %v11834_v45  ;;  %v12090_v47 = vadd.f32 %v11708_v36, %v11838_v5  ;;  %v12094_v43 = vadd.f32 %v11708_v36, %v11842_v52  ;;  %v12098_v21 = vadd.f32 %v11708_v36, %v11846_v46 }
 0x912   :  { %v12102_v59 = vadd.f32 %v11708_v36, %v11850_v31  ;;  %v12106_v45 = vadd.f32 %v11708_v36, %v11854_v10  ;;  %v12110_v5 = vadd.f32 %v11708_v36, %v11858_v12  ;;  %v12114_v52 = vadd.f32 %v11708_v36, %v11862_v54 }
 0x913   :  { %v12118_v46 = vadd.f32 %v11708_v36, %v11866_v4  ;;  %v12122_v31 = vadd.f32 %v11708_v36, %v11870_v13  ;;  %v12126_v10 = vadd.f32 %v11708_v36, %v11874_v6  ;;  %v12130_v12 = vadd.f32 %v11708_v36, %v11878_v50 }
 0x914   :  { %v12134_v54 = vadd.f32 %v11708_v36, %v11882_v51  ;;  %v12138_v4 = vadd.f32 %v11708_v36, %v11886_v62  ;;  %v12142_v13 = vadd.f32 %v11708_v36, %v11890_v35  ;;  %v12146_v6 = vadd.f32 %v11708_v36, %v13706_v49 }
 0x915   :  { %13701 = vst [vmem:[#allocation83_spill] sm:$0xff] %v12126_v10  ;;  %13702 = vst [vmem:[#allocation89_spill] sm:$0xff] %v12130_v12  ;;  %v13707_v10 = vld [vmem:[#allocation25_spill] sm:$0xff] }
 0x916   :  { %13703 = vst [vmem:[#allocation93_spill] sm:$0xff] %v12134_v54  ;;  %13704 = vst [vmem:[#allocation87_spill] sm:$0xff] %v12138_v4  ;;  %v12150_v50 = vadd.f32 %v11708_v36, %v13707_v10  ;;  %v13708_v12 = vld [vmem:[#allocation133_spill] sm:$0xff]  ;;  %v12170_v10 = vadd.f32 %v11708_v36, %v11918_v9  ;;  %v12190_v9 = vadd.f32 %v11708_v36, %v11938_v53  ;;  %v13722_v53 = vld [vmem:[#allocation22_spill] sm:$0xff] }
 0x917   :  { %13705 = vst [vmem:[#allocation91_spill] sm:$0xff] %v12142_v13  ;;  %v12154_v51 = vadd.f32 %v11708_v36, %v13708_v12  ;;  %v13709_v54 = vld [vmem:[#allocation81_spill] sm:$0xff]  ;;  %v13711_v13 = vld [vmem:[#allocation79_spill] sm:$0xff]  ;;  %v12174_v12 = vadd.f32 %v11708_v36, %v11922_v55 }
 0x918   :  { %v12158_v62 = vadd.f32 %v11708_v36, %v13709_v54  ;;  %v13710_v4 = vld [vmem:[#allocation85_spill] sm:$0xff]  ;;  %v12166_v49 = vadd.f32 %v11708_v36, %v13711_v13  ;;  %13712 = vst [vmem:[#allocation30_spill] sm:$0xff] %v12170_v10  ;;  %v12178_v54 = vadd.f32 %v11708_v36, %v11926_v23  ;;  %v12186_v13 = vadd.f32 %v11708_v36, %v11934_v30  ;;  %v13717_v10 = vld [vmem:[#allocation34_spill] sm:$0xff] }
 0x919   :  { %v12162_v35 = vadd.f32 %v11708_v36, %v13710_v4  ;;  %13713 = vst [vmem:[#allocation7_spill] sm:$0xff] %v12174_v12  ;;  %v12182_v4 = vadd.f32 %v11708_v36, %v11930_v41  ;;  %v12194_v55 = vadd.f32 %v11942_v25, %v13717_v10  ;;  %v13718_v12 = vld [vmem:[#allocation35_spill] sm:$0xff]  ;;  %v12214_v25 = vadd.f32 %v11962_v48, %v13722_v53  ;;  %v13728_v53 = vld [vmem:[#allocation21_spill] sm:$0xff] }
 0x91a   :  { %13714 = vst [vmem:[#allocation70_spill] sm:$0xff] %v12178_v54  ;;  %13716 = vst [vmem:[#allocation42_spill] sm:$0xff] %v12186_v13  ;;  %v12198_v23 = vadd.f32 %v11946_v0, %v13718_v12  ;;  %v13719_v54 = vld [vmem:[#allocation77_spill] sm:$0xff]  ;;  %v13721_v13 = vld [vmem:[#allocation75_spill] sm:$0xff] }
 0x91b   :  { %13715 = vst [vmem:[#allocation32_spill] sm:$0xff] %v12182_v4  ;;  %v12202_v41 = vadd.f32 %v11950_v14, %v13719_v54  ;;  %v13720_v4 = vld [vmem:[#allocation12_spill] sm:$0xff]  ;;  %v12210_v36 = vadd.f32 %v11958_v8, %v13721_v13  ;;  %v13723_v10 = vld [vmem:[#allocation39_spill] sm:$0xff]  ;;  %v13724_v12 = vld [vmem:[#allocation18_spill] sm:$0xff] }
 0x91c   :  { %v12206_v30 = vadd.f32 %v11954_v22, %v13720_v4  ;;  %v12218_v0 = vadd.f32 %v11966_v29, %v13723_v10  ;;  %v12222_v14 = vadd.f32 %v11970_v17, %v13724_v12  ;;  %v13725_v54 = vld [vmem:[#allocation17_spill] sm:$0xff]  ;;  %v13727_v13 = vld [vmem:[#allocation44_spill] sm:$0xff]  ;;  %v12238_v29 = vadd.f32 %v11986_v3, %v13728_v53  ;;  %v13729_v10 = vld [vmem:[#allocation38_spill] sm:$0xff] }
 0x91d   :  { %v12226_v22 = vadd.f32 %v11974_v32, %v13725_v54  ;;  %v13726_v4 = vld [vmem:[#allocation41_spill] sm:$0xff]  ;;  %v12234_v48 = vadd.f32 %v11982_v61, %v13727_v13  ;;  %v12242_v17 = vadd.f32 %v11990_v39, %v13729_v10  ;;  %v13730_v12 = vld [vmem:[#allocation47_spill] sm:$0xff]  ;;  %v13731_v54 = vld [vmem:[#allocation52_spill] sm:$0xff] }
 0x91e   :  { %v12230_v8 = vadd.f32 %v11978_v20, %v13726_v4  ;;  %v12246_v32 = vadd.f32 %v11994_v24, %v13730_v12  ;;  %v12250_v20 = vadd.f32 %v11998_v40, %v13731_v54  ;;  %v13732_v4 = vld [vmem:[#allocation40_spill] sm:$0xff]  ;;  %v13733_v13 = vld [vmem:[#allocation43_spill] sm:$0xff]  ;;  %v13734_v53 = vld [vmem:[#allocation49_spill] sm:$0xff] }
 0x91f   :  { %v12254_v61 = vadd.f32 %v12002_v27, %v13732_v4  ;;  %v12258_v3 = vadd.f32 %v12006_v37, %v13733_v13  ;;  %v12262_v39 = vadd.f32 %v12010_v1, %v13734_v53  ;;  %v13735_v10 = vld [vmem:[#allocation33_spill] sm:$0xff]  ;;  %v13736_v12 = vld [vmem:[#allocation36_spill] sm:$0xff]  ;;  %v13737_v54 = vld [vmem:[#allocation46_spill] sm:$0xff] }
 0x920   :  { %v12266_v24 = vadd.f32 %v12014_v56, %v13735_v10  ;;  %v12270_v40 = vadd.f32 %v12018_v42, %v13736_v12  ;;  %v12274_v27 = vadd.f32 %v12022_v38, %v13737_v54  ;;  %v13738_v4 = vld [vmem:[#allocation56_spill] sm:$0xff]  ;;  %v13739_v13 = vld [vmem:[#allocation50_spill] sm:$0xff]  ;;  %v13740_v53 = vld [vmem:[#allocation51_spill] sm:$0xff] }
 0x921   :  { %v12278_v37 = vadd.f32 %v12026_v15, %v13738_v4  ;;  %v12282_v1 = vadd.f32 %v12030_v34, %v13739_v13  ;;  %v12286_v56 = vadd.f32 %v12034_v33, %v13740_v53  ;;  %v13741_v10 = vld [vmem:[#allocation54_spill] sm:$0xff]  ;;  %v13742_v12 = vld [vmem:[#allocation55_spill] sm:$0xff]  ;;  %v13745_v13 = vld [vmem:[#allocation57_spill] sm:$0xff] }
 0x922   :  { %v12290_v42 = vadd.f32 %v12038_v18, %v13741_v10  ;;  %v12294_v38 = vadd.f32 %v12042_v58, %v13742_v12  ;;  %v13743_v54 = vld [vmem:[#allocation62_spill] sm:$0xff]  ;;  %v13744_v4 = vld [vmem:[#allocation59_spill] sm:$0xff]  ;;  %v12306_v33 = vadd.f32 %v12054_v11, %v13745_v13  ;;  %v13746_v53 = vld [vmem:[#allocation60_spill] sm:$0xff] }
 0x923   :  { %v12298_v15 = vadd.f32 %v12046_v60, %v13743_v54  ;;  %v12302_v34 = vadd.f32 %v12050_v28, %v13744_v4  ;;  %v12310_v18 = vadd.f32 %v12058_v26, %v13746_v53  ;;  %v13747_v10 = vld [vmem:[#allocation61_spill] sm:$0xff]  ;;  %v13748_v12 = vld [vmem:[#allocation58_spill] sm:$0xff]  ;;  %v13750_v4 = vld [vmem:[#allocation8_spill] sm:$0xff] }
 0x924   :  { %v12314_v58 = vadd.f32 %v12062_v7, %v13747_v10  ;;  %v12318_v60 = vadd.f32 %v12066_v44, %v13748_v12  ;;  %v13749_v54 = vld [vmem:[#allocation65_spill] sm:$0xff]  ;;  %v12326_v11 = vadd.f32 %v12074_v19, %v13750_v4  ;;  %v13751_v13 = vld [vmem:[#allocation10_spill] sm:$0xff]  ;;  %v13753_v10 = vld [vmem:[#allocation48_spill] sm:$0xff] }
 0x925   :  { %v12322_v28 = vadd.f32 %v12070_v63, %v13749_v54  ;;  %v12330_v26 = vadd.f32 %v12078_v16, %v13751_v13  ;;  %v13752_v53 = vld [vmem:[#allocation45_spill] sm:$0xff]  ;;  %v12338_v44 = vadd.f32 %v12086_v2, %v13753_v10  ;;  %v13755_v54 = vld [vmem:[#allocation6_spill] sm:$0xff]  ;;  %v13757_v13 = vld [vmem:[#allocation16_spill] sm:$0xff] }
 0x926   :  { %v12334_v7 = vadd.f32 %v12082_v57, %v13752_v53  ;;  %v13754_v12 = vld [vmem:[#allocation9_spill] sm:$0xff]  ;;  %v12346_v19 = vadd.f32 %v12094_v43, %v13755_v54  ;;  %v12354_v57 = vadd.f32 %v12102_v59, %v13757_v13  ;;  %v13759_v53 = vld [vmem:[#allocation71_spill] sm:$0xff]  ;;  %v13761_v10 = vld [vmem:[#allocation72_spill] sm:$0xff] }
 0x927   :  { %v12342_v63 = vadd.f32 %v12090_v47, %v13754_v12  ;;  %v13756_v4 = vld [vmem:[#allocation53_spill] sm:$0xff]  ;;  %v12358_v2 = vadd.f32 %v12106_v45, %v13759_v53  ;;  %v12362_v47 = vadd.f32 %v12110_v5, %v13761_v10  ;;  %v13763_v12 = vld [vmem:[#allocation14_spill] sm:$0xff]  ;;  %v13765_v54 = vld [vmem:[#allocation11_spill] sm:$0xff] }
 0x928   :  { %v12350_v16 = vadd.f32 %v12098_v21, %v13756_v4  ;;  %13758 = vst [vmem:[#allocation76_spill] sm:$0xff] %v12354_v57  ;;  %v12366_v43 = vadd.f32 %v12114_v52, %v13763_v12  ;;  %v12370_v21 = vadd.f32 %v12118_v46, %v13765_v54  ;;  %v13767_v4 = vld [vmem:[#allocation73_spill] sm:$0xff]  ;;  %v13768_v13 = vld [vmem:[#allocation64_spill] sm:$0xff]  ;;  %v13769_v57 = vld [vmem:[#allocation83_spill] sm:$0xff] }
 0x929   :  { %13760 = vst [vmem:[#allocation5_spill] sm:$0xff] %v12358_v2  ;;  %13762 = vst [vmem:[#allocation74_spill] sm:$0xff] %v12362_v47  ;;  %v12374_v59 = vadd.f32 %v12122_v31, %v13767_v4  ;;  %v12378_v45 = vadd.f32 %v13769_v57, %v13768_v13  ;;  %v13770_v53 = vld [vmem:[#allocation28_spill] sm:$0xff]  ;;  %v13771_v2 = vld [vmem:[#allocation89_spill] sm:$0xff] }
 0x92a   :  { %13764 = vst [vmem:[#allocation80_spill] sm:$0xff] %v12366_v43  ;;  %13766 = vst [vmem:[#allocation84_spill] sm:$0xff] %v12370_v21  ;;  %v12382_v5 = vadd.f32 %v13771_v2, %v13770_v53  ;;  %v13772_v10 = vld [vmem:[#allocation63_spill] sm:$0xff]  ;;  %v13773_v47 = vld [vmem:[#allocation93_spill] sm:$0xff] }
 0x92b   :  { %v12386_v52 = vadd.f32 %v13773_v47, %v13772_v10  ;;  %v13774_v12 = vld [vmem:[#allocation24_spill] sm:$0xff]  ;;  %v13775_v43 = vld [vmem:[#allocation87_spill] sm:$0xff]  ;;  %v13778_v4 = vld [vmem:[#allocation66_spill] sm:$0xff] }
 0x92c   :  { %v12390_v46 = vadd.f32 %v13775_v43, %v13774_v12  ;;  %v13776_v54 = vld [vmem:[#allocation23_spill] sm:$0xff]  ;;  %v12398_v57 = vadd.f32 %v12146_v6, %v13778_v4  ;;  %v13782_v53 = vld [vmem:[#allocation20_spill] sm:$0xff]  ;;  %v13789_v4 = vld [vmem:[#allocation29_spill] sm:$0xff] }
 0x92d   :  { %v13777_v21 = vld [vmem:[#allocation91_spill] sm:$0xff]  ;;  %v12406_v47 = vadd.f32 %v12154_v51, %v13782_v53  ;;  %v13784_v10 = vld [vmem:[#allocation68_spill] sm:$0xff] }
 0x92e   :  { %v12394_v31 = vadd.f32 %v13777_v21, %v13776_v54  ;;  %13779 = vst [vmem:[#allocation78_spill] sm:$0xff] %v12398_v57  ;;  %v13780_v13 = vld [vmem:[#allocation15_spill] sm:$0xff]  ;;  %v12410_v43 = vadd.f32 %v12158_v62, %v13784_v10  ;;  %v13788_v54 = vld [vmem:[#allocation13_spill] sm:$0xff]  ;;  %v13790_v57 = vld [vmem:[#allocation30_spill] sm:$0xff] }
 0x92f   :  { %v12402_v2 = vadd.f32 %v12150_v50, %v13780_v13  ;;  %13783 = vst [vmem:[#allocation26_spill] sm:$0xff] %v12406_v47  ;;  %v13786_v12 = vld [vmem:[#allocation67_spill] sm:$0xff]  ;;  %v12418_v6 = vadd.f32 %v12166_v49, %v13788_v54  ;;  %v12422_v50 = vadd.f32 %v13790_v57, %v13789_v4  ;;  %v13791_v13 = vld [vmem:[#allocation69_spill] sm:$0xff]  ;;  %v13794_v47 = vld [vmem:[#allocation70_spill] sm:$0xff]  ;;  %v6260_v4 = vmax.f32 %v12194_v55, 0.0 }
 0x930   :  { %13785 = vst [vmem:[#allocation88_spill] sm:$0xff] %v12410_v43  ;;  %v12414_v21 = vadd.f32 %v12162_v35, %v13786_v12  ;;  %v13793_v53 = vld [vmem:[#allocation19_spill] sm:$0xff]  ;;  %v13796_v43 = vld [vmem:[#allocation32_spill] sm:$0xff]  ;;  %v13799_v54 = vld [vmem:[#allocation37_spill] sm:$0xff]  ;;  %v6270_v55 = vmax.f32 %v12234_v48, 0.0  ;;  %v6280_v48 = vmax.f32 %v12274_v27, 0.0 }
 0x931   :  { %13781 = vst [vmem:[#allocation82_spill] sm:$0xff] %v12402_v2  ;;  %v13792_v2 = vld [vmem:[#allocation7_spill] sm:$0xff]  ;;  %v12430_v62 = vadd.f32 %v13794_v47, %v13793_v53  ;;  %v12442_v57 = vadd.f32 %v12190_v9, %v13799_v54  ;;  %v6263_v47 = vmax.f32 %v12206_v30, 0.0  ;;  %v6264_v53 = vmax.f32 %v12210_v36, 0.0  ;;  %6324 = vst [vmem:[#allocation2] sm:$0xff] %v6260_v4  ;;  %v13804_v4 = vld [vmem:[#allocation84_spill] sm:$0xff] }
 0x932   :  { %13787 = vst [vmem:[#allocation92_spill] sm:$0xff] %v12414_v21  ;;  %v12426_v51 = vadd.f32 %v13792_v2, %v13791_v13  ;;  %v13795_v10 = vld [vmem:[#allocation27_spill] sm:$0xff]  ;;  %v13798_v21 = vld [vmem:[#allocation42_spill] sm:$0xff]  ;;  %v6261_v2 = vmax.f32 %v12198_v23, 0.0  ;;  %v6262_v13 = vmax.f32 %v12202_v41, 0.0  ;;  %v6269_v9 = vmax.f32 %v12230_v8, 0.0 }
 0x933   :  { %v12434_v35 = vadd.f32 %v13796_v43, %v13795_v10  ;;  %v13797_v12 = vld [vmem:[#allocation31_spill] sm:$0xff]  ;;  %v6265_v43 = vmax.f32 %v12214_v25, 0.0  ;;  %v6266_v10 = vmax.f32 %v12218_v0, 0.0  ;;  %v6271_v23 = vmax.f32 %v12238_v29, 0.0  ;;  %6327 = vst [vmem:[#allocation2 + $0x18] sm:$0xff] %v6263_v47  ;;  %6328 = vst [vmem:[#allocation2 + $0x20] sm:$0xff] %v6264_v53 }
 0x934   :  { %v12438_v49 = vadd.f32 %v13798_v21, %v13797_v12  ;;  %v6267_v21 = vmax.f32 %v12222_v14, 0.0  ;;  %v6268_v12 = vmax.f32 %v12226_v22, 0.0  ;;  %v6272_v41 = vmax.f32 %v12242_v17, 0.0  ;;  %6325 = vst [vmem:[#allocation2 + $0x8] sm:$0xff] %v6261_v2  ;;  %6326 = vst [vmem:[#allocation2 + $0x10] sm:$0xff] %v6262_v13 }
 0x935   :  { %v6273_v30 = vmax.f32 %v12246_v32, 0.0  ;;  %v6274_v36 = vmax.f32 %v12250_v20, 0.0  ;;  %v6275_v25 = vmax.f32 %v12254_v61, 0.0  ;;  %v6276_v0 = vmax.f32 %v12258_v3, 0.0  ;;  %6329 = vst [vmem:[#allocation2 + $0x28] sm:$0xff] %v6265_v43  ;;  %6330 = vst [vmem:[#allocation2 + $0x30] sm:$0xff] %v6266_v10 }
 0x936   :  { %6331 = vst [vmem:[#allocation2 + $0x38] sm:$0xff] %v6267_v21  ;;  %6332 = vst [vmem:[#allocation2 + $0x40] sm:$0xff] %v6268_v12  ;;  %v6277_v14 = vmax.f32 %v12262_v39, 0.0  ;;  %v6278_v22 = vmax.f32 %v12266_v24, 0.0  ;;  %v6279_v8 = vmax.f32 %v12270_v40, 0.0  ;;  %v6281_v29 = vmax.f32 %v12278_v37, 0.0 }
 0x937   :  { %6333 = vst [vmem:[#allocation2 + $0x48] sm:$0xff] %v6269_v9  ;;  %6334 = vst [vmem:[#allocation2 + $0x50] sm:$0xff] %v6270_v55  ;;  %v6282_v17 = vmax.f32 %v12282_v1, 0.0  ;;  %v6283_v32 = vmax.f32 %v12286_v56, 0.0  ;;  %v6284_v20 = vmax.f32 %v12290_v42, 0.0  ;;  %v6285_v61 = vmax.f32 %v12294_v38, 0.0 }
 0x938   :  { %6335 = vst [vmem:[#allocation2 + $0x58] sm:$0xff] %v6271_v23  ;;  %6336 = vst [vmem:[#allocation2 + $0x60] sm:$0xff] %v6272_v41  ;;  %v6286_v3 = vmax.f32 %v12298_v15, 0.0  ;;  %v6287_v39 = vmax.f32 %v12302_v34, 0.0  ;;  %v6288_v24 = vmax.f32 %v12306_v33, 0.0  ;;  %v6289_v40 = vmax.f32 %v12310_v18, 0.0 }
 0x939   :  { %6337 = vst [vmem:[#allocation2 + $0x68] sm:$0xff] %v6273_v30  ;;  %6338 = vst [vmem:[#allocation2 + $0x70] sm:$0xff] %v6274_v36  ;;  %v6290_v27 = vmax.f32 %v12314_v58, 0.0  ;;  %v6291_v37 = vmax.f32 %v12318_v60, 0.0  ;;  %v6292_v1 = vmax.f32 %v12322_v28, 0.0  ;;  %v6293_v56 = vmax.f32 %v12326_v11, 0.0 }
 0x93a   :  { %6339 = vst [vmem:[#allocation2 + $0x78] sm:$0xff] %v6275_v25  ;;  %6340 = vst [vmem:[#allocation2 + $0x80] sm:$0xff] %v6276_v0  ;;  %v6294_v42 = vmax.f32 %v12330_v26, 0.0  ;;  %v6295_v38 = vmax.f32 %v12334_v7, 0.0  ;;  %v6296_v15 = vmax.f32 %v12338_v44, 0.0  ;;  %v6297_v34 = vmax.f32 %v12342_v63, 0.0 }
 0x93b   :  { %6341 = vst [vmem:[#allocation2 + $0x88] sm:$0xff] %v6277_v14  ;;  %6342 = vst [vmem:[#allocation2 + $0x90] sm:$0xff] %v6278_v22  ;;  %v6298_v33 = vmax.f32 %v12346_v19, 0.0  ;;  %v6299_v18 = vmax.f32 %v12350_v16, 0.0  ;;  %v13800_v58 = vld [vmem:[#allocation76_spill] sm:$0xff]  ;;  %v13801_v28 = vld [vmem:[#allocation5_spill] sm:$0xff] }
 0x93c   :  { %6343 = vst [vmem:[#allocation2 + $0x98] sm:$0xff] %v6279_v8  ;;  %6344 = vst [vmem:[#allocation2 + $0xa0] sm:$0xff] %v6280_v48  ;;  %v6300_v60 = vmax.f32 %v13800_v58, 0.0  ;;  %v6301_v11 = vmax.f32 %v13801_v28, 0.0  ;;  %v13802_v26 = vld [vmem:[#allocation74_spill] sm:$0xff]  ;;  %v13803_v44 = vld [vmem:[#allocation80_spill] sm:$0xff] }
 0x93d   :  { %6345 = vst [vmem:[#allocation2 + $0xa8] sm:$0xff] %v6281_v29  ;;  %6346 = vst [vmem:[#allocation2 + $0xb0] sm:$0xff] %v6282_v17  ;;  %v6302_v7 = vmax.f32 %v13802_v26, 0.0  ;;  %v6303_v54 = vmax.f32 %v13803_v44, 0.0  ;;  %v6304_v2 = vmax.f32 %v13804_v4, 0.0  ;;  %v6305_v63 = vmax.f32 %v12374_v59, 0.0 }
 0x93e   :  { %6347 = vst [vmem:[#allocation2 + $0xb8] sm:$0xff] %v6283_v32  ;;  %6348 = vst [vmem:[#allocation2 + $0xc0] sm:$0xff] %v6284_v20  ;;  %v6306_v19 = vmax.f32 %v12378_v45, 0.0  ;;  %v6307_v16 = vmax.f32 %v12382_v5, 0.0  ;;  %v6308_v13 = vmax.f32 %v12386_v52, 0.0  ;;  %v6309_v47 = vmax.f32 %v12390_v46, 0.0 }
 0x93f   :  { %6349 = vst [vmem:[#allocation2 + $0xc8] sm:$0xff] %v6285_v61  ;;  %6350 = vst [vmem:[#allocation2 + $0xd0] sm:$0xff] %v6286_v3  ;;  %v6310_v53 = vmax.f32 %v12394_v31, 0.0  ;;  %v13805_v43 = vld [vmem:[#allocation78_spill] sm:$0xff]  ;;  %v13808_v52 = vld [vmem:[#allocation88_spill] sm:$0xff]  ;;  %v6316_v23 = vmax.f32 %v12418_v6, 0.0 }
 0x940   :  { %6351 = vst [vmem:[#allocation2 + $0xd8] sm:$0xff] %v6287_v39  ;;  %6352 = vst [vmem:[#allocation2 + $0xe0] sm:$0xff] %v6288_v24  ;;  %v6311_v10 = vmax.f32 %v13805_v43, 0.0  ;;  %v13806_v21 = vld [vmem:[#allocation82_spill] sm:$0xff]  ;;  %v6314_v12 = vmax.f32 %v13808_v52, 0.0  ;;  %v13809_v9 = vld [vmem:[#allocation92_spill] sm:$0xff] }
 0x941   :  { %6353 = vst [vmem:[#allocation2 + $0xe8] sm:$0xff] %v6289_v40  ;;  %6354 = vst [vmem:[#allocation2 + $0xf0] sm:$0xff] %v6290_v27  ;;  %v6312_v59 = vmax.f32 %v13806_v21, 0.0  ;;  %v13807_v45 = vld [vmem:[#allocation26_spill] sm:$0xff]  ;;  %v6315_v55 = vmax.f32 %v13809_v9, 0.0  ;;  %v6317_v46 = vmax.f32 %v12422_v50, 0.0 }
 0x942   :  { %6355 = vst [vmem:[#allocation2 + $0xf8] sm:$0xff] %v6291_v37  ;;  %6356 = vst [vmem:[#allocation2 + $0x100] sm:$0xff] %v6292_v1  ;;  %v6313_v5 = vmax.f32 %v13807_v45, 0.0  ;;  %v6318_v31 = vmax.f32 %v12426_v51, 0.0  ;;  %v6319_v41 = vmax.f32 %v12430_v62, 0.0  ;;  %v6320_v30 = vmax.f32 %v12434_v35, 0.0 }
 0x943   :  { %6357 = vst [vmem:[#allocation2 + $0x108] sm:$0xff] %v6293_v56  ;;  %6358 = vst [vmem:[#allocation2 + $0x110] sm:$0xff] %v6294_v42  ;;  %v6322_v36 = vmax.f32 %v12438_v49, 0.0  ;;  %v6323_v6 = vmax.f32 %v12442_v57, 0.0 }
 0x944   :  { %6359 = vst [vmem:[#allocation2 + $0x118] sm:$0xff] %v6295_v38  ;;  %6360 = vst [vmem:[#allocation2 + $0x120] sm:$0xff] %v6296_v15 }
 0x945   :  { %6361 = vst [vmem:[#allocation2 + $0x128] sm:$0xff] %v6297_v34  ;;  %6362 = vst [vmem:[#allocation2 + $0x130] sm:$0xff] %v6298_v33 }
 0x946   :  { %6363 = vst [vmem:[#allocation2 + $0x138] sm:$0xff] %v6299_v18  ;;  %6364 = vst [vmem:[#allocation2 + $0x140] sm:$0xff] %v6300_v60 }
 0x947   :  { %6365 = vst [vmem:[#allocation2 + $0x148] sm:$0xff] %v6301_v11  ;;  %6366 = vst [vmem:[#allocation2 + $0x150] sm:$0xff] %v6302_v7 }
 0x948   :  { %6367 = vst [vmem:[#allocation2 + $0x158] sm:$0xff] %v6303_v54  ;;  %6368 = vst [vmem:[#allocation2 + $0x160] sm:$0xff] %v6304_v2 }
 0x949   :  { %6369 = vst [vmem:[#allocation2 + $0x168] sm:$0xff] %v6305_v63  ;;  %6370 = vst [vmem:[#allocation2 + $0x170] sm:$0xff] %v6306_v19 }
 0x94a   :  { %6371 = vst [vmem:[#allocation2 + $0x178] sm:$0xff] %v6307_v16  ;;  %6372 = vst [vmem:[#allocation2 + $0x180] sm:$0xff] %v6308_v13 }
 0x94b   :  { %6373 = vst [vmem:[#allocation2 + $0x188] sm:$0xff] %v6309_v47  ;;  %6374 = vst [vmem:[#allocation2 + $0x190] sm:$0xff] %v6310_v53 }
 0x94c   :  { %6375 = vst [vmem:[#allocation2 + $0x198] sm:$0xff] %v6311_v10  ;;  %6376 = vst [vmem:[#allocation2 + $0x1a0] sm:$0xff] %v6312_v59 }
 0x94d   :  { %6377 = vst [vmem:[#allocation2 + $0x1a8] sm:$0xff] %v6313_v5  ;;  %6378 = vst [vmem:[#allocation2 + $0x1b0] sm:$0xff] %v6314_v12 }
 0x94e   :  { %6379 = vst [vmem:[#allocation2 + $0x1b8] sm:$0xff] %v6315_v55  ;;  %6380 = vst [vmem:[#allocation2 + $0x1c0] sm:$0xff] %v6316_v23 }
 0x94f   :  { %6381 = vst [vmem:[#allocation2 + $0x1c8] sm:$0xff] %v6317_v46  ;;  %6382 = vst [vmem:[#allocation2 + $0x1d0] sm:$0xff] %v6318_v31 }
 0x950   :  { %6383 = vst [vmem:[#allocation2 + $0x1d8] sm:$0xff] %v6319_v41  ;;  %6384 = vst [vmem:[#allocation2 + $0x1e0] sm:$0xff] %v6320_v30 }
 0x951   :  { %6386 = vst [vmem:[#allocation2 + $0x1f0] sm:$0xff] %v6322_v36  ;;  %6387 = vst [vmem:[#allocation2 + $0x1f8] sm:$0xff] %v6323_v6 }
 0x952   :  { %7211 = shalt.err (!%p7208_p4)
}
 0x953   :  { %s7224_s12 = smov 128   ;;  %s7225_s2 = smov 8  }
 0x954   :  { %6399 = dma.vmem_to_hbm [thread:$0]  %s6394_s10, 8192, %s12517_s7, [#allocation3], %s7224_s12, %s7224_s12, %s7225_s2  }
 0x955   :  { %7220 = dma.done.wait [#allocation3], 8192  }
 0x956   :  { %7221 = vsyncadd [#allocation3], 4294959104 }
 0x957   :  { %6403 = vsyncpa [#allocation3], 1 }

</bundles_post_ra>
